<compile_context>
chip_gen: v6e
topology: v6e:2x2x1
jax: 0.10.0
libtpu: 0.0.40
codegen_flags: <defaults>
</compile_context>

<pallas_src>
import jax
import jax.numpy as jnp
from jax import lax
from jax.experimental import pallas as pl
from jax.experimental.pallas import tpu as pltpu

N_STAGES = 4             # conv_1 and conv_2 are each double_conv => 4x (conv3x3 + IN + PReLU)
_IN_EPS = 1e-5           # torch.nn.InstanceNorm2d default
_SOFTPLUS_THRESH = 20.0  # torch.nn.Softplus default threshold (beta=1)
_PAD_LANES = 128         # zero halo (flattened pixels) around the activation; must be >= W+1


# ----------------------------- fused kernel ---------------------------------


def _make_fused_kernel(H, W, C, K2):
    HW = H * W
    assert W + 1 <= _PAD_LANES, "halo must cover a +/- one-row flat shift"

    def kernel(x_ref, wconv_ref, affine_ref, wlastb_ref, masks_ref, alpha_ref,
               out_ref, pad_ref):
        # pad_ref: (C, HW + 2*_PAD_LANES) VMEM scratch providing a zero halo for the taps.
        pad_ref[...] = jnp.zeros((C, HW + 2 * _PAD_LANES), jnp.float32)

        act = x_ref[0]            # (C, HW)   channels on sublanes, pixels on lanes
        wconv = wconv_ref[...]    # (C, 4*9*C)  wconv[co, (s*9 + t)*C + ci]
        aff = affine_ref[...]     # (C, 8)      [:, 2s] = gamma_s, [:, 2s+1] = beta_s
        wlb = wlastb_ref[...]     # (K2, C+1)   [:, :C] = W_last, [:, C] = b_last
        masks = masks_ref[...]    # (9, HW)     1.0 where the tap's source pixel is in-image

        for s in range(N_STAGES):
            # ---- Conv2d 3x3, padding=1, bias=False: 9 shifted taps + VPU FMAs ----
            pad_ref[:, _PAD_LANES:_PAD_LANES + HW] = act   # lane-aligned store into the halo buf
            acc = jnp.zeros((C, HW), jnp.float32)
            for t in range(9):
                oy, ox = t // 3 - 1, t % 3 - 1
                start = _PAD_LANES + oy * W + ox
                tap = pad_ref[:, start:start + HW]         # (C, HW) flat-shifted window
                if not (oy == 0 and ox == 0):
                    tap = tap * masks[t:t + 1, :]          # kill row-wrap / out-of-image pixels
                base = (s * 9 + t) * C
                for ci in range(C):
                    # (C, 1) out-channel weight column  x  (1, HW) input-channel row
                    acc = acc + wconv[:, base + ci:base + ci + 1] * tap[ci:ci + 1, :]

            # ---- InstanceNorm2d(affine=True): per-channel stats over H*W (lane axis) ----
            mean = jnp.mean(acc, axis=1, keepdims=True)            # (C, 1)
            cen = acc - mean
            var = jnp.mean(cen * cen, axis=1, keepdims=True)       # biased variance, like torch
            y = cen * lax.rsqrt(var + _IN_EPS)
            y = y * aff[:, 2 * s:2 * s + 1] + aff[:, 2 * s + 1:2 * s + 2]

            # ---- PReLU, single shared slope (scalar read from SMEM) ----
            a = alpha_ref[s]
            act = jnp.where(y >= 0.0, y, a * y)

        # ---- conv_last: 1x1 conv + bias, then Softplus; output stays lane-dense ----
        z = jnp.zeros((K2, HW), jnp.float32)
        for ci in range(C):
            z = z + wlb[:, ci:ci + 1] * act[ci:ci + 1, :]
        z = z + wlb[:, C:C + 1]
        out_ref[0] = jnp.where(z > _SOFTPLUS_THRESH, z,
                               jnp.log1p(jnp.exp(jnp.minimum(z, _SOFTPLUS_THRESH))))

    return kernel


# ----------------------------- host-side packing -----------------------------


def _tap_masks(H, W):
    """(9, H*W) f32: mask[t, y*W+x] == 1 iff source pixel (y+dy-1, x+dx-1) is in-image."""
    yy = jnp.arange(H, dtype=jnp.int32).reshape(H, 1)
    xx = jnp.arange(W, dtype=jnp.int32).reshape(1, W)
    rows = []
    for t in range(9):
        oy, ox = t // 3 - 1, t % 3 - 1
        valid = (yy + oy >= 0) & (yy + oy < H) & (xx + ox >= 0) & (xx + ox < W)
        rows.append(valid.reshape(1, H * W))
    return jnp.concatenate(rows, axis=0).astype(jnp.float32)


def _pack_params(params, C, K2):
    # Conv weights: torch OIHW -> (C_out, 9*C_in) per stage, stages concatenated on lanes.
    wcols = []
    for s in range(N_STAGES):
        w = params["conv_w"][s]                                    # (O, I, 3, 3)
        wcols.append(jnp.transpose(w, (0, 2, 3, 1)).reshape(C, 9 * C))
    wconv = jnp.concatenate(wcols, axis=1).astype(jnp.float32)     # (C, 4*9*C)

    acols = []
    for s in range(N_STAGES):
        acols.append(params["in_gamma"][s].reshape(C, 1))
        acols.append(params["in_beta"][s].reshape(C, 1))
    affine = jnp.concatenate(acols, axis=1).astype(jnp.float32)    # (C, 2*N_STAGES)

    wlastb = jnp.concatenate(
        [params["w_last"], params["b_last"].reshape(K2, 1)],
        axis=1).astype(jnp.float32)                                # (K2, C+1)

    alphas = params["prelu_a"].astype(jnp.float32).reshape(N_STAGES)  # (4,) -> SMEM
    return wconv, affine, wlastb, alphas


# ----------------------------- forward wrapper --------------------------------


@jax.jit
def cm_layers_forward(x_nchw, params):
    """cm_layers forward. Input (B, C, H, W) NCHW; output (B, class_no**2, H, W)."""
    B, C, H, W = x_nchw.shape
    HW = H * W
    K2 = params["w_last"].shape[0]

    wconv, affine, wlastb, alphas = _pack_params(params, C, K2)
    masks = _tap_masks(H, W)
    x_flat = x_nchw.reshape(B, C, HW).astype(jnp.float32)   # NCHW -> flat; reshape only

    kernel = _make_fused_kernel(H, W, C, K2)

    # TODO(synk): for realistic image sizes where whole-image (C, H*W) blocks stop fitting
    # comfortably in VMEM (notably v7x's 64 MiB), tile the spatial axis with a one-row
    # halo and switch instance-norm to a two-pass stats/normalize scheme.
    out = pl.pallas_call(
        kernel,
        out_shape=jax.ShapeDtypeStruct((B, K2, HW), jnp.float32),
        grid=(B,),
        in_specs=[
            pl.BlockSpec((1, C, HW), lambda b: (b, 0, 0)),             # one image
            pl.BlockSpec((C, N_STAGES * 9 * C), lambda b: (0, 0)),     # packed conv weights
            pl.BlockSpec((C, 2 * N_STAGES), lambda b: (0, 0)),         # packed IN gamma/beta
            pl.BlockSpec((K2, C + 1), lambda b: (0, 0)),               # packed 1x1 weight+bias
            pl.BlockSpec((9, HW), lambda b: (0, 0)),                   # tap validity masks
            pl.BlockSpec(memory_space=pltpu.MemorySpace.SMEM),         # PReLU slopes (scalars)
        ],
        out_specs=pl.BlockSpec((1, K2, HW), lambda b: (b, 0, 0)),
        scratch_shapes=[pltpu.VMEM((C, HW + 2 * _PAD_LANES), jnp.float32)],
        compiler_params=pltpu.CompilerParams(dimension_semantics=("parallel",)),
    )(x_flat, wconv, affine, wlastb, masks, alphas)

    return out.reshape(B, K2, H, W)


# ----------------------------- pure-JAX reference ------------------------------


def cm_layers_reference(x_nchw, params):
    h = x_nchw.astype(jnp.float32)
    for s in range(N_STAGES):
        h = lax.conv_general_dilated(
            h, params["conv_w"][s], window_strides=(1, 1), padding=((1, 1), (1, 1)),
            dimension_numbers=("NCHW", "OIHW", "NCHW"), precision=lax.Precision.HIGHEST)
        mean = jnp.mean(h, axis=(2, 3), keepdims=True)
        var = jnp.mean((h - mean) ** 2, axis=(2, 3), keepdims=True)
        h = (h - mean) * lax.rsqrt(var + _IN_EPS)
        h = (h * params["in_gamma"][s][None, :, None, None]
             + params["in_beta"][s][None, :, None, None])
        a = params["prelu_a"][s]
        h = jnp.where(h >= 0.0, h, a * h)
    z = jnp.einsum("oc,bchw->bohw", params["w_last"], h,
                   precision=lax.Precision.HIGHEST)
    z = z + params["b_last"][None, :, None, None]
    return jnp.where(z > _SOFTPLUS_THRESH, z,
                     jnp.log1p(jnp.exp(jnp.minimum(z, _SOFTPLUS_THRESH))))


# ----------------------------- param init --------------------------------------


def init_params(key, in_channels, class_no):
    C, K2 = in_channels, class_no ** 2
    ks = jax.random.split(key, 3 * N_STAGES + 2)
    conv_w, gammas, betas = [], [], []
    for s in range(N_STAGES):
        conv_w.append(jax.random.normal(ks[3 * s], (C, C, 3, 3), jnp.float32)
                      / jnp.sqrt(9.0 * C))
        gammas.append(1.0 + 0.1 * jax.random.normal(ks[3 * s + 1], (C,), jnp.float32))
        betas.append(0.1 * jax.random.normal(ks[3 * s + 2], (C,), jnp.float32))
    return {
        "conv_w": jnp.stack(conv_w),                          # (4, C, C, 3, 3), OIHW like torch
        "in_gamma": jnp.stack(gammas),                        # (4, C)
        "in_beta": jnp.stack(betas),                          # (4, C)
        "prelu_a": jnp.full((N_STAGES,), 0.25, jnp.float32),  # torch PReLU default slope
        "w_last": jax.random.normal(ks[-2], (K2, C), jnp.float32) / jnp.sqrt(1.0 * C),
        "b_last": 0.1 * jax.random.normal(ks[-1], (K2,), jnp.float32),
    }


# ----------------------------- main ---------------------------------------------


if __name__ == "__main__":
    B, C, H, W = 2, 4, 16, 16
    class_no = 2

    key = jax.random.PRNGKey(0)
    k_x, k_p = jax.random.split(key)
    x = jax.random.normal(k_x, (B, C, H, W), jnp.float32)       # NCHW, like PyTorch
    params = init_params(k_p, in_channels=C, class_no=class_no)

    y = jax.block_until_ready(cm_layers_forward(x, params))
    assert y.shape == (B, class_no ** 2, H, W), y.shape
    assert bool(jnp.all(jnp.isfinite(y)))
    assert bool(jnp.all(y >= 0.0))                              # softplus output is positive

    y_ref = cm_layers_reference(x, params)
    max_err = float(jnp.max(jnp.abs(y - y_ref)))
    assert max_err < 1e-3, f"kernel vs reference mismatch: {max_err}"

    print("KERNEL_OK")
</pallas_src>

<mosaic_0001>
module attributes {stable_mosaic.version = 11 : i64} {
  func.func @kernel(%arg0: i32, %arg1: memref<1x4x256xf32, #tpu.memory_space<vmem>>, %arg2: memref<4x144xf32, #tpu.memory_space<vmem>>, %arg3: memref<4x8xf32, #tpu.memory_space<vmem>>, %arg4: memref<4x5xf32, #tpu.memory_space<vmem>>, %arg5: memref<9x256xf32, #tpu.memory_space<vmem>>, %arg6: memref<4xf32, #tpu.memory_space<smem>>, %arg7: memref<1x4x256xf32, #tpu.memory_space<vmem>>, %arg8: memref<4x512xf32, #tpu.memory_space<vmem>>) attributes {dimension_semantics = [#tpu.dimension_semantics<parallel>], iteration_bounds = array<i64: 2>, scalar_prefetch = 0 : i64, scratch_operands = 1 : i64, tpu.core_type = #tpu.core_type<tc>, window_params = [{transform_indices = @transform_0, window_bounds = array<i64: 1, 4, 256>}, {pipeline_mode = #tpu.pipeline_mode<synchronous>, transform_indices = @transform_1, window_bounds = array<i64: 4, 144>}, {pipeline_mode = #tpu.pipeline_mode<synchronous>, transform_indices = @transform_2, window_bounds = array<i64: 4, 8>}, {pipeline_mode = #tpu.pipeline_mode<synchronous>, transform_indices = @transform_3, window_bounds = array<i64: 4, 5>}, {pipeline_mode = #tpu.pipeline_mode<synchronous>, transform_indices = @transform_4, window_bounds = array<i64: 9, 256>}, {transform_indices = @transform_5, window_bounds = array<i64: 4>}, {transform_indices = @transform_6, window_bounds = array<i64: 1, 4, 256>}]} {
    %cst = arith.constant 0.000000e+00 : f32
    %0 = vector.broadcast %cst : f32 to vector<4x512xf32>
    %c0 = arith.constant 0 : index
    %c0_0 = arith.constant 0 : index
    %1 = vector.load %arg8[%c0, %c0_0] : memref<4x512xf32, #tpu.memory_space<vmem>>, vector<4x512xf32>
    tpu.vector_store %arg8[%c0, %c0_0], %0 {strides = array<i32>} : memref<4x512xf32, #tpu.memory_space<vmem>>, vector<4x512xf32>,
    %c0_1 = arith.constant 0 : index
    %c0_2 = arith.constant 0 : index
    %c0_3 = arith.constant 0 : index
    %2 = vector.load %arg1[%c0_1, %c0_2, %c0_3] : memref<1x4x256xf32, #tpu.memory_space<vmem>>, vector<1x4x256xf32>
    %3 = vector.shape_cast %2 : vector<1x4x256xf32> to vector<4x256xf32>
    %c0_4 = arith.constant 0 : index
    %c0_5 = arith.constant 0 : index
    %4 = vector.load %arg2[%c0_4, %c0_5] : memref<4x144xf32, #tpu.memory_space<vmem>>, vector<4x144xf32>
    %c0_6 = arith.constant 0 : index
    %c0_7 = arith.constant 0 : index
    %5 = vector.load %arg3[%c0_6, %c0_7] : memref<4x8xf32, #tpu.memory_space<vmem>>, vector<4x8xf32>
    %c0_8 = arith.constant 0 : index
    %c0_9 = arith.constant 0 : index
    %6 = vector.load %arg4[%c0_8, %c0_9] : memref<4x5xf32, #tpu.memory_space<vmem>>, vector<4x5xf32>
    %c0_10 = arith.constant 0 : index
    %c0_11 = arith.constant 0 : index
    %7 = vector.load %arg5[%c0_10, %c0_11] : memref<9x256xf32, #tpu.memory_space<vmem>>, vector<9x256xf32>
    %c0_12 = arith.constant 0 : index
    %c128 = arith.constant 128 : index
    %8 = vector.load %arg8[%c0_12, %c128] : memref<4x512xf32, #tpu.memory_space<vmem>>, vector<4x256xf32>
    tpu.vector_store %arg8[%c0_12, %c128], %3 {strides = array<i32>} : memref<4x512xf32, #tpu.memory_space<vmem>>, vector<4x256xf32>,
    %cst_13 = arith.constant 0.000000e+00 : f32
    %9 = vector.broadcast %cst_13 : f32 to vector<4x256xf32>
    %c0_14 = arith.constant 0 : index
    %c111 = arith.constant 111 : index
    %10 = vector.load %arg8[%c0_14, %c111] : memref<4x512xf32, #tpu.memory_space<vmem>>, vector<4x256xf32>
    %11 = vector.extract_strided_slice %7 {offsets = [0, 0], sizes = [1, 256], strides = [1, 1]} : vector<9x256xf32> to vector<1x256xf32>
    %12 = vector.broadcast %11 : vector<1x256xf32> to vector<4x256xf32>
    %13 = arith.mulf %10, %12 : vector<4x256xf32>
    %14 = vector.extract_strided_slice %4 {offsets = [0, 0], sizes = [4, 1], strides = [1, 1]} : vector<4x144xf32> to vector<4x1xf32>
    %15 = vector.extract_strided_slice %13 {offsets = [0, 0], sizes = [1, 256], strides = [1, 1]} : vector<4x256xf32> to vector<1x256xf32>
    %16 = vector.broadcast %14 : vector<4x1xf32> to vector<4x256xf32>
    %17 = vector.broadcast %15 : vector<1x256xf32> to vector<4x256xf32>
    %18 = arith.mulf %16, %17 : vector<4x256xf32>
    %19 = arith.addf %9, %18 : vector<4x256xf32>
    %20 = vector.extract_strided_slice %4 {offsets = [0, 1], sizes = [4, 1], strides = [1, 1]} : vector<4x144xf32> to vector<4x1xf32>
    %21 = vector.extract_strided_slice %13 {offsets = [1, 0], sizes = [1, 256], strides = [1, 1]} : vector<4x256xf32> to vector<1x256xf32>
    %22 = vector.broadcast %20 : vector<4x1xf32> to vector<4x256xf32>
    %23 = vector.broadcast %21 : vector<1x256xf32> to vector<4x256xf32>
    %24 = arith.mulf %22, %23 : vector<4x256xf32>
    %25 = arith.addf %19, %24 : vector<4x256xf32>
    %26 = vector.extract_strided_slice %4 {offsets = [0, 2], sizes = [4, 1], strides = [1, 1]} : vector<4x144xf32> to vector<4x1xf32>
    %27 = vector.extract_strided_slice %13 {offsets = [2, 0], sizes = [1, 256], strides = [1, 1]} : vector<4x256xf32> to vector<1x256xf32>
    %28 = vector.broadcast %26 : vector<4x1xf32> to vector<4x256xf32>
    %29 = vector.broadcast %27 : vector<1x256xf32> to vector<4x256xf32>
    %30 = arith.mulf %28, %29 : vector<4x256xf32>
    %31 = arith.addf %25, %30 : vector<4x256xf32>
    %32 = vector.extract_strided_slice %4 {offsets = [0, 3], sizes = [4, 1], strides = [1, 1]} : vector<4x144xf32> to vector<4x1xf32>
    %33 = vector.extract_strided_slice %13 {offsets = [3, 0], sizes = [1, 256], strides = [1, 1]} : vector<4x256xf32> to vector<1x256xf32>
    %34 = vector.broadcast %32 : vector<4x1xf32> to vector<4x256xf32>
    %35 = vector.broadcast %33 : vector<1x256xf32> to vector<4x256xf32>
    %36 = arith.mulf %34, %35 : vector<4x256xf32>
    %37 = arith.addf %31, %36 : vector<4x256xf32>
    %c0_15 = arith.constant 0 : index
    %c112 = arith.constant 112 : index
    %38 = vector.load %arg8[%c0_15, %c112] : memref<4x512xf32, #tpu.memory_space<vmem>>, vector<4x256xf32>
    %39 = vector.extract_strided_slice %7 {offsets = [1, 0], sizes = [1, 256], strides = [1, 1]} : vector<9x256xf32> to vector<1x256xf32>
    %40 = vector.broadcast %39 : vector<1x256xf32> to vector<4x256xf32>
    %41 = arith.mulf %38, %40 : vector<4x256xf32>
    %42 = vector.extract_strided_slice %4 {offsets = [0, 4], sizes = [4, 1], strides = [1, 1]} : vector<4x144xf32> to vector<4x1xf32>
    %43 = vector.extract_strided_slice %41 {offsets = [0, 0], sizes = [1, 256], strides = [1, 1]} : vector<4x256xf32> to vector<1x256xf32>
    %44 = vector.broadcast %42 : vector<4x1xf32> to vector<4x256xf32>
    %45 = vector.broadcast %43 : vector<1x256xf32> to vector<4x256xf32>
    %46 = arith.mulf %44, %45 : vector<4x256xf32>
    %47 = arith.addf %37, %46 : vector<4x256xf32>
    %48 = vector.extract_strided_slice %4 {offsets = [0, 5], sizes = [4, 1], strides = [1, 1]} : vector<4x144xf32> to vector<4x1xf32>
    %49 = vector.extract_strided_slice %41 {offsets = [1, 0], sizes = [1, 256], strides = [1, 1]} : vector<4x256xf32> to vector<1x256xf32>
    %50 = vector.broadcast %48 : vector<4x1xf32> to vector<4x256xf32>
    %51 = vector.broadcast %49 : vector<1x256xf32> to vector<4x256xf32>
    %52 = arith.mulf %50, %51 : vector<4x256xf32>
    %53 = arith.addf %47, %52 : vector<4x256xf32>
    %54 = vector.extract_strided_slice %4 {offsets = [0, 6], sizes = [4, 1], strides = [1, 1]} : vector<4x144xf32> to vector<4x1xf32>
    %55 = vector.extract_strided_slice %41 {offsets = [2, 0], sizes = [1, 256], strides = [1, 1]} : vector<4x256xf32> to vector<1x256xf32>
    %56 = vector.broadcast %54 : vector<4x1xf32> to vector<4x256xf32>
    %57 = vector.broadcast %55 : vector<1x256xf32> to vector<4x256xf32>
    %58 = arith.mulf %56, %57 : vector<4x256xf32>
    %59 = arith.addf %53, %58 : vector<4x256xf32>
    %60 = vector.extract_strided_slice %4 {offsets = [0, 7], sizes = [4, 1], strides = [1, 1]} : vector<4x144xf32> to vector<4x1xf32>
    %61 = vector.extract_strided_slice %41 {offsets = [3, 0], sizes = [1, 256], strides = [1, 1]} : vector<4x256xf32> to vector<1x256xf32>
    %62 = vector.broadcast %60 : vector<4x1xf32> to vector<4x256xf32>
    %63 = vector.broadcast %61 : vector<1x256xf32> to vector<4x256xf32>
    %64 = arith.mulf %62, %63 : vector<4x256xf32>
    %65 = arith.addf %59, %64 : vector<4x256xf32>
    %c0_16 = arith.constant 0 : index
    %c113 = arith.constant 113 : index
    %66 = vector.load %arg8[%c0_16, %c113] : memref<4x512xf32, #tpu.memory_space<vmem>>, vector<4x256xf32>
    %67 = vector.extract_strided_slice %7 {offsets = [2, 0], sizes = [1, 256], strides = [1, 1]} : vector<9x256xf32> to vector<1x256xf32>
    %68 = vector.broadcast %67 : vector<1x256xf32> to vector<4x256xf32>
    %69 = arith.mulf %66, %68 : vector<4x256xf32>
    %70 = vector.extract_strided_slice %4 {offsets = [0, 8], sizes = [4, 1], strides = [1, 1]} : vector<4x144xf32> to vector<4x1xf32>
    %71 = vector.extract_strided_slice %69 {offsets = [0, 0], sizes = [1, 256], strides = [1, 1]} : vector<4x256xf32> to vector<1x256xf32>
    %72 = vector.broadcast %70 : vector<4x1xf32> to vector<4x256xf32>
    %73 = vector.broadcast %71 : vector<1x256xf32> to vector<4x256xf32>
    %74 = arith.mulf %72, %73 : vector<4x256xf32>
    %75 = arith.addf %65, %74 : vector<4x256xf32>
    %76 = vector.extract_strided_slice %4 {offsets = [0, 9], sizes = [4, 1], strides = [1, 1]} : vector<4x144xf32> to vector<4x1xf32>
    %77 = vector.extract_strided_slice %69 {offsets = [1, 0], sizes = [1, 256], strides = [1, 1]} : vector<4x256xf32> to vector<1x256xf32>
    %78 = vector.broadcast %76 : vector<4x1xf32> to vector<4x256xf32>
    %79 = vector.broadcast %77 : vector<1x256xf32> to vector<4x256xf32>
    %80 = arith.mulf %78, %79 : vector<4x256xf32>
    %81 = arith.addf %75, %80 : vector<4x256xf32>
    %82 = vector.extract_strided_slice %4 {offsets = [0, 10], sizes = [4, 1], strides = [1, 1]} : vector<4x144xf32> to vector<4x1xf32>
    %83 = vector.extract_strided_slice %69 {offsets = [2, 0], sizes = [1, 256], strides = [1, 1]} : vector<4x256xf32> to vector<1x256xf32>
    %84 = vector.broadcast %82 : vector<4x1xf32> to vector<4x256xf32>
    %85 = vector.broadcast %83 : vector<1x256xf32> to vector<4x256xf32>
    %86 = arith.mulf %84, %85 : vector<4x256xf32>
    %87 = arith.addf %81, %86 : vector<4x256xf32>
    %88 = vector.extract_strided_slice %4 {offsets = [0, 11], sizes = [4, 1], strides = [1, 1]} : vector<4x144xf32> to vector<4x1xf32>
    %89 = vector.extract_strided_slice %69 {offsets = [3, 0], sizes = [1, 256], strides = [1, 1]} : vector<4x256xf32> to vector<1x256xf32>
    %90 = vector.broadcast %88 : vector<4x1xf32> to vector<4x256xf32>
    %91 = vector.broadcast %89 : vector<1x256xf32> to vector<4x256xf32>
    %92 = arith.mulf %90, %91 : vector<4x256xf32>
    %93 = arith.addf %87, %92 : vector<4x256xf32>
    %c0_17 = arith.constant 0 : index
    %c127 = arith.constant 127 : index
    %94 = vector.load %arg8[%c0_17, %c127] : memref<4x512xf32, #tpu.memory_space<vmem>>, vector<4x256xf32>
    %95 = vector.extract_strided_slice %7 {offsets = [3, 0], sizes = [1, 256], strides = [1, 1]} : vector<9x256xf32> to vector<1x256xf32>
    %96 = vector.broadcast %95 : vector<1x256xf32> to vector<4x256xf32>
    %97 = arith.mulf %94, %96 : vector<4x256xf32>
    %98 = vector.extract_strided_slice %4 {offsets = [0, 12], sizes = [4, 1], strides = [1, 1]} : vector<4x144xf32> to vector<4x1xf32>
    %99 = vector.extract_strided_slice %97 {offsets = [0, 0], sizes = [1, 256], strides = [1, 1]} : vector<4x256xf32> to vector<1x256xf32>
    %100 = vector.broadcast %98 : vector<4x1xf32> to vector<4x256xf32>
    %101 = vector.broadcast %99 : vector<1x256xf32> to vector<4x256xf32>
    %102 = arith.mulf %100, %101 : vector<4x256xf32>
    %103 = arith.addf %93, %102 : vector<4x256xf32>
    %104 = vector.extract_strided_slice %4 {offsets = [0, 13], sizes = [4, 1], strides = [1, 1]} : vector<4x144xf32> to vector<4x1xf32>
    %105 = vector.extract_strided_slice %97 {offsets = [1, 0], sizes = [1, 256], strides = [1, 1]} : vector<4x256xf32> to vector<1x256xf32>
    %106 = vector.broadcast %104 : vector<4x1xf32> to vector<4x256xf32>
    %107 = vector.broadcast %105 : vector<1x256xf32> to vector<4x256xf32>
    %108 = arith.mulf %106, %107 : vector<4x256xf32>
    %109 = arith.addf %103, %108 : vector<4x256xf32>
    %110 = vector.extract_strided_slice %4 {offsets = [0, 14], sizes = [4, 1], strides = [1, 1]} : vector<4x144xf32> to vector<4x1xf32>
    %111 = vector.extract_strided_slice %97 {offsets = [2, 0], sizes = [1, 256], strides = [1, 1]} : vector<4x256xf32> to vector<1x256xf32>
    %112 = vector.broadcast %110 : vector<4x1xf32> to vector<4x256xf32>
    %113 = vector.broadcast %111 : vector<1x256xf32> to vector<4x256xf32>
    %114 = arith.mulf %112, %113 : vector<4x256xf32>
    %115 = arith.addf %109, %114 : vector<4x256xf32>
    %116 = vector.extract_strided_slice %4 {offsets = [0, 15], sizes = [4, 1], strides = [1, 1]} : vector<4x144xf32> to vector<4x1xf32>
    %117 = vector.extract_strided_slice %97 {offsets = [3, 0], sizes = [1, 256], strides = [1, 1]} : vector<4x256xf32> to vector<1x256xf32>
    %118 = vector.broadcast %116 : vector<4x1xf32> to vector<4x256xf32>
    %119 = vector.broadcast %117 : vector<1x256xf32> to vector<4x256xf32>
    %120 = arith.mulf %118, %119 : vector<4x256xf32>
    %121 = arith.addf %115, %120 : vector<4x256xf32>
    %c0_18 = arith.constant 0 : index
    %c128_19 = arith.constant 128 : index
    %122 = vector.load %arg8[%c0_18, %c128_19] : memref<4x512xf32, #tpu.memory_space<vmem>>, vector<4x256xf32>
    %123 = vector.extract_strided_slice %4 {offsets = [0, 16], sizes = [4, 1], strides = [1, 1]} : vector<4x144xf32> to vector<4x1xf32>
    %124 = vector.extract_strided_slice %122 {offsets = [0, 0], sizes = [1, 256], strides = [1, 1]} : vector<4x256xf32> to vector<1x256xf32>
    %125 = vector.broadcast %123 : vector<4x1xf32> to vector<4x256xf32>
    %126 = vector.broadcast %124 : vector<1x256xf32> to vector<4x256xf32>
    %127 = arith.mulf %125, %126 : vector<4x256xf32>
    %128 = arith.addf %121, %127 : vector<4x256xf32>
    %129 = vector.extract_strided_slice %4 {offsets = [0, 17], sizes = [4, 1], strides = [1, 1]} : vector<4x144xf32> to vector<4x1xf32>
    %130 = vector.extract_strided_slice %122 {offsets = [1, 0], sizes = [1, 256], strides = [1, 1]} : vector<4x256xf32> to vector<1x256xf32>
    %131 = vector.broadcast %129 : vector<4x1xf32> to vector<4x256xf32>
    %132 = vector.broadcast %130 : vector<1x256xf32> to vector<4x256xf32>
    %133 = arith.mulf %131, %132 : vector<4x256xf32>
    %134 = arith.addf %128, %133 : vector<4x256xf32>
    %135 = vector.extract_strided_slice %4 {offsets = [0, 18], sizes = [4, 1], strides = [1, 1]} : vector<4x144xf32> to vector<4x1xf32>
    %136 = vector.extract_strided_slice %122 {offsets = [2, 0], sizes = [1, 256], strides = [1, 1]} : vector<4x256xf32> to vector<1x256xf32>
    %137 = vector.broadcast %135 : vector<4x1xf32> to vector<4x256xf32>
    %138 = vector.broadcast %136 : vector<1x256xf32> to vector<4x256xf32>
    %139 = arith.mulf %137, %138 : vector<4x256xf32>
    %140 = arith.addf %134, %139 : vector<4x256xf32>
    %141 = vector.extract_strided_slice %4 {offsets = [0, 19], sizes = [4, 1], strides = [1, 1]} : vector<4x144xf32> to vector<4x1xf32>
    %142 = vector.extract_strided_slice %122 {offsets = [3, 0], sizes = [1, 256], strides = [1, 1]} : vector<4x256xf32> to vector<1x256xf32>
    %143 = vector.broadcast %141 : vector<4x1xf32> to vector<4x256xf32>
    %144 = vector.broadcast %142 : vector<1x256xf32> to vector<4x256xf32>
    %145 = arith.mulf %143, %144 : vector<4x256xf32>
    %146 = arith.addf %140, %145 : vector<4x256xf32>
    %c0_20 = arith.constant 0 : index
    %c129 = arith.constant 129 : index
    %147 = vector.load %arg8[%c0_20, %c129] : memref<4x512xf32, #tpu.memory_space<vmem>>, vector<4x256xf32>
    %148 = vector.extract_strided_slice %7 {offsets = [5, 0], sizes = [1, 256], strides = [1, 1]} : vector<9x256xf32> to vector<1x256xf32>
    %149 = vector.broadcast %148 : vector<1x256xf32> to vector<4x256xf32>
    %150 = arith.mulf %147, %149 : vector<4x256xf32>
    %151 = vector.extract_strided_slice %4 {offsets = [0, 20], sizes = [4, 1], strides = [1, 1]} : vector<4x144xf32> to vector<4x1xf32>
    %152 = vector.extract_strided_slice %150 {offsets = [0, 0], sizes = [1, 256], strides = [1, 1]} : vector<4x256xf32> to vector<1x256xf32>
    %153 = vector.broadcast %151 : vector<4x1xf32> to vector<4x256xf32>
    %154 = vector.broadcast %152 : vector<1x256xf32> to vector<4x256xf32>
    %155 = arith.mulf %153, %154 : vector<4x256xf32>
    %156 = arith.addf %146, %155 : vector<4x256xf32>
    %157 = vector.extract_strided_slice %4 {offsets = [0, 21], sizes = [4, 1], strides = [1, 1]} : vector<4x144xf32> to vector<4x1xf32>
    %158 = vector.extract_strided_slice %150 {offsets = [1, 0], sizes = [1, 256], strides = [1, 1]} : vector<4x256xf32> to vector<1x256xf32>
    %159 = vector.broadcast %157 : vector<4x1xf32> to vector<4x256xf32>
    %160 = vector.broadcast %158 : vector<1x256xf32> to vector<4x256xf32>
    %161 = arith.mulf %159, %160 : vector<4x256xf32>
    %162 = arith.addf %156, %161 : vector<4x256xf32>
    %163 = vector.extract_strided_slice %4 {offsets = [0, 22], sizes = [4, 1], strides = [1, 1]} : vector<4x144xf32> to vector<4x1xf32>
    %164 = vector.extract_strided_slice %150 {offsets = [2, 0], sizes = [1, 256], strides = [1, 1]} : vector<4x256xf32> to vector<1x256xf32>
    %165 = vector.broadcast %163 : vector<4x1xf32> to vector<4x256xf32>
    %166 = vector.broadcast %164 : vector<1x256xf32> to vector<4x256xf32>
    %167 = arith.mulf %165, %166 : vector<4x256xf32>
    %168 = arith.addf %162, %167 : vector<4x256xf32>
    %169 = vector.extract_strided_slice %4 {offsets = [0, 23], sizes = [4, 1], strides = [1, 1]} : vector<4x144xf32> to vector<4x1xf32>
    %170 = vector.extract_strided_slice %150 {offsets = [3, 0], sizes = [1, 256], strides = [1, 1]} : vector<4x256xf32> to vector<1x256xf32>
    %171 = vector.broadcast %169 : vector<4x1xf32> to vector<4x256xf32>
    %172 = vector.broadcast %170 : vector<1x256xf32> to vector<4x256xf32>
    %173 = arith.mulf %171, %172 : vector<4x256xf32>
    %174 = arith.addf %168, %173 : vector<4x256xf32>
    %c0_21 = arith.constant 0 : index
    %c143 = arith.constant 143 : index
    %175 = vector.load %arg8[%c0_21, %c143] : memref<4x512xf32, #tpu.memory_space<vmem>>, vector<4x256xf32>
    %176 = vector.extract_strided_slice %7 {offsets = [6, 0], sizes = [1, 256], strides = [1, 1]} : vector<9x256xf32> to vector<1x256xf32>
    %177 = vector.broadcast %176 : vector<1x256xf32> to vector<4x256xf32>
    %178 = arith.mulf %175, %177 : vector<4x256xf32>
    %179 = vector.extract_strided_slice %4 {offsets = [0, 24], sizes = [4, 1], strides = [1, 1]} : vector<4x144xf32> to vector<4x1xf32>
    %180 = vector.extract_strided_slice %178 {offsets = [0, 0], sizes = [1, 256], strides = [1, 1]} : vector<4x256xf32> to vector<1x256xf32>
    %181 = vector.broadcast %179 : vector<4x1xf32> to vector<4x256xf32>
    %182 = vector.broadcast %180 : vector<1x256xf32> to vector<4x256xf32>
    %183 = arith.mulf %181, %182 : vector<4x256xf32>
    %184 = arith.addf %174, %183 : vector<4x256xf32>
    %185 = vector.extract_strided_slice %4 {offsets = [0, 25], sizes = [4, 1], strides = [1, 1]} : vector<4x144xf32> to vector<4x1xf32>
    %186 = vector.extract_strided_slice %178 {offsets = [1, 0], sizes = [1, 256], strides = [1, 1]} : vector<4x256xf32> to vector<1x256xf32>
    %187 = vector.broadcast %185 : vector<4x1xf32> to vector<4x256xf32>
    %188 = vector.broadcast %186 : vector<1x256xf32> to vector<4x256xf32>
    %189 = arith.mulf %187, %188 : vector<4x256xf32>
    %190 = arith.addf %184, %189 : vector<4x256xf32>
    %191 = vector.extract_strided_slice %4 {offsets = [0, 26], sizes = [4, 1], strides = [1, 1]} : vector<4x144xf32> to vector<4x1xf32>
    %192 = vector.extract_strided_slice %178 {offsets = [2, 0], sizes = [1, 256], strides = [1, 1]} : vector<4x256xf32> to vector<1x256xf32>
    %193 = vector.broadcast %191 : vector<4x1xf32> to vector<4x256xf32>
    %194 = vector.broadcast %192 : vector<1x256xf32> to vector<4x256xf32>
    %195 = arith.mulf %193, %194 : vector<4x256xf32>
    %196 = arith.addf %190, %195 : vector<4x256xf32>
    %197 = vector.extract_strided_slice %4 {offsets = [0, 27], sizes = [4, 1], strides = [1, 1]} : vector<4x144xf32> to vector<4x1xf32>
    %198 = vector.extract_strided_slice %178 {offsets = [3, 0], sizes = [1, 256], strides = [1, 1]} : vector<4x256xf32> to vector<1x256xf32>
    %199 = vector.broadcast %197 : vector<4x1xf32> to vector<4x256xf32>
    %200 = vector.broadcast %198 : vector<1x256xf32> to vector<4x256xf32>
    %201 = arith.mulf %199, %200 : vector<4x256xf32>
    %202 = arith.addf %196, %201 : vector<4x256xf32>
    %c0_22 = arith.constant 0 : index
    %c144 = arith.constant 144 : index
    %203 = vector.load %arg8[%c0_22, %c144] : memref<4x512xf32, #tpu.memory_space<vmem>>, vector<4x256xf32>
    %204 = vector.extract_strided_slice %7 {offsets = [7, 0], sizes = [1, 256], strides = [1, 1]} : vector<9x256xf32> to vector<1x256xf32>
    %205 = vector.broadcast %204 : vector<1x256xf32> to vector<4x256xf32>
    %206 = arith.mulf %203, %205 : vector<4x256xf32>
    %207 = vector.extract_strided_slice %4 {offsets = [0, 28], sizes = [4, 1], strides = [1, 1]} : vector<4x144xf32> to vector<4x1xf32>
    %208 = vector.extract_strided_slice %206 {offsets = [0, 0], sizes = [1, 256], strides = [1, 1]} : vector<4x256xf32> to vector<1x256xf32>
    %209 = vector.broadcast %207 : vector<4x1xf32> to vector<4x256xf32>
    %210 = vector.broadcast %208 : vector<1x256xf32> to vector<4x256xf32>
    %211 = arith.mulf %209, %210 : vector<4x256xf32>
    %212 = arith.addf %202, %211 : vector<4x256xf32>
    %213 = vector.extract_strided_slice %4 {offsets = [0, 29], sizes = [4, 1], strides = [1, 1]} : vector<4x144xf32> to vector<4x1xf32>
    %214 = vector.extract_strided_slice %206 {offsets = [1, 0], sizes = [1, 256], strides = [1, 1]} : vector<4x256xf32> to vector<1x256xf32>
    %215 = vector.broadcast %213 : vector<4x1xf32> to vector<4x256xf32>
    %216 = vector.broadcast %214 : vector<1x256xf32> to vector<4x256xf32>
    %217 = arith.mulf %215, %216 : vector<4x256xf32>
    %218 = arith.addf %212, %217 : vector<4x256xf32>
    %219 = vector.extract_strided_slice %4 {offsets = [0, 30], sizes = [4, 1], strides = [1, 1]} : vector<4x144xf32> to vector<4x1xf32>
    %220 = vector.extract_strided_slice %206 {offsets = [2, 0], sizes = [1, 256], strides = [1, 1]} : vector<4x256xf32> to vector<1x256xf32>
    %221 = vector.broadcast %219 : vector<4x1xf32> to vector<4x256xf32>
    %222 = vector.broadcast %220 : vector<1x256xf32> to vector<4x256xf32>
    %223 = arith.mulf %221, %222 : vector<4x256xf32>
    %224 = arith.addf %218, %223 : vector<4x256xf32>
    %225 = vector.extract_strided_slice %4 {offsets = [0, 31], sizes = [4, 1], strides = [1, 1]} : vector<4x144xf32> to vector<4x1xf32>
    %226 = vector.extract_strided_slice %206 {offsets = [3, 0], sizes = [1, 256], strides = [1, 1]} : vector<4x256xf32> to vector<1x256xf32>
    %227 = vector.broadcast %225 : vector<4x1xf32> to vector<4x256xf32>
    %228 = vector.broadcast %226 : vector<1x256xf32> to vector<4x256xf32>
    %229 = arith.mulf %227, %228 : vector<4x256xf32>
    %230 = arith.addf %224, %229 : vector<4x256xf32>
    %c0_23 = arith.constant 0 : index
    %c145 = arith.constant 145 : index
    %231 = vector.load %arg8[%c0_23, %c145] : memref<4x512xf32, #tpu.memory_space<vmem>>, vector<4x256xf32>
    %232 = vector.extract_strided_slice %7 {offsets = [8, 0], sizes = [1, 256], strides = [1, 1]} : vector<9x256xf32> to vector<1x256xf32>
    %233 = vector.broadcast %232 : vector<1x256xf32> to vector<4x256xf32>
    %234 = arith.mulf %231, %233 : vector<4x256xf32>
    %235 = vector.extract_strided_slice %4 {offsets = [0, 32], sizes = [4, 1], strides = [1, 1]} : vector<4x144xf32> to vector<4x1xf32>
    %236 = vector.extract_strided_slice %234 {offsets = [0, 0], sizes = [1, 256], strides = [1, 1]} : vector<4x256xf32> to vector<1x256xf32>
    %237 = vector.broadcast %235 : vector<4x1xf32> to vector<4x256xf32>
    %238 = vector.broadcast %236 : vector<1x256xf32> to vector<4x256xf32>
    %239 = arith.mulf %237, %238 : vector<4x256xf32>
    %240 = arith.addf %230, %239 : vector<4x256xf32>
    %241 = vector.extract_strided_slice %4 {offsets = [0, 33], sizes = [4, 1], strides = [1, 1]} : vector<4x144xf32> to vector<4x1xf32>
    %242 = vector.extract_strided_slice %234 {offsets = [1, 0], sizes = [1, 256], strides = [1, 1]} : vector<4x256xf32> to vector<1x256xf32>
    %243 = vector.broadcast %241 : vector<4x1xf32> to vector<4x256xf32>
    %244 = vector.broadcast %242 : vector<1x256xf32> to vector<4x256xf32>
    %245 = arith.mulf %243, %244 : vector<4x256xf32>
    %246 = arith.addf %240, %245 : vector<4x256xf32>
    %247 = vector.extract_strided_slice %4 {offsets = [0, 34], sizes = [4, 1], strides = [1, 1]} : vector<4x144xf32> to vector<4x1xf32>
    %248 = vector.extract_strided_slice %234 {offsets = [2, 0], sizes = [1, 256], strides = [1, 1]} : vector<4x256xf32> to vector<1x256xf32>
    %249 = vector.broadcast %247 : vector<4x1xf32> to vector<4x256xf32>
    %250 = vector.broadcast %248 : vector<1x256xf32> to vector<4x256xf32>
    %251 = arith.mulf %249, %250 : vector<4x256xf32>
    %252 = arith.addf %246, %251 : vector<4x256xf32>
    %253 = vector.extract_strided_slice %4 {offsets = [0, 35], sizes = [4, 1], strides = [1, 1]} : vector<4x144xf32> to vector<4x1xf32>
    %254 = vector.extract_strided_slice %234 {offsets = [3, 0], sizes = [1, 256], strides = [1, 1]} : vector<4x256xf32> to vector<1x256xf32>
    %255 = vector.broadcast %253 : vector<4x1xf32> to vector<4x256xf32>
    %256 = vector.broadcast %254 : vector<1x256xf32> to vector<4x256xf32>
    %257 = arith.mulf %255, %256 : vector<4x256xf32>
    %258 = arith.addf %252, %257 : vector<4x256xf32>
    %cst_24 = arith.constant dense<0.000000e+00> : vector<4xf32>
    %259 = vector.multi_reduction <add>, %258, %cst_24 [1] : vector<4x256xf32> to vector<4xf32>
    %260 = vector.shape_cast %259 : vector<4xf32> to vector<4x1xf32>
    %cst_25 = arith.constant 2.560000e+02 : f32
    %261 = vector.broadcast %cst_25 : f32 to vector<4x1xf32>
    %262 = arith.divf %260, %261 : vector<4x1xf32>
    %263 = vector.broadcast %262 : vector<4x1xf32> to vector<4x256xf32>
    %264 = arith.subf %258, %263 : vector<4x256xf32>
    %265 = arith.mulf %264, %264 : vector<4x256xf32>
    %cst_26 = arith.constant dense<0.000000e+00> : vector<4xf32>
    %266 = vector.multi_reduction <add>, %265, %cst_26 [1] : vector<4x256xf32> to vector<4xf32>
    %267 = vector.shape_cast %266 : vector<4xf32> to vector<4x1xf32>
    %cst_27 = arith.constant 2.560000e+02 : f32
    %268 = vector.broadcast %cst_27 : f32 to vector<4x1xf32>
    %269 = arith.divf %267, %268 : vector<4x1xf32>
    %cst_28 = arith.constant 9.99999974E-6 : f32
    %270 = vector.broadcast %cst_28 : f32 to vector<4x1xf32>
    %271 = arith.addf %269, %270 : vector<4x1xf32>
    %272 = math.rsqrt %271 : vector<4x1xf32>
    %273 = vector.broadcast %272 : vector<4x1xf32> to vector<4x256xf32>
    %274 = arith.mulf %264, %273 : vector<4x256xf32>
    %275 = vector.extract_strided_slice %5 {offsets = [0, 0], sizes = [4, 1], strides = [1, 1]} : vector<4x8xf32> to vector<4x1xf32>
    %276 = vector.broadcast %275 : vector<4x1xf32> to vector<4x256xf32>
    %277 = arith.mulf %274, %276 : vector<4x256xf32>
    %278 = vector.extract_strided_slice %5 {offsets = [0, 1], sizes = [4, 1], strides = [1, 1]} : vector<4x8xf32> to vector<4x1xf32>
    %279 = vector.broadcast %278 : vector<4x1xf32> to vector<4x256xf32>
    %280 = arith.addf %277, %279 : vector<4x256xf32>
    %c0_29 = arith.constant 0 : index
    %281 = memref.load %arg6[%c0_29] : memref<4xf32, #tpu.memory_space<smem>>
    %cst_30 = arith.constant 0.000000e+00 : f32
    %282 = vector.broadcast %cst_30 : f32 to vector<4x256xf32>
    %283 = arith.cmpf oge, %280, %282 : vector<4x256xf32>
    %284 = vector.broadcast %281 : f32 to vector<4x256xf32>
    %285 = arith.mulf %284, %280 : vector<4x256xf32>
    %286 = arith.select %283, %280, %285 : vector<4x256xi1>, vector<4x256xf32>
    %c0_31 = arith.constant 0 : index
    %c128_32 = arith.constant 128 : index
    %287 = vector.load %arg8[%c0_31, %c128_32] : memref<4x512xf32, #tpu.memory_space<vmem>>, vector<4x256xf32>
    tpu.vector_store %arg8[%c0_31, %c128_32], %286 {strides = array<i32>} : memref<4x512xf32, #tpu.memory_space<vmem>>, vector<4x256xf32>,
    %cst_33 = arith.constant 0.000000e+00 : f32
    %288 = vector.broadcast %cst_33 : f32 to vector<4x256xf32>
    %c0_34 = arith.constant 0 : index
    %c111_35 = arith.constant 111 : index
    %289 = vector.load %arg8[%c0_34, %c111_35] : memref<4x512xf32, #tpu.memory_space<vmem>>, vector<4x256xf32>
    %290 = vector.extract_strided_slice %7 {offsets = [0, 0], sizes = [1, 256], strides = [1, 1]} : vector<9x256xf32> to vector<1x256xf32>
    %291 = vector.broadcast %290 : vector<1x256xf32> to vector<4x256xf32>
    %292 = arith.mulf %289, %291 : vector<4x256xf32>
    %293 = vector.extract_strided_slice %4 {offsets = [0, 36], sizes = [4, 1], strides = [1, 1]} : vector<4x144xf32> to vector<4x1xf32>
    %294 = vector.extract_strided_slice %292 {offsets = [0, 0], sizes = [1, 256], strides = [1, 1]} : vector<4x256xf32> to vector<1x256xf32>
    %295 = vector.broadcast %293 : vector<4x1xf32> to vector<4x256xf32>
    %296 = vector.broadcast %294 : vector<1x256xf32> to vector<4x256xf32>
    %297 = arith.mulf %295, %296 : vector<4x256xf32>
    %298 = arith.addf %288, %297 : vector<4x256xf32>
    %299 = vector.extract_strided_slice %4 {offsets = [0, 37], sizes = [4, 1], strides = [1, 1]} : vector<4x144xf32> to vector<4x1xf32>
    %300 = vector.extract_strided_slice %292 {offsets = [1, 0], sizes = [1, 256], strides = [1, 1]} : vector<4x256xf32> to vector<1x256xf32>
    %301 = vector.broadcast %299 : vector<4x1xf32> to vector<4x256xf32>
    %302 = vector.broadcast %300 : vector<1x256xf32> to vector<4x256xf32>
    %303 = arith.mulf %301, %302 : vector<4x256xf32>
    %304 = arith.addf %298, %303 : vector<4x256xf32>
    %305 = vector.extract_strided_slice %4 {offsets = [0, 38], sizes = [4, 1], strides = [1, 1]} : vector<4x144xf32> to vector<4x1xf32>
    %306 = vector.extract_strided_slice %292 {offsets = [2, 0], sizes = [1, 256], strides = [1, 1]} : vector<4x256xf32> to vector<1x256xf32>
    %307 = vector.broadcast %305 : vector<4x1xf32> to vector<4x256xf32>
    %308 = vector.broadcast %306 : vector<1x256xf32> to vector<4x256xf32>
    %309 = arith.mulf %307, %308 : vector<4x256xf32>
    %310 = arith.addf %304, %309 : vector<4x256xf32>
    %311 = vector.extract_strided_slice %4 {offsets = [0, 39], sizes = [4, 1], strides = [1, 1]} : vector<4x144xf32> to vector<4x1xf32>
    %312 = vector.extract_strided_slice %292 {offsets = [3, 0], sizes = [1, 256], strides = [1, 1]} : vector<4x256xf32> to vector<1x256xf32>
    %313 = vector.broadcast %311 : vector<4x1xf32> to vector<4x256xf32>
    %314 = vector.broadcast %312 : vector<1x256xf32> to vector<4x256xf32>
    %315 = arith.mulf %313, %314 : vector<4x256xf32>
    %316 = arith.addf %310, %315 : vector<4x256xf32>
    %c0_36 = arith.constant 0 : index
    %c112_37 = arith.constant 112 : index
    %317 = vector.load %arg8[%c0_36, %c112_37] : memref<4x512xf32, #tpu.memory_space<vmem>>, vector<4x256xf32>
    %318 = vector.extract_strided_slice %7 {offsets = [1, 0], sizes = [1, 256], strides = [1, 1]} : vector<9x256xf32> to vector<1x256xf32>
    %319 = vector.broadcast %318 : vector<1x256xf32> to vector<4x256xf32>
    %320 = arith.mulf %317, %319 : vector<4x256xf32>
    %321 = vector.extract_strided_slice %4 {offsets = [0, 40], sizes = [4, 1], strides = [1, 1]} : vector<4x144xf32> to vector<4x1xf32>
    %322 = vector.extract_strided_slice %320 {offsets = [0, 0], sizes = [1, 256], strides = [1, 1]} : vector<4x256xf32> to vector<1x256xf32>
    %323 = vector.broadcast %321 : vector<4x1xf32> to vector<4x256xf32>
    %324 = vector.broadcast %322 : vector<1x256xf32> to vector<4x256xf32>
    %325 = arith.mulf %323, %324 : vector<4x256xf32>
    %326 = arith.addf %316, %325 : vector<4x256xf32>
    %327 = vector.extract_strided_slice %4 {offsets = [0, 41], sizes = [4, 1], strides = [1, 1]} : vector<4x144xf32> to vector<4x1xf32>
    %328 = vector.extract_strided_slice %320 {offsets = [1, 0], sizes = [1, 256], strides = [1, 1]} : vector<4x256xf32> to vector<1x256xf32>
    %329 = vector.broadcast %327 : vector<4x1xf32> to vector<4x256xf32>
    %330 = vector.broadcast %328 : vector<1x256xf32> to vector<4x256xf32>
    %331 = arith.mulf %329, %330 : vector<4x256xf32>
    %332 = arith.addf %326, %331 : vector<4x256xf32>
    %333 = vector.extract_strided_slice %4 {offsets = [0, 42], sizes = [4, 1], strides = [1, 1]} : vector<4x144xf32> to vector<4x1xf32>
    %334 = vector.extract_strided_slice %320 {offsets = [2, 0], sizes = [1, 256], strides = [1, 1]} : vector<4x256xf32> to vector<1x256xf32>
    %335 = vector.broadcast %333 : vector<4x1xf32> to vector<4x256xf32>
    %336 = vector.broadcast %334 : vector<1x256xf32> to vector<4x256xf32>
    %337 = arith.mulf %335, %336 : vector<4x256xf32>
    %338 = arith.addf %332, %337 : vector<4x256xf32>
    %339 = vector.extract_strided_slice %4 {offsets = [0, 43], sizes = [4, 1], strides = [1, 1]} : vector<4x144xf32> to vector<4x1xf32>
    %340 = vector.extract_strided_slice %320 {offsets = [3, 0], sizes = [1, 256], strides = [1, 1]} : vector<4x256xf32> to vector<1x256xf32>
    %341 = vector.broadcast %339 : vector<4x1xf32> to vector<4x256xf32>
    %342 = vector.broadcast %340 : vector<1x256xf32> to vector<4x256xf32>
    %343 = arith.mulf %341, %342 : vector<4x256xf32>
    %344 = arith.addf %338, %343 : vector<4x256xf32>
    %c0_38 = arith.constant 0 : index
    %c113_39 = arith.constant 113 : index
    %345 = vector.load %arg8[%c0_38, %c113_39] : memref<4x512xf32, #tpu.memory_space<vmem>>, vector<4x256xf32>
    %346 = vector.extract_strided_slice %7 {offsets = [2, 0], sizes = [1, 256], strides = [1, 1]} : vector<9x256xf32> to vector<1x256xf32>
    %347 = vector.broadcast %346 : vector<1x256xf32> to vector<4x256xf32>
    %348 = arith.mulf %345, %347 : vector<4x256xf32>
    %349 = vector.extract_strided_slice %4 {offsets = [0, 44], sizes = [4, 1], strides = [1, 1]} : vector<4x144xf32> to vector<4x1xf32>
    %350 = vector.extract_strided_slice %348 {offsets = [0, 0], sizes = [1, 256], strides = [1, 1]} : vector<4x256xf32> to vector<1x256xf32>
    %351 = vector.broadcast %349 : vector<4x1xf32> to vector<4x256xf32>
    %352 = vector.broadcast %350 : vector<1x256xf32> to vector<4x256xf32>
    %353 = arith.mulf %351, %352 : vector<4x256xf32>
    %354 = arith.addf %344, %353 : vector<4x256xf32>
    %355 = vector.extract_strided_slice %4 {offsets = [0, 45], sizes = [4, 1], strides = [1, 1]} : vector<4x144xf32> to vector<4x1xf32>
    %356 = vector.extract_strided_slice %348 {offsets = [1, 0], sizes = [1, 256], strides = [1, 1]} : vector<4x256xf32> to vector<1x256xf32>
    %357 = vector.broadcast %355 : vector<4x1xf32> to vector<4x256xf32>
    %358 = vector.broadcast %356 : vector<1x256xf32> to vector<4x256xf32>
    %359 = arith.mulf %357, %358 : vector<4x256xf32>
    %360 = arith.addf %354, %359 : vector<4x256xf32>
    %361 = vector.extract_strided_slice %4 {offsets = [0, 46], sizes = [4, 1], strides = [1, 1]} : vector<4x144xf32> to vector<4x1xf32>
    %362 = vector.extract_strided_slice %348 {offsets = [2, 0], sizes = [1, 256], strides = [1, 1]} : vector<4x256xf32> to vector<1x256xf32>
    %363 = vector.broadcast %361 : vector<4x1xf32> to vector<4x256xf32>
    %364 = vector.broadcast %362 : vector<1x256xf32> to vector<4x256xf32>
    %365 = arith.mulf %363, %364 : vector<4x256xf32>
    %366 = arith.addf %360, %365 : vector<4x256xf32>
    %367 = vector.extract_strided_slice %4 {offsets = [0, 47], sizes = [4, 1], strides = [1, 1]} : vector<4x144xf32> to vector<4x1xf32>
    %368 = vector.extract_strided_slice %348 {offsets = [3, 0], sizes = [1, 256], strides = [1, 1]} : vector<4x256xf32> to vector<1x256xf32>
    %369 = vector.broadcast %367 : vector<4x1xf32> to vector<4x256xf32>
    %370 = vector.broadcast %368 : vector<1x256xf32> to vector<4x256xf32>
    %371 = arith.mulf %369, %370 : vector<4x256xf32>
    %372 = arith.addf %366, %371 : vector<4x256xf32>
    %c0_40 = arith.constant 0 : index
    %c127_41 = arith.constant 127 : index
    %373 = vector.load %arg8[%c0_40, %c127_41] : memref<4x512xf32, #tpu.memory_space<vmem>>, vector<4x256xf32>
    %374 = vector.extract_strided_slice %7 {offsets = [3, 0], sizes = [1, 256], strides = [1, 1]} : vector<9x256xf32> to vector<1x256xf32>
    %375 = vector.broadcast %374 : vector<1x256xf32> to vector<4x256xf32>
    %376 = arith.mulf %373, %375 : vector<4x256xf32>
    %377 = vector.extract_strided_slice %4 {offsets = [0, 48], sizes = [4, 1], strides = [1, 1]} : vector<4x144xf32> to vector<4x1xf32>
    %378 = vector.extract_strided_slice %376 {offsets = [0, 0], sizes = [1, 256], strides = [1, 1]} : vector<4x256xf32> to vector<1x256xf32>
    %379 = vector.broadcast %377 : vector<4x1xf32> to vector<4x256xf32>
    %380 = vector.broadcast %378 : vector<1x256xf32> to vector<4x256xf32>
    %381 = arith.mulf %379, %380 : vector<4x256xf32>
    %382 = arith.addf %372, %381 : vector<4x256xf32>
    %383 = vector.extract_strided_slice %4 {offsets = [0, 49], sizes = [4, 1], strides = [1, 1]} : vector<4x144xf32> to vector<4x1xf32>
    %384 = vector.extract_strided_slice %376 {offsets = [1, 0], sizes = [1, 256], strides = [1, 1]} : vector<4x256xf32> to vector<1x256xf32>
    %385 = vector.broadcast %383 : vector<4x1xf32> to vector<4x256xf32>
    %386 = vector.broadcast %384 : vector<1x256xf32> to vector<4x256xf32>
    %387 = arith.mulf %385, %386 : vector<4x256xf32>
    %388 = arith.addf %382, %387 : vector<4x256xf32>
    %389 = vector.extract_strided_slice %4 {offsets = [0, 50], sizes = [4, 1], strides = [1, 1]} : vector<4x144xf32> to vector<4x1xf32>
    %390 = vector.extract_strided_slice %376 {offsets = [2, 0], sizes = [1, 256], strides = [1, 1]} : vector<4x256xf32> to vector<1x256xf32>
    %391 = vector.broadcast %389 : vector<4x1xf32> to vector<4x256xf32>
    %392 = vector.broadcast %390 : vector<1x256xf32> to vector<4x256xf32>
    %393 = arith.mulf %391, %392 : vector<4x256xf32>
    %394 = arith.addf %388, %393 : vector<4x256xf32>
    %395 = vector.extract_strided_slice %4 {offsets = [0, 51], sizes = [4, 1], strides = [1, 1]} : vector<4x144xf32> to vector<4x1xf32>
    %396 = vector.extract_strided_slice %376 {offsets = [3, 0], sizes = [1, 256], strides = [1, 1]} : vector<4x256xf32> to vector<1x256xf32>
    %397 = vector.broadcast %395 : vector<4x1xf32> to vector<4x256xf32>
    %398 = vector.broadcast %396 : vector<1x256xf32> to vector<4x256xf32>
    %399 = arith.mulf %397, %398 : vector<4x256xf32>
    %400 = arith.addf %394, %399 : vector<4x256xf32>
    %c0_42 = arith.constant 0 : index
    %c128_43 = arith.constant 128 : index
    %401 = vector.load %arg8[%c0_42, %c128_43] : memref<4x512xf32, #tpu.memory_space<vmem>>, vector<4x256xf32>
    %402 = vector.extract_strided_slice %4 {offsets = [0, 52], sizes = [4, 1], strides = [1, 1]} : vector<4x144xf32> to vector<4x1xf32>
    %403 = vector.extract_strided_slice %401 {offsets = [0, 0], sizes = [1, 256], strides = [1, 1]} : vector<4x256xf32> to vector<1x256xf32>
    %404 = vector.broadcast %402 : vector<4x1xf32> to vector<4x256xf32>
    %405 = vector.broadcast %403 : vector<1x256xf32> to vector<4x256xf32>
    %406 = arith.mulf %404, %405 : vector<4x256xf32>
    %407 = arith.addf %400, %406 : vector<4x256xf32>
    %408 = vector.extract_strided_slice %4 {offsets = [0, 53], sizes = [4, 1], strides = [1, 1]} : vector<4x144xf32> to vector<4x1xf32>
    %409 = vector.extract_strided_slice %401 {offsets = [1, 0], sizes = [1, 256], strides = [1, 1]} : vector<4x256xf32> to vector<1x256xf32>
    %410 = vector.broadcast %408 : vector<4x1xf32> to vector<4x256xf32>
    %411 = vector.broadcast %409 : vector<1x256xf32> to vector<4x256xf32>
    %412 = arith.mulf %410, %411 : vector<4x256xf32>
    %413 = arith.addf %407, %412 : vector<4x256xf32>
    %414 = vector.extract_strided_slice %4 {offsets = [0, 54], sizes = [4, 1], strides = [1, 1]} : vector<4x144xf32> to vector<4x1xf32>
    %415 = vector.extract_strided_slice %401 {offsets = [2, 0], sizes = [1, 256], strides = [1, 1]} : vector<4x256xf32> to vector<1x256xf32>
    %416 = vector.broadcast %414 : vector<4x1xf32> to vector<4x256xf32>
    %417 = vector.broadcast %415 : vector<1x256xf32> to vector<4x256xf32>
    %418 = arith.mulf %416, %417 : vector<4x256xf32>
    %419 = arith.addf %413, %418 : vector<4x256xf32>
    %420 = vector.extract_strided_slice %4 {offsets = [0, 55], sizes = [4, 1], strides = [1, 1]} : vector<4x144xf32> to vector<4x1xf32>
    %421 = vector.extract_strided_slice %401 {offsets = [3, 0], sizes = [1, 256], strides = [1, 1]} : vector<4x256xf32> to vector<1x256xf32>
    %422 = vector.broadcast %420 : vector<4x1xf32> to vector<4x256xf32>
    %423 = vector.broadcast %421 : vector<1x256xf32> to vector<4x256xf32>
    %424 = arith.mulf %422, %423 : vector<4x256xf32>
    %425 = arith.addf %419, %424 : vector<4x256xf32>
    %c0_44 = arith.constant 0 : index
    %c129_45 = arith.constant 129 : index
    %426 = vector.load %arg8[%c0_44, %c129_45] : memref<4x512xf32, #tpu.memory_space<vmem>>, vector<4x256xf32>
    %427 = vector.extract_strided_slice %7 {offsets = [5, 0], sizes = [1, 256], strides = [1, 1]} : vector<9x256xf32> to vector<1x256xf32>
    %428 = vector.broadcast %427 : vector<1x256xf32> to vector<4x256xf32>
    %429 = arith.mulf %426, %428 : vector<4x256xf32>
    %430 = vector.extract_strided_slice %4 {offsets = [0, 56], sizes = [4, 1], strides = [1, 1]} : vector<4x144xf32> to vector<4x1xf32>
    %431 = vector.extract_strided_slice %429 {offsets = [0, 0], sizes = [1, 256], strides = [1, 1]} : vector<4x256xf32> to vector<1x256xf32>
    %432 = vector.broadcast %430 : vector<4x1xf32> to vector<4x256xf32>
    %433 = vector.broadcast %431 : vector<1x256xf32> to vector<4x256xf32>
    %434 = arith.mulf %432, %433 : vector<4x256xf32>
    %435 = arith.addf %425, %434 : vector<4x256xf32>
    %436 = vector.extract_strided_slice %4 {offsets = [0, 57], sizes = [4, 1], strides = [1, 1]} : vector<4x144xf32> to vector<4x1xf32>
    %437 = vector.extract_strided_slice %429 {offsets = [1, 0], sizes = [1, 256], strides = [1, 1]} : vector<4x256xf32> to vector<1x256xf32>
    %438 = vector.broadcast %436 : vector<4x1xf32> to vector<4x256xf32>
    %439 = vector.broadcast %437 : vector<1x256xf32> to vector<4x256xf32>
    %440 = arith.mulf %438, %439 : vector<4x256xf32>
    %441 = arith.addf %435, %440 : vector<4x256xf32>
    %442 = vector.extract_strided_slice %4 {offsets = [0, 58], sizes = [4, 1], strides = [1, 1]} : vector<4x144xf32> to vector<4x1xf32>
    %443 = vector.extract_strided_slice %429 {offsets = [2, 0], sizes = [1, 256], strides = [1, 1]} : vector<4x256xf32> to vector<1x256xf32>
    %444 = vector.broadcast %442 : vector<4x1xf32> to vector<4x256xf32>
    %445 = vector.broadcast %443 : vector<1x256xf32> to vector<4x256xf32>
    %446 = arith.mulf %444, %445 : vector<4x256xf32>
    %447 = arith.addf %441, %446 : vector<4x256xf32>
    %448 = vector.extract_strided_slice %4 {offsets = [0, 59], sizes = [4, 1], strides = [1, 1]} : vector<4x144xf32> to vector<4x1xf32>
    %449 = vector.extract_strided_slice %429 {offsets = [3, 0], sizes = [1, 256], strides = [1, 1]} : vector<4x256xf32> to vector<1x256xf32>
    %450 = vector.broadcast %448 : vector<4x1xf32> to vector<4x256xf32>
    %451 = vector.broadcast %449 : vector<1x256xf32> to vector<4x256xf32>
    %452 = arith.mulf %450, %451 : vector<4x256xf32>
    %453 = arith.addf %447, %452 : vector<4x256xf32>
    %c0_46 = arith.constant 0 : index
    %c143_47 = arith.constant 143 : index
    %454 = vector.load %arg8[%c0_46, %c143_47] : memref<4x512xf32, #tpu.memory_space<vmem>>, vector<4x256xf32>
    %455 = vector.extract_strided_slice %7 {offsets = [6, 0], sizes = [1, 256], strides = [1, 1]} : vector<9x256xf32> to vector<1x256xf32>
    %456 = vector.broadcast %455 : vector<1x256xf32> to vector<4x256xf32>
    %457 = arith.mulf %454, %456 : vector<4x256xf32>
    %458 = vector.extract_strided_slice %4 {offsets = [0, 60], sizes = [4, 1], strides = [1, 1]} : vector<4x144xf32> to vector<4x1xf32>
    %459 = vector.extract_strided_slice %457 {offsets = [0, 0], sizes = [1, 256], strides = [1, 1]} : vector<4x256xf32> to vector<1x256xf32>
    %460 = vector.broadcast %458 : vector<4x1xf32> to vector<4x256xf32>
    %461 = vector.broadcast %459 : vector<1x256xf32> to vector<4x256xf32>
    %462 = arith.mulf %460, %461 : vector<4x256xf32>
    %463 = arith.addf %453, %462 : vector<4x256xf32>
    %464 = vector.extract_strided_slice %4 {offsets = [0, 61], sizes = [4, 1], strides = [1, 1]} : vector<4x144xf32> to vector<4x1xf32>
    %465 = vector.extract_strided_slice %457 {offsets = [1, 0], sizes = [1, 256], strides = [1, 1]} : vector<4x256xf32> to vector<1x256xf32>
    %466 = vector.broadcast %464 : vector<4x1xf32> to vector<4x256xf32>
    %467 = vector.broadcast %465 : vector<1x256xf32> to vector<4x256xf32>
    %468 = arith.mulf %466, %467 : vector<4x256xf32>
    %469 = arith.addf %463, %468 : vector<4x256xf32>
    %470 = vector.extract_strided_slice %4 {offsets = [0, 62], sizes = [4, 1], strides = [1, 1]} : vector<4x144xf32> to vector<4x1xf32>
    %471 = vector.extract_strided_slice %457 {offsets = [2, 0], sizes = [1, 256], strides = [1, 1]} : vector<4x256xf32> to vector<1x256xf32>
    %472 = vector.broadcast %470 : vector<4x1xf32> to vector<4x256xf32>
    %473 = vector.broadcast %471 : vector<1x256xf32> to vector<4x256xf32>
    %474 = arith.mulf %472, %473 : vector<4x256xf32>
    %475 = arith.addf %469, %474 : vector<4x256xf32>
    %476 = vector.extract_strided_slice %4 {offsets = [0, 63], sizes = [4, 1], strides = [1, 1]} : vector<4x144xf32> to vector<4x1xf32>
    %477 = vector.extract_strided_slice %457 {offsets = [3, 0], sizes = [1, 256], strides = [1, 1]} : vector<4x256xf32> to vector<1x256xf32>
    %478 = vector.broadcast %476 : vector<4x1xf32> to vector<4x256xf32>
    %479 = vector.broadcast %477 : vector<1x256xf32> to vector<4x256xf32>
    %480 = arith.mulf %478, %479 : vector<4x256xf32>
    %481 = arith.addf %475, %480 : vector<4x256xf32>
    %c0_48 = arith.constant 0 : index
    %c144_49 = arith.constant 144 : index
    %482 = vector.load %arg8[%c0_48, %c144_49] : memref<4x512xf32, #tpu.memory_space<vmem>>, vector<4x256xf32>
    %483 = vector.extract_strided_slice %7 {offsets = [7, 0], sizes = [1, 256], strides = [1, 1]} : vector<9x256xf32> to vector<1x256xf32>
    %484 = vector.broadcast %483 : vector<1x256xf32> to vector<4x256xf32>
    %485 = arith.mulf %482, %484 : vector<4x256xf32>
    %486 = vector.extract_strided_slice %4 {offsets = [0, 64], sizes = [4, 1], strides = [1, 1]} : vector<4x144xf32> to vector<4x1xf32>
    %487 = vector.extract_strided_slice %485 {offsets = [0, 0], sizes = [1, 256], strides = [1, 1]} : vector<4x256xf32> to vector<1x256xf32>
    %488 = vector.broadcast %486 : vector<4x1xf32> to vector<4x256xf32>
    %489 = vector.broadcast %487 : vector<1x256xf32> to vector<4x256xf32>
    %490 = arith.mulf %488, %489 : vector<4x256xf32>
    %491 = arith.addf %481, %490 : vector<4x256xf32>
    %492 = vector.extract_strided_slice %4 {offsets = [0, 65], sizes = [4, 1], strides = [1, 1]} : vector<4x144xf32> to vector<4x1xf32>
    %493 = vector.extract_strided_slice %485 {offsets = [1, 0], sizes = [1, 256], strides = [1, 1]} : vector<4x256xf32> to vector<1x256xf32>
    %494 = vector.broadcast %492 : vector<4x1xf32> to vector<4x256xf32>
    %495 = vector.broadcast %493 : vector<1x256xf32> to vector<4x256xf32>
    %496 = arith.mulf %494, %495 : vector<4x256xf32>
    %497 = arith.addf %491, %496 : vector<4x256xf32>
    %498 = vector.extract_strided_slice %4 {offsets = [0, 66], sizes = [4, 1], strides = [1, 1]} : vector<4x144xf32> to vector<4x1xf32>
    %499 = vector.extract_strided_slice %485 {offsets = [2, 0], sizes = [1, 256], strides = [1, 1]} : vector<4x256xf32> to vector<1x256xf32>
    %500 = vector.broadcast %498 : vector<4x1xf32> to vector<4x256xf32>
    %501 = vector.broadcast %499 : vector<1x256xf32> to vector<4x256xf32>
    %502 = arith.mulf %500, %501 : vector<4x256xf32>
    %503 = arith.addf %497, %502 : vector<4x256xf32>
    %504 = vector.extract_strided_slice %4 {offsets = [0, 67], sizes = [4, 1], strides = [1, 1]} : vector<4x144xf32> to vector<4x1xf32>
    %505 = vector.extract_strided_slice %485 {offsets = [3, 0], sizes = [1, 256], strides = [1, 1]} : vector<4x256xf32> to vector<1x256xf32>
    %506 = vector.broadcast %504 : vector<4x1xf32> to vector<4x256xf32>
    %507 = vector.broadcast %505 : vector<1x256xf32> to vector<4x256xf32>
    %508 = arith.mulf %506, %507 : vector<4x256xf32>
    %509 = arith.addf %503, %508 : vector<4x256xf32>
    %c0_50 = arith.constant 0 : index
    %c145_51 = arith.constant 145 : index
    %510 = vector.load %arg8[%c0_50, %c145_51] : memref<4x512xf32, #tpu.memory_space<vmem>>, vector<4x256xf32>
    %511 = vector.extract_strided_slice %7 {offsets = [8, 0], sizes = [1, 256], strides = [1, 1]} : vector<9x256xf32> to vector<1x256xf32>
    %512 = vector.broadcast %511 : vector<1x256xf32> to vector<4x256xf32>
    %513 = arith.mulf %510, %512 : vector<4x256xf32>
    %514 = vector.extract_strided_slice %4 {offsets = [0, 68], sizes = [4, 1], strides = [1, 1]} : vector<4x144xf32> to vector<4x1xf32>
    %515 = vector.extract_strided_slice %513 {offsets = [0, 0], sizes = [1, 256], strides = [1, 1]} : vector<4x256xf32> to vector<1x256xf32>
    %516 = vector.broadcast %514 : vector<4x1xf32> to vector<4x256xf32>
    %517 = vector.broadcast %515 : vector<1x256xf32> to vector<4x256xf32>
    %518 = arith.mulf %516, %517 : vector<4x256xf32>
    %519 = arith.addf %509, %518 : vector<4x256xf32>
    %520 = vector.extract_strided_slice %4 {offsets = [0, 69], sizes = [4, 1], strides = [1, 1]} : vector<4x144xf32> to vector<4x1xf32>
    %521 = vector.extract_strided_slice %513 {offsets = [1, 0], sizes = [1, 256], strides = [1, 1]} : vector<4x256xf32> to vector<1x256xf32>
    %522 = vector.broadcast %520 : vector<4x1xf32> to vector<4x256xf32>
    %523 = vector.broadcast %521 : vector<1x256xf32> to vector<4x256xf32>
    %524 = arith.mulf %522, %523 : vector<4x256xf32>
    %525 = arith.addf %519, %524 : vector<4x256xf32>
    %526 = vector.extract_strided_slice %4 {offsets = [0, 70], sizes = [4, 1], strides = [1, 1]} : vector<4x144xf32> to vector<4x1xf32>
    %527 = vector.extract_strided_slice %513 {offsets = [2, 0], sizes = [1, 256], strides = [1, 1]} : vector<4x256xf32> to vector<1x256xf32>
    %528 = vector.broadcast %526 : vector<4x1xf32> to vector<4x256xf32>
    %529 = vector.broadcast %527 : vector<1x256xf32> to vector<4x256xf32>
    %530 = arith.mulf %528, %529 : vector<4x256xf32>
    %531 = arith.addf %525, %530 : vector<4x256xf32>
    %532 = vector.extract_strided_slice %4 {offsets = [0, 71], sizes = [4, 1], strides = [1, 1]} : vector<4x144xf32> to vector<4x1xf32>
    %533 = vector.extract_strided_slice %513 {offsets = [3, 0], sizes = [1, 256], strides = [1, 1]} : vector<4x256xf32> to vector<1x256xf32>
    %534 = vector.broadcast %532 : vector<4x1xf32> to vector<4x256xf32>
    %535 = vector.broadcast %533 : vector<1x256xf32> to vector<4x256xf32>
    %536 = arith.mulf %534, %535 : vector<4x256xf32>
    %537 = arith.addf %531, %536 : vector<4x256xf32>
    %cst_52 = arith.constant dense<0.000000e+00> : vector<4xf32>
    %538 = vector.multi_reduction <add>, %537, %cst_52 [1] : vector<4x256xf32> to vector<4xf32>
    %539 = vector.shape_cast %538 : vector<4xf32> to vector<4x1xf32>
    %cst_53 = arith.constant 2.560000e+02 : f32
    %540 = vector.broadcast %cst_53 : f32 to vector<4x1xf32>
    %541 = arith.divf %539, %540 : vector<4x1xf32>
    %542 = vector.broadcast %541 : vector<4x1xf32> to vector<4x256xf32>
    %543 = arith.subf %537, %542 : vector<4x256xf32>
    %544 = arith.mulf %543, %543 : vector<4x256xf32>
    %cst_54 = arith.constant dense<0.000000e+00> : vector<4xf32>
    %545 = vector.multi_reduction <add>, %544, %cst_54 [1] : vector<4x256xf32> to vector<4xf32>
    %546 = vector.shape_cast %545 : vector<4xf32> to vector<4x1xf32>
    %cst_55 = arith.constant 2.560000e+02 : f32
    %547 = vector.broadcast %cst_55 : f32 to vector<4x1xf32>
    %548 = arith.divf %546, %547 : vector<4x1xf32>
    %cst_56 = arith.constant 9.99999974E-6 : f32
    %549 = vector.broadcast %cst_56 : f32 to vector<4x1xf32>
    %550 = arith.addf %548, %549 : vector<4x1xf32>
    %551 = math.rsqrt %550 : vector<4x1xf32>
    %552 = vector.broadcast %551 : vector<4x1xf32> to vector<4x256xf32>
    %553 = arith.mulf %543, %552 : vector<4x256xf32>
    %554 = vector.extract_strided_slice %5 {offsets = [0, 2], sizes = [4, 1], strides = [1, 1]} : vector<4x8xf32> to vector<4x1xf32>
    %555 = vector.broadcast %554 : vector<4x1xf32> to vector<4x256xf32>
    %556 = arith.mulf %553, %555 : vector<4x256xf32>
    %557 = vector.extract_strided_slice %5 {offsets = [0, 3], sizes = [4, 1], strides = [1, 1]} : vector<4x8xf32> to vector<4x1xf32>
    %558 = vector.broadcast %557 : vector<4x1xf32> to vector<4x256xf32>
    %559 = arith.addf %556, %558 : vector<4x256xf32>
    %c1 = arith.constant 1 : index
    %560 = memref.load %arg6[%c1] : memref<4xf32, #tpu.memory_space<smem>>
    %cst_57 = arith.constant 0.000000e+00 : f32
    %561 = vector.broadcast %cst_57 : f32 to vector<4x256xf32>
    %562 = arith.cmpf oge, %559, %561 : vector<4x256xf32>
    %563 = vector.broadcast %560 : f32 to vector<4x256xf32>
    %564 = arith.mulf %563, %559 : vector<4x256xf32>
    %565 = arith.select %562, %559, %564 : vector<4x256xi1>, vector<4x256xf32>
    %c0_58 = arith.constant 0 : index
    %c128_59 = arith.constant 128 : index
    %566 = vector.load %arg8[%c0_58, %c128_59] : memref<4x512xf32, #tpu.memory_space<vmem>>, vector<4x256xf32>
    tpu.vector_store %arg8[%c0_58, %c128_59], %565 {strides = array<i32>} : memref<4x512xf32, #tpu.memory_space<vmem>>, vector<4x256xf32>,
    %cst_60 = arith.constant 0.000000e+00 : f32
    %567 = vector.broadcast %cst_60 : f32 to vector<4x256xf32>
    %c0_61 = arith.constant 0 : index
    %c111_62 = arith.constant 111 : index
    %568 = vector.load %arg8[%c0_61, %c111_62] : memref<4x512xf32, #tpu.memory_space<vmem>>, vector<4x256xf32>
    %569 = vector.extract_strided_slice %7 {offsets = [0, 0], sizes = [1, 256], strides = [1, 1]} : vector<9x256xf32> to vector<1x256xf32>
    %570 = vector.broadcast %569 : vector<1x256xf32> to vector<4x256xf32>
    %571 = arith.mulf %568, %570 : vector<4x256xf32>
    %572 = vector.extract_strided_slice %4 {offsets = [0, 72], sizes = [4, 1], strides = [1, 1]} : vector<4x144xf32> to vector<4x1xf32>
    %573 = vector.extract_strided_slice %571 {offsets = [0, 0], sizes = [1, 256], strides = [1, 1]} : vector<4x256xf32> to vector<1x256xf32>
    %574 = vector.broadcast %572 : vector<4x1xf32> to vector<4x256xf32>
    %575 = vector.broadcast %573 : vector<1x256xf32> to vector<4x256xf32>
    %576 = arith.mulf %574, %575 : vector<4x256xf32>
    %577 = arith.addf %567, %576 : vector<4x256xf32>
    %578 = vector.extract_strided_slice %4 {offsets = [0, 73], sizes = [4, 1], strides = [1, 1]} : vector<4x144xf32> to vector<4x1xf32>
    %579 = vector.extract_strided_slice %571 {offsets = [1, 0], sizes = [1, 256], strides = [1, 1]} : vector<4x256xf32> to vector<1x256xf32>
    %580 = vector.broadcast %578 : vector<4x1xf32> to vector<4x256xf32>
    %581 = vector.broadcast %579 : vector<1x256xf32> to vector<4x256xf32>
    %582 = arith.mulf %580, %581 : vector<4x256xf32>
    %583 = arith.addf %577, %582 : vector<4x256xf32>
    %584 = vector.extract_strided_slice %4 {offsets = [0, 74], sizes = [4, 1], strides = [1, 1]} : vector<4x144xf32> to vector<4x1xf32>
    %585 = vector.extract_strided_slice %571 {offsets = [2, 0], sizes = [1, 256], strides = [1, 1]} : vector<4x256xf32> to vector<1x256xf32>
    %586 = vector.broadcast %584 : vector<4x1xf32> to vector<4x256xf32>
    %587 = vector.broadcast %585 : vector<1x256xf32> to vector<4x256xf32>
    %588 = arith.mulf %586, %587 : vector<4x256xf32>
    %589 = arith.addf %583, %588 : vector<4x256xf32>
    %590 = vector.extract_strided_slice %4 {offsets = [0, 75], sizes = [4, 1], strides = [1, 1]} : vector<4x144xf32> to vector<4x1xf32>
    %591 = vector.extract_strided_slice %571 {offsets = [3, 0], sizes = [1, 256], strides = [1, 1]} : vector<4x256xf32> to vector<1x256xf32>
    %592 = vector.broadcast %590 : vector<4x1xf32> to vector<4x256xf32>
    %593 = vector.broadcast %591 : vector<1x256xf32> to vector<4x256xf32>
    %594 = arith.mulf %592, %593 : vector<4x256xf32>
    %595 = arith.addf %589, %594 : vector<4x256xf32>
    %c0_63 = arith.constant 0 : index
    %c112_64 = arith.constant 112 : index
    %596 = vector.load %arg8[%c0_63, %c112_64] : memref<4x512xf32, #tpu.memory_space<vmem>>, vector<4x256xf32>
    %597 = vector.extract_strided_slice %7 {offsets = [1, 0], sizes = [1, 256], strides = [1, 1]} : vector<9x256xf32> to vector<1x256xf32>
    %598 = vector.broadcast %597 : vector<1x256xf32> to vector<4x256xf32>
    %599 = arith.mulf %596, %598 : vector<4x256xf32>
    %600 = vector.extract_strided_slice %4 {offsets = [0, 76], sizes = [4, 1], strides = [1, 1]} : vector<4x144xf32> to vector<4x1xf32>
    %601 = vector.extract_strided_slice %599 {offsets = [0, 0], sizes = [1, 256], strides = [1, 1]} : vector<4x256xf32> to vector<1x256xf32>
    %602 = vector.broadcast %600 : vector<4x1xf32> to vector<4x256xf32>
    %603 = vector.broadcast %601 : vector<1x256xf32> to vector<4x256xf32>
    %604 = arith.mulf %602, %603 : vector<4x256xf32>
    %605 = arith.addf %595, %604 : vector<4x256xf32>
    %606 = vector.extract_strided_slice %4 {offsets = [0, 77], sizes = [4, 1], strides = [1, 1]} : vector<4x144xf32> to vector<4x1xf32>
    %607 = vector.extract_strided_slice %599 {offsets = [1, 0], sizes = [1, 256], strides = [1, 1]} : vector<4x256xf32> to vector<1x256xf32>
    %608 = vector.broadcast %606 : vector<4x1xf32> to vector<4x256xf32>
    %609 = vector.broadcast %607 : vector<1x256xf32> to vector<4x256xf32>
    %610 = arith.mulf %608, %609 : vector<4x256xf32>
    %611 = arith.addf %605, %610 : vector<4x256xf32>
    %612 = vector.extract_strided_slice %4 {offsets = [0, 78], sizes = [4, 1], strides = [1, 1]} : vector<4x144xf32> to vector<4x1xf32>
    %613 = vector.extract_strided_slice %599 {offsets = [2, 0], sizes = [1, 256], strides = [1, 1]} : vector<4x256xf32> to vector<1x256xf32>
    %614 = vector.broadcast %612 : vector<4x1xf32> to vector<4x256xf32>
    %615 = vector.broadcast %613 : vector<1x256xf32> to vector<4x256xf32>
    %616 = arith.mulf %614, %615 : vector<4x256xf32>
    %617 = arith.addf %611, %616 : vector<4x256xf32>
    %618 = vector.extract_strided_slice %4 {offsets = [0, 79], sizes = [4, 1], strides = [1, 1]} : vector<4x144xf32> to vector<4x1xf32>
    %619 = vector.extract_strided_slice %599 {offsets = [3, 0], sizes = [1, 256], strides = [1, 1]} : vector<4x256xf32> to vector<1x256xf32>
    %620 = vector.broadcast %618 : vector<4x1xf32> to vector<4x256xf32>
    %621 = vector.broadcast %619 : vector<1x256xf32> to vector<4x256xf32>
    %622 = arith.mulf %620, %621 : vector<4x256xf32>
    %623 = arith.addf %617, %622 : vector<4x256xf32>
    %c0_65 = arith.constant 0 : index
    %c113_66 = arith.constant 113 : index
    %624 = vector.load %arg8[%c0_65, %c113_66] : memref<4x512xf32, #tpu.memory_space<vmem>>, vector<4x256xf32>
    %625 = vector.extract_strided_slice %7 {offsets = [2, 0], sizes = [1, 256], strides = [1, 1]} : vector<9x256xf32> to vector<1x256xf32>
    %626 = vector.broadcast %625 : vector<1x256xf32> to vector<4x256xf32>
    %627 = arith.mulf %624, %626 : vector<4x256xf32>
    %628 = vector.extract_strided_slice %4 {offsets = [0, 80], sizes = [4, 1], strides = [1, 1]} : vector<4x144xf32> to vector<4x1xf32>
    %629 = vector.extract_strided_slice %627 {offsets = [0, 0], sizes = [1, 256], strides = [1, 1]} : vector<4x256xf32> to vector<1x256xf32>
    %630 = vector.broadcast %628 : vector<4x1xf32> to vector<4x256xf32>
    %631 = vector.broadcast %629 : vector<1x256xf32> to vector<4x256xf32>
    %632 = arith.mulf %630, %631 : vector<4x256xf32>
    %633 = arith.addf %623, %632 : vector<4x256xf32>
    %634 = vector.extract_strided_slice %4 {offsets = [0, 81], sizes = [4, 1], strides = [1, 1]} : vector<4x144xf32> to vector<4x1xf32>
    %635 = vector.extract_strided_slice %627 {offsets = [1, 0], sizes = [1, 256], strides = [1, 1]} : vector<4x256xf32> to vector<1x256xf32>
    %636 = vector.broadcast %634 : vector<4x1xf32> to vector<4x256xf32>
    %637 = vector.broadcast %635 : vector<1x256xf32> to vector<4x256xf32>
    %638 = arith.mulf %636, %637 : vector<4x256xf32>
    %639 = arith.addf %633, %638 : vector<4x256xf32>
    %640 = vector.extract_strided_slice %4 {offsets = [0, 82], sizes = [4, 1], strides = [1, 1]} : vector<4x144xf32> to vector<4x1xf32>
    %641 = vector.extract_strided_slice %627 {offsets = [2, 0], sizes = [1, 256], strides = [1, 1]} : vector<4x256xf32> to vector<1x256xf32>
    %642 = vector.broadcast %640 : vector<4x1xf32> to vector<4x256xf32>
    %643 = vector.broadcast %641 : vector<1x256xf32> to vector<4x256xf32>
    %644 = arith.mulf %642, %643 : vector<4x256xf32>
    %645 = arith.addf %639, %644 : vector<4x256xf32>
    %646 = vector.extract_strided_slice %4 {offsets = [0, 83], sizes = [4, 1], strides = [1, 1]} : vector<4x144xf32> to vector<4x1xf32>
    %647 = vector.extract_strided_slice %627 {offsets = [3, 0], sizes = [1, 256], strides = [1, 1]} : vector<4x256xf32> to vector<1x256xf32>
    %648 = vector.broadcast %646 : vector<4x1xf32> to vector<4x256xf32>
    %649 = vector.broadcast %647 : vector<1x256xf32> to vector<4x256xf32>
    %650 = arith.mulf %648, %649 : vector<4x256xf32>
    %651 = arith.addf %645, %650 : vector<4x256xf32>
    %c0_67 = arith.constant 0 : index
    %c127_68 = arith.constant 127 : index
    %652 = vector.load %arg8[%c0_67, %c127_68] : memref<4x512xf32, #tpu.memory_space<vmem>>, vector<4x256xf32>
    %653 = vector.extract_strided_slice %7 {offsets = [3, 0], sizes = [1, 256], strides = [1, 1]} : vector<9x256xf32> to vector<1x256xf32>
    %654 = vector.broadcast %653 : vector<1x256xf32> to vector<4x256xf32>
    %655 = arith.mulf %652, %654 : vector<4x256xf32>
    %656 = vector.extract_strided_slice %4 {offsets = [0, 84], sizes = [4, 1], strides = [1, 1]} : vector<4x144xf32> to vector<4x1xf32>
    %657 = vector.extract_strided_slice %655 {offsets = [0, 0], sizes = [1, 256], strides = [1, 1]} : vector<4x256xf32> to vector<1x256xf32>
    %658 = vector.broadcast %656 : vector<4x1xf32> to vector<4x256xf32>
    %659 = vector.broadcast %657 : vector<1x256xf32> to vector<4x256xf32>
    %660 = arith.mulf %658, %659 : vector<4x256xf32>
    %661 = arith.addf %651, %660 : vector<4x256xf32>
    %662 = vector.extract_strided_slice %4 {offsets = [0, 85], sizes = [4, 1], strides = [1, 1]} : vector<4x144xf32> to vector<4x1xf32>
    %663 = vector.extract_strided_slice %655 {offsets = [1, 0], sizes = [1, 256], strides = [1, 1]} : vector<4x256xf32> to vector<1x256xf32>
    %664 = vector.broadcast %662 : vector<4x1xf32> to vector<4x256xf32>
    %665 = vector.broadcast %663 : vector<1x256xf32> to vector<4x256xf32>
    %666 = arith.mulf %664, %665 : vector<4x256xf32>
    %667 = arith.addf %661, %666 : vector<4x256xf32>
    %668 = vector.extract_strided_slice %4 {offsets = [0, 86], sizes = [4, 1], strides = [1, 1]} : vector<4x144xf32> to vector<4x1xf32>
    %669 = vector.extract_strided_slice %655 {offsets = [2, 0], sizes = [1, 256], strides = [1, 1]} : vector<4x256xf32> to vector<1x256xf32>
    %670 = vector.broadcast %668 : vector<4x1xf32> to vector<4x256xf32>
    %671 = vector.broadcast %669 : vector<1x256xf32> to vector<4x256xf32>
    %672 = arith.mulf %670, %671 : vector<4x256xf32>
    %673 = arith.addf %667, %672 : vector<4x256xf32>
    %674 = vector.extract_strided_slice %4 {offsets = [0, 87], sizes = [4, 1], strides = [1, 1]} : vector<4x144xf32> to vector<4x1xf32>
    %675 = vector.extract_strided_slice %655 {offsets = [3, 0], sizes = [1, 256], strides = [1, 1]} : vector<4x256xf32> to vector<1x256xf32>
    %676 = vector.broadcast %674 : vector<4x1xf32> to vector<4x256xf32>
    %677 = vector.broadcast %675 : vector<1x256xf32> to vector<4x256xf32>
    %678 = arith.mulf %676, %677 : vector<4x256xf32>
    %679 = arith.addf %673, %678 : vector<4x256xf32>
    %c0_69 = arith.constant 0 : index
    %c128_70 = arith.constant 128 : index
    %680 = vector.load %arg8[%c0_69, %c128_70] : memref<4x512xf32, #tpu.memory_space<vmem>>, vector<4x256xf32>
    %681 = vector.extract_strided_slice %4 {offsets = [0, 88], sizes = [4, 1], strides = [1, 1]} : vector<4x144xf32> to vector<4x1xf32>
    %682 = vector.extract_strided_slice %680 {offsets = [0, 0], sizes = [1, 256], strides = [1, 1]} : vector<4x256xf32> to vector<1x256xf32>
    %683 = vector.broadcast %681 : vector<4x1xf32> to vector<4x256xf32>
    %684 = vector.broadcast %682 : vector<1x256xf32> to vector<4x256xf32>
    %685 = arith.mulf %683, %684 : vector<4x256xf32>
    %686 = arith.addf %679, %685 : vector<4x256xf32>
    %687 = vector.extract_strided_slice %4 {offsets = [0, 89], sizes = [4, 1], strides = [1, 1]} : vector<4x144xf32> to vector<4x1xf32>
    %688 = vector.extract_strided_slice %680 {offsets = [1, 0], sizes = [1, 256], strides = [1, 1]} : vector<4x256xf32> to vector<1x256xf32>
    %689 = vector.broadcast %687 : vector<4x1xf32> to vector<4x256xf32>
    %690 = vector.broadcast %688 : vector<1x256xf32> to vector<4x256xf32>
    %691 = arith.mulf %689, %690 : vector<4x256xf32>
    %692 = arith.addf %686, %691 : vector<4x256xf32>
    %693 = vector.extract_strided_slice %4 {offsets = [0, 90], sizes = [4, 1], strides = [1, 1]} : vector<4x144xf32> to vector<4x1xf32>
    %694 = vector.extract_strided_slice %680 {offsets = [2, 0], sizes = [1, 256], strides = [1, 1]} : vector<4x256xf32> to vector<1x256xf32>
    %695 = vector.broadcast %693 : vector<4x1xf32> to vector<4x256xf32>
    %696 = vector.broadcast %694 : vector<1x256xf32> to vector<4x256xf32>
    %697 = arith.mulf %695, %696 : vector<4x256xf32>
    %698 = arith.addf %692, %697 : vector<4x256xf32>
    %699 = vector.extract_strided_slice %4 {offsets = [0, 91], sizes = [4, 1], strides = [1, 1]} : vector<4x144xf32> to vector<4x1xf32>
    %700 = vector.extract_strided_slice %680 {offsets = [3, 0], sizes = [1, 256], strides = [1, 1]} : vector<4x256xf32> to vector<1x256xf32>
    %701 = vector.broadcast %699 : vector<4x1xf32> to vector<4x256xf32>
    %702 = vector.broadcast %700 : vector<1x256xf32> to vector<4x256xf32>
    %703 = arith.mulf %701, %702 : vector<4x256xf32>
    %704 = arith.addf %698, %703 : vector<4x256xf32>
    %c0_71 = arith.constant 0 : index
    %c129_72 = arith.constant 129 : index
    %705 = vector.load %arg8[%c0_71, %c129_72] : memref<4x512xf32, #tpu.memory_space<vmem>>, vector<4x256xf32>
    %706 = vector.extract_strided_slice %7 {offsets = [5, 0], sizes = [1, 256], strides = [1, 1]} : vector<9x256xf32> to vector<1x256xf32>
    %707 = vector.broadcast %706 : vector<1x256xf32> to vector<4x256xf32>
    %708 = arith.mulf %705, %707 : vector<4x256xf32>
    %709 = vector.extract_strided_slice %4 {offsets = [0, 92], sizes = [4, 1], strides = [1, 1]} : vector<4x144xf32> to vector<4x1xf32>
    %710 = vector.extract_strided_slice %708 {offsets = [0, 0], sizes = [1, 256], strides = [1, 1]} : vector<4x256xf32> to vector<1x256xf32>
    %711 = vector.broadcast %709 : vector<4x1xf32> to vector<4x256xf32>
    %712 = vector.broadcast %710 : vector<1x256xf32> to vector<4x256xf32>
    %713 = arith.mulf %711, %712 : vector<4x256xf32>
    %714 = arith.addf %704, %713 : vector<4x256xf32>
    %715 = vector.extract_strided_slice %4 {offsets = [0, 93], sizes = [4, 1], strides = [1, 1]} : vector<4x144xf32> to vector<4x1xf32>
    %716 = vector.extract_strided_slice %708 {offsets = [1, 0], sizes = [1, 256], strides = [1, 1]} : vector<4x256xf32> to vector<1x256xf32>
    %717 = vector.broadcast %715 : vector<4x1xf32> to vector<4x256xf32>
    %718 = vector.broadcast %716 : vector<1x256xf32> to vector<4x256xf32>
    %719 = arith.mulf %717, %718 : vector<4x256xf32>
    %720 = arith.addf %714, %719 : vector<4x256xf32>
    %721 = vector.extract_strided_slice %4 {offsets = [0, 94], sizes = [4, 1], strides = [1, 1]} : vector<4x144xf32> to vector<4x1xf32>
    %722 = vector.extract_strided_slice %708 {offsets = [2, 0], sizes = [1, 256], strides = [1, 1]} : vector<4x256xf32> to vector<1x256xf32>
    %723 = vector.broadcast %721 : vector<4x1xf32> to vector<4x256xf32>
    %724 = vector.broadcast %722 : vector<1x256xf32> to vector<4x256xf32>
    %725 = arith.mulf %723, %724 : vector<4x256xf32>
    %726 = arith.addf %720, %725 : vector<4x256xf32>
    %727 = vector.extract_strided_slice %4 {offsets = [0, 95], sizes = [4, 1], strides = [1, 1]} : vector<4x144xf32> to vector<4x1xf32>
    %728 = vector.extract_strided_slice %708 {offsets = [3, 0], sizes = [1, 256], strides = [1, 1]} : vector<4x256xf32> to vector<1x256xf32>
    %729 = vector.broadcast %727 : vector<4x1xf32> to vector<4x256xf32>
    %730 = vector.broadcast %728 : vector<1x256xf32> to vector<4x256xf32>
    %731 = arith.mulf %729, %730 : vector<4x256xf32>
    %732 = arith.addf %726, %731 : vector<4x256xf32>
    %c0_73 = arith.constant 0 : index
    %c143_74 = arith.constant 143 : index
    %733 = vector.load %arg8[%c0_73, %c143_74] : memref<4x512xf32, #tpu.memory_space<vmem>>, vector<4x256xf32>
    %734 = vector.extract_strided_slice %7 {offsets = [6, 0], sizes = [1, 256], strides = [1, 1]} : vector<9x256xf32> to vector<1x256xf32>
    %735 = vector.broadcast %734 : vector<1x256xf32> to vector<4x256xf32>
    %736 = arith.mulf %733, %735 : vector<4x256xf32>
    %737 = vector.extract_strided_slice %4 {offsets = [0, 96], sizes = [4, 1], strides = [1, 1]} : vector<4x144xf32> to vector<4x1xf32>
    %738 = vector.extract_strided_slice %736 {offsets = [0, 0], sizes = [1, 256], strides = [1, 1]} : vector<4x256xf32> to vector<1x256xf32>
    %739 = vector.broadcast %737 : vector<4x1xf32> to vector<4x256xf32>
    %740 = vector.broadcast %738 : vector<1x256xf32> to vector<4x256xf32>
    %741 = arith.mulf %739, %740 : vector<4x256xf32>
    %742 = arith.addf %732, %741 : vector<4x256xf32>
    %743 = vector.extract_strided_slice %4 {offsets = [0, 97], sizes = [4, 1], strides = [1, 1]} : vector<4x144xf32> to vector<4x1xf32>
    %744 = vector.extract_strided_slice %736 {offsets = [1, 0], sizes = [1, 256], strides = [1, 1]} : vector<4x256xf32> to vector<1x256xf32>
    %745 = vector.broadcast %743 : vector<4x1xf32> to vector<4x256xf32>
    %746 = vector.broadcast %744 : vector<1x256xf32> to vector<4x256xf32>
    %747 = arith.mulf %745, %746 : vector<4x256xf32>
    %748 = arith.addf %742, %747 : vector<4x256xf32>
    %749 = vector.extract_strided_slice %4 {offsets = [0, 98], sizes = [4, 1], strides = [1, 1]} : vector<4x144xf32> to vector<4x1xf32>
    %750 = vector.extract_strided_slice %736 {offsets = [2, 0], sizes = [1, 256], strides = [1, 1]} : vector<4x256xf32> to vector<1x256xf32>
    %751 = vector.broadcast %749 : vector<4x1xf32> to vector<4x256xf32>
    %752 = vector.broadcast %750 : vector<1x256xf32> to vector<4x256xf32>
    %753 = arith.mulf %751, %752 : vector<4x256xf32>
    %754 = arith.addf %748, %753 : vector<4x256xf32>
    %755 = vector.extract_strided_slice %4 {offsets = [0, 99], sizes = [4, 1], strides = [1, 1]} : vector<4x144xf32> to vector<4x1xf32>
    %756 = vector.extract_strided_slice %736 {offsets = [3, 0], sizes = [1, 256], strides = [1, 1]} : vector<4x256xf32> to vector<1x256xf32>
    %757 = vector.broadcast %755 : vector<4x1xf32> to vector<4x256xf32>
    %758 = vector.broadcast %756 : vector<1x256xf32> to vector<4x256xf32>
    %759 = arith.mulf %757, %758 : vector<4x256xf32>
    %760 = arith.addf %754, %759 : vector<4x256xf32>
    %c0_75 = arith.constant 0 : index
    %c144_76 = arith.constant 144 : index
    %761 = vector.load %arg8[%c0_75, %c144_76] : memref<4x512xf32, #tpu.memory_space<vmem>>, vector<4x256xf32>
    %762 = vector.extract_strided_slice %7 {offsets = [7, 0], sizes = [1, 256], strides = [1, 1]} : vector<9x256xf32> to vector<1x256xf32>
    %763 = vector.broadcast %762 : vector<1x256xf32> to vector<4x256xf32>
    %764 = arith.mulf %761, %763 : vector<4x256xf32>
    %765 = vector.extract_strided_slice %4 {offsets = [0, 100], sizes = [4, 1], strides = [1, 1]} : vector<4x144xf32> to vector<4x1xf32>
    %766 = vector.extract_strided_slice %764 {offsets = [0, 0], sizes = [1, 256], strides = [1, 1]} : vector<4x256xf32> to vector<1x256xf32>
    %767 = vector.broadcast %765 : vector<4x1xf32> to vector<4x256xf32>
    %768 = vector.broadcast %766 : vector<1x256xf32> to vector<4x256xf32>
    %769 = arith.mulf %767, %768 : vector<4x256xf32>
    %770 = arith.addf %760, %769 : vector<4x256xf32>
    %771 = vector.extract_strided_slice %4 {offsets = [0, 101], sizes = [4, 1], strides = [1, 1]} : vector<4x144xf32> to vector<4x1xf32>
    %772 = vector.extract_strided_slice %764 {offsets = [1, 0], sizes = [1, 256], strides = [1, 1]} : vector<4x256xf32> to vector<1x256xf32>
    %773 = vector.broadcast %771 : vector<4x1xf32> to vector<4x256xf32>
    %774 = vector.broadcast %772 : vector<1x256xf32> to vector<4x256xf32>
    %775 = arith.mulf %773, %774 : vector<4x256xf32>
    %776 = arith.addf %770, %775 : vector<4x256xf32>
    %777 = vector.extract_strided_slice %4 {offsets = [0, 102], sizes = [4, 1], strides = [1, 1]} : vector<4x144xf32> to vector<4x1xf32>
    %778 = vector.extract_strided_slice %764 {offsets = [2, 0], sizes = [1, 256], strides = [1, 1]} : vector<4x256xf32> to vector<1x256xf32>
    %779 = vector.broadcast %777 : vector<4x1xf32> to vector<4x256xf32>
    %780 = vector.broadcast %778 : vector<1x256xf32> to vector<4x256xf32>
    %781 = arith.mulf %779, %780 : vector<4x256xf32>
    %782 = arith.addf %776, %781 : vector<4x256xf32>
    %783 = vector.extract_strided_slice %4 {offsets = [0, 103], sizes = [4, 1], strides = [1, 1]} : vector<4x144xf32> to vector<4x1xf32>
    %784 = vector.extract_strided_slice %764 {offsets = [3, 0], sizes = [1, 256], strides = [1, 1]} : vector<4x256xf32> to vector<1x256xf32>
    %785 = vector.broadcast %783 : vector<4x1xf32> to vector<4x256xf32>
    %786 = vector.broadcast %784 : vector<1x256xf32> to vector<4x256xf32>
    %787 = arith.mulf %785, %786 : vector<4x256xf32>
    %788 = arith.addf %782, %787 : vector<4x256xf32>
    %c0_77 = arith.constant 0 : index
    %c145_78 = arith.constant 145 : index
    %789 = vector.load %arg8[%c0_77, %c145_78] : memref<4x512xf32, #tpu.memory_space<vmem>>, vector<4x256xf32>
    %790 = vector.extract_strided_slice %7 {offsets = [8, 0], sizes = [1, 256], strides = [1, 1]} : vector<9x256xf32> to vector<1x256xf32>
    %791 = vector.broadcast %790 : vector<1x256xf32> to vector<4x256xf32>
    %792 = arith.mulf %789, %791 : vector<4x256xf32>
    %793 = vector.extract_strided_slice %4 {offsets = [0, 104], sizes = [4, 1], strides = [1, 1]} : vector<4x144xf32> to vector<4x1xf32>
    %794 = vector.extract_strided_slice %792 {offsets = [0, 0], sizes = [1, 256], strides = [1, 1]} : vector<4x256xf32> to vector<1x256xf32>
    %795 = vector.broadcast %793 : vector<4x1xf32> to vector<4x256xf32>
    %796 = vector.broadcast %794 : vector<1x256xf32> to vector<4x256xf32>
    %797 = arith.mulf %795, %796 : vector<4x256xf32>
    %798 = arith.addf %788, %797 : vector<4x256xf32>
    %799 = vector.extract_strided_slice %4 {offsets = [0, 105], sizes = [4, 1], strides = [1, 1]} : vector<4x144xf32> to vector<4x1xf32>
    %800 = vector.extract_strided_slice %792 {offsets = [1, 0], sizes = [1, 256], strides = [1, 1]} : vector<4x256xf32> to vector<1x256xf32>
    %801 = vector.broadcast %799 : vector<4x1xf32> to vector<4x256xf32>
    %802 = vector.broadcast %800 : vector<1x256xf32> to vector<4x256xf32>
    %803 = arith.mulf %801, %802 : vector<4x256xf32>
    %804 = arith.addf %798, %803 : vector<4x256xf32>
    %805 = vector.extract_strided_slice %4 {offsets = [0, 106], sizes = [4, 1], strides = [1, 1]} : vector<4x144xf32> to vector<4x1xf32>
    %806 = vector.extract_strided_slice %792 {offsets = [2, 0], sizes = [1, 256], strides = [1, 1]} : vector<4x256xf32> to vector<1x256xf32>
    %807 = vector.broadcast %805 : vector<4x1xf32> to vector<4x256xf32>
    %808 = vector.broadcast %806 : vector<1x256xf32> to vector<4x256xf32>
    %809 = arith.mulf %807, %808 : vector<4x256xf32>
    %810 = arith.addf %804, %809 : vector<4x256xf32>
    %811 = vector.extract_strided_slice %4 {offsets = [0, 107], sizes = [4, 1], strides = [1, 1]} : vector<4x144xf32> to vector<4x1xf32>
    %812 = vector.extract_strided_slice %792 {offsets = [3, 0], sizes = [1, 256], strides = [1, 1]} : vector<4x256xf32> to vector<1x256xf32>
    %813 = vector.broadcast %811 : vector<4x1xf32> to vector<4x256xf32>
    %814 = vector.broadcast %812 : vector<1x256xf32> to vector<4x256xf32>
    %815 = arith.mulf %813, %814 : vector<4x256xf32>
    %816 = arith.addf %810, %815 : vector<4x256xf32>
    %cst_79 = arith.constant dense<0.000000e+00> : vector<4xf32>
    %817 = vector.multi_reduction <add>, %816, %cst_79 [1] : vector<4x256xf32> to vector<4xf32>
    %818 = vector.shape_cast %817 : vector<4xf32> to vector<4x1xf32>
    %cst_80 = arith.constant 2.560000e+02 : f32
    %819 = vector.broadcast %cst_80 : f32 to vector<4x1xf32>
    %820 = arith.divf %818, %819 : vector<4x1xf32>
    %821 = vector.broadcast %820 : vector<4x1xf32> to vector<4x256xf32>
    %822 = arith.subf %816, %821 : vector<4x256xf32>
    %823 = arith.mulf %822, %822 : vector<4x256xf32>
    %cst_81 = arith.constant dense<0.000000e+00> : vector<4xf32>
    %824 = vector.multi_reduction <add>, %823, %cst_81 [1] : vector<4x256xf32> to vector<4xf32>
    %825 = vector.shape_cast %824 : vector<4xf32> to vector<4x1xf32>
    %cst_82 = arith.constant 2.560000e+02 : f32
    %826 = vector.broadcast %cst_82 : f32 to vector<4x1xf32>
    %827 = arith.divf %825, %826 : vector<4x1xf32>
    %cst_83 = arith.constant 9.99999974E-6 : f32
    %828 = vector.broadcast %cst_83 : f32 to vector<4x1xf32>
    %829 = arith.addf %827, %828 : vector<4x1xf32>
    %830 = math.rsqrt %829 : vector<4x1xf32>
    %831 = vector.broadcast %830 : vector<4x1xf32> to vector<4x256xf32>
    %832 = arith.mulf %822, %831 : vector<4x256xf32>
    %833 = vector.extract_strided_slice %5 {offsets = [0, 4], sizes = [4, 1], strides = [1, 1]} : vector<4x8xf32> to vector<4x1xf32>
    %834 = vector.broadcast %833 : vector<4x1xf32> to vector<4x256xf32>
    %835 = arith.mulf %832, %834 : vector<4x256xf32>
    %836 = vector.extract_strided_slice %5 {offsets = [0, 5], sizes = [4, 1], strides = [1, 1]} : vector<4x8xf32> to vector<4x1xf32>
    %837 = vector.broadcast %836 : vector<4x1xf32> to vector<4x256xf32>
    %838 = arith.addf %835, %837 : vector<4x256xf32>
    %c2 = arith.constant 2 : index
    %839 = memref.load %arg6[%c2] : memref<4xf32, #tpu.memory_space<smem>>
    %cst_84 = arith.constant 0.000000e+00 : f32
    %840 = vector.broadcast %cst_84 : f32 to vector<4x256xf32>
    %841 = arith.cmpf oge, %838, %840 : vector<4x256xf32>
    %842 = vector.broadcast %839 : f32 to vector<4x256xf32>
    %843 = arith.mulf %842, %838 : vector<4x256xf32>
    %844 = arith.select %841, %838, %843 : vector<4x256xi1>, vector<4x256xf32>
    %c0_85 = arith.constant 0 : index
    %c128_86 = arith.constant 128 : index
    %845 = vector.load %arg8[%c0_85, %c128_86] : memref<4x512xf32, #tpu.memory_space<vmem>>, vector<4x256xf32>
    tpu.vector_store %arg8[%c0_85, %c128_86], %844 {strides = array<i32>} : memref<4x512xf32, #tpu.memory_space<vmem>>, vector<4x256xf32>,
    %cst_87 = arith.constant 0.000000e+00 : f32
    %846 = vector.broadcast %cst_87 : f32 to vector<4x256xf32>
    %c0_88 = arith.constant 0 : index
    %c111_89 = arith.constant 111 : index
    %847 = vector.load %arg8[%c0_88, %c111_89] : memref<4x512xf32, #tpu.memory_space<vmem>>, vector<4x256xf32>
    %848 = vector.extract_strided_slice %7 {offsets = [0, 0], sizes = [1, 256], strides = [1, 1]} : vector<9x256xf32> to vector<1x256xf32>
    %849 = vector.broadcast %848 : vector<1x256xf32> to vector<4x256xf32>
    %850 = arith.mulf %847, %849 : vector<4x256xf32>
    %851 = vector.extract_strided_slice %4 {offsets = [0, 108], sizes = [4, 1], strides = [1, 1]} : vector<4x144xf32> to vector<4x1xf32>
    %852 = vector.extract_strided_slice %850 {offsets = [0, 0], sizes = [1, 256], strides = [1, 1]} : vector<4x256xf32> to vector<1x256xf32>
    %853 = vector.broadcast %851 : vector<4x1xf32> to vector<4x256xf32>
    %854 = vector.broadcast %852 : vector<1x256xf32> to vector<4x256xf32>
    %855 = arith.mulf %853, %854 : vector<4x256xf32>
    %856 = arith.addf %846, %855 : vector<4x256xf32>
    %857 = vector.extract_strided_slice %4 {offsets = [0, 109], sizes = [4, 1], strides = [1, 1]} : vector<4x144xf32> to vector<4x1xf32>
    %858 = vector.extract_strided_slice %850 {offsets = [1, 0], sizes = [1, 256], strides = [1, 1]} : vector<4x256xf32> to vector<1x256xf32>
    %859 = vector.broadcast %857 : vector<4x1xf32> to vector<4x256xf32>
    %860 = vector.broadcast %858 : vector<1x256xf32> to vector<4x256xf32>
    %861 = arith.mulf %859, %860 : vector<4x256xf32>
    %862 = arith.addf %856, %861 : vector<4x256xf32>
    %863 = vector.extract_strided_slice %4 {offsets = [0, 110], sizes = [4, 1], strides = [1, 1]} : vector<4x144xf32> to vector<4x1xf32>
    %864 = vector.extract_strided_slice %850 {offsets = [2, 0], sizes = [1, 256], strides = [1, 1]} : vector<4x256xf32> to vector<1x256xf32>
    %865 = vector.broadcast %863 : vector<4x1xf32> to vector<4x256xf32>
    %866 = vector.broadcast %864 : vector<1x256xf32> to vector<4x256xf32>
    %867 = arith.mulf %865, %866 : vector<4x256xf32>
    %868 = arith.addf %862, %867 : vector<4x256xf32>
    %869 = vector.extract_strided_slice %4 {offsets = [0, 111], sizes = [4, 1], strides = [1, 1]} : vector<4x144xf32> to vector<4x1xf32>
    %870 = vector.extract_strided_slice %850 {offsets = [3, 0], sizes = [1, 256], strides = [1, 1]} : vector<4x256xf32> to vector<1x256xf32>
    %871 = vector.broadcast %869 : vector<4x1xf32> to vector<4x256xf32>
    %872 = vector.broadcast %870 : vector<1x256xf32> to vector<4x256xf32>
    %873 = arith.mulf %871, %872 : vector<4x256xf32>
    %874 = arith.addf %868, %873 : vector<4x256xf32>
    %c0_90 = arith.constant 0 : index
    %c112_91 = arith.constant 112 : index
    %875 = vector.load %arg8[%c0_90, %c112_91] : memref<4x512xf32, #tpu.memory_space<vmem>>, vector<4x256xf32>
    %876 = vector.extract_strided_slice %7 {offsets = [1, 0], sizes = [1, 256], strides = [1, 1]} : vector<9x256xf32> to vector<1x256xf32>
    %877 = vector.broadcast %876 : vector<1x256xf32> to vector<4x256xf32>
    %878 = arith.mulf %875, %877 : vector<4x256xf32>
    %879 = vector.extract_strided_slice %4 {offsets = [0, 112], sizes = [4, 1], strides = [1, 1]} : vector<4x144xf32> to vector<4x1xf32>
    %880 = vector.extract_strided_slice %878 {offsets = [0, 0], sizes = [1, 256], strides = [1, 1]} : vector<4x256xf32> to vector<1x256xf32>
    %881 = vector.broadcast %879 : vector<4x1xf32> to vector<4x256xf32>
    %882 = vector.broadcast %880 : vector<1x256xf32> to vector<4x256xf32>
    %883 = arith.mulf %881, %882 : vector<4x256xf32>
    %884 = arith.addf %874, %883 : vector<4x256xf32>
    %885 = vector.extract_strided_slice %4 {offsets = [0, 113], sizes = [4, 1], strides = [1, 1]} : vector<4x144xf32> to vector<4x1xf32>
    %886 = vector.extract_strided_slice %878 {offsets = [1, 0], sizes = [1, 256], strides = [1, 1]} : vector<4x256xf32> to vector<1x256xf32>
    %887 = vector.broadcast %885 : vector<4x1xf32> to vector<4x256xf32>
    %888 = vector.broadcast %886 : vector<1x256xf32> to vector<4x256xf32>
    %889 = arith.mulf %887, %888 : vector<4x256xf32>
    %890 = arith.addf %884, %889 : vector<4x256xf32>
    %891 = vector.extract_strided_slice %4 {offsets = [0, 114], sizes = [4, 1], strides = [1, 1]} : vector<4x144xf32> to vector<4x1xf32>
    %892 = vector.extract_strided_slice %878 {offsets = [2, 0], sizes = [1, 256], strides = [1, 1]} : vector<4x256xf32> to vector<1x256xf32>
    %893 = vector.broadcast %891 : vector<4x1xf32> to vector<4x256xf32>
    %894 = vector.broadcast %892 : vector<1x256xf32> to vector<4x256xf32>
    %895 = arith.mulf %893, %894 : vector<4x256xf32>
    %896 = arith.addf %890, %895 : vector<4x256xf32>
    %897 = vector.extract_strided_slice %4 {offsets = [0, 115], sizes = [4, 1], strides = [1, 1]} : vector<4x144xf32> to vector<4x1xf32>
    %898 = vector.extract_strided_slice %878 {offsets = [3, 0], sizes = [1, 256], strides = [1, 1]} : vector<4x256xf32> to vector<1x256xf32>
    %899 = vector.broadcast %897 : vector<4x1xf32> to vector<4x256xf32>
    %900 = vector.broadcast %898 : vector<1x256xf32> to vector<4x256xf32>
    %901 = arith.mulf %899, %900 : vector<4x256xf32>
    %902 = arith.addf %896, %901 : vector<4x256xf32>
    %c0_92 = arith.constant 0 : index
    %c113_93 = arith.constant 113 : index
    %903 = vector.load %arg8[%c0_92, %c113_93] : memref<4x512xf32, #tpu.memory_space<vmem>>, vector<4x256xf32>
    %904 = vector.extract_strided_slice %7 {offsets = [2, 0], sizes = [1, 256], strides = [1, 1]} : vector<9x256xf32> to vector<1x256xf32>
    %905 = vector.broadcast %904 : vector<1x256xf32> to vector<4x256xf32>
    %906 = arith.mulf %903, %905 : vector<4x256xf32>
    %907 = vector.extract_strided_slice %4 {offsets = [0, 116], sizes = [4, 1], strides = [1, 1]} : vector<4x144xf32> to vector<4x1xf32>
    %908 = vector.extract_strided_slice %906 {offsets = [0, 0], sizes = [1, 256], strides = [1, 1]} : vector<4x256xf32> to vector<1x256xf32>
    %909 = vector.broadcast %907 : vector<4x1xf32> to vector<4x256xf32>
    %910 = vector.broadcast %908 : vector<1x256xf32> to vector<4x256xf32>
    %911 = arith.mulf %909, %910 : vector<4x256xf32>
    %912 = arith.addf %902, %911 : vector<4x256xf32>
    %913 = vector.extract_strided_slice %4 {offsets = [0, 117], sizes = [4, 1], strides = [1, 1]} : vector<4x144xf32> to vector<4x1xf32>
    %914 = vector.extract_strided_slice %906 {offsets = [1, 0], sizes = [1, 256], strides = [1, 1]} : vector<4x256xf32> to vector<1x256xf32>
    %915 = vector.broadcast %913 : vector<4x1xf32> to vector<4x256xf32>
    %916 = vector.broadcast %914 : vector<1x256xf32> to vector<4x256xf32>
    %917 = arith.mulf %915, %916 : vector<4x256xf32>
    %918 = arith.addf %912, %917 : vector<4x256xf32>
    %919 = vector.extract_strided_slice %4 {offsets = [0, 118], sizes = [4, 1], strides = [1, 1]} : vector<4x144xf32> to vector<4x1xf32>
    %920 = vector.extract_strided_slice %906 {offsets = [2, 0], sizes = [1, 256], strides = [1, 1]} : vector<4x256xf32> to vector<1x256xf32>
    %921 = vector.broadcast %919 : vector<4x1xf32> to vector<4x256xf32>
    %922 = vector.broadcast %920 : vector<1x256xf32> to vector<4x256xf32>
    %923 = arith.mulf %921, %922 : vector<4x256xf32>
    %924 = arith.addf %918, %923 : vector<4x256xf32>
    %925 = vector.extract_strided_slice %4 {offsets = [0, 119], sizes = [4, 1], strides = [1, 1]} : vector<4x144xf32> to vector<4x1xf32>
    %926 = vector.extract_strided_slice %906 {offsets = [3, 0], sizes = [1, 256], strides = [1, 1]} : vector<4x256xf32> to vector<1x256xf32>
    %927 = vector.broadcast %925 : vector<4x1xf32> to vector<4x256xf32>
    %928 = vector.broadcast %926 : vector<1x256xf32> to vector<4x256xf32>
    %929 = arith.mulf %927, %928 : vector<4x256xf32>
    %930 = arith.addf %924, %929 : vector<4x256xf32>
    %c0_94 = arith.constant 0 : index
    %c127_95 = arith.constant 127 : index
    %931 = vector.load %arg8[%c0_94, %c127_95] : memref<4x512xf32, #tpu.memory_space<vmem>>, vector<4x256xf32>
    %932 = vector.extract_strided_slice %7 {offsets = [3, 0], sizes = [1, 256], strides = [1, 1]} : vector<9x256xf32> to vector<1x256xf32>
    %933 = vector.broadcast %932 : vector<1x256xf32> to vector<4x256xf32>
    %934 = arith.mulf %931, %933 : vector<4x256xf32>
    %935 = vector.extract_strided_slice %4 {offsets = [0, 120], sizes = [4, 1], strides = [1, 1]} : vector<4x144xf32> to vector<4x1xf32>
    %936 = vector.extract_strided_slice %934 {offsets = [0, 0], sizes = [1, 256], strides = [1, 1]} : vector<4x256xf32> to vector<1x256xf32>
    %937 = vector.broadcast %935 : vector<4x1xf32> to vector<4x256xf32>
    %938 = vector.broadcast %936 : vector<1x256xf32> to vector<4x256xf32>
    %939 = arith.mulf %937, %938 : vector<4x256xf32>
    %940 = arith.addf %930, %939 : vector<4x256xf32>
    %941 = vector.extract_strided_slice %4 {offsets = [0, 121], sizes = [4, 1], strides = [1, 1]} : vector<4x144xf32> to vector<4x1xf32>
    %942 = vector.extract_strided_slice %934 {offsets = [1, 0], sizes = [1, 256], strides = [1, 1]} : vector<4x256xf32> to vector<1x256xf32>
    %943 = vector.broadcast %941 : vector<4x1xf32> to vector<4x256xf32>
    %944 = vector.broadcast %942 : vector<1x256xf32> to vector<4x256xf32>
    %945 = arith.mulf %943, %944 : vector<4x256xf32>
    %946 = arith.addf %940, %945 : vector<4x256xf32>
    %947 = vector.extract_strided_slice %4 {offsets = [0, 122], sizes = [4, 1], strides = [1, 1]} : vector<4x144xf32> to vector<4x1xf32>
    %948 = vector.extract_strided_slice %934 {offsets = [2, 0], sizes = [1, 256], strides = [1, 1]} : vector<4x256xf32> to vector<1x256xf32>
    %949 = vector.broadcast %947 : vector<4x1xf32> to vector<4x256xf32>
    %950 = vector.broadcast %948 : vector<1x256xf32> to vector<4x256xf32>
    %951 = arith.mulf %949, %950 : vector<4x256xf32>
    %952 = arith.addf %946, %951 : vector<4x256xf32>
    %953 = vector.extract_strided_slice %4 {offsets = [0, 123], sizes = [4, 1], strides = [1, 1]} : vector<4x144xf32> to vector<4x1xf32>
    %954 = vector.extract_strided_slice %934 {offsets = [3, 0], sizes = [1, 256], strides = [1, 1]} : vector<4x256xf32> to vector<1x256xf32>
    %955 = vector.broadcast %953 : vector<4x1xf32> to vector<4x256xf32>
    %956 = vector.broadcast %954 : vector<1x256xf32> to vector<4x256xf32>
    %957 = arith.mulf %955, %956 : vector<4x256xf32>
    %958 = arith.addf %952, %957 : vector<4x256xf32>
    %c0_96 = arith.constant 0 : index
    %c128_97 = arith.constant 128 : index
    %959 = vector.load %arg8[%c0_96, %c128_97] : memref<4x512xf32, #tpu.memory_space<vmem>>, vector<4x256xf32>
    %960 = vector.extract_strided_slice %4 {offsets = [0, 124], sizes = [4, 1], strides = [1, 1]} : vector<4x144xf32> to vector<4x1xf32>
    %961 = vector.extract_strided_slice %959 {offsets = [0, 0], sizes = [1, 256], strides = [1, 1]} : vector<4x256xf32> to vector<1x256xf32>
    %962 = vector.broadcast %960 : vector<4x1xf32> to vector<4x256xf32>
    %963 = vector.broadcast %961 : vector<1x256xf32> to vector<4x256xf32>
    %964 = arith.mulf %962, %963 : vector<4x256xf32>
    %965 = arith.addf %958, %964 : vector<4x256xf32>
    %966 = vector.extract_strided_slice %4 {offsets = [0, 125], sizes = [4, 1], strides = [1, 1]} : vector<4x144xf32> to vector<4x1xf32>
    %967 = vector.extract_strided_slice %959 {offsets = [1, 0], sizes = [1, 256], strides = [1, 1]} : vector<4x256xf32> to vector<1x256xf32>
    %968 = vector.broadcast %966 : vector<4x1xf32> to vector<4x256xf32>
    %969 = vector.broadcast %967 : vector<1x256xf32> to vector<4x256xf32>
    %970 = arith.mulf %968, %969 : vector<4x256xf32>
    %971 = arith.addf %965, %970 : vector<4x256xf32>
    %972 = vector.extract_strided_slice %4 {offsets = [0, 126], sizes = [4, 1], strides = [1, 1]} : vector<4x144xf32> to vector<4x1xf32>
    %973 = vector.extract_strided_slice %959 {offsets = [2, 0], sizes = [1, 256], strides = [1, 1]} : vector<4x256xf32> to vector<1x256xf32>
    %974 = vector.broadcast %972 : vector<4x1xf32> to vector<4x256xf32>
    %975 = vector.broadcast %973 : vector<1x256xf32> to vector<4x256xf32>
    %976 = arith.mulf %974, %975 : vector<4x256xf32>
    %977 = arith.addf %971, %976 : vector<4x256xf32>
    %978 = vector.extract_strided_slice %4 {offsets = [0, 127], sizes = [4, 1], strides = [1, 1]} : vector<4x144xf32> to vector<4x1xf32>
    %979 = vector.extract_strided_slice %959 {offsets = [3, 0], sizes = [1, 256], strides = [1, 1]} : vector<4x256xf32> to vector<1x256xf32>
    %980 = vector.broadcast %978 : vector<4x1xf32> to vector<4x256xf32>
    %981 = vector.broadcast %979 : vector<1x256xf32> to vector<4x256xf32>
    %982 = arith.mulf %980, %981 : vector<4x256xf32>
    %983 = arith.addf %977, %982 : vector<4x256xf32>
    %c0_98 = arith.constant 0 : index
    %c129_99 = arith.constant 129 : index
    %984 = vector.load %arg8[%c0_98, %c129_99] : memref<4x512xf32, #tpu.memory_space<vmem>>, vector<4x256xf32>
    %985 = vector.extract_strided_slice %7 {offsets = [5, 0], sizes = [1, 256], strides = [1, 1]} : vector<9x256xf32> to vector<1x256xf32>
    %986 = vector.broadcast %985 : vector<1x256xf32> to vector<4x256xf32>
    %987 = arith.mulf %984, %986 : vector<4x256xf32>
    %988 = vector.extract_strided_slice %4 {offsets = [0, 128], sizes = [4, 1], strides = [1, 1]} : vector<4x144xf32> to vector<4x1xf32>
    %989 = vector.extract_strided_slice %987 {offsets = [0, 0], sizes = [1, 256], strides = [1, 1]} : vector<4x256xf32> to vector<1x256xf32>
    %990 = vector.broadcast %988 : vector<4x1xf32> to vector<4x256xf32>
    %991 = vector.broadcast %989 : vector<1x256xf32> to vector<4x256xf32>
    %992 = arith.mulf %990, %991 : vector<4x256xf32>
    %993 = arith.addf %983, %992 : vector<4x256xf32>
    %994 = vector.extract_strided_slice %4 {offsets = [0, 129], sizes = [4, 1], strides = [1, 1]} : vector<4x144xf32> to vector<4x1xf32>
    %995 = vector.extract_strided_slice %987 {offsets = [1, 0], sizes = [1, 256], strides = [1, 1]} : vector<4x256xf32> to vector<1x256xf32>
    %996 = vector.broadcast %994 : vector<4x1xf32> to vector<4x256xf32>
    %997 = vector.broadcast %995 : vector<1x256xf32> to vector<4x256xf32>
    %998 = arith.mulf %996, %997 : vector<4x256xf32>
    %999 = arith.addf %993, %998 : vector<4x256xf32>
    %1000 = vector.extract_strided_slice %4 {offsets = [0, 130], sizes = [4, 1], strides = [1, 1]} : vector<4x144xf32> to vector<4x1xf32>
    %1001 = vector.extract_strided_slice %987 {offsets = [2, 0], sizes = [1, 256], strides = [1, 1]} : vector<4x256xf32> to vector<1x256xf32>
    %1002 = vector.broadcast %1000 : vector<4x1xf32> to vector<4x256xf32>
    %1003 = vector.broadcast %1001 : vector<1x256xf32> to vector<4x256xf32>
    %1004 = arith.mulf %1002, %1003 : vector<4x256xf32>
    %1005 = arith.addf %999, %1004 : vector<4x256xf32>
    %1006 = vector.extract_strided_slice %4 {offsets = [0, 131], sizes = [4, 1], strides = [1, 1]} : vector<4x144xf32> to vector<4x1xf32>
    %1007 = vector.extract_strided_slice %987 {offsets = [3, 0], sizes = [1, 256], strides = [1, 1]} : vector<4x256xf32> to vector<1x256xf32>
    %1008 = vector.broadcast %1006 : vector<4x1xf32> to vector<4x256xf32>
    %1009 = vector.broadcast %1007 : vector<1x256xf32> to vector<4x256xf32>
    %1010 = arith.mulf %1008, %1009 : vector<4x256xf32>
    %1011 = arith.addf %1005, %1010 : vector<4x256xf32>
    %c0_100 = arith.constant 0 : index
    %c143_101 = arith.constant 143 : index
    %1012 = vector.load %arg8[%c0_100, %c143_101] : memref<4x512xf32, #tpu.memory_space<vmem>>, vector<4x256xf32>
    %1013 = vector.extract_strided_slice %7 {offsets = [6, 0], sizes = [1, 256], strides = [1, 1]} : vector<9x256xf32> to vector<1x256xf32>
    %1014 = vector.broadcast %1013 : vector<1x256xf32> to vector<4x256xf32>
    %1015 = arith.mulf %1012, %1014 : vector<4x256xf32>
    %1016 = vector.extract_strided_slice %4 {offsets = [0, 132], sizes = [4, 1], strides = [1, 1]} : vector<4x144xf32> to vector<4x1xf32>
    %1017 = vector.extract_strided_slice %1015 {offsets = [0, 0], sizes = [1, 256], strides = [1, 1]} : vector<4x256xf32> to vector<1x256xf32>
    %1018 = vector.broadcast %1016 : vector<4x1xf32> to vector<4x256xf32>
    %1019 = vector.broadcast %1017 : vector<1x256xf32> to vector<4x256xf32>
    %1020 = arith.mulf %1018, %1019 : vector<4x256xf32>
    %1021 = arith.addf %1011, %1020 : vector<4x256xf32>
    %1022 = vector.extract_strided_slice %4 {offsets = [0, 133], sizes = [4, 1], strides = [1, 1]} : vector<4x144xf32> to vector<4x1xf32>
    %1023 = vector.extract_strided_slice %1015 {offsets = [1, 0], sizes = [1, 256], strides = [1, 1]} : vector<4x256xf32> to vector<1x256xf32>
    %1024 = vector.broadcast %1022 : vector<4x1xf32> to vector<4x256xf32>
    %1025 = vector.broadcast %1023 : vector<1x256xf32> to vector<4x256xf32>
    %1026 = arith.mulf %1024, %1025 : vector<4x256xf32>
    %1027 = arith.addf %1021, %1026 : vector<4x256xf32>
    %1028 = vector.extract_strided_slice %4 {offsets = [0, 134], sizes = [4, 1], strides = [1, 1]} : vector<4x144xf32> to vector<4x1xf32>
    %1029 = vector.extract_strided_slice %1015 {offsets = [2, 0], sizes = [1, 256], strides = [1, 1]} : vector<4x256xf32> to vector<1x256xf32>
    %1030 = vector.broadcast %1028 : vector<4x1xf32> to vector<4x256xf32>
    %1031 = vector.broadcast %1029 : vector<1x256xf32> to vector<4x256xf32>
    %1032 = arith.mulf %1030, %1031 : vector<4x256xf32>
    %1033 = arith.addf %1027, %1032 : vector<4x256xf32>
    %1034 = vector.extract_strided_slice %4 {offsets = [0, 135], sizes = [4, 1], strides = [1, 1]} : vector<4x144xf32> to vector<4x1xf32>
    %1035 = vector.extract_strided_slice %1015 {offsets = [3, 0], sizes = [1, 256], strides = [1, 1]} : vector<4x256xf32> to vector<1x256xf32>
    %1036 = vector.broadcast %1034 : vector<4x1xf32> to vector<4x256xf32>
    %1037 = vector.broadcast %1035 : vector<1x256xf32> to vector<4x256xf32>
    %1038 = arith.mulf %1036, %1037 : vector<4x256xf32>
    %1039 = arith.addf %1033, %1038 : vector<4x256xf32>
    %c0_102 = arith.constant 0 : index
    %c144_103 = arith.constant 144 : index
    %1040 = vector.load %arg8[%c0_102, %c144_103] : memref<4x512xf32, #tpu.memory_space<vmem>>, vector<4x256xf32>
    %1041 = vector.extract_strided_slice %7 {offsets = [7, 0], sizes = [1, 256], strides = [1, 1]} : vector<9x256xf32> to vector<1x256xf32>
    %1042 = vector.broadcast %1041 : vector<1x256xf32> to vector<4x256xf32>
    %1043 = arith.mulf %1040, %1042 : vector<4x256xf32>
    %1044 = vector.extract_strided_slice %4 {offsets = [0, 136], sizes = [4, 1], strides = [1, 1]} : vector<4x144xf32> to vector<4x1xf32>
    %1045 = vector.extract_strided_slice %1043 {offsets = [0, 0], sizes = [1, 256], strides = [1, 1]} : vector<4x256xf32> to vector<1x256xf32>
    %1046 = vector.broadcast %1044 : vector<4x1xf32> to vector<4x256xf32>
    %1047 = vector.broadcast %1045 : vector<1x256xf32> to vector<4x256xf32>
    %1048 = arith.mulf %1046, %1047 : vector<4x256xf32>
    %1049 = arith.addf %1039, %1048 : vector<4x256xf32>
    %1050 = vector.extract_strided_slice %4 {offsets = [0, 137], sizes = [4, 1], strides = [1, 1]} : vector<4x144xf32> to vector<4x1xf32>
    %1051 = vector.extract_strided_slice %1043 {offsets = [1, 0], sizes = [1, 256], strides = [1, 1]} : vector<4x256xf32> to vector<1x256xf32>
    %1052 = vector.broadcast %1050 : vector<4x1xf32> to vector<4x256xf32>
    %1053 = vector.broadcast %1051 : vector<1x256xf32> to vector<4x256xf32>
    %1054 = arith.mulf %1052, %1053 : vector<4x256xf32>
    %1055 = arith.addf %1049, %1054 : vector<4x256xf32>
    %1056 = vector.extract_strided_slice %4 {offsets = [0, 138], sizes = [4, 1], strides = [1, 1]} : vector<4x144xf32> to vector<4x1xf32>
    %1057 = vector.extract_strided_slice %1043 {offsets = [2, 0], sizes = [1, 256], strides = [1, 1]} : vector<4x256xf32> to vector<1x256xf32>
    %1058 = vector.broadcast %1056 : vector<4x1xf32> to vector<4x256xf32>
    %1059 = vector.broadcast %1057 : vector<1x256xf32> to vector<4x256xf32>
    %1060 = arith.mulf %1058, %1059 : vector<4x256xf32>
    %1061 = arith.addf %1055, %1060 : vector<4x256xf32>
    %1062 = vector.extract_strided_slice %4 {offsets = [0, 139], sizes = [4, 1], strides = [1, 1]} : vector<4x144xf32> to vector<4x1xf32>
    %1063 = vector.extract_strided_slice %1043 {offsets = [3, 0], sizes = [1, 256], strides = [1, 1]} : vector<4x256xf32> to vector<1x256xf32>
    %1064 = vector.broadcast %1062 : vector<4x1xf32> to vector<4x256xf32>
    %1065 = vector.broadcast %1063 : vector<1x256xf32> to vector<4x256xf32>
    %1066 = arith.mulf %1064, %1065 : vector<4x256xf32>
    %1067 = arith.addf %1061, %1066 : vector<4x256xf32>
    %c0_104 = arith.constant 0 : index
    %c145_105 = arith.constant 145 : index
    %1068 = vector.load %arg8[%c0_104, %c145_105] : memref<4x512xf32, #tpu.memory_space<vmem>>, vector<4x256xf32>
    %1069 = vector.extract_strided_slice %7 {offsets = [8, 0], sizes = [1, 256], strides = [1, 1]} : vector<9x256xf32> to vector<1x256xf32>
    %1070 = vector.broadcast %1069 : vector<1x256xf32> to vector<4x256xf32>
    %1071 = arith.mulf %1068, %1070 : vector<4x256xf32>
    %1072 = vector.extract_strided_slice %4 {offsets = [0, 140], sizes = [4, 1], strides = [1, 1]} : vector<4x144xf32> to vector<4x1xf32>
    %1073 = vector.extract_strided_slice %1071 {offsets = [0, 0], sizes = [1, 256], strides = [1, 1]} : vector<4x256xf32> to vector<1x256xf32>
    %1074 = vector.broadcast %1072 : vector<4x1xf32> to vector<4x256xf32>
    %1075 = vector.broadcast %1073 : vector<1x256xf32> to vector<4x256xf32>
    %1076 = arith.mulf %1074, %1075 : vector<4x256xf32>
    %1077 = arith.addf %1067, %1076 : vector<4x256xf32>
    %1078 = vector.extract_strided_slice %4 {offsets = [0, 141], sizes = [4, 1], strides = [1, 1]} : vector<4x144xf32> to vector<4x1xf32>
    %1079 = vector.extract_strided_slice %1071 {offsets = [1, 0], sizes = [1, 256], strides = [1, 1]} : vector<4x256xf32> to vector<1x256xf32>
    %1080 = vector.broadcast %1078 : vector<4x1xf32> to vector<4x256xf32>
    %1081 = vector.broadcast %1079 : vector<1x256xf32> to vector<4x256xf32>
    %1082 = arith.mulf %1080, %1081 : vector<4x256xf32>
    %1083 = arith.addf %1077, %1082 : vector<4x256xf32>
    %1084 = vector.extract_strided_slice %4 {offsets = [0, 142], sizes = [4, 1], strides = [1, 1]} : vector<4x144xf32> to vector<4x1xf32>
    %1085 = vector.extract_strided_slice %1071 {offsets = [2, 0], sizes = [1, 256], strides = [1, 1]} : vector<4x256xf32> to vector<1x256xf32>
    %1086 = vector.broadcast %1084 : vector<4x1xf32> to vector<4x256xf32>
    %1087 = vector.broadcast %1085 : vector<1x256xf32> to vector<4x256xf32>
    %1088 = arith.mulf %1086, %1087 : vector<4x256xf32>
    %1089 = arith.addf %1083, %1088 : vector<4x256xf32>
    %1090 = vector.extract_strided_slice %4 {offsets = [0, 143], sizes = [4, 1], strides = [1, 1]} : vector<4x144xf32> to vector<4x1xf32>
    %1091 = vector.extract_strided_slice %1071 {offsets = [3, 0], sizes = [1, 256], strides = [1, 1]} : vector<4x256xf32> to vector<1x256xf32>
    %1092 = vector.broadcast %1090 : vector<4x1xf32> to vector<4x256xf32>
    %1093 = vector.broadcast %1091 : vector<1x256xf32> to vector<4x256xf32>
    %1094 = arith.mulf %1092, %1093 : vector<4x256xf32>
    %1095 = arith.addf %1089, %1094 : vector<4x256xf32>
    %cst_106 = arith.constant dense<0.000000e+00> : vector<4xf32>
    %1096 = vector.multi_reduction <add>, %1095, %cst_106 [1] : vector<4x256xf32> to vector<4xf32>
    %1097 = vector.shape_cast %1096 : vector<4xf32> to vector<4x1xf32>
    %cst_107 = arith.constant 2.560000e+02 : f32
    %1098 = vector.broadcast %cst_107 : f32 to vector<4x1xf32>
    %1099 = arith.divf %1097, %1098 : vector<4x1xf32>
    %1100 = vector.broadcast %1099 : vector<4x1xf32> to vector<4x256xf32>
    %1101 = arith.subf %1095, %1100 : vector<4x256xf32>
    %1102 = arith.mulf %1101, %1101 : vector<4x256xf32>
    %cst_108 = arith.constant dense<0.000000e+00> : vector<4xf32>
    %1103 = vector.multi_reduction <add>, %1102, %cst_108 [1] : vector<4x256xf32> to vector<4xf32>
    %1104 = vector.shape_cast %1103 : vector<4xf32> to vector<4x1xf32>
    %cst_109 = arith.constant 2.560000e+02 : f32
    %1105 = vector.broadcast %cst_109 : f32 to vector<4x1xf32>
    %1106 = arith.divf %1104, %1105 : vector<4x1xf32>
    %cst_110 = arith.constant 9.99999974E-6 : f32
    %1107 = vector.broadcast %cst_110 : f32 to vector<4x1xf32>
    %1108 = arith.addf %1106, %1107 : vector<4x1xf32>
    %1109 = math.rsqrt %1108 : vector<4x1xf32>
    %1110 = vector.broadcast %1109 : vector<4x1xf32> to vector<4x256xf32>
    %1111 = arith.mulf %1101, %1110 : vector<4x256xf32>
    %1112 = vector.extract_strided_slice %5 {offsets = [0, 6], sizes = [4, 1], strides = [1, 1]} : vector<4x8xf32> to vector<4x1xf32>
    %1113 = vector.broadcast %1112 : vector<4x1xf32> to vector<4x256xf32>
    %1114 = arith.mulf %1111, %1113 : vector<4x256xf32>
    %1115 = vector.extract_strided_slice %5 {offsets = [0, 7], sizes = [4, 1], strides = [1, 1]} : vector<4x8xf32> to vector<4x1xf32>
    %1116 = vector.broadcast %1115 : vector<4x1xf32> to vector<4x256xf32>
    %1117 = arith.addf %1114, %1116 : vector<4x256xf32>
    %c3 = arith.constant 3 : index
    %1118 = memref.load %arg6[%c3] : memref<4xf32, #tpu.memory_space<smem>>
    %cst_111 = arith.constant 0.000000e+00 : f32
    %1119 = vector.broadcast %cst_111 : f32 to vector<4x256xf32>
    %1120 = arith.cmpf oge, %1117, %1119 : vector<4x256xf32>
    %1121 = vector.broadcast %1118 : f32 to vector<4x256xf32>
    %1122 = arith.mulf %1121, %1117 : vector<4x256xf32>
    %1123 = arith.select %1120, %1117, %1122 : vector<4x256xi1>, vector<4x256xf32>
    %cst_112 = arith.constant 0.000000e+00 : f32
    %1124 = vector.broadcast %cst_112 : f32 to vector<4x256xf32>
    %1125 = vector.extract_strided_slice %6 {offsets = [0, 0], sizes = [4, 1], strides = [1, 1]} : vector<4x5xf32> to vector<4x1xf32>
    %1126 = vector.extract_strided_slice %1123 {offsets = [0, 0], sizes = [1, 256], strides = [1, 1]} : vector<4x256xf32> to vector<1x256xf32>
    %1127 = vector.broadcast %1125 : vector<4x1xf32> to vector<4x256xf32>
    %1128 = vector.broadcast %1126 : vector<1x256xf32> to vector<4x256xf32>
    %1129 = arith.mulf %1127, %1128 : vector<4x256xf32>
    %1130 = arith.addf %1124, %1129 : vector<4x256xf32>
    %1131 = vector.extract_strided_slice %6 {offsets = [0, 1], sizes = [4, 1], strides = [1, 1]} : vector<4x5xf32> to vector<4x1xf32>
    %1132 = vector.extract_strided_slice %1123 {offsets = [1, 0], sizes = [1, 256], strides = [1, 1]} : vector<4x256xf32> to vector<1x256xf32>
    %1133 = vector.broadcast %1131 : vector<4x1xf32> to vector<4x256xf32>
    %1134 = vector.broadcast %1132 : vector<1x256xf32> to vector<4x256xf32>
    %1135 = arith.mulf %1133, %1134 : vector<4x256xf32>
    %1136 = arith.addf %1130, %1135 : vector<4x256xf32>
    %1137 = vector.extract_strided_slice %6 {offsets = [0, 2], sizes = [4, 1], strides = [1, 1]} : vector<4x5xf32> to vector<4x1xf32>
    %1138 = vector.extract_strided_slice %1123 {offsets = [2, 0], sizes = [1, 256], strides = [1, 1]} : vector<4x256xf32> to vector<1x256xf32>
    %1139 = vector.broadcast %1137 : vector<4x1xf32> to vector<4x256xf32>
    %1140 = vector.broadcast %1138 : vector<1x256xf32> to vector<4x256xf32>
    %1141 = arith.mulf %1139, %1140 : vector<4x256xf32>
    %1142 = arith.addf %1136, %1141 : vector<4x256xf32>
    %1143 = vector.extract_strided_slice %6 {offsets = [0, 3], sizes = [4, 1], strides = [1, 1]} : vector<4x5xf32> to vector<4x1xf32>
    %1144 = vector.extract_strided_slice %1123 {offsets = [3, 0], sizes = [1, 256], strides = [1, 1]} : vector<4x256xf32> to vector<1x256xf32>
    %1145 = vector.broadcast %1143 : vector<4x1xf32> to vector<4x256xf32>
    %1146 = vector.broadcast %1144 : vector<1x256xf32> to vector<4x256xf32>
    %1147 = arith.mulf %1145, %1146 : vector<4x256xf32>
    %1148 = arith.addf %1142, %1147 : vector<4x256xf32>
    %1149 = vector.extract_strided_slice %6 {offsets = [0, 4], sizes = [4, 1], strides = [1, 1]} : vector<4x5xf32> to vector<4x1xf32>
    %1150 = vector.broadcast %1149 : vector<4x1xf32> to vector<4x256xf32>
    %1151 = arith.addf %1148, %1150 : vector<4x256xf32>
    %cst_113 = arith.constant 2.000000e+01 : f32
    %1152 = vector.broadcast %cst_113 : f32 to vector<4x256xf32>
    %1153 = arith.cmpf ogt, %1151, %1152 : vector<4x256xf32>
    %cst_114 = arith.constant 2.000000e+01 : f32
    %1154 = vector.broadcast %cst_114 : f32 to vector<4x256xf32>
    %1155 = arith.minimumf %1151, %1154 : vector<4x256xf32>
    %1156 = math.exp %1155 : vector<4x256xf32>
    %1157 = math.log1p %1156 : vector<4x256xf32>
    %1158 = arith.select %1153, %1151, %1157 : vector<4x256xi1>, vector<4x256xf32>
    %c0_115 = arith.constant 0 : index
    %c0_116 = arith.constant 0 : index
    %c0_117 = arith.constant 0 : index
    %1159 = vector.load %arg7[%c0_115, %c0_116, %c0_117] : memref<1x4x256xf32, #tpu.memory_space<vmem>>, vector<1x4x256xf32>
    %1160 = vector.shape_cast %1159 : vector<1x4x256xf32> to vector<4x256xf32>
    %1161 = vector.shape_cast %1158 : vector<4x256xf32> to vector<1x4x256xf32>
    tpu.vector_store %arg7[%c0_115, %c0_116, %c0_117], %1161 {strides = array<i32>} : memref<1x4x256xf32, #tpu.memory_space<vmem>>, vector<1x4x256xf32>,
    return
  }
  func.func @transform_0(%arg0: i32) -> (i32, i32, i32) {
    %c0_i32 = arith.constant 0 : i32
    %c0_i32_0 = arith.constant 0 : i32
    %c0_i32_1 = arith.constant 0 : i32
    return %arg0, %c0_i32, %c0_i32_0 : i32, i32, i32
  }
  func.func @transform_1(%arg0: i32) -> (i32, i32) {
    %c0_i32 = arith.constant 0 : i32
    %c0_i32_0 = arith.constant 0 : i32
    %c0_i32_1 = arith.constant 0 : i32
    return %c0_i32, %c0_i32_0 : i32, i32
  }
  func.func @transform_2(%arg0: i32) -> (i32, i32) {
    %c0_i32 = arith.constant 0 : i32
    %c0_i32_0 = arith.constant 0 : i32
    %c0_i32_1 = arith.constant 0 : i32
    return %c0_i32, %c0_i32_0 : i32, i32
  }
  func.func @transform_3(%arg0: i32) -> (i32, i32) {
    %c0_i32 = arith.constant 0 : i32
    %c0_i32_0 = arith.constant 0 : i32
    %c0_i32_1 = arith.constant 0 : i32
    return %c0_i32, %c0_i32_0 : i32, i32
  }
  func.func @transform_4(%arg0: i32) -> (i32, i32) {
    %c0_i32 = arith.constant 0 : i32
    %c0_i32_0 = arith.constant 0 : i32
    %c0_i32_1 = arith.constant 0 : i32
    return %c0_i32, %c0_i32_0 : i32, i32
  }
  func.func @transform_5(%arg0: i32) -> i32 {
    %c0_i32 = arith.constant 0 : i32
    %c0_i32_0 = arith.constant 0 : i32
    return %c0_i32 : i32
  }
  func.func @transform_6(%arg0: i32) -> (i32, i32, i32) {
    %c0_i32 = arith.constant 0 : i32
    %c0_i32_0 = arith.constant 0 : i32
    %c0_i32_1 = arith.constant 0 : i32
    return %arg0, %c0_i32, %c0_i32_0 : i32, i32, i32
  }
}

</mosaic_0001>

<bundles_post_ra>
// kernel: cm_layers_forward.1
= control target key start
LH: loop header
LB: loop body
LE: loop exit
PB: predicated region body
PF: predicated region fallthrough
CT: control target
= control target key end

     0   :  { %11 = vsyncpa [#allocation4], 0  ;;  %s8942_s21 = smov 0   ;;  %s12191_s0 = inlined_call_operand.vmem [shape: f32[2,4,256], index: 0, kind: input, shape index: {}]   ;;  %s12192_s1 = inlined_call_operand.vmem [shape: f32[4,144], index: 1, kind: input, shape index: {}]   ;;  %s12193_s2 = inlined_call_operand.vmem [shape: f32[4,8], index: 2, kind: input, shape index: {}]   ;;  %s12194_s3 = inlined_call_operand.vmem [shape: f32[4,5], index: 3, kind: input, shape index: {}]   ;;  %s12195_s4 = inlined_call_operand.vmem [shape: f32[9,256], index: 4, kind: input, shape index: {}]   ;;  %s12196_s5 = inlined_call_operand.vmem [shape: f32[4], index: 5, kind: input, shape index: {}]   ;;  %s12197_s6 = inlined_call_operand.vmem [shape: f32[2,4,256], index: 6, kind: output, shape index: {}]  }
   0x1 LB: > { %s8948_s22 = sadd.s32 4294967295, %s8765_s21   ;;  %p8396_p0 = scmp.ge.s32.totalorder %s8765_s21, 1  ;;  %s8765_s21 = sphi %s8942_s21, %s17_s21  }
   0x2   : > { %p179_p1 = scmp.lt.s32.totalorder %s8765_s21, 3  ;;  %s204_s25 = sshll.u32 %s12196_s5, 4  ;;  %s205_s25 = int_to_ptr.vmem [resolvable:$true] %s204_s25 }
   0x3   : > { %p8422_p3 = scmp.eq.s32.totalorder %s8948_s22, 0  ;;  %s8740_s27 = scalar_lea.vmem %s205_s25, 16 }
   0x4   : > { %p8955_p2 = pnand %p8396_p0, %p179_p1  ;;  %p8741_p6 = scmp.ne.s32.totalorder %s205_s25, %s8740_s27 }
   0x5   : > { %p8748_p10 = scmp.lt.s32.totalorder %s205_s25, %s205_s25  ;;  %p8749_p11 = scmp.lt.s32.totalorder %s8740_s27, %s8740_s27 }
   0x6   : > { %p8418_p4 = pneg %p8955_p2 }
   0x7   : > { %p8750_p12 = por %p8749_p11, %p8748_p10 }
   0x8   : > { %p8419_p5 = pnand %p8422_p3, %p8418_p4 }
   0xa   : > { %p8742_p7 = pneg %p8419_p5 }
   0xc   : > { %p8743_p8 = pnand %p8742_p7, %p8741_p6 }
   0xe   : > { %p8744_p9 = pneg %p8743_p8 }
  0x10   : > { %p8751_p13 = pnand %p8750_p12, %p8744_p9 }
  0x12   : > { %8754 = shalt.err (!%p8751_p13)
}
  0x13   : > { %s8767_s28 = smov [#allocation3]   ;;  %225 = sbr.rel (%p8955_p2) target bundleno = 2919 (0xb67), region = 44 }
  0x14   : > { %8421 = dma.vmem_to_smem (!%p8419_p5), %s205_s25, 16, %s8767_s28, [#allocation4]  }
  0x18   : > { %8760 = dma.done.wait (%p8422_p3), [#allocation4], 16  }
  0x19   : > { %8762 = vsyncadd (%p8422_p3), [#allocation4], 4294967280 }
  0x1a   : > { %231 = sfence }
  0x1b   : > { %v279_v0 = vlaneseq  ;;  %v12199_v1 = vmov 0   ;;  %v272_v3 = vld [vmem:[%s12195_s4] sm:$0xff]  ;;  %v273_v4 = vld [vmem:[%s12195_s4 + $0x8] sm:$0xff]  ;;  %p256_p0 = scmp.lt.s32.totalorder %s8948_s22, 1  ;;  %s8769_s10 = smov 111   ;;  %v12198_v29 = vmov 1  }
  0x1c   : > { %8572 = vset.pattern.permute.xlu0 %v12199_v1  ;;  %s8770_s14 = smov 113   ;;  %8573 = vset.pattern.permute.xlu1 %v12198_v29  ;;  %v8772_v30 = vmov 0.0   ;;  %s8773_s15 = smov 112   ;;  %v8405_v35 = vld [vmem:[%s12195_s4 + $0x10] ss:$0 sm:$0xff]  ;;  %v9044_v39 = vld [vmem:[%s12192_s1] sm:$0xff] }
  0x1d   : > { %v8971_v2 = vshrl.u32 %v279_v0, 7  ;;  %s12590_s22 = smov (!%p256_p0, %s8948_s22), 1  ;;  %266 = vst [vmem:[#allocation2] sm:$0xff] %v8772_v30  ;;  %267 = vst [vmem:[#allocation2 + $0x8] sm:$0xff] %v8772_v30  ;;  %s8774_s16 = smov 127   ;;  %v12207_v40 = vmov 3  }
  0x1e   : > { %s8412_s9 = sshll.u32 %s12590_s22, 3  ;;  %v8406_v36 = vld [vmem:[%s12195_s4 + $0x18] ss:$0 sm:$0xff]  ;;  %s8775_s23 = smov 1   ;;  %v12205_v41 = vmov 2   ;;  %v12202_v42 = vmov 4  }
  0x1f   : > { %12295 = vst [vmem:[#allocation6_spill] sm:$0xff] %v8971_v2  ;;  %v8980_v5 = vsub.s32 0, %v8971_v2  ;;  %v8983_v6 = vsub.s32 1, %v8971_v2  ;;  %v8986_v7 = vsub.s32 2, %v8971_v2  ;;  %v8989_v8 = vsub.s32 5, %v8971_v2  ;;  %s260_s13 = scalar_lea.vmem %s12191_s0, %s8412_s9  ;;  %s8776_s24 = smov 15  }
  0x20   : > { %v8992_v9 = vsub.s32 3, %v8971_v2  ;;  %v9002_v16 = vsub.s32 6, %v8971_v2  ;;  %v9014_v24 = vsub.s32 7, %v8971_v2  ;;  %v9024_v28 = vld [vmem:[%s260_s13] sm:$0xff]  ;;  %v2086_v38 = vcombine.low %v8405_v35, %v8406_v36  ;;  %s8777_s25 = smov 16   ;;  %s8778_s28 = smov 17  }
  0x21   : > { %12296 = vst [vmem:[#allocation7_spill] sm:$0xff] %v8986_v7  ;;  %12297 = vst [vmem:[#allocation8_spill] sm:$0xff] %v8989_v8  ;;  %v282_v10 = vrot.slane %v272_v3, %v8980_v5  ;;  %v286_v11 = vrot.slane %v273_v4, %v8980_v5  ;;  %v521_v12 = vrot.slane %v272_v3, %v8983_v6  ;;  %v12204_v43 = vmov 5   ;;  %s2376_s11 = sld [smem:[#allocation3]] }
  0x22   : > { %12298 = vst [vmem:[#allocation9_spill] sm:$0xff] %v8992_v9  ;;  %v525_v13 = vrot.slane %v273_v4, %v8983_v6  ;;  %v758_v14 = vrot.slane %v272_v3, %v8986_v7  ;;  %v762_v15 = vrot.slane %v273_v4, %v8986_v7  ;;  %12299 = vst [vmem:[#allocation10_spill] sm:$0xff] %v9002_v16  ;;  %v12201_v44 = vmov 6   ;;  %s8407_s26 = sld [smem:[#allocation3 + $0x1]] }
  0x23   : > { %v289_v17 = vcombine.low %v282_v10, %v286_v11  ;;  %v995_v19 = vrot.slane %v272_v3, %v8992_v9  ;;  %v999_v20 = vrot.slane %v273_v4, %v8992_v9  ;;  %v1374_v22 = vrot.slane %v272_v3, %v8989_v8  ;;  %12300 = vst [vmem:[#allocation11_spill] sm:$0xff] %v9014_v24  ;;  %s8408_s8 = sld [smem:[#allocation3 + $0x2]] }
  0x24   : > { %v765_v18 = vcombine.low %v758_v14, %v762_v15  ;;  %v528_v21 = vcombine.low %v521_v12, %v525_v13  ;;  %v1378_v23 = vrot.slane %v273_v4, %v8989_v8  ;;  %v1609_v26 = vrot.slane %v272_v3, %v9002_v16  ;;  %276 = vst [vmem:[#allocation2 + $0x4] sm:$0xff] %v9024_v28 }
  0x25   : > { %290 = vrot.lane.b32.xlu0 %v289_v17, %s8769_s10  ;;  %v1002_v25 = vcombine.low %v995_v19, %v999_v20  ;;  %v1613_v27 = vrot.slane %v273_v4, %v9002_v16  ;;  %v1844_v32 = vrot.slane %v272_v3, %v9014_v24  ;;  %v1848_v33 = vrot.slane %v273_v4, %v9014_v24 }
  0x26   : > { %766 = vrot.lane.b32.xlu1 %v765_v18, %s8770_s14  ;;  %v1381_v31 = vcombine.low %v1374_v22, %v1378_v23  ;;  %v12200_v45 = vmov 7   ;;  %v8785_v46 = vmov 8   ;;  %v8786_v47 = vmov 9  }
  0x27   : > { %v1616_v34 = vcombine.low %v1609_v26, %v1613_v27  ;;  %v1851_v37 = vcombine.low %v1844_v32, %v1848_v33  ;;  %v8787_v48 = vmov 10   ;;  %v8788_v49 = vmov 11  }
  0x28   : > { %v8789_v50 = vmov 12   ;;  %v8790_v51 = vmov 13   ;;  %v8791_v52 = vmov 14   ;;  %v8792_v53 = vmov 15  }
  0x29   : > { %529 = vrot.lane.b32.xlu0 %v528_v21, %s8773_s15  ;;  %v8793_v54 = vmov 16   ;;  %vm293_vm0 = vcmask 908288   ;;  %v9074_v59 = vsub.s32 4, %v8971_v2  ;;  %v8794_v63 = vmov 18  }
  0x2a   : > { %1003 = vrot.lane.b32.xlu1 %v1002_v25, %s8774_s16  ;;  %vm1063_vm1 = vcmask 7168   ;;  %vm532_vm2 = vcmask 916480   ;;  %vm769_vm3 = vcmask 924672   ;;  %vm352_vm4 = vcmask 138240  }
  0x2b   : > { %v278_v56 = vld [vmem:[#allocation2 + $0x8] sm:$0xf]  ;;  %v9069_v57 = vld [vmem:[#allocation2] sm:$0xff]  ;;  %12302 = vst [vmem:[#allocation13_spill] sm:$0xff] %v9074_v59  ;;  %vm1006_vm5 = vcmask 1039360   ;;  %vm826_vm6 = vcmask 121856  }
  0x2c   : > { %v517_v21 = vld [vmem:[#allocation2 + $0x8] sm:$0xf]  ;;  %vm589_vm7 = vcmask 130048   ;;  %vm350_vm8 = vcmask 1043456  }
  0x2d   : > { %1382 = vrot.lane.b32.xlu0 %v1381_v31, %s8775_s23 }
  0x2e   : > { %1617 = vrot.lane.b32.xlu1 %v1616_v34, %s8776_s24 }
  0x31   : > { %1852 = vrot.lane.b32.xlu0 %v1851_v37, %s8777_s25  ;;  %v1370_v37 = vld [vmem:[#allocation2 + $0xc] sm:$0xf] }
  0x32   : > { %2087 = vrot.lane.b32.xlu1 %v2086_v38, %s8778_s28 }
  0x35   : > { %301 = vperm.xlu0 %8572, %v9044_v39  }
  0x36   : > { %358 = vperm.xlu1 %8573, %v9044_v39  }
  0x39   : > { %8575 = vset.pattern.permute.xlu0 %v12207_v40 }
  0x3a   : > { %464 = vperm.xlu0 %8575, %v9044_v39   ;;  %8574 = vset.pattern.permute.xlu1 %v12205_v41  ;;  %v1840_v41 = vld [vmem:[#allocation2 + $0xc] sm:$0xf] }
  0x3b   : > { %411 = vperm.xlu1 %8574, %v9044_v39  }
  0x3e   : > { %8576 = vset.pattern.permute.xlu0 %v12202_v42 }
  0x3f   : > { %539 = vperm.xlu0 %8576, %v9044_v39   ;;  %8590 = vset.pattern.permute.xlu1 %v8794_v63 }
  0x43   : > { %8577 = vset.pattern.permute.xlu0 %v12204_v43 }
  0x44   : > { %595 = vperm.xlu0 %8577, %v9044_v39  }
  0x48   : > { %8578 = vset.pattern.permute.xlu0 %v12201_v44 }
  0x49   : > { %648 = vperm.xlu0 %8578, %v9044_v39  }
  0x4d   : > { %8579 = vset.pattern.permute.xlu0 %v12200_v45 }
  0x4e   : > { %701 = vperm.xlu0 %8579, %v9044_v39  }
  0x52   : > { %8580 = vset.pattern.permute.xlu0 %v8785_v46 }
  0x53   : > { %776 = vperm.xlu0 %8580, %v9044_v39  }
  0x57   : > { %8581 = vset.pattern.permute.xlu0 %v8786_v47 }
  0x58   : > { %832 = vperm.xlu0 %8581, %v9044_v39  }
  0x5c   : > { %8582 = vset.pattern.permute.xlu0 %v8787_v48 }
  0x5d   : > { %885 = vperm.xlu0 %8582, %v9044_v39  }
  0x61   : > { %8583 = vset.pattern.permute.xlu0 %v8788_v49 }
  0x62   : > { %938 = vperm.xlu0 %8583, %v9044_v39  }
  0x66   : > { %8584 = vset.pattern.permute.xlu0 %v8789_v50  ;;  %v7311_v50 = vld [vmem:[#allocation2 + $0xc] sm:$0xf] }
  0x67   : > { %1013 = vperm.xlu0 %8584, %v9044_v39  }
  0x6b   : > { %8585 = vset.pattern.permute.xlu0 %v8790_v51 }
  0x6c   : > { %1069 = vperm.xlu0 %8585, %v9044_v39  }
  0x70   : > { %8586 = vset.pattern.permute.xlu0 %v8791_v52 }
  0x71   : > { %1122 = vperm.xlu0 %8586, %v9044_v39  }
  0x75   : > { %8587 = vset.pattern.permute.xlu0 %v8792_v53 }
  0x76   : > { %1175 = vperm.xlu0 %8587, %v9044_v39  }
  0x7a   : > { %8588 = vset.pattern.permute.xlu0 %v8793_v54  ;;  %v8795_v54 = vmov 17  }
  0x97   : > { %v291_v55 = vpop.permute.xlu0 %290 }
  0x98   : > { %v9071_v58 = vrot.slane %v291_v55, 4  ;;  %v9124_v38 = vpop.permute.xlu1 %766 }
  0x9a   : > { %12301 = vst [vmem:[#allocation12_spill] sm:$0xff] %v9071_v58  ;;  %v9078_v60 = vsel %vm293_vm0, %v9071_v58, %v291_v55  ;;  %v298_v61 = vmul.f32 %v9071_v58, %v278_v56 }
  0x9b   : > { %12303 = vst [vmem:[#allocation14_spill] sm:$0xff] %v9078_v60  ;;  %v9083_v62 = vmul.f32 %v9078_v60, %v9069_v57  ;;  %v9098_v17 = vpop.permute.xlu0 %529 }
  0x9c   : > { %v324_v0 = vrot.slane %v298_v61, %v8980_v5  ;;  %v379_v13 = vrot.slane %v298_v61, %v8983_v6  ;;  %v9105_v23 = vrot.slane %v9098_v17, 4  ;;  %v432_v25 = vrot.slane %v298_v61, %v8986_v7  ;;  %v9144_v55 = vpop.permute.xlu1 %1003 }
  0x9d   : > { %v316_v3 = vrot.slane %v9083_v62, %v8980_v5  ;;  %v320_v4 = vrot.slane %v9083_v62, %v9074_v59  ;;  %v371_v10 = vrot.slane %v9083_v62, %v8983_v6  ;;  %v375_v11 = vrot.slane %v9083_v62, %v8989_v8 }
  0x9e   : > { %v339_v12 = vrot.slane %v324_v0, %v8980_v5  ;;  %v394_v22 = vrot.slane %v379_v13, %v8983_v6  ;;  %12304 = vst [vmem:[#allocation15_spill] sm:$0xff] %v9105_v23  ;;  %v537_v27 = vmul.f32 %v9105_v23, %v517_v21  ;;  %v447_v31 = vrot.slane %v432_v25, %v8986_v7 }
  0x9f   : > { %v331_v14 = vrot.slane %v316_v3, %v8980_v5  ;;  %v335_v15 = vrot.slane %v320_v4, %v8980_v5  ;;  %v386_v19 = vrot.slane %v371_v10, %v8983_v6  ;;  %v390_v20 = vrot.slane %v375_v11, %v8983_v6  ;;  %v1383_v26 = vpop.permute.xlu0 %1382 }
  0xa0   : > { %346 = vrot.lane.b32.xlu1 %v339_v12, %s8778_s28  ;;  %v485_v32 = vrot.slane %v298_v61, %v8992_v9  ;;  %v9113_v33 = vrot.slane %v1383_v26, 4  ;;  %v562_v34 = vrot.slane %v537_v27, %v8980_v5  ;;  %v616_v52 = vrot.slane %v537_v27, %v8983_v6  ;;  %v754_v61 = vld [vmem:[#allocation2 + $0x8] sm:$0xf]  ;;  %v9159_v11 = vpop.permute.xlu1 %1617 }
  0xa1   : > { %v343_v18 = vcombine.low %v331_v14, %v335_v15  ;;  %v398_v30 = vcombine.low %v386_v19, %v390_v20  ;;  %v9156_v4 = vrot.slane %v9124_v38, 4  ;;  %v669_v10 = vrot.slane %v537_v27, %v8986_v7 }
  0xa2   : > { %12305 = vst [vmem:[#allocation16_spill] sm:$0xff] %v9113_v33  ;;  %v500_v35 = vrot.slane %v485_v32, %v8992_v9  ;;  %v9121_v36 = vsel %vm1063_vm1, %v9113_v33, %v1383_v26  ;;  %v577_v47 = vrot.slane %v562_v34, %v8980_v5  ;;  %v9138_v51 = vmul.f32 %v9113_v33, %v1370_v37 }
  0xa3   : > { %344 = vrot.lane.b32.xlu0 %v343_v18, %s8778_s28  ;;  %12306 = vst [vmem:[#allocation17_spill] sm:$0xff] %v9121_v36  ;;  %v9126_v46 = vpop.permute.xlu0 %1852  ;;  %v9135_v49 = vmul.f32 %v9121_v36, %v9024_v28  ;;  %v631_v3 = vrot.slane %v616_v52, %v8983_v6  ;;  %12309 = vst [vmem:[#allocation20_spill] sm:$0xff] %v9156_v4  ;;  %v8796_v12 = vmov 20   ;;  %v774_v13 = vmul.f32 %v9156_v4, %v754_v61 }
  0xa4   : > { %401 = vrot.lane.b32.xlu1 %v394_v22, %s8778_s28  ;;  %v9131_v48 = vrot.slane %v9126_v46, 4  ;;  %v1414_v56 = vrot.slane %v9138_v51, %v8980_v5  ;;  %v684_v19 = vrot.slane %v669_v10, %v8986_v7  ;;  %v722_v20 = vrot.slane %v537_v27, %v8992_v9  ;;  %v9172_v25 = vpop.permute.xlu1 %2087 }
  0xa5   : > { %v1459_v63 = vrot.slane %v9135_v49, %v8983_v6  ;;  %v1463_v0 = vrot.slane %v9135_v49, %v8989_v8  ;;  %v799_v21 = vrot.slane %v774_v13, %v8980_v5  ;;  %v9178_v32 = vrot.slane %v9172_v25, 4 }
  0xa6   : > { %12307 = vst [vmem:[#allocation18_spill] sm:$0xff] %v9131_v48  ;;  %v9142_v53 = vmul.f32 %v7311_v50, %v9131_v48  ;;  %v1429_v14 = vrot.slane %v1414_v56, %v8980_v5  ;;  %v737_v26 = vrot.slane %v722_v20, %v8992_v9  ;;  %v853_v27 = vrot.slane %v774_v13, %v8983_v6 }
  0xa7   : > { %399 = vrot.lane.b32.xlu0 %v398_v30, %s8778_s28  ;;  %v1474_v15 = vrot.slane %v1459_v63, %v8983_v6  ;;  %v1478_v18 = vrot.slane %v1463_v0, %v8983_v6  ;;  %v8797_v30 = vmov 23   ;;  %12310 = vst [vmem:[#allocation21_spill] sm:$0xff] %v9178_v32  ;;  %v9183_v34 = vmul.f32 %v7311_v50, %v9178_v32 }
  0xa8   : > { %454 = vrot.lane.b32.xlu1 %v447_v31, %s8778_s28  ;;  %12308 = vst [vmem:[#allocation19_spill] sm:$0xff] %v9142_v53  ;;  %v814_v31 = vrot.slane %v799_v21, %v8980_v5  ;;  %v868_v37 = vrot.slane %v853_v27, %v8983_v6  ;;  %v906_v52 = vrot.slane %v774_v13, %v8986_v7  ;;  %v8798_v56 = vmov 24  }
  0xa9   : > { %v1486_v22 = vcombine.low %v1474_v15, %v1478_v18  ;;  %12311 = vst [vmem:[#allocation22_spill] sm:$0xff] %v9183_v34  ;;  %v959_v61 = vrot.slane %v774_v13, %v8992_v9  ;;  %v8800_v13 = vmov 26   ;;  %v428_v20 = vrot.slane %v9083_v62, %v9002_v16 }
  0xaa   : > { %v921_v50 = vrot.slane %v906_v52, %v8986_v7  ;;  %v8801_v21 = vmov 27   ;;  %v481_v27 = vrot.slane %v9083_v62, %v9014_v24 }
  0xab   : > { %1229 = vperm.xlu0 %8588, %v9044_v39   ;;  %v974_v0 = vrot.slane %v959_v61, %v8992_v9 }
  0xac   : > { %507 = vrot.lane.b32.xlu1 %v500_v35, %s8778_s28  ;;  %v991_v35 = vld [vmem:[#allocation2 + $0x8] sm:$0xf] }
  0xaf   : > { %8589 = vset.pattern.permute.xlu0 %v8795_v54 }
  0xb0   : > { %584 = vrot.lane.b32.xlu1 %v577_v47, %s8777_s25  ;;  %1265 = vperm.xlu0 %8589, %v9044_v39   ;;  %v9189_v47 = vrot.slane %v9144_v55, 4  ;;  %v9437_v45 = vpop.permute.xlu0 %301 }
  0xb1   : > { %12321 = vst [vmem:[#allocation32_spill] sm:$0xff] %v9437_v45 }
  0xb2   : > { %12312 = vst [vmem:[#allocation23_spill] sm:$0xff] %v9189_v47  ;;  %v9194_v54 = vmul.f32 %v9189_v47, %v991_v35  ;;  %v8802_v35 = vmov 28  }
  0xb4   : > { %638 = vrot.lane.b32.xlu1 %v631_v3, %s8777_s25  ;;  %8592 = vset.pattern.permute.xlu0 %v8796_v12  ;;  %v1036_v63 = vrot.slane %v9194_v54, %v8980_v5  ;;  %v8799_v3 = vmov 25   ;;  %v1090_v12 = vrot.slane %v9194_v54, %v8983_v6  ;;  %v1143_v18 = vrot.slane %v9194_v54, %v8986_v7 }
  0xb5   : > { %1391 = vperm.xlu0 %8592, %v9044_v39  }
  0xb6   : > { %v1051_v10 = vrot.slane %v1036_v63, %v8980_v5  ;;  %v1105_v15 = vrot.slane %v1090_v12, %v8983_v6 }
  0xb8   : > { %691 = vrot.lane.b32.xlu1 %v684_v19, %s8777_s25  ;;  %v424_v19 = vrot.slane %v9083_v62, %v8986_v7 }
  0xb9   : > { %1436 = vrot.lane.b32.xlu0 %v1429_v14, %s8774_s16  ;;  %v9213_v14 = vsel %vm532_vm2, %v9105_v23, %v9098_v17  ;;  %v477_v17 = vrot.slane %v9083_v62, %v8992_v9 }
  0xba   : > { %8595 = vset.pattern.permute.xlu0 %v8797_v30  ;;  %12313 = vst [vmem:[#allocation24_spill] sm:$0xff] %v9213_v14  ;;  %v439_v30 = vrot.slane %v424_v19, %v8986_v7 }
  0xbc   : > { %744 = vrot.lane.b32.xlu1 %v737_v26, %s8777_s25  ;;  %v1158_v26 = vrot.slane %v1143_v18, %v8986_v7 }
  0xbd   : > { %1487 = vrot.lane.b32.xlu0 %v1486_v22, %s8774_s16  ;;  %v536_v22 = vmul.f32 %v9213_v14, %v9069_v57 }
  0xbf   : > { %v558_v61 = vrot.slane %v536_v22, %v9074_v59  ;;  %v608_v62 = vrot.slane %v536_v22, %v8983_v6  ;;  %v612_v12 = vrot.slane %v536_v22, %v8989_v8 }
  0xc0   : > { %821 = vrot.lane.b32.xlu1 %v814_v31, %s8776_s24  ;;  %v443_v31 = vrot.slane %v428_v20, %v8986_v7  ;;  %v661_v20 = vrot.slane %v536_v22, %v8986_v7 }
  0xc1   : > { %1552 = vperm.xlu0 %8595, %v9044_v39   ;;  %v627_v19 = vrot.slane %v612_v12, %v8983_v6 }
  0xc2   : > { %v451_v52 = vcombine.low %v439_v30, %v443_v31  ;;  %v676_v31 = vrot.slane %v661_v20, %v8986_v7 }
  0xc4   : > { %875 = vrot.lane.b32.xlu1 %v868_v37, %s8776_s24  ;;  %v492_v37 = vrot.slane %v477_v17, %v8992_v9  ;;  %v8804_v17 = vmov 30  }
  0xc5   : > { %8596 = vset.pattern.permute.xlu0 %v8798_v56  ;;  %v496_v56 = vrot.slane %v481_v27, %v8992_v9 }
  0xc6   : > { %1626 = vperm.xlu0 %8596, %v9044_v39  }
  0xc7   : > { %v504_v63 = vcombine.low %v492_v37, %v496_v56  ;;  %v8805_v37 = vmov 31  }
  0xc8   : > { %928 = vrot.lane.b32.xlu1 %v921_v50, %s8776_s24  ;;  %v554_v50 = vrot.slane %v536_v22, %v8980_v5 }
  0xca   : > { %8597 = vset.pattern.permute.xlu0 %v8799_v3  ;;  %v569_v3 = vrot.slane %v554_v50, %v8980_v5 }
  0xcb   : > { %1681 = vperm.xlu0 %8597, %v9044_v39  }
  0xcc   : > { %981 = vrot.lane.b32.xlu1 %v974_v0, %s8776_s24  ;;  %v8803_v0 = vmov 29  }
  0xcf   : > { %8598 = vset.pattern.permute.xlu0 %v8800_v13  ;;  %v9249_v13 = vsel %vm769_vm3, %v9156_v4, %v9124_v38  ;;  %v714_v38 = vrot.slane %v536_v22, %v8992_v9 }
  0xd0   : > { %1058 = vrot.lane.b32.xlu1 %v1051_v10, %s8775_s23  ;;  %1734 = vperm.xlu0 %8598, %v9044_v39   ;;  %v573_v10 = vrot.slane %v558_v61, %v8980_v5  ;;  %12314 = vst [vmem:[#allocation25_spill] sm:$0xff] %v9249_v13 }
  0xd1   : > { %v729_v50 = vrot.slane %v714_v38, %v8992_v9 }
  0xd2   : > { %v581_v18 = vcombine.low %v569_v3, %v573_v10 }
  0xd4   : > { %1112 = vrot.lane.b32.xlu1 %v1105_v15, %s8775_s23  ;;  %8599 = vset.pattern.permute.xlu0 %v8801_v21  ;;  %v623_v15 = vrot.slane %v608_v62, %v8983_v6  ;;  %v665_v21 = vrot.slane %v536_v22, %v9002_v16 }
  0xd5   : > { %1787 = vperm.xlu0 %8599, %v9044_v39  }
  0xd6   : > { %v635_v30 = vcombine.low %v623_v15, %v627_v19  ;;  %v680_v27 = vrot.slane %v665_v21, %v8986_v7  ;;  %v9278_v15 = vsel %vm352_vm4, %v9178_v32, %v9172_v25  ;;  %v9292_v25 = vsel %vm1006_vm5, %v9189_v47, %v9144_v55 }
  0xd7   : > { %12315 = vst [vmem:[#allocation26_spill] sm:$0xff] %v9278_v15  ;;  %v9285_v20 = vmul.f32 %v9278_v15, %v9024_v28  ;;  %12316 = vst [vmem:[#allocation27_spill] sm:$0xff] %v9292_v25 }
  0xd8   : > { %1165 = vrot.lane.b32.xlu1 %v1158_v26, %s8775_s23  ;;  %v773_v26 = vmul.f32 %v9249_v13, %v9069_v57  ;;  %v688_v56 = vcombine.low %v676_v31, %v680_v27 }
  0xd9   : > { %8600 = vset.pattern.permute.xlu0 %v8802_v35  ;;  %v718_v35 = vrot.slane %v536_v22, %v9014_v24  ;;  %v2217_v58 = vrot.slane %v9285_v20, %v8986_v7 }
  0xda   : > { %1861 = vperm.xlu0 %8600, %v9044_v39   ;;  %v795_v62 = vrot.slane %v773_v26, %v9074_v59  ;;  %v849_v12 = vrot.slane %v773_v26, %v8989_v8  ;;  %v902_v19 = vrot.slane %v773_v26, %v9002_v16  ;;  %v951_v55 = vrot.slane %v773_v26, %v8992_v9 }
  0xdb   : > { %v733_v61 = vrot.slane %v718_v35, %v8992_v9  ;;  %v2270_v35 = vrot.slane %v9285_v20, %v8992_v9 }
  0xdc   : > { %452 = vrot.lane.b32.xlu1 %v451_v52, %s8778_s28  ;;  %v791_v52 = vrot.slane %v773_v26, %v8980_v5  ;;  %v810_v10 = vrot.slane %v795_v62, %v8980_v5  ;;  %v917_v27 = vrot.slane %v902_v19, %v8986_v7 }
  0xdd   : > { %v741_v3 = vcombine.low %v729_v50, %v733_v61  ;;  %v955_v50 = vrot.slane %v773_v26, %v9014_v24  ;;  %v8808_v61 = vmov 34  }
  0xde   : > { %8601 = vset.pattern.permute.xlu0 %v8803_v0  ;;  %v806_v22 = vrot.slane %v791_v52, %v8980_v5  ;;  %v845_v0 = vrot.slane %v773_v26, %v8983_v6  ;;  %v1010_v52 = vmul.f32 %v9292_v25, %v9069_v57 }
  0xdf   : > { %1916 = vperm.xlu0 %8601, %v9044_v39   ;;  %v970_v57 = vrot.slane %v955_v50, %v8992_v9 }
  0xe0   : > { %505 = vrot.lane.b32.xlu1 %v504_v63, %s8778_s28  ;;  %v8806_v63 = vmov 32   ;;  %v818_v21 = vcombine.low %v806_v22, %v810_v10  ;;  %v860_v38 = vrot.slane %v845_v0, %v8983_v6  ;;  %v966_v0 = vrot.slane %v951_v55, %v8992_v9  ;;  %v9328_v55 = vpop.permute.xlu1 %358 }
  0xe1   : > { %v1032_v10 = vrot.slane %v1010_v52, %v9074_v59  ;;  %12317 = vst [vmem:[#allocation28_spill] sm:$0xff] %v9328_v55 }
  0xe3   : > { %8602 = vset.pattern.permute.xlu0 %v8804_v17  ;;  %v8807_v17 = vmov 33  }
  0xe4   : > { %582 = vrot.lane.b32.xlu1 %v581_v18, %s8777_s25  ;;  %1969 = vperm.xlu0 %8602, %v9044_v39   ;;  %v898_v18 = vrot.slane %v773_v26, %v8986_v7  ;;  %v8809_v26 = vmov 35  }
  0xe6   : > { %v913_v31 = vrot.slane %v898_v18, %v8986_v7  ;;  %v1086_v18 = vrot.slane %v1010_v52, %v8989_v8 }
  0xe8   : > { %636 = vrot.lane.b32.xlu1 %v635_v30, %s8777_s25  ;;  %8603 = vset.pattern.permute.xlu0 %v8805_v37  ;;  %v864_v30 = vrot.slane %v849_v12, %v8983_v6  ;;  %v2274_v37 = vrot.slane %v9285_v20, %v9014_v24  ;;  %v925_v62 = vcombine.low %v913_v31, %v917_v27 }
  0xe9   : > { %2022 = vperm.xlu0 %8603, %v9044_v39   ;;  %v1082_v12 = vrot.slane %v1010_v52, %v8983_v6  ;;  %v1101_v31 = vrot.slane %v1086_v18, %v8983_v6 }
  0xea   : > { %v2289_v22 = vrot.slane %v2274_v37, %v8992_v9  ;;  %v1139_v37 = vrot.slane %v1010_v52, %v9002_v16 }
  0xec   : > { %689 = vrot.lane.b32.xlu1 %v688_v56, %s8777_s25  ;;  %v872_v56 = vcombine.low %v860_v38, %v864_v30  ;;  %v1047_v38 = vrot.slane %v1032_v10, %v8980_v5  ;;  %v1097_v30 = vrot.slane %v1082_v12, %v8983_v6 }
  0xed   : > { %8604 = vset.pattern.permute.xlu0 %v8806_v63  ;;  %v2285_v63 = vrot.slane %v2270_v35, %v8992_v9  ;;  %v1135_v35 = vrot.slane %v1010_v52, %v8986_v7 }
  0xee   : > { %2096 = vperm.xlu0 %8604, %v9044_v39  }
  0xef   : > { %v2297_v19 = vcombine.low %v2285_v63, %v2289_v22  ;;  %v1150_v50 = vrot.slane %v1135_v35, %v8986_v7  ;;  %v1192_v63 = vrot.slane %v1010_v52, %v9014_v24 }
  0xf0   : > { %742 = vrot.lane.b32.xlu1 %v741_v3, %s8777_s25  ;;  %v1028_v3 = vrot.slane %v1010_v52, %v8980_v5 }
  0xf2   : > { %8605 = vset.pattern.permute.xlu0 %v8807_v17  ;;  %v1043_v17 = vrot.slane %v1028_v3, %v8980_v5  ;;  %v9338_v3 = vpop.permute.xlu1 %411 }
  0xf3   : > { %2151 = vperm.xlu0 %8605, %v9044_v39   ;;  %12318 = vst [vmem:[#allocation29_spill] sm:$0xff] %v9338_v3 }
  0xf4   : > { %819 = vrot.lane.b32.xlu1 %v818_v21, %s8776_s24  ;;  %v978_v21 = vcombine.low %v966_v0, %v970_v57  ;;  %v1055_v27 = vcombine.low %v1043_v17, %v1047_v38  ;;  %v1207_v57 = vrot.slane %v1192_v63, %v8992_v9  ;;  %v1406_v17 = vrot.slane %v9135_v49, %v8980_v5 }
  0xf5   : > { %v1516_v63 = vrot.slane %v9135_v49, %v9002_v16 }
  0xf7   : > { %8606 = vset.pattern.permute.xlu0 %v8808_v61  ;;  %v1154_v61 = vrot.slane %v1139_v37, %v8986_v7 }
  0xf8   : > { %873 = vrot.lane.b32.xlu1 %v872_v56, %s8776_s24  ;;  %2204 = vperm.xlu0 %8606, %v9044_v39   ;;  %v1109_v56 = vcombine.low %v1097_v30, %v1101_v31  ;;  %v1421_v30 = vrot.slane %v1406_v17, %v8980_v5  ;;  %v1565_v17 = vrot.slane %v9135_v49, %v8992_v9 }
  0xf9   : > { %v1162_v22 = vcombine.low %v1150_v50, %v1154_v61  ;;  %v8812_v50 = vmov 22   ;;  %v1467_v61 = vrot.slane %v9138_v51, %v8983_v6 }
  0xfc   : > { %926 = vrot.lane.b32.xlu1 %v925_v62, %s8776_s24  ;;  %8607 = vset.pattern.permute.xlu0 %v8809_v26  ;;  %v1188_v62 = vrot.slane %v1010_v52, %v8992_v9  ;;  %v1196_v26 = vrot.slane %v9194_v54, %v8992_v9  ;;  %v1410_v54 = vrot.slane %v9135_v49, %v9074_v59 }
  0xfd   : > { %2257 = vperm.xlu0 %8607, %v9044_v39  }
  0xfe   : > { %v1203_v0 = vrot.slane %v1188_v62, %v8992_v9  ;;  %v1211_v52 = vrot.slane %v1196_v26, %v8992_v9  ;;  %v1425_v31 = vrot.slane %v1410_v54, %v8980_v5  ;;  %v1512_v62 = vrot.slane %v9135_v49, %v8986_v7 }
  0xff   : > { %v9380_v26 = vrot.slane %v9159_v11, 4  ;;  %v1569_v54 = vrot.slane %v9135_v49, %v9014_v24 }
 0x100   : > { %979 = vrot.lane.b32.xlu1 %v978_v21, %s8776_s24  ;;  %v1215_v10 = vcombine.low %v1203_v0, %v1207_v57  ;;  %v8810_v21 = vmov 19   ;;  %v1433_v37 = vcombine.low %v1421_v30, %v1425_v31  ;;  %v1482_v0 = vrot.slane %v1467_v61, %v8983_v6 }
 0x101   : > { %2298 = vrot.lane.b32.xlu0 %v2297_v19, %s8769_s10  ;;  %v1527_v57 = vrot.slane %v1512_v62, %v8986_v7  ;;  %12319 = vst [vmem:[#allocation30_spill] sm:$0xff] %v9380_v26  ;;  %v9395_v30 = vsel %vm826_vm6, %v9380_v26, %v9159_v11  ;;  %v1584_v61 = vrot.slane %v1569_v54, %v8992_v9 }
 0x102   : > { %8608 = vset.pattern.permute.xlu0 %v12199_v1  ;;  %12320 = vst [vmem:[#allocation31_spill] sm:$0xff] %v9395_v30  ;;  %v1573_v11 = vrot.slane %v9138_v51, %v8992_v9 }
 0x104   : > { %1056 = vrot.lane.b32.xlu1 %v1055_v27, %s8775_s23  ;;  %v8811_v27 = vmov 21  }
 0x108   : > { %1110 = vrot.lane.b32.xlu1 %v1109_v56, %s8775_s23 }
 0x10c   : > { %1163 = vrot.lane.b32.xlu1 %v1162_v22, %s8775_s23 }
 0x110   : > { %1216 = vrot.lane.b32.xlu1 %v1215_v10, %s8775_s23  ;;  %v1531_v10 = vrot.slane %v1516_v63, %v8986_v7 }
 0x112   : > { %v9343_v12 = vpop.permute.xlu1 %346 }
 0x114   : > { %1218 = vrot.lane.b32.xlu1 %v1211_v52, %s8775_s23 }
 0x116   : > { %v9347_v18 = vpop.permute.xlu1 %401 }
 0x118   : > { %1300 = vperm.xlu1 %8590, %v9044_v39  }
 0x11a   : > { %v9350_v19 = vpop.permute.xlu1 %454 }
 0x11c   : > { %8591 = vset.pattern.permute.xlu1 %v8810_v21  ;;  %v1539_v21 = vcombine.low %v1527_v57, %v1531_v10  ;;  %v1605_v57 = vld [vmem:[#allocation2 + $0xc] sm:$0xf] }
 0x11d   : > { %1335 = vperm.xlu1 %8591, %v9044_v39   ;;  %v1624_v54 = vmul.f32 %v9380_v26, %v1605_v57 }
 0x11e   : > { %v9357_v38 = vpop.permute.xlu1 %507 }
 0x11f   : > { %v1808_v40 = vrot.slane %v1624_v54, %v8992_v9 }
 0x121   : > { %8593 = vset.pattern.permute.xlu1 %v8811_v27  ;;  %v1623_v27 = vmul.f32 %v9395_v30, %v9024_v28  ;;  %v1823_v53 = vrot.slane %v1808_v40, %v8992_v9 }
 0x122   : > { %v9361_v35 = vpop.permute.xlu1 %584  ;;  %1446 = vperm.xlu1 %8593, %v9044_v39  }
 0x123   : > { %v1641_v63 = vrot.slane %v1623_v27, %v8980_v5  ;;  %v1751_v1 = vrot.slane %v1623_v27, %v9002_v16 }
 0x126   : > { %v9364_v56 = vpop.permute.xlu1 %638  ;;  %1434 = vrot.lane.b32.xlu1 %v1433_v37, %s8774_s16 }
 0x127   : > { %8594 = vset.pattern.permute.xlu1 %v8812_v50  ;;  %v1580_v50 = vrot.slane %v1565_v17, %v8992_v9 }
 0x129   : > { %v1592_v49 = vcombine.low %v1580_v50, %v1584_v61  ;;  %v1649_v50 = vrot.slane %v1624_v54, %v8980_v5  ;;  %v1694_v61 = vrot.slane %v1623_v27, %v8983_v6 }
 0x12a   : > { %v9373_v22 = vpop.permute.xlu1 %691  ;;  %1499 = vperm.xlu1 %8594, %v9044_v39   ;;  %v1520_v39 = vrot.slane %v9138_v51, %v8986_v7 }
 0x12c   : > { %v1535_v37 = vrot.slane %v1520_v39, %v8986_v7  ;;  %v1656_v39 = vrot.slane %v1641_v63, %v8980_v5  ;;  %v1709_v63 = vrot.slane %v1694_v61, %v8983_v6  ;;  %v1766_v61 = vrot.slane %v1751_v1, %v8986_v7 }
 0x12e   : > { %v9382_v52 = vpop.permute.xlu1 %744  ;;  %1489 = vrot.lane.b32.xlu1 %v1482_v0, %s8774_s16  ;;  %v1645_v0 = vrot.slane %v1623_v27, %v9074_v59 }
 0x12f   : > { %8609 = vset.pattern.permute.xlu1 %v12198_v29  ;;  %v1698_v29 = vrot.slane %v1623_v27, %v8989_v8 }
 0x130   : > { %v1660_v17 = vrot.slane %v1645_v0, %v8980_v5 }
 0x131   : > { %v1713_v0 = vrot.slane %v1698_v29, %v8983_v6 }
 0x132   : > { %v9397_v31 = vpop.permute.xlu1 %821  ;;  %1540 = vrot.lane.b32.xlu1 %v1539_v21, %s8774_s16  ;;  %v1588_v21 = vrot.slane %v1573_v11, %v8992_v9  ;;  %v1668_v51 = vcombine.low %v1656_v39, %v1660_v17  ;;  %v1664_v11 = vrot.slane %v1649_v50, %v8980_v5  ;;  %v1702_v39 = vrot.slane %v1624_v54, %v8983_v6 }
 0x133   : > { %v1747_v17 = vrot.slane %v1623_v27, %v8986_v7 }
 0x134   : > { %v1717_v29 = vrot.slane %v1702_v39, %v8983_v6  ;;  %v1800_v39 = vrot.slane %v1623_v27, %v8992_v9 }
 0x135   : > { %v1762_v50 = vrot.slane %v1747_v17, %v8986_v7  ;;  %v1804_v17 = vrot.slane %v1623_v27, %v9014_v24 }
 0x136   : > { %v9405_v62 = vpop.permute.xlu1 %875  ;;  %1542 = vrot.lane.b32.xlu1 %v1535_v37, %s8774_s16 }
 0x137   : > { %v1774_v44 = vcombine.low %v1762_v50, %v1766_v61  ;;  %v1819_v43 = vrot.slane %v1804_v17, %v8992_v9 }
 0x13a   : > { %v9412_v10 = vpop.permute.xlu1 %928  ;;  %1593 = vrot.lane.b32.xlu1 %v1592_v49, %s8774_s16 }
 0x13e   : > { %v9419_v37 = vpop.permute.xlu1 %981  ;;  %1595 = vrot.lane.b32.xlu1 %v1588_v21, %s8774_s16  ;;  %v1721_v21 = vcombine.low %v1709_v63, %v1713_v0  ;;  %v9451_v63 = vsel %vm589_vm7, %v9131_v48, %v9126_v46  ;;  %v9453_v0 = vpop.permute.xlu0 %464  ;;  %v1815_v46 = vrot.slane %v1800_v39, %v8992_v9 }
 0x13f   : > { %12323 = vst [vmem:[#allocation34_spill] sm:$0xff] %v9451_v63  ;;  %12324 = vst [vmem:[#allocation35_spill] sm:$0xff] %v9453_v0  ;;  %v1858_v1 = vmul.f32 %v9451_v63, %v9024_v28 }
 0x141   : > { %v1876_v27 = vrot.slane %v1858_v1, %v8980_v5  ;;  %v1880_v28 = vrot.slane %v1858_v1, %v9074_v59  ;;  %v1982_v13 = vrot.slane %v1858_v1, %v8986_v7  ;;  %v2035_v15 = vrot.slane %v1858_v1, %v8992_v9 }
 0x142   : > { %v9425_v49 = vpop.permute.xlu1 %1058  ;;  %1669 = vrot.lane.b32.xlu1 %v1668_v51, %s8770_s14  ;;  %v9466_v50 = vpop.permute.xlu0 %539 }
 0x143   : > { %12325 = vst [vmem:[#allocation36_spill] sm:$0xff] %v9466_v50  ;;  %v1891_v17 = vrot.slane %v1876_v27, %v8980_v5  ;;  %v2050_v47 = vrot.slane %v2035_v15, %v8992_v9 }
 0x146   : > { %v9431_v57 = vpop.permute.xlu1 %1112  ;;  %1671 = vrot.lane.b32.xlu1 %v1664_v11, %s8770_s14  ;;  %v9480_v34 = vpop.permute.xlu0 %595 }
 0x147   : > { %12326 = vst [vmem:[#allocation37_spill] sm:$0xff] %v9480_v34 }
 0x14a   : > { %v9439_v51 = vpop.permute.xlu1 %1165  ;;  %1722 = vrot.lane.b32.xlu1 %v1721_v21, %s8770_s14  ;;  %v1755_v21 = vrot.slane %v1624_v54, %v8986_v7 }
 0x14b   : > { %12322 = vst [vmem:[#allocation33_spill] sm:$0xff] %v9439_v51 }
 0x14c   : > { %v1770_v42 = vrot.slane %v1755_v21, %v8986_v7  ;;  %v1859_v21 = vmul.f32 %v9131_v48, %v1840_v41  ;;  %v1929_v41 = vrot.slane %v1858_v1, %v8983_v6 }
 0x14e   : > { %1724 = vrot.lane.b32.xlu1 %v1717_v29, %s8770_s14  ;;  %v9446_v11 = vpop.permute.xlu1 %452  ;;  %v1884_v54 = vrot.slane %v1859_v21, %v8980_v5  ;;  %v1944_v40 = vrot.slane %v1929_v41, %v8983_v6  ;;  %v1937_v25 = vrot.slane %v1859_v21, %v8983_v6  ;;  %v1990_v48 = vrot.slane %v1859_v21, %v8986_v7 }
 0x14f   : > { %v2043_v36 = vrot.slane %v1859_v21, %v8992_v9 }
 0x150   : > { %v1952_v41 = vrot.slane %v1937_v25, %v8983_v6 }
 0x152   : > { %1775 = vrot.lane.b32.xlu1 %v1774_v44, %s8770_s14  ;;  %v9461_v29 = vpop.permute.xlu1 %505  ;;  %v1827_v44 = vcombine.low %v1815_v46, %v1819_v43  ;;  %v1933_v46 = vrot.slane %v1858_v1, %v8989_v8 }
 0x156   : > { %1777 = vrot.lane.b32.xlu1 %v1770_v42, %s8770_s14  ;;  %v9469_v61 = vpop.permute.xlu1 %582  ;;  %v1895_v42 = vrot.slane %v1880_v28, %v8980_v5  ;;  %v1899_v28 = vrot.slane %v1884_v54, %v8980_v5 }
 0x157   : > { %v586_v51 = vrot.slane %v9469_v61, 4 }
 0x158   : > { %v1903_v43 = vcombine.low %v1891_v17, %v1895_v42 }
 0x15a   : > { %1828 = vrot.lane.b32.xlu1 %v1827_v44, %s8770_s14  ;;  %v9476_v39 = vpop.permute.xlu1 %636  ;;  %v9489_v44 = vpop.permute.xlu0 %648 }
 0x15b   : > { %12327 = vst [vmem:[#allocation38_spill] sm:$0xff] %v9489_v44 }
 0x15e   : > { %1830 = vrot.lane.b32.xlu1 %v1823_v53, %s8770_s14  ;;  %v9484_v63 = vpop.permute.xlu1 %689  ;;  %v1948_v53 = vrot.slane %v1933_v46, %v8983_v6  ;;  %v9500_v30 = vpop.permute.xlu0 %701  ;;  %v1997_v46 = vrot.slane %v1982_v13, %v8986_v7 }
 0x15f   : > { %12328 = vst [vmem:[#allocation39_spill] sm:$0xff] %v9500_v30 }
 0x160   : > { %v1956_v42 = vcombine.low %v1944_v40, %v1948_v53 }
 0x162   : > { %1904 = vrot.lane.b32.xlu1 %v1903_v43, %s8773_s15  ;;  %v9492_v27 = vpop.permute.xlu1 %742  ;;  %v1986_v43 = vrot.slane %v1858_v1, %v9002_v16  ;;  %v9511_v14 = vpop.permute.xlu0 %776 }
 0x163   : > { %12329 = vst [vmem:[#allocation40_spill] sm:$0xff] %v9511_v14 }
 0x166   : > { %1906 = vrot.lane.b32.xlu1 %v1899_v28, %s8773_s15  ;;  %v9498_v17 = vpop.permute.xlu1 %819  ;;  %v2001_v28 = vrot.slane %v1986_v43, %v8986_v7  ;;  %v9522_v13 = vpop.permute.xlu0 %832  ;;  %v2005_v43 = vrot.slane %v1990_v48, %v8986_v7  ;;  %v2075_v48 = vld [vmem:[#allocation2 + $0xc] sm:$0xf] }
 0x167   : > { %12330 = vst [vmem:[#allocation41_spill] sm:$0xff] %v9522_v13  ;;  %v2094_v15 = vmul.f32 %v9178_v32, %v2075_v48  ;;  %v2168_v48 = vrot.slane %v9285_v20, %v8989_v8 }
 0x168   : > { %v2009_v53 = vcombine.low %v1997_v46, %v2001_v28 }
 0x169   : > { %v2119_v60 = vrot.slane %v2094_v15, %v8980_v5  ;;  %v2225_v8 = vrot.slane %v2094_v15, %v8986_v7 }
 0x16a   : > { %1957 = vrot.lane.b32.xlu1 %v1956_v42, %s8773_s15  ;;  %v9506_v54 = vpop.permute.xlu1 %873  ;;  %v2039_v42 = vrot.slane %v1858_v1, %v9014_v24  ;;  %v2111_v1 = vrot.slane %v9285_v20, %v8980_v5  ;;  %v9535_v4 = vpop.permute.xlu0 %885 }
 0x16b   : > { %12331 = vst [vmem:[#allocation42_spill] sm:$0xff] %v9535_v4 }
 0x16e   : > { %1959 = vrot.lane.b32.xlu1 %v1952_v41, %s8773_s15  ;;  %v9514_v40 = vpop.permute.xlu1 %926  ;;  %v2054_v41 = vrot.slane %v2039_v42, %v8992_v9  ;;  %v2058_v42 = vrot.slane %v2043_v36, %v8992_v9 }
 0x170   : > { %v2062_v28 = vcombine.low %v2050_v47, %v2054_v41  ;;  %v9545_v41 = vpop.permute.xlu0 %938 }
 0x171   : > { %12332 = vst [vmem:[#allocation43_spill] sm:$0xff] %v9545_v41 }
 0x172   : > { %2010 = vrot.lane.b32.xlu1 %v2009_v53, %s8773_s15  ;;  %v9520_v25 = vpop.permute.xlu1 %979  ;;  %v2115_v53 = vrot.slane %v9285_v20, %v9074_v59 }
 0x174   : > { %v2130_v47 = vrot.slane %v2115_v53, %v8980_v5  ;;  %v9558_v32 = vpop.permute.xlu0 %1013 }
 0x175   : > { %12333 = vst [vmem:[#allocation44_spill] sm:$0xff] %v9558_v32 }
 0x176   : > { %2012 = vrot.lane.b32.xlu1 %v2005_v43, %s8773_s15  ;;  %v9528_v46 = vpop.permute.xlu1 %1056  ;;  %v2126_v43 = vrot.slane %v2111_v1, %v8980_v5  ;;  %v2134_v1 = vrot.slane %v2119_v60, %v8980_v5 }
 0x178   : > { %v2138_v23 = vcombine.low %v2126_v43, %v2130_v47  ;;  %v2172_v47 = vrot.slane %v2094_v15, %v8983_v6  ;;  %v9569_v60 = vpop.permute.xlu0 %1069 }
 0x179   : > { %12335 = vst [vmem:[#allocation46_spill] sm:$0xff] %v9569_v60 }
 0x17a   : > { %2063 = vrot.lane.b32.xlu1 %v2062_v28, %s8773_s15  ;;  %v9542_v21 = vpop.permute.xlu1 %1110  ;;  %v2164_v28 = vrot.slane %v9285_v20, %v8983_v6 }
 0x17c   : > { %v2179_v53 = vrot.slane %v2164_v28, %v8983_v6  ;;  %v2187_v28 = vrot.slane %v2172_v47, %v8983_v6  ;;  %v2278_v47 = vrot.slane %v2094_v15, %v8992_v9  ;;  %v8813_v15 = vmov 36  }
 0x17e   : > { %2065 = vrot.lane.b32.xlu1 %v2058_v42, %s8773_s15  ;;  %v9553_v36 = vpop.permute.xlu1 %1163  ;;  %v2183_v42 = vrot.slane %v2168_v48, %v8983_v6  ;;  %v2232_v48 = vrot.slane %v2217_v58, %v8986_v7 }
 0x180   : > { %v2191_v43 = vcombine.low %v2179_v53, %v2183_v42 }
 0x182   : > { %2139 = vrot.lane.b32.xlu1 %v2138_v23, %s8769_s10  ;;  %v2221_v23 = vrot.slane %v9285_v20, %v9002_v16  ;;  %v9566_v24 = vpop.permute.xlu1 %1216  ;;  %v9578_v20 = vpop.permute.xlu0 %1122  ;;  %v2240_v16 = vrot.slane %v2225_v8, %v8986_v7 }
 0x183   : > { %12334 = vst [vmem:[#allocation45_spill] sm:$0xff] %v9566_v24  ;;  %12337 = vst [vmem:[#allocation48_spill] sm:$0xff] %v9578_v20 }
 0x186   : > { %2141 = vrot.lane.b32.xlu1 %v2134_v1, %s8769_s10  ;;  %v2236_v1 = vrot.slane %v2221_v23, %v8986_v7  ;;  %v9575_v53 = vpop.permute.xlu1 %1218  ;;  %v9586_v58 = vpop.permute.xlu0 %1175 }
 0x187   : > { %12336 = vst [vmem:[#allocation47_spill] sm:$0xff] %v9575_v53  ;;  %12339 = vst [vmem:[#allocation50_spill] sm:$0xff] %v9586_v58  ;;  %v8816_v58 = vmov 39  }
 0x188   : > { %v2244_v42 = vcombine.low %v2232_v48, %v2236_v1  ;;  %v9595_v48 = vld [vmem:[%s12193_s2] sm:$0xf] }
 0x189   : > { %12341 = vst [vmem:[#allocation52_spill] sm:$0xff] %v9595_v48 }
 0x18a   : > { %2192 = vrot.lane.b32.xlu1 %v2191_v43, %s8769_s10  ;;  %v9597_v1 = vpop.permute.xlu0 %344 }
 0x18e   : > { %2194 = vrot.lane.b32.xlu1 %v2187_v28, %s8769_s10  ;;  %v2293_v28 = vrot.slane %v2278_v47, %v8992_v9  ;;  %v9607_v47 = vld [vmem:[%s12192_s1] sm:$0xff] }
 0x18f   : > { %12344 = vst [vmem:[#allocation55_spill] sm:$0xff] %v9607_v47 }
 0x192   : > { %2245 = vrot.lane.b32.xlu1 %v2244_v42, %s8769_s10  ;;  %v400_v42 = vpop.permute.xlu0 %399 }
 0x193   : > { %v9581_v43 = vpop.permute.xlu1 %1300 }
 0x194   : > { %12338 = vst [vmem:[#allocation49_spill] sm:$0xff] %v9581_v43  ;;  %v8814_v43 = vmov 37  }
 0x196   : > { %2247 = vrot.lane.b32.xlu1 %v2240_v16, %s8769_s10 }
 0x198   : > { %v9588_v23 = vpop.permute.xlu1 %1335 }
 0x199   : > { %12340 = vst [vmem:[#allocation51_spill] sm:$0xff] %v9588_v23  ;;  %v9612_v23 = vpop.permute.xlu0 %1229 }
 0x19a   : > { %2300 = vrot.lane.b32.xlu1 %v2293_v28, %s8769_s10  ;;  %12346 = vst [vmem:[#allocation57_spill] sm:$0xff] %v9612_v23  ;;  %v8817_v23 = vmov 54  }
 0x19d   : > { %v9599_v8 = vpop.permute.xlu1 %1446 }
 0x19e   : > { %12342 = vst [vmem:[#allocation53_spill] sm:$0xff] %v9599_v8  ;;  %2365 = vperm.xlu1 %8609, %v9595_v48   ;;  %v8815_v8 = vmov 38  }
 0x1a1   : > { %v9602_v16 = vpop.permute.xlu1 %1434 }
 0x1a2   : > { %12343 = vst [vmem:[#allocation54_spill] sm:$0xff] %v9602_v16  ;;  %8610 = vset.pattern.permute.xlu1 %v8813_v15  ;;  %v9617_v15 = vpop.permute.xlu0 %1265 }
 0x1a3   : > { %2387 = vperm.xlu1 %8610, %v9607_v47   ;;  %12348 = vst [vmem:[#allocation59_spill] sm:$0xff] %v9617_v15  ;;  %v8818_v15 = vmov 55  }
 0x1a5   : > { %v9610_v28 = vpop.permute.xlu1 %1499 }
 0x1a6   : > { %12345 = vst [vmem:[#allocation56_spill] sm:$0xff] %v9610_v28  ;;  %v9625_v28 = vpop.permute.xlu0 %1391 }
 0x1a7   : > { %8611 = vset.pattern.permute.xlu1 %v8814_v43  ;;  %12351 = vst [vmem:[#allocation62_spill] sm:$0xff] %v9625_v28 }
 0x1a8   : > { %2442 = vperm.xlu1 %8611, %v9607_v47  }
 0x1a9   : > { %v9615_v48 = vpop.permute.xlu1 %1489 }
 0x1aa   : > { %12347 = vst [vmem:[#allocation58_spill] sm:$0xff] %v9615_v48 }
 0x1ac   : > { %8612 = vset.pattern.permute.xlu1 %v8815_v8  ;;  %v9630_v8 = vpop.permute.xlu0 %1436 }
 0x1ad   : > { %2495 = vperm.xlu1 %8612, %v9607_v47   ;;  %v9620_v16 = vpop.permute.xlu1 %1540  ;;  %12353 = vst [vmem:[#allocation64_spill] sm:$0xff] %v9630_v8 }
 0x1ae   : > { %12349 = vst [vmem:[#allocation60_spill] sm:$0xff] %v9620_v16 }
 0x1b0   : > { %v9637_v28 = vpop.permute.xlu0 %1487 }
 0x1b1   : > { %8613 = vset.pattern.permute.xlu1 %v8816_v58  ;;  %v9622_v20 = vpop.permute.xlu1 %1542  ;;  %v3397_v58 = vld [vmem:[#allocation2 + $0xc] sm:$0xf]  ;;  %12356 = vst [vmem:[#allocation67_spill] sm:$0xff] %v9637_v28  ;;  %v8821_v28 = vmov 58  }
 0x1b2   : > { %12350 = vst [vmem:[#allocation61_spill] sm:$0xff] %v9622_v20  ;;  %2548 = vperm.xlu1 %8613, %v9607_v47   ;;  %v8819_v20 = vmov 839922192  }
 0x1b3   : > { %v305_v24 = vunpack.c.l.s4 %v8819_v20  ;;  %v404_v20 = vrot.slane %v9347_v18, 4 }
 0x1b4   : > { %v9649_v60 = vpop.permute.xlu0 %1552 }
 0x1b5   : > { %v9627_v43 = vpop.permute.xlu1 %1593  ;;  %12358 = vst [vmem:[#allocation69_spill] sm:$0xff] %v9649_v60  ;;  %v3615_v60 = vld [vmem:[#allocation2 + $0xc] sm:$0xf] }
 0x1b6   : > { %12352 = vst [vmem:[#allocation63_spill] sm:$0xff] %v9627_v43  ;;  %8628 = vset.pattern.permute.xlu1 %v8817_v23  ;;  %v9640_v43 = vmul.f32 %v3397_v58, %v9113_v33  ;;  %v8820_v23 = vmov 57   ;;  %v349_v33 = vrot.slane %v9343_v12, 4 }
 0x1b7   : > { %3327 = vperm.xlu1 %8628, %v9607_v47  }
 0x1b8   : > { %v3477_v59 = vrot.slane %v9640_v43, %v8983_v6  ;;  %v3530_v18 = vrot.slane %v9640_v43, %v8986_v7 }
 0x1b9   : > { %v9632_v48 = vpop.permute.xlu1 %1595 }
 0x1ba   : > { %12354 = vst [vmem:[#allocation65_spill] sm:$0xff] %v9632_v48  ;;  %v306_v48 = vunpack.c.0.s8 %v305_v24  ;;  %v3492_v53 = vrot.slane %v3477_v59, %v8983_v6 }
 0x1bb   : > { %8629 = vset.pattern.permute.xlu1 %v8818_v15  ;;  %v403_v15 = vrot.slane %v400_v42, 4 }
 0x1bc   : > { %3362 = vperm.xlu1 %8629, %v9607_v47   ;;  %v9656_v24 = vsub.s32 %v306_v48, %v8971_v2 }
 0x1bd   : > { %v9635_v16 = vpop.permute.xlu1 %1669 }
 0x1be   : > { %12355 = vst [vmem:[#allocation66_spill] sm:$0xff] %v9635_v16  ;;  %v348_v16 = vrot.slane %v9597_v1, 4  ;;  %v367_v59 = vrot.slane %v9328_v55, %v9656_v24 }
 0x1c0   : > { %8631 = vset.pattern.permute.xlu1 %v8820_v23  ;;  %v456_v23 = vrot.slane %v9446_v11, 4  ;;  %v351_v48 = vsel %vm350_vm8, %v348_v16, %v349_v33  ;;  %v3545_v33 = vrot.slane %v3530_v18, %v8986_v7  ;;  %v3583_v16 = vrot.slane %v9640_v43, %v8992_v9 }
 0x1c1   : > { %3456 = vperm.xlu1 %8631, %v9607_v47   ;;  %v9643_v8 = vpop.permute.xlu1 %1671  ;;  %v548_v18 = vrot.slane %v9466_v50, %v9656_v24 }
 0x1c2   : > { %12357 = vst [vmem:[#allocation68_spill] sm:$0xff] %v9643_v8  ;;  %v405_v8 = vsel %vm350_vm8, %v403_v15, %v404_v20  ;;  %v510_v15 = vrot.slane %v9357_v38, 4  ;;  %v12360_v38 = vmov 3  }
 0x1c3   : > { %v406_v12 = vsel %vm352_vm4, %v400_v42, %v405_v8  ;;  %v353_v42 = vsel %vm352_vm4, %v9597_v1, %v351_v48  ;;  %v640_v8 = vrot.slane %v9476_v39, 4  ;;  %v420_v1 = vrot.slane %v9338_v3, %v9656_v24 }
 0x1c4   : > { %v693_v48 = vrot.slane %v9484_v63, 4 }
 0x1c5   : > { %8632 = vset.pattern.permute.xlu1 %v8821_v28  ;;  %v9651_v58 = vpop.permute.xlu1 %1722  ;;  %v457_v28 = vrot.slane %v9350_v19, 4  ;;  %v9676_v19 = vmul.f32 %v3615_v60, %v9380_v26 }
 0x1c6   : > { %12359 = vst [vmem:[#allocation70_spill] sm:$0xff] %v9651_v58  ;;  %3509 = vperm.xlu1 %8632, %v9607_v47   ;;  %v509_v58 = vrot.slane %v9461_v29, 4  ;;  %v310_v47 = vrot.slane %v9437_v45, %v9656_v24  ;;  %v9680_v45 = vpop.permute.xlu0 %1626 }
 0x1c7   : > { %v458_v20 = vsel %vm350_vm8, %v456_v23, %v457_v28  ;;  %v473_v23 = vrot.slane %v9453_v0, %v9656_v24  ;;  %v408_v28 = vmul.f32 %v406_v12, %v367_v59  ;;  %v3598_v59 = vrot.slane %v3583_v16, %v8992_v9 }
 0x1c8   : > { %v511_v60 = vsel %vm350_vm8, %v509_v58, %v510_v15  ;;  %v459_v55 = vsel %vm352_vm4, %v9446_v11, %v458_v20  ;;  %v355_v15 = vmul.f32 %v353_v42, %v310_v47  ;;  %v3642_v11 = vrot.slane %v9676_v19, %v8980_v5 }
 0x1c9   : > { %v9668_v2 = vpop.permute.xlu1 %1724  ;;  %v512_v12 = vsel %vm352_vm4, %v9461_v29, %v511_v60  ;;  %v694_v20 = vrot.slane %v9373_v22, 4  ;;  %v461_v50 = vmul.f32 %v459_v55, %v420_v1  ;;  %v657_v47 = vrot.slane %v9489_v44, %v9656_v24 }
 0x1ca   : > { %3499 = vrot.lane.b32.xlu1 %v3492_v53, %s8774_s16  ;;  %v587_v53 = vrot.slane %v9361_v35, 4  ;;  %v641_v35 = vrot.slane %v9364_v56, 4  ;;  %v9717_v29 = vpop.permute.xlu0 %1681  ;;  %v747_v55 = vrot.slane %v9382_v52, 4  ;;  %v514_v22 = vmul.f32 %v512_v12, %v473_v23 }
 0x1cb   : > { %8647 = vset.pattern.permute.xlu1 %v12360_v38  ;;  %v695_v60 = vsel %vm350_vm8, %v693_v48, %v694_v20  ;;  %v824_v1 = vrot.slane %v9397_v31, 4  ;;  %v877_v23 = vrot.slane %v9506_v54, 4  ;;  %v710_v48 = vrot.slane %v9500_v30, %v9656_v24 }
 0x1cc   : > { %v588_v58 = vsel %vm350_vm8, %v586_v51, %v587_v53  ;;  %v642_v56 = vsel %vm350_vm8, %v640_v8, %v641_v35  ;;  %v746_v51 = vrot.slane %v9492_v27, 4  ;;  %v604_v53 = vrot.slane %v9480_v34, %v9656_v24 }
 0x1cd   : > { %v9697_v38 = vpop.permute.xlu1 %1775  ;;  %v590_v16 = vsel %vm589_vm7, %v9469_v61, %v588_v58  ;;  %v823_v8 = vrot.slane %v9498_v17, 4  ;;  %v3657_v35 = vrot.slane %v3642_v11, %v8980_v5  ;;  %v3695_v61 = vrot.slane %v9676_v19, %v8983_v6 }
 0x1ce   : > { %3552 = vrot.lane.b32.xlu1 %v3545_v33, %s8774_s16  ;;  %v409_v33 = vadd.f32 %v408_v28, %v355_v15  ;;  %v643_v28 = vsel %vm589_vm7, %v9476_v39, %v642_v56  ;;  %v592_v15 = vmul.f32 %v590_v16, %v548_v18  ;;  %v748_v52 = vsel %vm350_vm8, %v746_v51, %v747_v55  ;;  %v9748_v51 = vpop.permute.xlu0 %1734 }
 0x1cf   : > { %v785_v31 = vrot.slane %v9511_v14, %v9656_v24  ;;  %v878_v12 = vrot.slane %v9405_v62, 4  ;;  %v696_v39 = vsel %vm589_vm7, %v9484_v63, %v695_v60  ;;  %v825_v18 = vsel %vm350_vm8, %v823_v8, %v824_v1 }
 0x1d0   : > { %v462_v58 = vadd.f32 %v461_v50, %v409_v33  ;;  %v645_v50 = vmul.f32 %v643_v28, %v604_v53  ;;  %v930_v20 = vrot.slane %v9514_v40, 4  ;;  %v931_v56 = vrot.slane %v9412_v10, 4 }
 0x1d1   : > { %v9721_v42 = vpop.permute.xlu1 %1777  ;;  %v749_v62 = vsel %vm589_vm7, %v9492_v27, %v748_v52  ;;  %v3710_v33 = vrot.slane %v3695_v61, %v8983_v6  ;;  %v3748_v63 = vrot.slane %v9676_v19, %v8986_v7  ;;  %v698_v53 = vmul.f32 %v696_v39, %v657_v47 }
 0x1d2   : > { %3605 = vrot.lane.b32.xlu1 %v3598_v59, %s8774_s16  ;;  %v515_v11 = vadd.f32 %v514_v22, %v462_v58  ;;  %v879_v55 = vsel %vm350_vm8, %v877_v23, %v878_v12  ;;  %v983_v22 = vrot.slane %v9520_v25, 4  ;;  %v841_v60 = vrot.slane %v9522_v13, %v9656_v24 }
 0x1d3   : > { %v984_v10 = vrot.slane %v9419_v37, 4  ;;  %v827_v8 = vsel %vm826_vm6, %v9498_v17, %v825_v18  ;;  %v751_v28 = vmul.f32 %v749_v62, %v710_v48  ;;  %v1060_v47 = vrot.slane %v9528_v46, 4  ;;  %v8731_v62 = vld [vmem:[#allocation2 + $0x4] sm:$0xff] }
 0x1d4   : > { %v593_v16 = vadd.f32 %v592_v15, %v515_v11  ;;  %v894_v61 = vrot.slane %v9535_v4, %v9656_v24  ;;  %v1061_v58 = vrot.slane %v9425_v49, 4  ;;  %v880_v37 = vsel %vm826_vm6, %v9506_v54, %v879_v55  ;;  %v9778_v11 = vpop.permute.xlu0 %1787 }
 0x1d5   : > { %v9742_v59 = vpop.permute.xlu1 %1828  ;;  %v3763_v17 = vrot.slane %v3748_v63, %v8986_v7  ;;  %v829_v52 = vmul.f32 %v827_v8, %v785_v31  ;;  %v985_v23 = vsel %vm350_vm8, %v983_v22, %v984_v10  ;;  %v1114_v48 = vrot.slane %v9542_v21, 4  ;;  %v12362_v22 = vld [vmem:[#allocation47_spill] sm:$0xff]  ;;  %v12363_v10 = vld [vmem:[#allocation46_spill] sm:$0xff] }
 0x1d6   : > { %3664 = vrot.lane.b32.xlu1 %v3657_v35, %s8770_s14  ;;  %v646_v1 = vadd.f32 %v645_v50, %v593_v16  ;;  %v932_v35 = vsel %vm350_vm8, %v930_v20, %v931_v56  ;;  %v947_v12 = vrot.slane %v9545_v41, %v9656_v24  ;;  %v1115_v39 = vrot.slane %v9431_v57, 4 }
 0x1d7   : > { %v933_v49 = vsel %vm826_vm6, %v9514_v40, %v932_v35  ;;  %v882_v18 = vmul.f32 %v880_v37, %v841_v60  ;;  %v1062_v31 = vsel %vm350_vm8, %v1060_v47, %v1061_v58  ;;  %v1167_v20 = vrot.slane %v9553_v36, 4 }
 0x1d8   : > { %v699_v15 = vadd.f32 %v698_v53, %v646_v1  ;;  %v1022_v56 = vrot.slane %v9558_v32, %v9656_v24  ;;  %v1243_v57 = vrot.slane %v8731_v62, %v8980_v5  ;;  %v986_v40 = vsel %vm826_vm6, %v9520_v25, %v985_v23  ;;  %v12364_v1 = vld [vmem:[#allocation13_spill] sm:$0xff] }
 0x1d9   : > { %v9762_v27 = vpop.permute.xlu1 %1830  ;;  %v935_v53 = vmul.f32 %v933_v49, %v894_v61  ;;  %v1116_v55 = vsel %vm350_vm8, %v1114_v48, %v1115_v39  ;;  %v1221_v60 = vrot.slane %v12362_v22, 4  ;;  %v1078_v8 = vrot.slane %v12363_v10, %v9656_v24  ;;  %v12366_v48 = vld [vmem:[#allocation48_spill] sm:$0xff] }
 0x1da   : > { %3717 = vrot.lane.b32.xlu1 %v3710_v33, %s8770_s14  ;;  %v752_v54 = vadd.f32 %v751_v28, %v699_v15  ;;  %v12361_v33 = vld [vmem:[#allocation33_spill] sm:$0xff]  ;;  %v1247_v28 = vrot.slane %v8731_v62, %v12364_v1  ;;  %v1064_v35 = vsel %vm1063_vm1, %v9528_v46, %v1062_v31  ;;  %v988_v37 = vmul.f32 %v986_v40, %v947_v12  ;;  %v12367_v31 = vld [vmem:[#allocation8_spill] sm:$0xff] }
 0x1db   : > { %v1168_v63 = vrot.slane %v12361_v33, 4  ;;  %v1253_v15 = vrot.slane %v1243_v57, %v8980_v5  ;;  %v1117_v23 = vsel %vm1063_vm1, %v9542_v21, %v1116_v55  ;;  %v1131_v39 = vrot.slane %v12366_v48, %v9656_v24  ;;  %v12368_v21 = vld [vmem:[#allocation50_spill] sm:$0xff] }
 0x1dc   : > { %v830_v16 = vadd.f32 %v829_v52, %v752_v54  ;;  %v9805_v52 = vpop.permute.xlu0 %1861  ;;  %v1066_v46 = vmul.f32 %v1064_v35, %v1022_v56  ;;  %v1257_v12 = vrot.slane %v1247_v28, %v8980_v5  ;;  %v1313_v22 = vrot.slane %v8731_v62, %v8986_v7 }
 0x1dd   : > { %v9782_v50 = vpop.permute.xlu1 %1904  ;;  %v1169_v25 = vsel %vm350_vm8, %v1167_v20, %v1168_v63  ;;  %v1282_v20 = vrot.slane %v8731_v62, %v12367_v31  ;;  %v1184_v63 = vrot.slane %v12368_v21, %v9656_v24  ;;  %v12372_v21 = vld [vmem:[#allocation59_spill] sm:$0xff] }
 0x1de   : > { %3770 = vrot.lane.b32.xlu1 %v3763_v17, %s8770_s14  ;;  %v883_v58 = vadd.f32 %v882_v18, %v830_v16  ;;  %v12365_v17 = vld [vmem:[#allocation45_spill] sm:$0xff]  ;;  %v1278_v18 = vrot.slane %v8731_v62, %v8983_v6  ;;  %v1170_v57 = vsel %vm1063_vm1, %v9553_v36, %v1169_v25  ;;  %v1119_v16 = vmul.f32 %v1117_v23, %v1078_v8 }
 0x1df   : > { %v1220_v61 = vrot.slane %v12365_v17, 4  ;;  %v1172_v55 = vmul.f32 %v1170_v57, %v1131_v39  ;;  %v1260_v35 = vcombine.low %v1253_v15, %v1257_v12  ;;  %v1292_v36 = vrot.slane %v1282_v20, %v8983_v6  ;;  %v12370_v8 = vld [vmem:[#allocation57_spill] sm:$0xff] }
 0x1e0   : > { %v936_v49 = vadd.f32 %v935_v53, %v883_v58  ;;  %v1288_v58 = vrot.slane %v1278_v18, %v8983_v6  ;;  %v9827_v25 = vpop.permute.xlu0 %1916  ;;  %v1323_v15 = vrot.slane %v1313_v22, %v8986_v7  ;;  %v1274_v48 = vrot.slane %v12372_v21, %v9656_v24 }
 0x1e1   : > { %v9800_v47 = vpop.permute.xlu1 %1906  ;;  %v1222_v54 = vsel %vm350_vm8, %v1220_v61, %v1221_v60  ;;  %v12369_v60 = vld [vmem:[#allocation10_spill] sm:$0xff]  ;;  %v1348_v61 = vrot.slane %v8731_v62, %v8992_v9 }
 0x1e2   : > { %v989_v40 = vadd.f32 %v988_v37, %v936_v49  ;;  %v1223_v56 = vsel %vm1063_vm1, %v12365_v17, %v1222_v54  ;;  %v1317_v28 = vrot.slane %v8731_v62, %v12369_v60  ;;  %v1238_v17 = vrot.slane %v12370_v8, %v9656_v24  ;;  %v12371_v49 = vld [vmem:[#allocation11_spill] sm:$0xff] }
 0x1e3   : > { %v1225_v39 = vmul.f32 %v1223_v56, %v1184_v63  ;;  %v1295_v18 = vcombine.low %v1288_v58, %v1292_v36  ;;  %v1358_v20 = vrot.slane %v1348_v61, %v8992_v9  ;;  %v12376_v36 = vld [vmem:[#allocation58_spill] sm:$0xff] }
 0x1e4   : > { %v1067_v53 = vadd.f32 %v1066_v46, %v989_v40  ;;  %v1352_v46 = vrot.slane %v8731_v62, %v12371_v49  ;;  %v1327_v12 = vrot.slane %v1317_v28, %v8986_v7  ;;  %v1262_v40 = vmul.f32 %v1260_v35, %v1238_v17  ;;  %v9843_v63 = vpop.permute.xlu0 %1969  ;;  %v12373_v62 = vld [vmem:[#allocation54_spill] sm:$0xff]  ;;  %v12375_v28 = vld [vmem:[#allocation64_spill] sm:$0xff] }
 0x1e5   : > { %v9817_v33 = vpop.permute.xlu1 %1957  ;;  %v1438_v56 = vrot.slane %v12373_v62, 4  ;;  %v1439_v58 = vrot.slane %v12375_v28, 4  ;;  %v1492_v61 = vrot.slane %v12376_v36, 4  ;;  %v1297_v35 = vmul.f32 %v1295_v18, %v1274_v48  ;;  %v12381_v48 = vld [vmem:[#allocation60_spill] sm:$0xff]  ;;  %v12382_v18 = vld [vmem:[#allocation65_spill] sm:$0xff] }
 0x1e6   : > { %v1120_v23 = vadd.f32 %v1119_v16, %v1067_v53  ;;  %v1362_v16 = vrot.slane %v1352_v46, %v8992_v9  ;;  %v1330_v53 = vcombine.low %v1323_v15, %v1327_v12  ;;  %v12378_v46 = vld [vmem:[#allocation67_spill] sm:$0xff]  ;;  %v12379_v15 = vld [vmem:[#allocation61_spill] sm:$0xff] }
 0x1e7   : > { %v1440_v32 = vsel %vm350_vm8, %v1438_v56, %v1439_v58  ;;  %v1545_v12 = vrot.slane %v12379_v15, 4  ;;  %v12384_v15 = vld [vmem:[#allocation68_spill] sm:$0xff] }
 0x1e8   : > { %v1173_v54 = vadd.f32 %v1172_v55, %v1120_v23  ;;  %v12374_v55 = vld [vmem:[#allocation49_spill] sm:$0xff]  ;;  %v1365_v21 = vcombine.low %v1358_v20, %v1362_v16  ;;  %v12377_v23 = vld [vmem:[#allocation51_spill] sm:$0xff]  ;;  %v9859_v4 = vpop.permute.xlu0 %2022  ;;  %v1598_v20 = vrot.slane %v12382_v18, 4  ;;  %v1441_v56 = vsel %vm1006_vm5, %v12373_v62, %v1440_v32 }
 0x1e9   : > { %v9830_v37 = vpop.permute.xlu1 %1959  ;;  %v1309_v22 = vrot.slane %v12374_v55, %v9656_v24  ;;  %v12380_v55 = vld [vmem:[#allocation62_spill] sm:$0xff]  ;;  %v1727_v32 = vrot.slane %v9668_v2, 4  ;;  %v1780_v2 = vrot.slane %v9721_v42, 4  ;;  %v1690_v42 = vrot.slane %v9717_v29, %v9656_v24 }
 0x1ea   : > { %v1226_v10 = vadd.f32 %v1225_v39, %v1173_v54  ;;  %v1344_v39 = vrot.slane %v12377_v23, %v9656_v24  ;;  %v1491_v54 = vrot.slane %v12378_v46, 4  ;;  %v1400_v28 = vrot.slane %v12380_v55, %v9656_v24 }
 0x1eb   : > { %v1332_v41 = vmul.f32 %v1330_v53, %v1309_v22  ;;  %v12383_v22 = vld [vmem:[#allocation63_spill] sm:$0xff]  ;;  %v1674_v55 = vrot.slane %v12384_v15, 4 }
 0x1ec   : > { %v1263_v17 = vadd.f32 %v1262_v40, %v1226_v10  ;;  %v1493_v36 = vsel %vm350_vm8, %v1491_v54, %v1492_v61  ;;  %v1544_v10 = vrot.slane %v12381_v48, 4  ;;  %v1367_v23 = vmul.f32 %v1365_v21, %v1344_v39  ;;  %v12385_v61 = vld [vmem:[#allocation53_spill] sm:$0xff] }
 0x1ed   : > { %v9838_v57 = vpop.permute.xlu1 %2010  ;;  %v1597_v58 = vrot.slane %v12383_v22, 4  ;;  %v1455_v54 = vrot.slane %v12385_v61, %v9656_v24  ;;  %v1494_v18 = vsel %vm1006_vm5, %v12378_v46, %v1493_v36  ;;  %v1443_v14 = vmul.f32 %v1441_v56, %v1400_v28  ;;  %v12387_v39 = vld [vmem:[#allocation69_spill] sm:$0xff]  ;;  %v9886_v46 = vpop.permute.xlu0 %2096 }
 0x1ee   : > { %v1298_v16 = vadd.f32 %v1297_v35, %v1263_v17  ;;  %v1546_v53 = vsel %vm350_vm8, %v1544_v10, %v1545_v12  ;;  %v12386_v17 = vld [vmem:[#allocation66_spill] sm:$0xff]  ;;  %v1561_v12 = vrot.slane %v12387_v39, %v9656_v24 }
 0x1ef   : > { %v1599_v35 = vsel %vm350_vm8, %v1597_v58, %v1598_v20  ;;  %v1673_v21 = vrot.slane %v12386_v17, 4  ;;  %v1547_v15 = vsel %vm1006_vm5, %v12381_v48, %v1546_v53  ;;  %v1496_v28 = vmul.f32 %v1494_v18, %v1455_v54  ;;  %v12389_v20 = vld [vmem:[#allocation70_spill] sm:$0xff] }
 0x1f0   : > { %v1333_v13 = vadd.f32 %v1332_v41, %v1298_v16  ;;  %v12388_v41 = vld [vmem:[#allocation56_spill] sm:$0xff]  ;;  %v1726_v56 = vrot.slane %v12389_v20, 4  ;;  %v1635_v58 = vrot.slane %v9680_v45, %v9656_v24  ;;  %v1779_v48 = vrot.slane %v9697_v38, 4 }
 0x1f1   : > { %v9850_v8 = vpop.permute.xlu1 %2012  ;;  %v1508_v16 = vrot.slane %v12388_v41, %v9656_v24  ;;  %v1675_v36 = vsel %vm350_vm8, %v1673_v21, %v1674_v55  ;;  %v1833_v54 = vrot.slane %v9762_v27, 4  ;;  %v1909_v21 = vrot.slane %v9800_v47, 4 }
 0x1f2   : > { %v1368_v10 = vadd.f32 %v1367_v23, %v1333_v13  ;;  %v1600_v13 = vsel %vm1006_vm5, %v12383_v22, %v1599_v35  ;;  %v1728_v39 = vsel %vm350_vm8, %v1726_v56, %v1727_v32  ;;  %v1676_v55 = vsel %vm769_vm3, %v12386_v17, %v1675_v36  ;;  %v9911_v17 = vpop.permute.xlu0 %2151 }
 0x1f3   : > { %v1549_v61 = vmul.f32 %v1547_v15, %v1508_v16  ;;  %v1602_v18 = vmul.f32 %v1600_v13, %v1561_v12  ;;  %v1781_v22 = vsel %vm350_vm8, %v1779_v48, %v1780_v2  ;;  %v1832_v35 = vrot.slane %v9742_v59, 4 }
 0x1f4   : > { %v1444_v23 = vadd.f32 %v1443_v14, %v1368_v10  ;;  %v1729_v14 = vsel %vm769_vm3, %v12389_v20, %v1728_v39  ;;  %v1743_v32 = vrot.slane %v9748_v51, %v9656_v24  ;;  %v1678_v10 = vmul.f32 %v1676_v55, %v1635_v58 }
 0x1f5   : > { %v9864_v40 = vpop.permute.xlu1 %2063  ;;  %v1782_v29 = vsel %vm769_vm3, %v9697_v38, %v1781_v22  ;;  %v1834_v12 = vsel %vm350_vm8, %v1832_v35, %v1833_v54  ;;  %v1908_v16 = vrot.slane %v9782_v50, 4  ;;  %v1962_v15 = vrot.slane %v9830_v37, 4 }
 0x1f6   : > { %v1497_v45 = vadd.f32 %v1496_v28, %v1444_v23  ;;  %v1731_v36 = vmul.f32 %v1729_v14, %v1690_v42  ;;  %v1796_v47 = vrot.slane %v9778_v11, %v9656_v24  ;;  %v1961_v20 = vrot.slane %v9817_v33, 4  ;;  %v2205_v48 = vpop.permute.xlu0 %2204 }
 0x1f7   : > { %v1910_v51 = vsel %vm350_vm8, %v1908_v16, %v1909_v21  ;;  %v2015_v56 = vrot.slane %v9850_v8, 4  ;;  %v1784_v58 = vmul.f32 %v1782_v29, %v1743_v32  ;;  %v1835_v38 = vsel %vm769_vm3, %v9742_v59, %v1834_v12 }
 0x1f8   : > { %v1550_v27 = vadd.f32 %v1549_v61, %v1497_v45  ;;  %v1870_v37 = vrot.slane %v9805_v52, %v9656_v24  ;;  %v1963_v23 = vsel %vm350_vm8, %v1961_v20, %v1962_v15  ;;  %v2014_v61 = vrot.slane %v9838_v57, 4 }
 0x1f9   : > { %v9878_v62 = vpop.permute.xlu1 %2065  ;;  %v1925_v39 = vrot.slane %v9827_v25, %v9656_v24  ;;  %v1911_v55 = vsel %vm532_vm2, %v9782_v50, %v1910_v51  ;;  %v1837_v54 = vmul.f32 %v1835_v38, %v1796_v47  ;;  %v2067_v42 = vrot.slane %v9864_v40, 4 }
 0x1fa   : > { %v1603_v28 = vadd.f32 %v1602_v18, %v1550_v27  ;;  %v2068_v11 = vrot.slane %v9878_v62, 4  ;;  %v2016_v59 = vsel %vm350_vm8, %v2014_v61, %v2015_v56  ;;  %v1978_v45 = vrot.slane %v9843_v63, %v9656_v24  ;;  %v2258_v29 = vpop.permute.xlu0 %2257 }
 0x1fb   : > { %v1964_v62 = vsel %vm532_vm2, %v9817_v33, %v1963_v23  ;;  %v1913_v25 = vmul.f32 %v1911_v55, %v1870_v37  ;;  %v2031_v21 = vrot.slane %v9859_v4, %v9656_v24  ;;  %v2017_v32 = vsel %vm532_vm2, %v9838_v57, %v2016_v59 }
 0x1fc   : > { %v1679_v2 = vadd.f32 %v1678_v10, %v1603_v28  ;;  %v2069_v14 = vsel %vm350_vm8, %v2067_v42, %v2068_v11  ;;  %v1966_v10 = vmul.f32 %v1964_v62, %v1925_v39  ;;  %v2105_v16 = vrot.slane %v9886_v46, %v9656_v24 }
 0x1fd   : > { %v9897_v53 = vpop.permute.xlu1 %2139  ;;  %v2070_v33 = vsel %vm532_vm2, %v9864_v40, %v2069_v14  ;;  %v2019_v28 = vmul.f32 %v2017_v32, %v1978_v45  ;;  %v2160_v51 = vrot.slane %v9911_v17, %v9656_v24  ;;  %v2213_v37 = vrot.slane %v2205_v48, %v9656_v24 }
 0x1fe   : > { %v1732_v8 = vadd.f32 %v1731_v36, %v1679_v2  ;;  %v2143_v35 = vrot.slane %v9897_v53, 4  ;;  %v2072_v47 = vmul.f32 %v2070_v33, %v2031_v21  ;;  %v2299_v46 = vpop.permute.xlu0 %2298  ;;  %v12391_v21 = vld [vmem:[#allocation55_spill] sm:$0xff]  ;;  %v8823_v32 = vmov 41  }
 0x1ff   : > { %v8829_v33 = vmov 47  }
 0x200   : > { %v1785_v18 = vadd.f32 %v1784_v58, %v1732_v8  ;;  %v2302_v8 = vrot.slane %v2299_v46, 4 }
 0x201   : > { %v2142_v41 = vpop.permute.xlu1 %2141 }
 0x202   : > { %v2144_v52 = vrot.slane %v2142_v41, 4  ;;  %v1838_v27 = vadd.f32 %v1837_v54, %v1785_v18 }
 0x204   : > { %v2145_v63 = vsel %vm350_vm8, %v2143_v35, %v2144_v52  ;;  %v1914_v15 = vadd.f32 %v1913_v25, %v1838_v27  ;;  %v12390_v35 = vld [vmem:[#allocation52_spill] sm:$0xff]  ;;  %v8824_v27 = vmov 42  }
 0x205   : > { %v2193_v13 = vpop.permute.xlu1 %2192  ;;  %v2146_v57 = vsel %vm293_vm0, %v9897_v53, %v2145_v63  ;;  %v8826_v63 = vmov 44  }
 0x206   : > { %v2196_v41 = vrot.slane %v2193_v13, 4  ;;  %v1967_v36 = vadd.f32 %v1966_v10, %v1914_v15  ;;  %v2148_v2 = vmul.f32 %v2146_v57, %v2105_v16  ;;  %v8825_v10 = vmov 43  }
 0x207   : > { %v8831_v16 = vmov 49   ;;  %v8832_v15 = vmov 50   ;;  %v8835_v57 = vmov 53  }
 0x208   : > { %v2020_v40 = vadd.f32 %v2019_v28, %v1967_v36  ;;  %v8833_v28 = vmov 51   ;;  %v3424_v36 = vrot.slane %v9640_v43, %v8980_v5 }
 0x209   : > { %v2195_v22 = vpop.permute.xlu1 %2194 }
 0x20a   : > { %v2197_v50 = vrot.slane %v2195_v22, 4  ;;  %v2073_v23 = vadd.f32 %v2072_v47, %v2020_v40  ;;  %v8836_v47 = vmov 56  }
 0x20c   : > { %v2198_v4 = vsel %vm350_vm8, %v2196_v41, %v2197_v50  ;;  %v2149_v55 = vadd.f32 %v2148_v2, %v2073_v23  ;;  %v8822_v50 = vmov 40   ;;  %v8827_v41 = vmov 45  }
 0x20d   : > { %v2246_v12 = vpop.permute.xlu1 %2245  ;;  %v2199_v20 = vsel %vm293_vm0, %v2193_v13, %v2198_v4  ;;  %v2266_v13 = vrot.slane %v2258_v29, %v9656_v24  ;;  %v8828_v29 = vmov 46   ;;  %v8834_v4 = vmov 52  }
 0x20e   : > { %v2249_v58 = vrot.slane %v2246_v12, 4  ;;  %v2201_v61 = vmul.f32 %v2199_v20, %v2160_v51  ;;  %v3439_v51 = vrot.slane %v3424_v36, %v8980_v5  ;;  %v8837_v23 = vmov 59  }
 0x210   : > { %v2202_v42 = vadd.f32 %v2201_v61, %v2149_v55  ;;  %v8838_v61 = vmov 60   ;;  %v8841_v55 = vmov 63  }
 0x211   : > { %v2248_v56 = vpop.permute.xlu1 %2247 }
 0x212   : > { %v2250_v38 = vrot.slane %v2248_v56, 4 }
 0x214   : > { %v2251_v11 = vsel %vm350_vm8, %v2249_v58, %v2250_v38 }
 0x215   : > { %v2252_v53 = vsel %vm293_vm0, %v2246_v12, %v2251_v11  ;;  %v2301_v39 = vpop.permute.xlu1 %2300  ;;  %v8830_v12 = vmov 48   ;;  %v8839_v11 = vmov 61  }
 0x216   : > { %v2254_v17 = vmul.f32 %v2252_v53, %v2213_v37  ;;  %v2303_v54 = vrot.slane %v2301_v39, 4  ;;  %v8840_v39 = vmov 62  }
 0x218   : > { %v2304_v59 = vsel %vm350_vm8, %v2302_v8, %v2303_v54  ;;  %v2255_v45 = vadd.f32 %v2254_v17, %v2202_v42  ;;  %v8842_v17 = vmov 64  }
 0x219   : > { %v2305_v52 = vsel %vm293_vm0, %v2299_v46, %v2304_v59  ;;  %v2366_v53 = vpop.permute.xlu1 %2365 }
 0x21a   : > { %v2307_v48 = vmul.f32 %v2305_v52, %v2266_v13 }
 0x21c   : > { %v2308_v18 = vadd.f32 %v2307_v48, %v2255_v45 }
 0x21e   : > { %v2310_v62 = vcombine.high %v2308_v18, %v2308_v18  ;;  %v2312_v22 = vsel %vm350_vm8, %v2308_v18, 0.0  ;;  %v9992_v8 = vpop.permute.xlu1 %2387 }
 0x220   : > { %v2313_v25 = vsel %vm350_vm8, %v2310_v62, 0.0 }
 0x221   : > { %v2314_v14 = vadd.f32 %v2313_v25, %v2312_v22 }
 0x223   : > { %2315 = vadd.xlane.f32.xlu0 %v2314_v14  ;;  %v9995_v54 = vpop.permute.xlu1 %2442 }
 0x228   : > { %v9997_v13 = vpop.permute.xlu1 %2495 }
 0x22d   : > { %v9999_v59 = vpop.permute.xlu1 %2548 }
 0x232   : > { %v10001_v42 = vpop.permute.xlu1 %3327 }
 0x233   : > { %12392 = vst [vmem:[#allocation33_spill] sm:$0xff] %v10001_v42 }
 0x237   : > { %v10003_v52 = vpop.permute.xlu1 %3362 }
 0x238   : > { %12393 = vst [vmem:[#allocation47_spill] sm:$0xff] %v10003_v52 }
 0x239   : > { %2353 = vperm.xlu0 %8608, %v12390_v35  }
 0x23c   : > { %v10005_v45 = vpop.permute.xlu1 %3456 }
 0x23d   : > { %8614 = vset.pattern.permute.xlu0 %v8822_v50  ;;  %12394 = vst [vmem:[#allocation13_spill] sm:$0xff] %v10005_v45 }
 0x23e   : > { %2605 = vperm.xlu0 %8614, %v12391_v21  }
 0x241   : > { %v10007_v48 = vpop.permute.xlu1 %3509 }
 0x242   : > { %8615 = vset.pattern.permute.xlu0 %v8823_v32  ;;  %12395 = vst [vmem:[#allocation45_spill] sm:$0xff] %v10007_v48 }
 0x243   : > { %2660 = vperm.xlu0 %8615, %v12391_v21  }
 0x247   : > { %8616 = vset.pattern.permute.xlu0 %v8824_v27 }
 0x248   : > { %2713 = vperm.xlu0 %8616, %v12391_v21  }
 0x24c   : > { %8617 = vset.pattern.permute.xlu0 %v8825_v10 }
 0x24d   : > { %2766 = vperm.xlu0 %8617, %v12391_v21  }
 0x251   : > { %8618 = vset.pattern.permute.xlu0 %v8826_v63 }
 0x252   : > { %2823 = vperm.xlu0 %8618, %v12391_v21  }
 0x256   : > { %8619 = vset.pattern.permute.xlu0 %v8827_v41 }
 0x257   : > { %2878 = vperm.xlu0 %8619, %v12391_v21  }
 0x25b   : > { %8620 = vset.pattern.permute.xlu0 %v8828_v29 }
 0x25c   : > { %2931 = vperm.xlu0 %8620, %v12391_v21  }
 0x260   : > { %8621 = vset.pattern.permute.xlu0 %v8829_v33 }
 0x261   : > { %2984 = vperm.xlu0 %8621, %v12391_v21  }
 0x265   : > { %8622 = vset.pattern.permute.xlu0 %v8830_v12  ;;  %v2373_v12 = vrot.slane %v2366_v53, %v9656_v24 }
 0x266   : > { %3041 = vperm.xlu0 %8622, %v12391_v21  }
 0x26a   : > { %8623 = vset.pattern.permute.xlu0 %v8831_v16 }
 0x26b   : > { %3096 = vperm.xlu0 %8623, %v12391_v21  }
 0x26f   : > { %8624 = vset.pattern.permute.xlu0 %v8832_v15  ;;  %v2378_v15 = vstv %s2376_s11 }
 0x270   : > { %3149 = vperm.xlu0 %8624, %v12391_v21  }
 0x274   : > { %8625 = vset.pattern.permute.xlu0 %v8833_v28 }
 0x275   : > { %3202 = vperm.xlu0 %8625, %v12391_v21  }
 0x279   : > { %8626 = vset.pattern.permute.xlu0 %v8834_v4 }
 0x27a   : > { %3256 = vperm.xlu0 %8626, %v12391_v21  }
 0x27e   : > { %8627 = vset.pattern.permute.xlu0 %v8835_v57 }
 0x27f   : > { %3292 = vperm.xlu0 %8627, %v12391_v21  }
 0x283   : > { %8630 = vset.pattern.permute.xlu0 %v8836_v47 }
 0x284   : > { %3401 = vperm.xlu0 %8630, %v12391_v21  }
 0x288   : > { %3446 = vrot.lane.b32.xlu0 %v3439_v51, %s8774_s16  ;;  %v12402_v51 = vld [vmem:[#allocation12_spill] sm:$0xff] }
 0x289   : > { %8633 = vset.pattern.permute.xlu0 %v8837_v23 }
 0x28c   : > { %3562 = vperm.xlu0 %8633, %v12391_v21  }
 0x290   : > { %8634 = vset.pattern.permute.xlu0 %v8838_v61 }
 0x291   : > { %3619 = vperm.xlu0 %8634, %v12391_v21  }
 0x295   : > { %8635 = vset.pattern.permute.xlu0 %v8839_v11 }
 0x296   : > { %3674 = vperm.xlu0 %8635, %v12391_v21  }
 0x29a   : > { %8636 = vset.pattern.permute.xlu0 %v8840_v39 }
 0x29b   : > { %3727 = vperm.xlu0 %8636, %v12391_v21  }
 0x29f   : > { %8637 = vset.pattern.permute.xlu0 %v8841_v55 }
 0x2a0   : > { %3780 = vperm.xlu0 %8637, %v12391_v21  }
 0x2a4   : > { %8638 = vset.pattern.permute.xlu0 %v8842_v17 }
 0x2ac   : > { %v2316_v20 = vpop.xlane.xlu0 %2315 }
 0x2ad   : > { %v2318_v56 = vmul.f32 0.00390625, %v2316_v20 }
 0x2af   : > { %v2326_v40 = vrot.slane %v2318_v56, %v9656_v24  ;;  %v12403_v56 = vld [vmem:[#allocation14_spill] sm:$0xff] }
 0x2b1   : > { %v2328_v2 = vsub.f32 %v2308_v18, %v2326_v40  ;;  %v10009_v18 = vpop.permute.xlu1 %3499 }
 0x2b2   : > { %12396 = vst [vmem:[#allocation57_spill] sm:$0xff] %v10009_v18 }
 0x2b3   : > { %v2329_v58 = vmul.f32 %v2328_v2, %v2328_v2 }
 0x2b4   : > { %v2354_v63 = vpop.permute.xlu0 %2353 }
 0x2b5   : > { %v2331_v38 = vcombine.high %v2329_v58, %v2329_v58  ;;  %v2333_v46 = vsel %vm350_vm8, %v2329_v58, 0.0  ;;  %v10011_v62 = vpop.permute.xlu1 %3552  ;;  %v2361_v41 = vrot.slane %v2354_v63, %v9656_v24 }
 0x2b6   : > { %12397 = vst [vmem:[#allocation59_spill] sm:$0xff] %v10011_v62 }
 0x2b7   : > { %v2334_v37 = vsel %vm350_vm8, %v2331_v38, 0.0 }
 0x2b8   : > { %v2335_v43 = vadd.f32 %v2334_v37, %v2333_v46 }
 0x2b9   : > { %v10013_v22 = vpop.permute.xlu1 %3605 }
 0x2ba   : > { %2336 = vadd.xlane.f32.xlu1 %v2335_v43  ;;  %12398 = vst [vmem:[#allocation54_spill] sm:$0xff] %v10013_v22 }
 0x2bd   : > { %v10015_v25 = vpop.permute.xlu1 %3664 }
 0x2be   : > { %12399 = vst [vmem:[#allocation49_spill] sm:$0xff] %v10015_v25 }
 0x2c1   : > { %v10017_v14 = vpop.permute.xlu1 %3717 }
 0x2c2   : > { %12400 = vst [vmem:[#allocation64_spill] sm:$0xff] %v10017_v14  ;;  %v12418_v14 = vld [vmem:[#allocation34_spill] sm:$0xff] }
 0x2c5   : > { %v10019_v35 = vpop.permute.xlu1 %3770 }
 0x2c6   : > { %12401 = vst [vmem:[#allocation58_spill] sm:$0xff] %v10019_v35 }
 0x343   : > { %v2337_v50 = vpop.xlane.xlu1 %2336 }
 0x344   : > { %v2338_v32 = vmul.f32 0.00390625, %v2337_v50  ;;  %v12404_v50 = vld [vmem:[#allocation15_spill] sm:$0xff] }
 0x346   : > { %v2339_v27 = vadd.f32 1e-05, %v2338_v32 }
 0x348   : > { %8714 = vrsqrt.f32 %v2339_v27 }
 0x355   : > { %v8715_v10 = vpop.eup %8714 }
 0x356   : > { %v2348_v29 = vrot.slane %v8715_v10, %v9656_v24 }
 0x358   : > { %v2350_v33 = vmul.f32 %v2348_v29, %v2328_v2  ;;  %v8843_v29 = vmov 65  }
 0x35a   : > { %v2363_v16 = vmul.f32 %v2361_v41, %v2350_v33 }
 0x35c   : > { %v2375_v28 = vadd.f32 %v2373_v12, %v2363_v16 }
 0x35e   : > { %vm2377_vm9 = vcmp.ge.f32.partialorder %v2375_v28, 0.0  ;;  %v2379_v4 = vmul.f32 %v2378_v15, %v2375_v28  ;;  %v8844_v15 = vmov 66  }
 0x360   : > { %v10024_v57 = vsel %vm2377_vm9, %v2375_v28, %v2379_v4 }
 0x361   : > { %2381 = vst [vmem:[#allocation2 + $0x4] sm:$0xff] %v10024_v57 }
 0x368   : > { %v2383_v36 = vld [vmem:[#allocation2 + $0x8] sm:$0xf]  ;;  %v10027_v47 = vld [vmem:[#allocation2] sm:$0xff] }
 0x369   : > { %v2385_v20 = vmul.f32 %v2383_v36, %v12402_v51  ;;  %v10032_v40 = vmul.f32 %v10027_v47, %v12403_v56  ;;  %v2601_v53 = vld [vmem:[#allocation2 + $0x8] sm:$0xf]  ;;  %v12405_v36 = vld [vmem:[#allocation20_spill] sm:$0xff] }
 0x36a   : > { %v2603_v32 = vmul.f32 %v2601_v53, %v12404_v50  ;;  %v2819_v16 = vld [vmem:[#allocation2 + $0x8] sm:$0xf] }
 0x36b   : > { %v2463_v2 = vrot.slane %v2385_v20, %v8983_v6  ;;  %v2410_v58 = vrot.slane %v2385_v20, %v8980_v5  ;;  %v2508_v38 = vrot.slane %v10032_v40, %v8986_v7  ;;  %v2512_v46 = vrot.slane %v10032_v40, %v12369_v60 }
 0x36c   : > { %v2516_v23 = vrot.slane %v2385_v20, %v8986_v7  ;;  %v2569_v17 = vrot.slane %v2385_v20, %v8992_v9  ;;  %v2628_v10 = vrot.slane %v2603_v32, %v8980_v5  ;;  %v2681_v41 = vrot.slane %v2603_v32, %v8983_v6 }
 0x36d   : > { %v2478_v37 = vrot.slane %v2463_v2, %v8983_v6  ;;  %v2425_v43 = vrot.slane %v2410_v58, %v8980_v5  ;;  %v2523_v61 = vrot.slane %v2508_v38, %v8986_v7  ;;  %v2527_v11 = vrot.slane %v2512_v46, %v8986_v7  ;;  %v12406_v2 = vld [vmem:[#allocation17_spill] sm:$0xff] }
 0x36e   : > { %v2531_v39 = vrot.slane %v2516_v23, %v8986_v7  ;;  %v2584_v27 = vrot.slane %v2569_v17, %v8992_v9  ;;  %v2643_v63 = vrot.slane %v2628_v10, %v8980_v5  ;;  %v2696_v33 = vrot.slane %v2681_v41, %v8983_v6  ;;  %v10081_v23 = vld [vmem:[%s12192_s1] sm:$0xff]  ;;  %v3037_v10 = vld [vmem:[#allocation2 + $0x8] sm:$0xf] }
 0x36f   : > { %2485 = vrot.lane.b32.xlu0 %v2478_v37, %s8778_s28  ;;  %2432 = vrot.lane.b32.xlu1 %v2425_v43, %s8778_s28  ;;  %v2535_v55 = vcombine.low %v2523_v61, %v2527_v11  ;;  %v2734_v12 = vrot.slane %v2603_v32, %v8986_v7  ;;  %v2787_v4 = vrot.slane %v2603_v32, %v8992_v9  ;;  %v8845_v38 = vmov 67  }
 0x370   : > { %v2821_v20 = vmul.f32 %v2819_v16, %v12405_v36  ;;  %v10069_v58 = vmul.f32 %v10024_v57, %v12406_v2  ;;  %v12408_v16 = vld [vmem:[#allocation26_spill] sm:$0xff] }
 0x371   : > { %v2749_v28 = vrot.slane %v2734_v12, %v8986_v7  ;;  %v2802_v46 = vrot.slane %v2787_v4, %v8992_v9 }
 0x372   : > { %v2846_v37 = vrot.slane %v2821_v20, %v8980_v5  ;;  %v3473_v43 = vrot.slane %v10069_v58, %v12367_v31  ;;  %v2899_v11 = vrot.slane %v2821_v20, %v8983_v6 }
 0x373   : > { %2538 = vrot.lane.b32.xlu1 %v2531_v39, %s8778_s28  ;;  %2536 = vrot.lane.b32.xlu0 %v2535_v55, %s8778_s28  ;;  %v8846_v55 = vmov 68  }
 0x374   : > { %v2861_v61 = vrot.slane %v2846_v37, %v8980_v5  ;;  %v3488_v39 = vrot.slane %v3473_v43, %v8983_v6  ;;  %v2914_v17 = vrot.slane %v2899_v11, %v8983_v6  ;;  %v8849_v11 = vmov 71  }
 0x377   : > { %2591 = vrot.lane.b32.xlu1 %v2584_v27, %s8778_s28  ;;  %3837 = vperm.xlu0 %8638, %v12391_v21   ;;  %v2952_v27 = vrot.slane %v2821_v20, %v8986_v7 }
 0x379   : > { %v2967_v41 = vrot.slane %v2952_v27, %v8986_v7  ;;  %v2402_v27 = vrot.slane %v10032_v40, %v8980_v5 }
 0x37b   : > { %2650 = vrot.lane.b32.xlu1 %v2643_v63, %s8777_s25  ;;  %8639 = vset.pattern.permute.xlu0 %v8843_v29  ;;  %v8847_v63 = vmov 69   ;;  %v3005_v29 = vrot.slane %v2821_v20, %v8992_v9 }
 0x37c   : > { %3892 = vperm.xlu0 %8639, %v12391_v21  }
 0x37f   : > { %2703 = vrot.lane.b32.xlu1 %v2696_v33, %s8777_s25  ;;  %v12407_v33 = vld [vmem:[#allocation23_spill] sm:$0xff] }
 0x380   : > { %8640 = vset.pattern.permute.xlu0 %v8844_v15  ;;  %v3039_v12 = vmul.f32 %v3037_v10, %v12407_v33  ;;  %v10102_v15 = vmul.f32 %v10024_v57, %v12408_v16  ;;  %v2406_v10 = vrot.slane %v10032_v40, %v12364_v1  ;;  %v12415_v33 = vld [vmem:[#allocation31_spill] sm:$0xff] }
 0x381   : > { %3945 = vperm.xlu0 %8640, %v12391_v21   ;;  %v3469_v21 = vrot.slane %v10069_v58, %v8983_v6  ;;  %v3616_v16 = vmul.f32 %v10024_v57, %v12415_v33 }
 0x382   : > { %v3064_v4 = vrot.slane %v3039_v12, %v8980_v5  ;;  %v4229_v20 = vrot.slane %v10102_v15, %v8992_v9 }
 0x383   : > { %2756 = vrot.lane.b32.xlu1 %v2749_v28, %s8777_s25  ;;  %v3484_v53 = vrot.slane %v3469_v21, %v8983_v6  ;;  %v3020_v28 = vrot.slane %v3005_v29, %v8992_v9  ;;  %v3117_v21 = vrot.slane %v3039_v12, %v8983_v6  ;;  %v3691_v51 = vrot.slane %v3616_v16, %v12367_v31 }
 0x384   : > { %v3079_v37 = vrot.slane %v3064_v4, %v8980_v5  ;;  %v4244_v43 = vrot.slane %v4229_v20, %v8992_v9  ;;  %v2421_v4 = vrot.slane %v2406_v10, %v8980_v5  ;;  %v3744_v35 = vrot.slane %v3616_v16, %v12369_v60 }
 0x385   : > { %8641 = vset.pattern.permute.xlu0 %v8845_v38  ;;  %v3496_v32 = vcombine.low %v3484_v53, %v3488_v39  ;;  %v8848_v38 = vmov 70   ;;  %v3132_v53 = vrot.slane %v3117_v21, %v8983_v6  ;;  %v3170_v39 = vrot.slane %v3039_v12, %v8986_v7  ;;  %v3833_v21 = vld [vmem:[#allocation2 + $0xc] sm:$0xf] }
 0x386   : > { %3998 = vperm.xlu0 %8641, %v10081_v23  }
 0x387   : > { %2809 = vrot.lane.b32.xlu1 %v2802_v46, %s8777_s25  ;;  %v4233_v46 = vrot.slane %v10102_v15, %v12371_v49 }
 0x38a   : > { %8642 = vset.pattern.permute.xlu0 %v8846_v55 }
 0x38b   : > { %2868 = vrot.lane.b32.xlu1 %v2861_v61, %s8776_s24  ;;  %4055 = vperm.xlu0 %8642, %v10081_v23   ;;  %v4248_v61 = vrot.slane %v4233_v46, %v8992_v9 }
 0x38d   : > { %v4256_v55 = vcombine.low %v4244_v43, %v4248_v61  ;;  %v12410_v43 = vld [vmem:[#allocation18_spill] sm:$0xff] }
 0x38e   : > { %v3835_v61 = vmul.f32 %v3833_v21, %v12410_v43 }
 0x38f   : > { %2921 = vrot.lane.b32.xlu1 %v2914_v17, %s8776_s24  ;;  %3497 = vrot.lane.b32.xlu0 %v3496_v32, %s8774_s16  ;;  %v3185_v17 = vrot.slane %v3170_v39, %v8986_v7  ;;  %v3223_v32 = vrot.slane %v3039_v12, %v8992_v9  ;;  %v2459_v12 = vrot.slane %v10032_v40, %v12367_v31 }
 0x390   : > { %8643 = vset.pattern.permute.xlu0 %v8847_v63  ;;  %v12409_v63 = vmov 2   ;;  %v3966_v10 = vrot.slane %v3835_v61, %v8986_v7 }
 0x391   : > { %v3238_v29 = vrot.slane %v3223_v32, %v8992_v9  ;;  %v3913_v32 = vrot.slane %v3835_v61, %v8983_v6 }
 0x393   : > { %2974 = vrot.lane.b32.xlu1 %v2967_v41, %s8776_s24  ;;  %4110 = vperm.xlu0 %8643, %v10081_v23   ;;  %v2455_v41 = vrot.slane %v10032_v40, %v8983_v6 }
 0x395   : > { %v2470_v46 = vrot.slane %v2455_v41, %v8983_v6  ;;  %v3981_v41 = vrot.slane %v3966_v10, %v8986_v7 }
 0x397   : > { %3027 = vrot.lane.b32.xlu1 %v3020_v28, %s8776_s24  ;;  %8644 = vset.pattern.permute.xlu0 %v8848_v38  ;;  %v2417_v28 = vrot.slane %v2402_v27, %v8980_v5  ;;  %v10140_v38 = vld [vmem:[%s12193_s2] sm:$0xf]  ;;  %v3928_v27 = vrot.slane %v3913_v32, %v8983_v6 }
 0x398   : > { %4163 = vperm.xlu0 %8644, %v10081_v23  }
 0x399   : > { %v2429_v20 = vcombine.low %v2417_v28, %v2421_v4  ;;  %v2565_v28 = vrot.slane %v10032_v40, %v12371_v49  ;;  %v12411_v4 = vld [vmem:[#allocation24_spill] sm:$0xff] }
 0x39b   : > { %3086 = vrot.lane.b32.xlu1 %v3079_v37, %s8775_s23  ;;  %v2474_v37 = vrot.slane %v2459_v12, %v8983_v6  ;;  %v2602_v12 = vmul.f32 %v10027_v47, %v12411_v4 }
 0x39c   : > { %8645 = vset.pattern.permute.xlu0 %v8849_v11 }
 0x39d   : > { %4216 = vperm.xlu0 %8645, %v10081_v23   ;;  %v2482_v11 = vcombine.low %v2470_v46, %v2474_v37  ;;  %v2580_v37 = vrot.slane %v2565_v28, %v8992_v9  ;;  %v2620_v21 = vrot.slane %v2602_v12, %v8980_v5 }
 0x39f   : > { %3139 = vrot.lane.b32.xlu1 %v3132_v53, %s8775_s23  ;;  %v3801_v53 = vrot.slane %v9676_v19, %v8992_v9  ;;  %v4019_v19 = vrot.slane %v3835_v61, %v8992_v9 }
 0x3a1   : > { %4257 = vrot.lane.b32.xlu0 %v4256_v55, %s8769_s10  ;;  %v3816_v39 = vrot.slane %v3801_v53, %v8992_v9  ;;  %v3860_v55 = vrot.slane %v3835_v61, %v8980_v5  ;;  %v2624_v61 = vrot.slane %v2602_v12, %v12364_v1  ;;  %v2635_v53 = vrot.slane %v2620_v21, %v8980_v5 }
 0x3a2   : > { %8646 = vset.pattern.permute.xlu0 %v12409_v63  ;;  %v2783_v21 = vrot.slane %v2602_v12, %v12371_v49 }
 0x3a3   : > { %3192 = vrot.lane.b32.xlu1 %v3185_v17, %s8775_s23  ;;  %v3875_v17 = vrot.slane %v3860_v55, %v8980_v5  ;;  %v2677_v55 = vrot.slane %v2602_v12, %v12367_v31 }
 0x3a5   : > { %4310 = vperm.xlu0 %8646, %v10140_v38   ;;  %v2692_v10 = vrot.slane %v2677_v55, %v8983_v6 }
 0x3a7   : > { %3245 = vrot.lane.b32.xlu1 %v3238_v29, %s8775_s23  ;;  %v2561_v29 = vrot.slane %v10032_v40, %v8992_v9 }
 0x3a9   : > { %v2576_v46 = vrot.slane %v2561_v29, %v8992_v9  ;;  %v12412_v29 = vld [vmem:[#allocation25_spill] sm:$0xff] }
 0x3aa   : > { %v2820_v28 = vmul.f32 %v10027_v47, %v12412_v29 }
 0x3ab   : > { %2430 = vrot.lane.b32.xlu1 %v2429_v20, %s8778_s28  ;;  %v4034_v20 = vrot.slane %v4019_v19, %v8992_v9  ;;  %v2588_v40 = vcombine.low %v2576_v46, %v2580_v37  ;;  %v2730_v19 = vrot.slane %v2602_v12, %v12369_v60  ;;  %v2779_v37 = vrot.slane %v2602_v12, %v8992_v9 }
 0x3ad   : > { %v2745_v46 = vrot.slane %v2730_v19, %v8986_v7  ;;  %v2944_v19 = vrot.slane %v2820_v28, %v8986_v7 }
 0x3af   : > { %2483 = vrot.lane.b32.xlu1 %v2482_v11, %s8778_s28  ;;  %v2673_v11 = vrot.slane %v2602_v12, %v8983_v6 }
 0x3b3   : > { %3823 = vrot.lane.b32.xlu1 %v3816_v39, %s8770_s14  ;;  %v2639_v39 = vrot.slane %v2624_v61, %v8980_v5  ;;  %v2838_v61 = vrot.slane %v2820_v28, %v8980_v5 }
 0x3b5   : > { %v2647_v32 = vcombine.low %v2635_v53, %v2639_v39  ;;  %v2798_v53 = vrot.slane %v2783_v21, %v8992_v9  ;;  %v2842_v39 = vrot.slane %v2820_v28, %v12364_v1  ;;  %v2853_v55 = vrot.slane %v2838_v61, %v8980_v5 }
 0x3b6   : > { %v2997_v21 = vrot.slane %v2820_v28, %v8992_v9  ;;  %v3001_v61 = vrot.slane %v2820_v28, %v12371_v49 }
 0x3b7   : > { %3882 = vrot.lane.b32.xlu1 %v3875_v17, %s8773_s15  ;;  %v2726_v17 = vrot.slane %v2602_v12, %v8986_v7  ;;  %v2891_v12 = vrot.slane %v2820_v28, %v8983_v6 }
 0x3bb   : > { %3935 = vrot.lane.b32.xlu1 %v3928_v27, %s8773_s15  ;;  %v2688_v27 = vrot.slane %v2673_v11, %v8983_v6 }
 0x3bf   : > { %3988 = vrot.lane.b32.xlu1 %v3981_v41, %s8773_s15  ;;  %v2741_v41 = vrot.slane %v2726_v17, %v8986_v7 }
 0x3c1   : > { %v2753_v11 = vcombine.low %v2741_v41, %v2745_v46 }
 0x3c3   : > { %4041 = vrot.lane.b32.xlu1 %v4034_v20, %s8773_s15  ;;  %v2700_v20 = vcombine.low %v2688_v27, %v2692_v10  ;;  %v2895_v27 = vrot.slane %v2820_v28, %v12367_v31  ;;  %v10201_v10 = vpop.permute.xlu0 %2605 }
 0x3c5   : > { %v2910_v46 = vrot.slane %v2895_v27, %v8983_v6 }
 0x3c7   : > { %2589 = vrot.lane.b32.xlu1 %v2588_v40, %s8778_s28  ;;  %v2794_v40 = vrot.slane %v2779_v37, %v8992_v9  ;;  %v2948_v37 = vrot.slane %v2820_v28, %v12369_v60 }
 0x3c9   : > { %v2806_v17 = vcombine.low %v2794_v40, %v2798_v53  ;;  %v2959_v53 = vrot.slane %v2944_v19, %v8986_v7 }
 0x3cb   : > { %2648 = vrot.lane.b32.xlu1 %v2647_v32, %s8777_s25  ;;  %v2857_v32 = vrot.slane %v2842_v39, %v8980_v5  ;;  %v2963_v39 = vrot.slane %v2948_v37, %v8986_v7 }
 0x3cd   : > { %v2865_v41 = vcombine.low %v2853_v55, %v2857_v32  ;;  %v12413_v55 = vld [vmem:[#allocation27_spill] sm:$0xff]  ;;  %v3012_v32 = vrot.slane %v2997_v21, %v8992_v9 }
 0x3cf   : > { %2701 = vrot.lane.b32.xlu1 %v2700_v20, %s8777_s25  ;;  %v2906_v20 = vrot.slane %v2891_v12, %v8983_v6  ;;  %v3016_v12 = vrot.slane %v3001_v61, %v8992_v9 }
 0x3d1   : > { %v2918_v40 = vcombine.low %v2906_v20, %v2910_v46  ;;  %v3024_v19 = vcombine.low %v3012_v32, %v3016_v12 }
 0x3d3   : > { %2754 = vrot.lane.b32.xlu1 %v2753_v11, %s8777_s25  ;;  %v10211_v11 = vpop.permute.xlu0 %2660 }
 0x3d7   : > { %2807 = vrot.lane.b32.xlu1 %v2806_v17, %s8777_s25  ;;  %v3038_v17 = vmul.f32 %v10027_v47, %v12413_v55  ;;  %v10224_v46 = vpop.permute.xlu0 %2713 }
 0x3d9   : > { %v3056_v28 = vrot.slane %v3038_v17, %v8980_v5  ;;  %v3060_v20 = vrot.slane %v3038_v17, %v12364_v1  ;;  %v3109_v61 = vrot.slane %v3038_v17, %v8983_v6  ;;  %v3219_v0 = vrot.slane %v3038_v17, %v12371_v49 }
 0x3db   : > { %2866 = vrot.lane.b32.xlu1 %v2865_v41, %s8776_s24  ;;  %v2971_v41 = vcombine.low %v2959_v53, %v2963_v39  ;;  %v3071_v47 = vrot.slane %v3056_v28, %v8980_v5  ;;  %v3075_v21 = vrot.slane %v3060_v20, %v8980_v5  ;;  %v3162_v53 = vrot.slane %v3038_v17, %v8986_v7  ;;  %v10235_v39 = vpop.permute.xlu0 %2766 }
 0x3dc   : > { %v3124_v32 = vrot.slane %v3109_v61, %v8983_v6  ;;  %v3166_v28 = vrot.slane %v3038_v17, %v12369_v60  ;;  %v3215_v20 = vrot.slane %v3038_v17, %v8992_v9 }
 0x3dd   : > { %v3177_v44 = vrot.slane %v3162_v53, %v8986_v7  ;;  %v3420_v53 = vrot.slane %v10069_v58, %v12364_v1 }
 0x3de   : > { %v3181_v34 = vrot.slane %v3166_v28, %v8986_v7 }
 0x3df   : > { %2919 = vrot.lane.b32.xlu1 %v2918_v40, %s8776_s24  ;;  %v3113_v40 = vrot.slane %v3038_v17, %v12367_v31  ;;  %v12414_v17 = vld [vmem:[#allocation21_spill] sm:$0xff] }
 0x3e1   : > { %v10220_v27 = vpop.permute.xlu1 %2432  ;;  %v3128_v12 = vrot.slane %v3113_v40, %v8983_v6  ;;  %v3189_v40 = vcombine.low %v3177_v44, %v3181_v34  ;;  %v3435_v44 = vrot.slane %v3420_v53, %v8980_v5 }
 0x3e3   : > { %2972 = vrot.lane.b32.xlu1 %v2971_v41, %s8776_s24  ;;  %v3083_v41 = vcombine.low %v3071_v47, %v3075_v21  ;;  %v10249_v47 = vpop.permute.xlu0 %2823  ;;  %v3416_v21 = vrot.slane %v10069_v58, %v8980_v5 }
 0x3e5   : > { %v10227_v37 = vpop.permute.xlu1 %2538  ;;  %v3431_v34 = vrot.slane %v3416_v21, %v8980_v5 }
 0x3e7   : > { %3025 = vrot.lane.b32.xlu1 %v3024_v19, %s8776_s24  ;;  %v3136_v19 = vcombine.low %v3124_v32, %v3128_v12  ;;  %v3234_v32 = vrot.slane %v3219_v0, %v8992_v9  ;;  %v4051_v12 = vld [vmem:[#allocation2 + $0xc] sm:$0xf] }
 0x3e8   : > { %v10262_v28 = vmul.f32 %v4051_v12, %v12414_v17 }
 0x3e9   : > { %v10237_v63 = vpop.permute.xlu1 %2591 }
 0x3ea   : > { %v4131_v21 = vrot.slane %v10262_v28, %v8983_v6 }
 0x3eb   : > { %3084 = vrot.lane.b32.xlu1 %v3083_v41, %s8775_s23  ;;  %v3230_v41 = vrot.slane %v3215_v20, %v8992_v9  ;;  %v3443_v20 = vcombine.low %v3431_v34, %v3435_v44  ;;  %v4184_v34 = vrot.slane %v10262_v28, %v8986_v7  ;;  %v3522_v44 = vrot.slane %v10069_v58, %v8986_v7 }
 0x3ec   : > { %v4146_v53 = vrot.slane %v4131_v21, %v8983_v6 }
 0x3ed   : > { %v10244_v30 = vpop.permute.xlu1 %2650  ;;  %v3242_v55 = vcombine.low %v3230_v41, %v3234_v32  ;;  %v4199_v21 = vrot.slane %v4184_v34, %v8986_v7  ;;  %v3537_v4 = vrot.slane %v3522_v44, %v8986_v7  ;;  %v3634_v34 = vrot.slane %v3616_v16, %v8980_v5 }
 0x3ee   : > { %v3638_v44 = vrot.slane %v3616_v16, %v12364_v1 }
 0x3ef   : > { %3137 = vrot.lane.b32.xlu1 %v3136_v19, %s8775_s23  ;;  %v10264_v19 = vpop.permute.xlu0 %2878 }
 0x3f1   : > { %v10254_v61 = vpop.permute.xlu1 %2703 }
 0x3f3   : > { %3190 = vrot.lane.b32.xlu1 %v3189_v40, %s8775_s23  ;;  %v4078_v40 = vrot.slane %v10262_v28, %v8980_v5  ;;  %v10275_v29 = vpop.permute.xlu0 %2931 }
 0x3f5   : > { %v10266_v3 = vpop.permute.xlu1 %2756  ;;  %v4093_v41 = vrot.slane %v4078_v40, %v8980_v5  ;;  %v3575_v40 = vrot.slane %v10069_v58, %v8992_v9 }
 0x3f7   : > { %3243 = vrot.lane.b32.xlu1 %v3242_v55, %s8775_s23  ;;  %v10284_v55 = vpop.permute.xlu0 %2984 }
 0x3f9   : > { %v10271_v0 = vpop.permute.xlu1 %2809 }
 0x3fb   : > { %3444 = vrot.lane.b32.xlu1 %v3443_v20, %s8774_s16  ;;  %v3526_v20 = vrot.slane %v10069_v58, %v12369_v60  ;;  %v10307_v36 = vpop.permute.xlu0 %3041 }
 0x3fd   : > { %v10278_v12 = vpop.permute.xlu1 %2868  ;;  %v3541_v43 = vrot.slane %v3526_v20, %v8986_v7 }
 0x3ff   : > { %4100 = vrot.lane.b32.xlu1 %v4093_v41, %s8769_s10  ;;  %v3579_v41 = vrot.slane %v10069_v58, %v12371_v49  ;;  %v3549_v50 = vcombine.low %v3537_v4, %v3541_v43  ;;  %v10317_v56 = vpop.permute.xlu0 %3096  ;;  %v3740_v43 = vrot.slane %v3616_v16, %v8986_v7 }
 0x400   : > { %12416 = vst [vmem:[#allocation51_spill] sm:$0xff] %v10317_v56  ;;  %v8857_v56 = vmov 93  }
 0x401   : > { %v10286_v32 = vpop.permute.xlu1 %2921  ;;  %v3594_v2 = vrot.slane %v3579_v41, %v8992_v9  ;;  %v3687_v41 = vrot.slane %v3616_v16, %v8983_v6 }
 0x403   : > { %4153 = vrot.lane.b32.xlu1 %v4146_v53, %s8769_s10  ;;  %v3590_v53 = vrot.slane %v3575_v40, %v8992_v9  ;;  %v3653_v40 = vrot.slane %v3638_v44, %v8980_v5  ;;  %v3793_v44 = vrot.slane %v3616_v16, %v8992_v9 }
 0x405   : > { %v10300_v17 = vpop.permute.xlu1 %2974  ;;  %v3602_v20 = vcombine.low %v3590_v53, %v3594_v2  ;;  %v3702_v2 = vrot.slane %v3687_v41, %v8983_v6  ;;  %v3706_v53 = vrot.slane %v3691_v51, %v8983_v6  ;;  %v3797_v51 = vrot.slane %v3616_v16, %v12371_v49 }
 0x406   : > { %v3808_v41 = vrot.slane %v3793_v44, %v8992_v9 }
 0x407   : > { %4206 = vrot.lane.b32.xlu1 %v4199_v21, %s8769_s10  ;;  %v3649_v21 = vrot.slane %v3634_v34, %v8980_v5  ;;  %v10332_v34 = vpop.permute.xlu0 %3149  ;;  %v3714_v45 = vcombine.low %v3702_v2, %v3706_v53 }
 0x408   : > { %12417 = vst [vmem:[#allocation67_spill] sm:$0xff] %v10332_v34 }
 0x409   : > { %v10312_v58 = vpop.permute.xlu1 %3027 }
 0x40b   : > { %3550 = vrot.lane.b32.xlu1 %v3549_v50, %s8774_s16  ;;  %v3661_v50 = vcombine.low %v3649_v21, %v3653_v40  ;;  %v3755_v21 = vrot.slane %v3740_v43, %v8986_v7  ;;  %v3759_v40 = vrot.slane %v3744_v35, %v8986_v7  ;;  %v10345_v25 = vpop.permute.xlu0 %3202 }
 0x40c   : > { %12419 = vst [vmem:[#allocation61_spill] sm:$0xff] %v10345_v25 }
 0x40d   : > { %v10319_v33 = vpop.permute.xlu1 %3086  ;;  %v3767_v22 = vcombine.low %v3755_v21, %v3759_v40 }
 0x40f   : > { %3603 = vrot.lane.b32.xlu1 %v3602_v20, %s8774_s16  ;;  %v3834_v20 = vmul.f32 %v10024_v57, %v12418_v14  ;;  %v3812_v57 = vrot.slane %v3797_v51, %v8992_v9  ;;  %v10359_v21 = vpop.permute.xlu0 %3256 }
 0x410   : > { %12420 = vst [vmem:[#allocation62_spill] sm:$0xff] %v10359_v21 }
 0x411   : > { %v10327_v4 = vpop.permute.xlu1 %3139  ;;  %v3852_v14 = vrot.slane %v3834_v20, %v8980_v5  ;;  %v3856_v2 = vrot.slane %v3834_v20, %v12364_v1  ;;  %v3905_v35 = vrot.slane %v3834_v20, %v8983_v6  ;;  %v3909_v44 = vrot.slane %v3834_v20, %v12367_v31 }
 0x412   : > { %v3958_v18 = vrot.slane %v3834_v20, %v8986_v7 }
 0x413   : > { %3662 = vrot.lane.b32.xlu1 %v3661_v50, %s8770_s14  ;;  %v3867_v43 = vrot.slane %v3852_v14, %v8980_v5  ;;  %v3871_v53 = vrot.slane %v3856_v2, %v8980_v5  ;;  %v3920_v40 = vrot.slane %v3905_v35, %v8983_v6  ;;  %v3924_v62 = vrot.slane %v3909_v44, %v8983_v6 }
 0x414   : > { %v4011_v14 = vrot.slane %v3834_v20, %v8992_v9  ;;  %v3973_v35 = vrot.slane %v3958_v18, %v8986_v7  ;;  %v4070_v44 = vrot.slane %v10102_v15, %v8980_v5 }
 0x415   : > { %v10338_v48 = vpop.permute.xlu1 %3192 }
 0x417   : > { %3715 = vrot.lane.b32.xlu1 %v3714_v45, %s8770_s14  ;;  %v3820_v45 = vcombine.low %v3808_v41, %v3812_v57  ;;  %v3962_v41 = vrot.slane %v3834_v20, %v12369_v60  ;;  %v10370_v57 = vpop.permute.xlu0 %3292 }
 0x418   : > { %12421 = vst [vmem:[#allocation60_spill] sm:$0xff] %v10370_v57 }
 0x419   : > { %v10347_v50 = vpop.permute.xlu1 %3245  ;;  %v3977_v52 = vrot.slane %v3962_v41, %v8986_v7  ;;  %v4085_v41 = vrot.slane %v4070_v44, %v8980_v5 }
 0x41b   : > { %3768 = vrot.lane.b32.xlu1 %v3767_v22, %s8770_s14  ;;  %v3879_v22 = vcombine.low %v3867_v43, %v3871_v53  ;;  %v4015_v43 = vrot.slane %v3834_v20, %v12371_v49  ;;  %v8850_v53 = vmov 75   ;;  %v3985_v42 = vcombine.low %v3973_v35, %v3977_v52  ;;  %v10387_v20 = vpop.permute.xlu0 %3401 }
 0x41c   : > { %8651 = vset.pattern.permute.xlu0 %v8850_v53  ;;  %12424 = vst [vmem:[#allocation68_spill] sm:$0xff] %v10387_v20  ;;  %v4123_v52 = vrot.slane %v10102_v15, %v8983_v6  ;;  %v4176_v35 = vrot.slane %v10102_v15, %v8986_v7  ;;  %v2541_v49 = vrot.slane %v10227_v37, 4  ;;  %v2451_v37 = vrot.slane %v9995_v54, %v9656_v24 }
 0x41d   : > { %v10354_v16 = vpop.permute.xlu1 %2430  ;;  %4505 = vperm.xlu0 %8651, %v10081_v23   ;;  %v4030_v18 = vrot.slane %v4015_v43, %v8992_v9  ;;  %v2653_v54 = vrot.slane %v10244_v30, 4 }
 0x41e   : > { %v4191_v20 = vrot.slane %v4176_v35, %v8986_v7 }
 0x41f   : > { %3821 = vrot.lane.b32.xlu1 %v3820_v45, %s8770_s14  ;;  %v3932_v45 = vcombine.low %v3920_v40, %v3924_v62  ;;  %v4026_v62 = vrot.slane %v4011_v14, %v8992_v9  ;;  %v4074_v40 = vrot.slane %v10102_v15, %v12364_v1  ;;  %v4127_v14 = vrot.slane %v10102_v15, %v12367_v31  ;;  %v10401_v43 = vpop.permute.xlu0 %3446  ;;  %v12434_v31 = vld [vmem:[#allocation16_spill] sm:$0xff] }
 0x420   : > { %12426 = vst [vmem:[#allocation66_spill] sm:$0xff] %v10401_v43 }
 0x421   : > { %v10363_v51 = vpop.permute.xlu1 %2483  ;;  %v4038_v53 = vcombine.low %v4026_v62, %v4030_v18  ;;  %v4138_v62 = vrot.slane %v4123_v52, %v8983_v6  ;;  %v4142_v18 = vrot.slane %v4127_v14, %v8983_v6  ;;  %v4237_v52 = vrot.slane %v10262_v28, %v8992_v9 }
 0x422   : > { %v8851_v28 = vmov 72  }
 0x423   : > { %3880 = vrot.lane.b32.xlu1 %v3879_v22, %s8773_s15 }
 0x425   : > { %v10372_v2 = vpop.permute.xlu1 %3823 }
 0x426   : > { %12422 = vst [vmem:[#allocation65_spill] sm:$0xff] %v10372_v2  ;;  %v4089_v2 = vrot.slane %v4074_v40, %v8980_v5  ;;  %v4180_v40 = vrot.slane %v10102_v15, %v12369_v60 }
 0x427   : > { %3933 = vrot.lane.b32.xlu1 %v3932_v45, %s8773_s15 }
 0x428   : > { %v4097_v44 = vcombine.low %v4085_v41, %v4089_v2  ;;  %v4195_v43 = vrot.slane %v4180_v40, %v8986_v7 }
 0x429   : > { %v10381_v22 = vpop.permute.xlu1 %3882 }
 0x42a   : > { %12423 = vst [vmem:[#allocation63_spill] sm:$0xff] %v10381_v22  ;;  %v4150_v22 = vcombine.low %v4138_v62, %v4142_v18  ;;  %v4203_v41 = vcombine.low %v4191_v20, %v4195_v43  ;;  %v8852_v18 = vmov 73  }
 0x42b   : > { %3986 = vrot.lane.b32.xlu1 %v3985_v42, %s8773_s15 }
 0x42d   : > { %v10391_v45 = vpop.permute.xlu1 %3935 }
 0x42e   : > { %12425 = vst [vmem:[#allocation53_spill] sm:$0xff] %v10391_v45  ;;  %v10410_v45 = vpop.permute.xlu0 %3562 }
 0x42f   : > { %4039 = vrot.lane.b32.xlu1 %v4038_v53, %s8773_s15  ;;  %12428 = vst [vmem:[#allocation56_spill] sm:$0xff] %v10410_v45  ;;  %v2435_v45 = vrot.slane %v10220_v27, 4  ;;  %v5572_v27 = vld [vmem:[#allocation2 + $0xc] sm:$0xf] }
 0x431   : > { %v10403_v42 = vpop.permute.xlu1 %3988 }
 0x432   : > { %12427 = vst [vmem:[#allocation69_spill] sm:$0xff] %v10403_v42  ;;  %v10421_v15 = vpop.permute.xlu0 %3619  ;;  %v8855_v42 = vmov 90  }
 0x433   : > { %4098 = vrot.lane.b32.xlu1 %v4097_v44, %s8769_s10  ;;  %12430 = vst [vmem:[#allocation52_spill] sm:$0xff] %v10421_v15  ;;  %v4252_v44 = vrot.slane %v4237_v52, %v8992_v9  ;;  %v8853_v52 = vmov 76   ;;  %v5354_v15 = vld [vmem:[#allocation2 + $0xc] sm:$0xf] }
 0x434   : > { %8652 = vset.pattern.permute.xlu0 %v8853_v52  ;;  %v2434_v52 = vrot.slane %v10354_v16, 4  ;;  %v10464_v25 = vmul.f32 %v5354_v15, %v12434_v31 }
 0x435   : > { %v10412_v53 = vpop.permute.xlu1 %4041 }
 0x436   : > { %12429 = vst [vmem:[#allocation70_spill] sm:$0xff] %v10412_v53  ;;  %v10428_v35 = vpop.permute.xlu0 %3674  ;;  %v2436_v21 = vsel %vm350_vm8, %v2434_v52, %v2435_v45  ;;  %v2396_v45 = vrot.slane %v9992_v8, %v9656_v24  ;;  %v5434_v8 = vrot.slane %v10464_v25, %v8983_v6 }
 0x437   : > { %4151 = vrot.lane.b32.xlu1 %v4150_v22, %s8769_s10  ;;  %12431 = vst [vmem:[#allocation55_spill] sm:$0xff] %v10428_v35  ;;  %v2437_v15 = vsel %vm352_vm4, %v10354_v16, %v2436_v21  ;;  %v2706_v16 = vrot.slane %v10254_v61, 4  ;;  %v5487_v61 = vrot.slane %v10464_v25, %v8986_v7 }
 0x438   : > { %v2439_v21 = vmul.f32 %v2437_v15, %v2396_v45  ;;  %v5449_v15 = vrot.slane %v5434_v8, %v8983_v6 }
 0x439   : > { %v10417_v2 = vpop.permute.xlu1 %2589 }
 0x43a   : > { %v10435_v20 = vpop.permute.xlu0 %3727 }
 0x43b   : > { %4204 = vrot.lane.b32.xlu1 %v4203_v41, %s8769_s10  ;;  %12432 = vst [vmem:[#allocation71_spill] sm:$0xff] %v10435_v20 }
 0x43d   : > { %v10424_v14 = vpop.permute.xlu1 %2648 }
 0x43e   : > { %v10440_v40 = vpop.permute.xlu0 %3780  ;;  %v2652_v34 = vrot.slane %v10424_v14, 4 }
 0x43f   : > { %4259 = vrot.lane.b32.xlu1 %v4252_v44, %s8769_s10  ;;  %12433 = vst [vmem:[#allocation72_spill] sm:$0xff] %v10440_v40 }
 0x441   : > { %v10430_v62 = vpop.permute.xlu1 %2701 }
 0x443   : > { %4322 = vperm.xlu1 %8647, %v10140_v38   ;;  %v8854_v38 = vmov 74  }
 0x445   : > { %v10433_v22 = vpop.permute.xlu1 %2754 }
 0x446   : > { %v2758_v30 = vrot.slane %v10433_v22, 4 }
 0x447   : > { %8648 = vset.pattern.permute.xlu1 %v8851_v28  ;;  %v2486_v28 = vpop.permute.xlu0 %2485 }
 0x448   : > { %4344 = vperm.xlu1 %8648, %v10081_v23   ;;  %v2488_v35 = vrot.slane %v2486_v28, 4  ;;  %v2593_v28 = vrot.slane %v10417_v2, 4 }
 0x449   : > { %v10438_v43 = vpop.permute.xlu1 %2807 }
 0x44b   : > { %v2537_v40 = vpop.permute.xlu0 %2536 }
 0x44c   : > { %8649 = vset.pattern.permute.xlu1 %v8852_v18  ;;  %v2487_v18 = vrot.slane %v10363_v51, 4  ;;  %v2540_v57 = vrot.slane %v2537_v40, 4 }
 0x44d   : > { %4399 = vperm.xlu1 %8649, %v10081_v23   ;;  %v10443_v41 = vpop.permute.xlu1 %2866 }
 0x451   : > { %8650 = vset.pattern.permute.xlu1 %v8854_v38  ;;  %v10445_v44 = vpop.permute.xlu1 %2919  ;;  %v8856_v38 = vmov 91  }
 0x452   : > { %4452 = vperm.xlu1 %8650, %v10081_v23  }
 0x455   : > { %v10448_v53 = vpop.permute.xlu1 %2972 }
 0x456   : > { %8666 = vset.pattern.permute.xlu1 %v8855_v42  ;;  %v2489_v42 = vsel %vm350_vm8, %v2487_v18, %v2488_v35  ;;  %v2542_v35 = vsel %vm350_vm8, %v2540_v57, %v2541_v49  ;;  %v2594_v18 = vrot.slane %v10237_v63, 4  ;;  %v2705_v63 = vrot.slane %v10430_v62, 4 }
 0x457   : > { %5284 = vperm.xlu1 %8666, %v10081_v23   ;;  %v10484_v57 = vmul.f32 %v5572_v27, %v9380_v26 }
 0x458   : > { %v2595_v49 = vsel %vm350_vm8, %v2593_v28, %v2594_v18  ;;  %v2504_v28 = vrot.slane %v9997_v13, %v9656_v24  ;;  %v2707_v18 = vsel %vm350_vm8, %v2705_v63, %v2706_v16  ;;  %v2811_v13 = vrot.slane %v10438_v43, 4 }
 0x459   : > { %v10452_v20 = vpop.permute.xlu1 %3025  ;;  %v2596_v27 = vsel %vm352_vm4, %v10417_v2, %v2595_v49  ;;  %v2669_v63 = vrot.slane %v10211_v11, %v9656_v24  ;;  %v2722_v11 = vrot.slane %v10224_v46, %v9656_v24  ;;  %v2977_v46 = vrot.slane %v10300_v17, 4  ;;  %v10549_v17 = vpop.permute.xlu0 %3837 }
 0x45b   : > { %8667 = vset.pattern.permute.xlu1 %v8856_v38  ;;  %v2490_v38 = vsel %vm352_vm4, %v10363_v51, %v2489_v42  ;;  %v2654_v42 = vsel %vm350_vm8, %v2652_v34, %v2653_v54  ;;  %v2759_v34 = vrot.slane %v10266_v3, 4  ;;  %v2812_v54 = vrot.slane %v10271_v0, 4 }
 0x45c   : > { %5319 = vperm.xlu1 %8667, %v10081_v23   ;;  %v2492_v52 = vmul.f32 %v2490_v38, %v2451_v37  ;;  %v2557_v38 = vrot.slane %v9999_v59, %v9656_v24  ;;  %v2614_v59 = vrot.slane %v10201_v10, %v9656_v24  ;;  %v2655_v45 = vsel %vm589_vm7, %v10424_v14, %v2654_v42 }
 0x45d   : > { %v10459_v60 = vpop.permute.xlu1 %3084  ;;  %v2760_v3 = vsel %vm350_vm8, %v2758_v30, %v2759_v34  ;;  %v2708_v10 = vsel %vm589_vm7, %v10430_v62, %v2707_v18  ;;  %v5502_v14 = vrot.slane %v5487_v61, %v8986_v7  ;;  %v2813_v0 = vsel %vm350_vm8, %v2811_v13, %v2812_v54 }
 0x45e   : > { %v2598_v49 = vmul.f32 %v2596_v27, %v2557_v38  ;;  %v2657_v16 = vmul.f32 %v2655_v45, %v2614_v59  ;;  %v2761_v62 = vsel %vm589_vm7, %v10433_v22, %v2760_v3  ;;  %v5540_v42 = vrot.slane %v10464_v25, %v8992_v9 }
 0x45f   : > { %v12435_v30 = vmov 5   ;;  %v2710_v38 = vmul.f32 %v2708_v10, %v2669_v63  ;;  %v2775_v61 = vrot.slane %v10235_v39, %v9656_v24  ;;  %v5599_v34 = vrot.slane %v10484_v57, %v8980_v5 }
 0x460   : > { %8669 = vset.pattern.permute.xlu1 %v8857_v56  ;;  %v2543_v56 = vsel %vm352_vm4, %v2537_v40, %v2542_v35  ;;  %v8858_v40 = vmov 94   ;;  %v2493_v35 = vadd.f32 %v2492_v52, %v2439_v21  ;;  %v2870_v52 = vrot.slane %v10443_v41, 4 }
 0x461   : > { %5413 = vperm.xlu1 %8669, %v10081_v23   ;;  %v10478_v51 = vpop.permute.xlu1 %3137  ;;  %v2545_v2 = vmul.f32 %v2543_v56, %v2504_v28  ;;  %v2923_v21 = vrot.slane %v10445_v44, 4  ;;  %v2763_v18 = vmul.f32 %v2761_v62, %v2722_v11  ;;  %v3029_v59 = vrot.slane %v10452_v20, 4 }
 0x462   : > { %v2832_v39 = vrot.slane %v10249_v47, %v9656_v24  ;;  %v5555_v45 = vrot.slane %v5540_v42, %v8992_v9  ;;  %v3088_v3 = vrot.slane %v10459_v60, 4  ;;  %v3089_v47 = vrot.slane %v10319_v33, 4  ;;  %v10579_v42 = vpop.permute.xlu0 %3892 }
 0x463   : > { %v2546_v8 = vadd.f32 %v2545_v2, %v2493_v35  ;;  %v3142_v33 = vrot.slane %v10327_v4, 4  ;;  %v2993_v62 = vrot.slane %v10284_v55, %v9656_v24  ;;  %v3050_v55 = vrot.slane %v10307_v36, %v9656_v24 }
 0x464   : > { %v3090_v11 = vsel %vm350_vm8, %v3088_v3, %v3089_v47  ;;  %v12438_v47 = vld [vmem:[#allocation61_spill] sm:$0xff] }
 0x465   : > { %8670 = vset.pattern.permute.xlu1 %v8858_v40  ;;  %v10498_v37 = vpop.permute.xlu1 %3190  ;;  %v2599_v28 = vadd.f32 %v2598_v49, %v2546_v8  ;;  %v2976_v40 = vrot.slane %v10448_v53, 4  ;;  %v3141_v8 = vrot.slane %v10478_v51, 4 }
 0x466   : > { %5466 = vperm.xlu1 %8670, %v10081_v23   ;;  %v2871_v23 = vrot.slane %v10278_v12, 4  ;;  %v2924_v12 = vrot.slane %v10286_v32, 4  ;;  %v2814_v32 = vsel %vm589_vm7, %v10438_v43, %v2813_v0  ;;  %v3030_v43 = vrot.slane %v10312_v58, 4 }
 0x467   : > { %v2658_v35 = vadd.f32 %v2657_v16, %v2599_v28  ;;  %v2816_v54 = vmul.f32 %v2814_v32, %v2775_v61  ;;  %v2978_v49 = vsel %vm350_vm8, %v2976_v40, %v2977_v46  ;;  %v5614_v16 = vrot.slane %v5599_v34, %v8980_v5 }
 0x468   : > { %v2872_v27 = vsel %vm350_vm8, %v2870_v52, %v2871_v23  ;;  %v2925_v13 = vsel %vm350_vm8, %v2923_v21, %v2924_v12  ;;  %v2887_v52 = vrot.slane %v10264_v19, %v9656_v24  ;;  %v2940_v19 = vrot.slane %v10275_v29, %v9656_v24 }
 0x469   : > { %v10519_v56 = vpop.permute.xlu1 %3243  ;;  %v2873_v2 = vsel %vm826_vm6, %v10443_v41, %v2872_v27  ;;  %v2926_v63 = vsel %vm826_vm6, %v10445_v44, %v2925_v13  ;;  %v5652_v41 = vrot.slane %v10484_v57, %v8983_v6  ;;  %v2979_v44 = vsel %vm826_vm6, %v10448_v53, %v2978_v49  ;;  %v10587_v27 = vld [vmem:[#allocation2 + $0x4] sm:$0xff] }
 0x46a   : > { %5456 = vrot.lane.b32.xlu1 %v5449_v15, %s8774_s16  ;;  %v2711_v15 = vadd.f32 %v2710_v38, %v2658_v35  ;;  %v2875_v10 = vmul.f32 %v2873_v2, %v2832_v39  ;;  %v2928_v21 = vmul.f32 %v2926_v63, %v2887_v52  ;;  %v3194_v12 = vrot.slane %v10498_v37, 4 }
 0x46b   : > { %8685 = vset.pattern.permute.xlu1 %v12435_v30  ;;  %v3195_v29 = vrot.slane %v10338_v48, 4  ;;  %v2981_v28 = vmul.f32 %v2979_v44, %v2940_v19  ;;  %v3143_v38 = vsel %vm350_vm8, %v3141_v8, %v3142_v33  ;;  %v3247_v40 = vrot.slane %v10519_v56, 4  ;;  %v12439_v33 = vld [vmem:[#allocation8_spill] sm:$0xff] }
 0x46c   : > { %v2764_v23 = vadd.f32 %v2763_v18, %v2711_v15  ;;  %v3091_v48 = vsel %vm1063_vm1, %v10459_v60, %v3090_v11  ;;  %v5705_v61 = vrot.slane %v10484_v57, %v8986_v7  ;;  %v3248_v46 = vrot.slane %v10347_v50, 4  ;;  %v12437_v15 = vld [vmem:[#allocation67_spill] sm:$0xff] }
 0x46d   : > { %v10540_v22 = vpop.permute.xlu1 %3444  ;;  %v3196_v35 = vsel %vm350_vm8, %v3194_v12, %v3195_v29  ;;  %v3144_v18 = vsel %vm1063_vm1, %v10478_v51, %v3143_v38  ;;  %v3270_v36 = vrot.slane %v10587_v27, %v8980_v5  ;;  %v3274_v60 = vrot.slane %v10587_v27, %v12364_v1 }
 0x46e   : > { %5509 = vrot.lane.b32.xlu1 %v5502_v14, %s8774_s16  ;;  %v3031_v14 = vsel %vm350_vm8, %v3029_v59, %v3030_v43  ;;  %v2817_v0 = vadd.f32 %v2816_v54, %v2764_v23  ;;  %v12436_v59 = vld [vmem:[#allocation51_spill] sm:$0xff]  ;;  %v3093_v50 = vmul.f32 %v3091_v48, %v3050_v55  ;;  %v3249_v2 = vsel %vm350_vm8, %v3247_v40, %v3248_v46  ;;  %v12442_v48 = vld [vmem:[#allocation60_spill] sm:$0xff] }
 0x46f   : > { %v3032_v4 = vsel %vm826_vm6, %v10452_v20, %v3031_v14  ;;  %v5667_v20 = vrot.slane %v5652_v41, %v8983_v6  ;;  %v3105_v39 = vrot.slane %v12436_v59, %v9656_v24  ;;  %v3197_v51 = vsel %vm1063_vm1, %v10498_v37, %v3196_v35  ;;  %v12443_v46 = vld [vmem:[#allocation11_spill] sm:$0xff] }
 0x470   : > { %v2876_v53 = vadd.f32 %v2875_v10, %v2817_v0  ;;  %v3034_v34 = vmul.f32 %v3032_v4, %v2993_v62  ;;  %v3158_v54 = vrot.slane %v12437_v15, %v9656_v24  ;;  %v5720_v52 = vrot.slane %v5705_v61, %v8986_v7  ;;  %v12441_v62 = vld [vmem:[#allocation10_spill] sm:$0xff] }
 0x471   : > { %v10562_v58 = vpop.permute.xlu1 %4100  ;;  %v3146_v3 = vmul.f32 %v3144_v18, %v3105_v39  ;;  %v3211_v63 = vrot.slane %v12438_v47, %v9656_v24  ;;  %v3280_v41 = vrot.slane %v3270_v36, %v8980_v5  ;;  %v3284_v23 = vrot.slane %v3274_v60, %v8980_v5 }
 0x472   : > { %5562 = vrot.lane.b32.xlu1 %v5555_v45, %s8774_s16  ;;  %v2929_v32 = vadd.f32 %v2928_v21, %v2876_v53  ;;  %v10612_v45 = vpop.permute.xlu0 %3945  ;;  %v3250_v10 = vsel %vm1063_vm1, %v10519_v56, %v3249_v2  ;;  %v3199_v8 = vmul.f32 %v3197_v51, %v3158_v54  ;;  %v3305_v19 = vrot.slane %v10587_v27, %v8983_v6  ;;  %v12440_v21 = vld [vmem:[#allocation62_spill] sm:$0xff]  ;;  %v12444_v54 = vld [vmem:[#allocation33_spill] sm:$0xff] }
 0x473   : > { %v3309_v44 = vrot.slane %v10587_v27, %v12439_v33  ;;  %v3252_v0 = vmul.f32 %v3250_v10, %v3211_v63  ;;  %v3265_v11 = vrot.slane %v12440_v21, %v9656_v24  ;;  %v3340_v56 = vrot.slane %v10587_v27, %v8986_v7  ;;  %v12445_v63 = vld [vmem:[#allocation66_spill] sm:$0xff] }
 0x474   : > { %v2982_v43 = vadd.f32 %v2981_v28, %v2929_v32  ;;  %v3344_v29 = vrot.slane %v10587_v27, %v12441_v62  ;;  %v3287_v28 = vcombine.low %v3280_v41, %v3284_v23  ;;  %v3315_v38 = vrot.slane %v3305_v19, %v8983_v6 }
 0x475   : > { %v10584_v30 = vpop.permute.xlu1 %4153  ;;  %v3319_v40 = vrot.slane %v3309_v44, %v8983_v6  ;;  %v3375_v61 = vrot.slane %v10587_v27, %v8992_v9  ;;  %v3379_v32 = vrot.slane %v10587_v27, %v12443_v46  ;;  %v3350_v36 = vrot.slane %v3340_v56, %v8986_v7 }
 0x476   : > { %5621 = vrot.lane.b32.xlu1 %v5614_v16, %s8770_s14  ;;  %v3035_v49 = vadd.f32 %v3034_v34, %v2982_v43  ;;  %v10634_v12 = vpop.permute.xlu0 %3998  ;;  %v3289_v18 = vmul.f32 %v3287_v28, %v3265_v11  ;;  %v3354_v60 = vrot.slane %v3344_v29, %v8986_v7  ;;  %v3336_v27 = vrot.slane %v12444_v54, %v9656_v24  ;;  %v12447_v11 = vld [vmem:[#allocation57_spill] sm:$0xff]  ;;  %v12448_v29 = vld [vmem:[#allocation59_spill] sm:$0xff] }
 0x477   : > { %v3322_v35 = vcombine.low %v3315_v38, %v3319_v40  ;;  %v3385_v51 = vrot.slane %v3375_v61, %v8992_v9  ;;  %v3389_v15 = vrot.slane %v3379_v32, %v8992_v9  ;;  %v3449_v41 = vrot.slane %v12445_v63, 4  ;;  %v12449_v40 = vld [vmem:[#allocation54_spill] sm:$0xff]  ;;  %v12452_v54 = vld [vmem:[#allocation13_spill] sm:$0xff] }
 0x478   : > { %v3094_v37 = vadd.f32 %v3093_v50, %v3035_v49  ;;  %v3357_v2 = vcombine.low %v3350_v36, %v3354_v60  ;;  %v3502_v56 = vrot.slane %v12447_v11, 4 }
 0x479   : > { %v10606_v13 = vpop.permute.xlu1 %4206  ;;  %v3392_v10 = vcombine.low %v3385_v51, %v3389_v15 }
 0x47a   : > { %5674 = vrot.lane.b32.xlu1 %v5667_v20, %s8770_s14  ;;  %v3147_v16 = vadd.f32 %v3146_v3, %v3094_v37  ;;  %v3301_v20 = vrot.slane %v12442_v48, %v9656_v24  ;;  %v10650_v59 = vpop.permute.xlu0 %4055  ;;  %v3448_v3 = vrot.slane %v10540_v22, 4  ;;  %v3359_v23 = vmul.f32 %v3357_v2, %v3336_v27  ;;  %v12446_v37 = vld [vmem:[#allocation47_spill] sm:$0xff]  ;;  %v12450_v48 = vld [vmem:[#allocation68_spill] sm:$0xff] }
 0x47b   : > { %v3465_v27 = vrot.slane %v12452_v54, %v9656_v24 }
 0x47c   : > { %v3200_v53 = vadd.f32 %v3199_v8, %v3147_v16  ;;  %v3324_v50 = vmul.f32 %v3322_v35, %v3301_v20  ;;  %v3371_v8 = vrot.slane %v12446_v37, %v9656_v24  ;;  %v3450_v16 = vsel %vm350_vm8, %v3448_v3, %v3449_v41  ;;  %v12454_v41 = vld [vmem:[#allocation64_spill] sm:$0xff] }
 0x47d   : > { %v10625_v14 = vpop.permute.xlu1 %3550  ;;  %v3410_v20 = vrot.slane %v12450_v48, %v9656_v24  ;;  %v3451_v61 = vsel %vm1006_vm5, %v10540_v22, %v3450_v16  ;;  %v12456_v16 = vld [vmem:[#allocation56_spill] sm:$0xff] }
 0x47e   : > { %5727 = vrot.lane.b32.xlu1 %v5720_v52, %s8770_s14  ;;  %v3253_v55 = vadd.f32 %v3252_v0, %v3200_v53  ;;  %v3498_v52 = vpop.permute.xlu0 %3497  ;;  %v3554_v0 = vrot.slane %v10625_v14, 4  ;;  %v3555_v53 = vrot.slane %v12448_v29, 4  ;;  %v3394_v28 = vmul.f32 %v3392_v10, %v3371_v8 }
 0x47f   : > { %v3501_v19 = vrot.slane %v3498_v52, 4  ;;  %v3453_v2 = vmul.f32 %v3451_v61, %v3410_v20 }
 0x480   : > { %v3290_v39 = vadd.f32 %v3289_v18, %v3253_v55  ;;  %v3608_v55 = vrot.slane %v12449_v40, 4  ;;  %v3556_v18 = vsel %vm350_vm8, %v3554_v0, %v3555_v53  ;;  %v3571_v0 = vrot.slane %v12456_v16, %v9656_v24  ;;  %v12458_v40 = vld [vmem:[#allocation65_spill] sm:$0xff] }
 0x481   : > { %v3604_v4 = vpop.permute.xlu1 %3603  ;;  %v3503_v32 = vsel %vm350_vm8, %v3501_v19, %v3502_v56  ;;  %v3557_v63 = vsel %vm1006_vm5, %v10625_v14, %v3556_v18  ;;  %v12455_v19 = vld [vmem:[#allocation58_spill] sm:$0xff]  ;;  %v12457_v14 = vld [vmem:[#allocation52_spill] sm:$0xff] }
 0x482   : > { %v3325_v49 = vadd.f32 %v3324_v50, %v3290_v39  ;;  %v3607_v38 = vrot.slane %v3604_v4, 4  ;;  %v12451_v39 = vld [vmem:[#allocation49_spill] sm:$0xff]  ;;  %v3504_v22 = vsel %vm1006_vm5, %v3498_v52, %v3503_v32 }
 0x483   : > { %v3667_v50 = vrot.slane %v12451_v39, 4  ;;  %v3506_v29 = vmul.f32 %v3504_v22, %v3465_v27  ;;  %v12460_v39 = vld [vmem:[#allocation63_spill] sm:$0xff]  ;;  %v12462_v22 = vld [vmem:[#allocation53_spill] sm:$0xff] }
 0x484   : > { %v3360_v44 = vadd.f32 %v3359_v23, %v3325_v49  ;;  %v3609_v51 = vsel %vm350_vm8, %v3607_v38, %v3608_v55  ;;  %v12453_v49 = vld [vmem:[#allocation45_spill] sm:$0xff]  ;;  %v3720_v23 = vrot.slane %v12454_v41, 4  ;;  %v3628_v38 = vrot.slane %v12457_v14, %v9656_v24 }
 0x485   : > { %v3663_v34 = vpop.permute.xlu1 %3662  ;;  %v3518_v3 = vrot.slane %v12453_v49, %v9656_v24  ;;  %v3610_v11 = vsel %vm1006_vm5, %v3604_v4, %v3609_v51  ;;  %v3826_v55 = vrot.slane %v12458_v40, 4  ;;  %v12459_v4 = vld [vmem:[#allocation55_spill] sm:$0xff]  ;;  %v12465_v40 = vld [vmem:[#allocation70_spill] sm:$0xff] }
 0x486   : > { %v3395_v35 = vadd.f32 %v3394_v28, %v3360_v44  ;;  %v3666_v36 = vrot.slane %v3663_v34, 4  ;;  %v3773_v44 = vrot.slane %v12455_v19, 4  ;;  %v3612_v61 = vmul.f32 %v3610_v11, %v3571_v0  ;;  %v12461_v49 = vld [vmem:[#allocation71_spill] sm:$0xff] }
 0x487   : > { %v3559_v53 = vmul.f32 %v3557_v63, %v3518_v3  ;;  %v3683_v18 = vrot.slane %v12459_v4, %v9656_v24  ;;  %v3736_v3 = vrot.slane %v12461_v49, %v9656_v24  ;;  %v3938_v63 = vrot.slane %v12462_v22, 4 }
 0x488   : > { %v3454_v10 = vadd.f32 %v3453_v2, %v3395_v35  ;;  %v3668_v37 = vsel %vm350_vm8, %v3666_v36, %v3667_v50  ;;  %v10694_v36 = vpop.permute.xlu0 %4110  ;;  %v3885_v50 = vrot.slane %v12460_v39, 4  ;;  %v4156_v49 = vrot.slane %v10584_v30, 4 }
 0x489   : > { %v3716_v43 = vpop.permute.xlu1 %3715  ;;  %v3669_v48 = vsel %vm769_vm3, %v3663_v34, %v3668_v37  ;;  %v4209_v30 = vrot.slane %v10606_v13, 4 }
 0x48a   : > { %v3719_v15 = vrot.slane %v3716_v43, 4  ;;  %v3507_v20 = vadd.f32 %v3506_v29, %v3454_v10  ;;  %v3671_v54 = vmul.f32 %v3669_v48, %v3628_v38 }
 0x48c   : > { %v3721_v52 = vsel %vm350_vm8, %v3719_v15, %v3720_v23  ;;  %v3560_v15 = vadd.f32 %v3559_v53, %v3507_v20  ;;  %v4164_v14 = vpop.permute.xlu0 %4163 }
 0x48d   : > { %v3769_v47 = vpop.permute.xlu1 %3768  ;;  %v3722_v2 = vsel %vm769_vm3, %v3716_v43, %v3721_v52  ;;  %v12463_v43 = vld [vmem:[#allocation72_spill] sm:$0xff] }
 0x48e   : > { %v3772_v8 = vrot.slane %v3769_v47, 4  ;;  %v3613_v23 = vadd.f32 %v3612_v61, %v3560_v15  ;;  %v3724_v10 = vmul.f32 %v3722_v2, %v3683_v18  ;;  %v3789_v19 = vrot.slane %v12463_v43, %v9656_v24 }
 0x48f   : > { %v3954_v2 = vrot.slane %v10612_v45, %v9656_v24  ;;  %v4064_v45 = vrot.slane %v10650_v59, %v9656_v24 }
 0x490   : > { %v3774_v32 = vsel %vm350_vm8, %v3772_v8, %v3773_v44  ;;  %v12464_v44 = vld [vmem:[#allocation69_spill] sm:$0xff]  ;;  %v3672_v29 = vadd.f32 %v3671_v54, %v3613_v23 }
 0x491   : > { %v3822_v21 = vpop.permute.xlu1 %3821  ;;  %v3775_v41 = vsel %vm769_vm3, %v3769_v47, %v3774_v32  ;;  %v3991_v16 = vrot.slane %v12464_v44, 4  ;;  %v3846_v47 = vrot.slane %v10549_v17, %v9656_v24  ;;  %v4103_v32 = vrot.slane %v10562_v58, 4 }
 0x492   : > { %v3825_v28 = vrot.slane %v3822_v21, 4  ;;  %v3777_v53 = vmul.f32 %v3775_v41, %v3736_v3  ;;  %v3725_v48 = vadd.f32 %v3724_v10, %v3672_v29  ;;  %v4007_v58 = vrot.slane %v10634_v12, %v9656_v24 }
 0x493   : > { %v4119_v12 = vrot.slane %v10694_v36, %v9656_v24 }
 0x494   : > { %v3827_v27 = vsel %vm350_vm8, %v3825_v28, %v3826_v55  ;;  %v4044_v55 = vrot.slane %v12465_v40, 4  ;;  %v3778_v18 = vadd.f32 %v3777_v53, %v3725_v48 }
 0x495   : > { %v3881_v60 = vpop.permute.xlu1 %3880  ;;  %v3828_v0 = vsel %vm769_vm3, %v3822_v21, %v3827_v27  ;;  %v3901_v21 = vrot.slane %v10579_v42, %v9656_v24  ;;  %v4217_v42 = vpop.permute.xlu0 %4216 }
 0x496   : > { %v3884_v35 = vrot.slane %v3881_v60, 4  ;;  %v3830_v20 = vmul.f32 %v3828_v0, %v3789_v19  ;;  %v4172_v0 = vrot.slane %v4164_v14, %v9656_v24  ;;  %v4225_v40 = vrot.slane %v4217_v42, %v9656_v24 }
 0x497   : > { %v8868_v42 = vmov 86  }
 0x498   : > { %v3886_v37 = vsel %vm350_vm8, %v3884_v35, %v3885_v50  ;;  %v3831_v15 = vadd.f32 %v3830_v20, %v3778_v18  ;;  %v10746_v18 = vld [vmem:[%s12192_s1] sm:$0xff] }
 0x499   : > { %v3934_v56 = vpop.permute.xlu1 %3933  ;;  %v3887_v38 = vsel %vm532_vm2, %v3881_v60, %v3886_v37 }
 0x49a   : > { %v3937_v34 = vrot.slane %v3934_v56, 4  ;;  %v3889_v39 = vmul.f32 %v3887_v38, %v3846_v47 }
 0x49c   : > { %v3939_v52 = vsel %vm350_vm8, %v3937_v34, %v3938_v63  ;;  %v3890_v3 = vadd.f32 %v3889_v39, %v3831_v15  ;;  %v8859_v39 = vmov 77   ;;  %v8864_v15 = vmov 82  }
 0x49d   : > { %v3987_v51 = vpop.permute.xlu1 %3986  ;;  %v3940_v35 = vsel %vm532_vm2, %v3934_v56, %v3939_v52 }
 0x49e   : > { %v3990_v8 = vrot.slane %v3987_v51, 4  ;;  %v3942_v54 = vmul.f32 %v3940_v35, %v3901_v21 }
 0x4a0   : > { %v3992_v61 = vsel %vm350_vm8, %v3990_v8, %v3991_v16  ;;  %v3943_v41 = vadd.f32 %v3942_v54, %v3890_v3  ;;  %v4258_v16 = vpop.permute.xlu0 %4257  ;;  %v8865_v54 = vmov 83   ;;  %v5381_v3 = vrot.slane %v10464_v25, %v8980_v5 }
 0x4a1   : > { %v4040_v11 = vpop.permute.xlu1 %4039  ;;  %v3993_v60 = vsel %vm532_vm2, %v3987_v51, %v3992_v61 }
 0x4a2   : > { %v4043_v28 = vrot.slane %v4040_v11, 4  ;;  %v3995_v22 = vmul.f32 %v3993_v60, %v3954_v2  ;;  %v8862_v60 = vmov 80   ;;  %v8863_v2 = vmov 81  }
 0x4a4   : > { %v4045_v17 = vsel %vm350_vm8, %v4043_v28, %v4044_v55  ;;  %v3996_v43 = vadd.f32 %v3995_v22, %v3943_v41  ;;  %v4261_v28 = vrot.slane %v4258_v16, 4  ;;  %v8872_v22 = vmov 92  }
 0x4a5   : > { %v4099_v4 = vpop.permute.xlu1 %4098  ;;  %v4046_v56 = vsel %vm532_vm2, %v4040_v11, %v4045_v17  ;;  %v8860_v17 = vmov 78  }
 0x4a6   : > { %v4102_v50 = vrot.slane %v4099_v4, 4  ;;  %v4048_v23 = vmul.f32 %v4046_v56, %v4007_v58  ;;  %v8867_v58 = vmov 85   ;;  %v8869_v56 = vmov 87  }
 0x4a8   : > { %v4104_v27 = vsel %vm350_vm8, %v4102_v50, %v4103_v32  ;;  %v4049_v11 = vadd.f32 %v4048_v23, %v3996_v43  ;;  %v8861_v50 = vmov 79  }
 0x4a9   : > { %v4152_v34 = vpop.permute.xlu1 %4151  ;;  %v4105_v51 = vsel %vm293_vm0, %v4099_v4, %v4104_v27  ;;  %v8866_v27 = vmov 84  }
 0x4aa   : > { %v4155_v63 = vrot.slane %v4152_v34, 4  ;;  %v4107_v19 = vmul.f32 %v4105_v51, %v4064_v45  ;;  %v4311_v51 = vpop.permute.xlu0 %4310 }
 0x4ac   : > { %v4157_v10 = vsel %vm350_vm8, %v4155_v63, %v4156_v49  ;;  %v4108_v36 = vadd.f32 %v4107_v19, %v4049_v11  ;;  %v8871_v49 = vmov 89   ;;  %v5396_v63 = vrot.slane %v5381_v3, %v8980_v5  ;;  %v12477_v3 = vld [vmem:[#allocation14_spill] sm:$0xff] }
 0x4ad   : > { %v4158_v37 = vsel %vm293_vm0, %v4152_v34, %v4157_v10  ;;  %v4205_v8 = vpop.permute.xlu1 %4204  ;;  %v8870_v34 = vmov 88   ;;  %v8873_v19 = vmov 95   ;;  %v8876_v11 = vmov 98  }
 0x4ae   : > { %v4208_v44 = vrot.slane %v4205_v8, 4  ;;  %v4160_v59 = vmul.f32 %v4158_v37, %v4119_v12  ;;  %v10767_v45 = vpop.permute.xlu0 %4505 }
 0x4b0   : > { %v4210_v29 = vsel %vm350_vm8, %v4208_v44, %v4209_v30  ;;  %v4161_v13 = vadd.f32 %v4160_v59, %v4108_v36  ;;  %v8874_v44 = vmov 96   ;;  %v8877_v59 = vmov 99  }
 0x4b1   : > { %v4211_v53 = vsel %vm293_vm0, %v4205_v8, %v4210_v29  ;;  %v4260_v52 = vpop.permute.xlu1 %4259 }
 0x4b2   : > { %v4213_v47 = vmul.f32 %v4211_v53, %v4172_v0  ;;  %v4262_v38 = vrot.slane %v4260_v52, 4  ;;  %v8878_v53 = vmov 100  }
 0x4b4   : > { %v4263_v55 = vsel %vm350_vm8, %v4261_v28, %v4262_v38  ;;  %v4214_v20 = vadd.f32 %v4213_v47, %v4161_v13 }
 0x4b5   : > { %v4264_v48 = vsel %vm293_vm0, %v4258_v16, %v4263_v55  ;;  %v8875_v16 = vmov 97  }
 0x4b6   : > { %v4266_v14 = vmul.f32 %v4264_v48, %v4225_v40 }
 0x4b8   : > { %v4267_v61 = vadd.f32 %v4266_v14, %v4214_v20 }
 0x4ba   : > { %v4269_v21 = vcombine.high %v4267_v61, %v4267_v61  ;;  %v4271_v32 = vsel %vm350_vm8, %v4267_v61, 0.0 }
 0x4bc   : > { %v4272_v35 = vsel %vm350_vm8, %v4269_v21, 0.0 }
 0x4bd   : > { %v4273_v4 = vadd.f32 %v4272_v35, %v4271_v32 }
 0x4be   : > { %v4323_v0 = vpop.permute.xlu1 %4322 }
 0x4bf   : > { %4274 = vadd.xlane.f32.xlu0 %v4273_v4 }
 0x4c3   : > { %v10776_v29 = vpop.permute.xlu1 %4344 }
 0x4c8   : > { %v10779_v52 = vpop.permute.xlu1 %4399 }
 0x4cd   : > { %v10781_v28 = vpop.permute.xlu1 %4452 }
 0x4d2   : > { %v10783_v36 = vpop.permute.xlu1 %5284 }
 0x4d3   : > { %12466 = vst [vmem:[#allocation51_spill] sm:$0xff] %v10783_v36 }
 0x4d5   : > { %4562 = vperm.xlu0 %8652, %v10746_v18  }
 0x4d7   : > { %v10785_v47 = vpop.permute.xlu1 %5319 }
 0x4d8   : > { %12467 = vst [vmem:[#allocation67_spill] sm:$0xff] %v10785_v47 }
 0x4d9   : > { %8653 = vset.pattern.permute.xlu0 %v8859_v39 }
 0x4da   : > { %4617 = vperm.xlu0 %8653, %v10746_v18  }
 0x4dc   : > { %v10787_v38 = vpop.permute.xlu1 %5413 }
 0x4dd   : > { %12468 = vst [vmem:[#allocation61_spill] sm:$0xff] %v10787_v38 }
 0x4de   : > { %8654 = vset.pattern.permute.xlu0 %v8860_v17  ;;  %v4318_v17 = vrot.slane %v4311_v51, %v9656_v24 }
 0x4df   : > { %4670 = vperm.xlu0 %8654, %v10746_v18  }
 0x4e1   : > { %v10789_v40 = vpop.permute.xlu1 %5466 }
 0x4e2   : > { %12469 = vst [vmem:[#allocation8_spill] sm:$0xff] %v10789_v40 }
 0x4e3   : > { %8655 = vset.pattern.permute.xlu0 %v8861_v50 }
 0x4e4   : > { %4723 = vperm.xlu0 %8655, %v10746_v18  }
 0x4e5   : > { %v10791_v13 = vpop.permute.xlu1 %5456 }
 0x4e6   : > { %12470 = vst [vmem:[#allocation62_spill] sm:$0xff] %v10791_v13 }
 0x4e8   : > { %8656 = vset.pattern.permute.xlu0 %v8862_v60  ;;  %v4330_v60 = vrot.slane %v4323_v0, %v9656_v24 }
 0x4e9   : > { %4780 = vperm.xlu0 %8656, %v10746_v18   ;;  %v10793_v55 = vpop.permute.xlu1 %5509 }
 0x4ea   : > { %12471 = vst [vmem:[#allocation60_spill] sm:$0xff] %v10793_v55 }
 0x4ed   : > { %8657 = vset.pattern.permute.xlu0 %v8863_v2  ;;  %v10795_v48 = vpop.permute.xlu1 %5562 }
 0x4ee   : > { %4835 = vperm.xlu0 %8657, %v10746_v18   ;;  %12472 = vst [vmem:[#allocation33_spill] sm:$0xff] %v10795_v48 }
 0x4f1   : > { %v10797_v20 = vpop.permute.xlu1 %5621 }
 0x4f2   : > { %8658 = vset.pattern.permute.xlu0 %v8864_v15  ;;  %12473 = vst [vmem:[#allocation66_spill] sm:$0xff] %v10797_v20  ;;  %v4335_v15 = vstv %s8407_s26 }
 0x4f3   : > { %4888 = vperm.xlu0 %8658, %v10746_v18  }
 0x4f5   : > { %v10799_v14 = vpop.permute.xlu1 %5674 }
 0x4f6   : > { %12474 = vst [vmem:[#allocation47_spill] sm:$0xff] %v10799_v14 }
 0x4f7   : > { %8659 = vset.pattern.permute.xlu0 %v8865_v54 }
 0x4f8   : > { %4941 = vperm.xlu0 %8659, %v10746_v18  }
 0x4fc   : > { %8660 = vset.pattern.permute.xlu0 %v8866_v27 }
 0x4fd   : > { %4998 = vperm.xlu0 %8660, %v10746_v18  }
 0x501   : > { %8661 = vset.pattern.permute.xlu0 %v8867_v58 }
 0x502   : > { %5053 = vperm.xlu0 %8661, %v10746_v18  }
 0x506   : > { %8662 = vset.pattern.permute.xlu0 %v8868_v42 }
 0x507   : > { %5106 = vperm.xlu0 %8662, %v10746_v18  }
 0x50b   : > { %8663 = vset.pattern.permute.xlu0 %v8869_v56 }
 0x50c   : > { %5159 = vperm.xlu0 %8663, %v10746_v18  }
 0x510   : > { %8664 = vset.pattern.permute.xlu0 %v8870_v34  ;;  %v12476_v34 = vld [vmem:[#allocation12_spill] sm:$0xff] }
 0x511   : > { %5213 = vperm.xlu0 %8664, %v10746_v18  }
 0x515   : > { %8665 = vset.pattern.permute.xlu0 %v8871_v49 }
 0x516   : > { %5249 = vperm.xlu0 %8665, %v10746_v18  }
 0x51a   : > { %8668 = vset.pattern.permute.xlu0 %v8872_v22 }
 0x51b   : > { %5358 = vperm.xlu0 %8668, %v10746_v18  }
 0x51f   : > { %5403 = vrot.lane.b32.xlu0 %v5396_v63, %s8774_s16 }
 0x520   : > { %8671 = vset.pattern.permute.xlu0 %v8873_v19 }
 0x523   : > { %5519 = vperm.xlu0 %8671, %v10746_v18  }
 0x527   : > { %8672 = vset.pattern.permute.xlu0 %v8874_v44 }
 0x528   : > { %5576 = vperm.xlu0 %8672, %v10746_v18  }
 0x52c   : > { %8673 = vset.pattern.permute.xlu0 %v8875_v16  ;;  %v12478_v16 = vld [vmem:[#allocation15_spill] sm:$0xff] }
 0x52d   : > { %5631 = vperm.xlu0 %8673, %v10746_v18  }
 0x531   : > { %8674 = vset.pattern.permute.xlu0 %v8876_v11  ;;  %v8879_v11 = vmov 101  }
 0x532   : > { %5684 = vperm.xlu0 %8674, %v10746_v18  }
 0x536   : > { %8675 = vset.pattern.permute.xlu0 %v8877_v59 }
 0x537   : > { %5737 = vperm.xlu0 %8675, %v10746_v18  }
 0x53b   : > { %8676 = vset.pattern.permute.xlu0 %v8878_v53 }
 0x548   : > { %v4275_v41 = vpop.xlane.xlu0 %4274 }
 0x549   : > { %v4276_v23 = vmul.f32 0.00390625, %v4275_v41 }
 0x54b   : > { %v4284_v10 = vrot.slane %v4276_v23, %v9656_v24 }
 0x54d   : > { %v4286_v12 = vsub.f32 %v4267_v61, %v4284_v10  ;;  %v10801_v61 = vpop.permute.xlu1 %5727 }
 0x54e   : > { %12475 = vst [vmem:[#allocation57_spill] sm:$0xff] %v10801_v61 }
 0x54f   : > { %v4287_v37 = vmul.f32 %v4286_v12, %v4286_v12 }
 0x551   : > { %v4289_v8 = vcombine.high %v4287_v37, %v4287_v37  ;;  %v4291_v25 = vsel %vm350_vm8, %v4287_v37, 0.0 }
 0x553   : > { %v4292_v30 = vsel %vm350_vm8, %v4289_v8, 0.0 }
 0x554   : > { %v4293_v43 = vadd.f32 %v4292_v30, %v4291_v25 }
 0x556   : > { %4294 = vadd.xlane.f32.xlu1 %v4293_v43 }
 0x5df   : > { %v4295_v21 = vpop.xlane.xlu1 %4294 }
 0x5e0   : > { %v4296_v32 = vmul.f32 0.00390625, %v4295_v21 }
 0x5e2   : > { %v4297_v35 = vadd.f32 1e-05, %v4296_v32 }
 0x5e4   : > { %8716 = vrsqrt.f32 %v4297_v35  ;;  %v8880_v35 = vmov 102  }
 0x5f1   : > { %v8717_v4 = vpop.eup %8716 }
 0x5f2   : > { %v4306_v39 = vrot.slane %v8717_v4, %v9656_v24  ;;  %v12479_v4 = vld [vmem:[#allocation17_spill] sm:$0xff] }
 0x5f4   : > { %v4308_v50 = vmul.f32 %v4306_v39, %v4286_v12 }
 0x5f6   : > { %v4320_v2 = vmul.f32 %v4318_v17, %v4308_v50 }
 0x5f8   : > { %v4332_v54 = vadd.f32 %v4330_v60, %v4320_v2  ;;  %v8881_v2 = vmov 103  }
 0x5fa   : > { %vm4334_vm10 = vcmp.ge.f32.partialorder %v4332_v54, 0.0  ;;  %v4336_v27 = vmul.f32 %v4335_v15, %v4332_v54 }
 0x5fc   : > { %v10806_v58 = vsel %vm4334_vm10, %v4332_v54, %v4336_v27 }
 0x5fd   : > { %4338 = vst [vmem:[#allocation2 + $0x4] sm:$0xff] %v10806_v58  ;;  %v10845_v39 = vmul.f32 %v10806_v58, %v12479_v4 }
 0x5ff   : > { %v5426_v15 = vrot.slane %v10845_v39, %v8983_v6  ;;  %v5430_v54 = vrot.slane %v10845_v39, %v12439_v33  ;;  %v5532_v26 = vrot.slane %v10845_v39, %v8992_v9  ;;  %v5536_v31 = vrot.slane %v10845_v39, %v12443_v46 }
 0x604   : > { %v4340_v42 = vld [vmem:[#allocation2 + $0x8] sm:$0xf]  ;;  %v10809_v56 = vld [vmem:[#allocation2] sm:$0xff] }
 0x605   : > { %v4342_v49 = vmul.f32 %v4340_v42, %v12476_v34  ;;  %v10814_v22 = vmul.f32 %v10809_v56, %v12477_v3  ;;  %v4558_v43 = vld [vmem:[#allocation2 + $0x8] sm:$0xf] }
 0x606   : > { %v4560_v0 = vmul.f32 %v4558_v43, %v12478_v16  ;;  %v4776_v60 = vld [vmem:[#allocation2 + $0x8] sm:$0xf]  ;;  %v12481_v43 = vld [vmem:[#allocation26_spill] sm:$0xff] }
 0x607   : > { %v4367_v63 = vrot.slane %v4342_v49, %v8980_v5  ;;  %v4412_v51 = vrot.slane %v10814_v22, %v8983_v6  ;;  %v4416_v41 = vrot.slane %v10814_v22, %v12439_v33  ;;  %v4420_v37 = vrot.slane %v4342_v49, %v8983_v6 }
 0x608   : > { %v4473_v30 = vrot.slane %v4342_v49, %v8986_v7  ;;  %v4526_v44 = vrot.slane %v4342_v49, %v8992_v9  ;;  %v4585_v53 = vrot.slane %v4560_v0, %v8980_v5  ;;  %v4638_v32 = vrot.slane %v4560_v0, %v8983_v6  ;;  %v12480_v49 = vld [vmem:[#allocation20_spill] sm:$0xff] }
 0x609   : > { %v4382_v23 = vrot.slane %v4367_v63, %v8980_v5  ;;  %v4427_v10 = vrot.slane %v4412_v51, %v8983_v6  ;;  %v4431_v12 = vrot.slane %v4416_v41, %v8983_v6  ;;  %v4435_v25 = vrot.slane %v4420_v37, %v8983_v6 }
 0x60a   : > { %v4488_v19 = vrot.slane %v4473_v30, %v8986_v7  ;;  %v4541_v59 = vrot.slane %v4526_v44, %v8992_v9  ;;  %v4600_v21 = vrot.slane %v4585_v53, %v8980_v5  ;;  %v4653_v17 = vrot.slane %v4638_v32, %v8983_v6 }
 0x60b   : > { %4389 = vrot.lane.b32.xlu1 %v4382_v23, %s8778_s28  ;;  %v4439_v8 = vcombine.low %v4427_v10, %v4431_v12  ;;  %v4691_v50 = vrot.slane %v4560_v0, %v8986_v7  ;;  %v4744_v42 = vrot.slane %v4560_v0, %v8992_v9  ;;  %v4778_v63 = vmul.f32 %v4776_v60, %v12480_v49 }
 0x60c   : > { %v5441_v51 = vrot.slane %v5426_v15, %v8983_v6  ;;  %v5445_v41 = vrot.slane %v5430_v54, %v8983_v6  ;;  %v8882_v23 = vmov 104   ;;  %v8883_v30 = vmov 105  }
 0x60d   : > { %4440 = vrot.lane.b32.xlu0 %v4439_v8, %s8778_s28  ;;  %v4706_v27 = vrot.slane %v4691_v50, %v8986_v7  ;;  %v4759_v10 = vrot.slane %v4744_v42, %v8992_v9  ;;  %v4803_v12 = vrot.slane %v4778_v63, %v8980_v5  ;;  %v4909_v0 = vrot.slane %v4778_v63, %v8986_v7 }
 0x60e   : > { %v5453_v37 = vcombine.low %v5441_v51, %v5445_v41  ;;  %v8884_v53 = vmov 106   ;;  %v4962_v32 = vrot.slane %v4778_v63, %v8992_v9  ;;  %v12483_v41 = vmov 4  }
 0x60f   : > { %4442 = vrot.lane.b32.xlu1 %v4435_v25, %s8778_s28  ;;  %v4818_v8 = vrot.slane %v4803_v12, %v8980_v5  ;;  %v4856_v25 = vrot.slane %v4778_v63, %v8983_v6 }
 0x610   : > { %v4977_v60 = vrot.slane %v4962_v32, %v8992_v9  ;;  %v5758_v32 = vrot.slane %v10484_v57, %v8992_v9 }
 0x611   : > { %5794 = vperm.xlu0 %8676, %v10746_v18   ;;  %v4871_v44 = vrot.slane %v4856_v25, %v8983_v6  ;;  %v4363_v25 = vrot.slane %v10814_v22, %v12364_v1 }
 0x613   : > { %4495 = vrot.lane.b32.xlu1 %v4488_v19, %s8778_s28  ;;  %v10871_v19 = vmul.f32 %v10806_v58, %v12481_v43 }
 0x615   : > { %8677 = vset.pattern.permute.xlu0 %v8879_v11  ;;  %v4994_v11 = vld [vmem:[#allocation2 + $0x8] sm:$0xf]  ;;  %v6190_v50 = vrot.slane %v10871_v19, %v12443_v46 }
 0x616   : > { %5849 = vperm.xlu0 %8677, %v10746_v18  }
 0x617   : > { %4548 = vrot.lane.b32.xlu1 %v4541_v59, %s8778_s28  ;;  %v6186_v59 = vrot.slane %v10871_v19, %v8992_v9  ;;  %v6205_v54 = vrot.slane %v6190_v50, %v8992_v9 }
 0x619   : > { %v6201_v15 = vrot.slane %v6186_v59, %v8992_v9  ;;  %v12484_v59 = vld [vmem:[#allocation18_spill] sm:$0xff] }
 0x61a   : > { %8678 = vset.pattern.permute.xlu0 %v8880_v35  ;;  %v12482_v35 = vld [vmem:[#allocation23_spill] sm:$0xff] }
 0x61b   : > { %4607 = vrot.lane.b32.xlu1 %v4600_v21, %s8777_s25  ;;  %5902 = vperm.xlu0 %8678, %v10746_v18   ;;  %v4924_v21 = vrot.slane %v4909_v0, %v8986_v7  ;;  %v6213_v63 = vcombine.low %v6201_v15, %v6205_v54  ;;  %v4378_v0 = vrot.slane %v4363_v25, %v8980_v5 }
 0x61f   : > { %4660 = vrot.lane.b32.xlu1 %v4653_v17, %s8777_s25  ;;  %8679 = vset.pattern.permute.xlu0 %v8881_v2  ;;  %v4996_v17 = vmul.f32 %v4994_v11, %v12482_v35  ;;  %v5790_v11 = vld [vmem:[#allocation2 + $0xc] sm:$0xf] }
 0x620   : > { %5955 = vperm.xlu0 %8679, %v10746_v18  }
 0x621   : > { %v5021_v2 = vrot.slane %v4996_v17, %v8980_v5  ;;  %v5074_v51 = vrot.slane %v4996_v17, %v8983_v6 }
 0x623   : > { %4713 = vrot.lane.b32.xlu1 %v4706_v27, %s8777_s25  ;;  %v8885_v27 = vmov 107   ;;  %v5036_v42 = vrot.slane %v5021_v2, %v8980_v5 }
 0x624   : > { %8680 = vset.pattern.permute.xlu0 %v8882_v23  ;;  %v5089_v23 = vrot.slane %v5074_v51, %v8983_v6 }
 0x625   : > { %6012 = vperm.xlu0 %8680, %v10746_v18  }
 0x627   : > { %4766 = vrot.lane.b32.xlu1 %v4759_v10, %s8777_s25  ;;  %v5127_v10 = vrot.slane %v4996_v17, %v8986_v7 }
 0x629   : > { %5454 = vrot.lane.b32.xlu0 %v5453_v37, %s8774_s16  ;;  %v5142_v12 = vrot.slane %v5127_v10, %v8986_v7  ;;  %v5180_v37 = vrot.slane %v4996_v17, %v8992_v9  ;;  %v5773_v17 = vrot.slane %v5758_v32, %v8992_v9 }
 0x62a   : > { %8681 = vset.pattern.permute.xlu0 %v8883_v30 }
 0x62b   : > { %4825 = vrot.lane.b32.xlu1 %v4818_v8, %s8776_s24  ;;  %v4359_v8 = vrot.slane %v10814_v22, %v8980_v5  ;;  %v5195_v30 = vrot.slane %v5180_v37, %v8992_v9  ;;  %v4522_v37 = vrot.slane %v10814_v22, %v12443_v46 }
 0x62d   : > { %6067 = vperm.xlu0 %8681, %v10746_v18  }
 0x62f   : > { %4878 = vrot.lane.b32.xlu1 %v4871_v44, %s8776_s24  ;;  %v4374_v44 = vrot.slane %v4359_v8, %v8980_v5  ;;  %v12485_v8 = vld [vmem:[#allocation24_spill] sm:$0xff] }
 0x630   : > { %v4559_v25 = vmul.f32 %v10809_v56, %v12485_v8 }
 0x631   : > { %8682 = vset.pattern.permute.xlu0 %v8884_v53  ;;  %v5792_v53 = vmul.f32 %v5790_v11, %v12484_v59 }
 0x632   : > { %6120 = vperm.xlu0 %8682, %v10746_v18   ;;  %v4577_v11 = vrot.slane %v4559_v25, %v8980_v5  ;;  %v4581_v59 = vrot.slane %v4559_v25, %v12364_v1 }
 0x633   : > { %4931 = vrot.lane.b32.xlu1 %v4924_v21, %s8776_s24  ;;  %v4386_v21 = vcombine.low %v4374_v44, %v4378_v0  ;;  %v5817_v50 = vrot.slane %v5792_v53, %v8980_v5  ;;  %v5870_v2 = vrot.slane %v5792_v53, %v8983_v6  ;;  %v5923_v54 = vrot.slane %v5792_v53, %v8986_v7 }
 0x634   : > { %v5976_v57 = vrot.slane %v5792_v53, %v8992_v9  ;;  %v4537_v0 = vrot.slane %v4522_v37, %v8992_v9  ;;  %v4630_v53 = vrot.slane %v4559_v25, %v8983_v6  ;;  %v4596_v32 = vrot.slane %v4581_v59, %v8980_v5 }
 0x635   : > { %v5885_v15 = vrot.slane %v5870_v2, %v8983_v6 }
 0x636   : > { %8683 = vset.pattern.permute.xlu0 %v8885_v27  ;;  %v5938_v27 = vrot.slane %v5923_v54, %v8986_v7  ;;  %v5991_v51 = vrot.slane %v5976_v57, %v8992_v9  ;;  %v4645_v2 = vrot.slane %v4630_v53, %v8983_v6  ;;  %v4687_v54 = vrot.slane %v4559_v25, %v12441_v62 }
 0x637   : > { %4984 = vrot.lane.b32.xlu1 %v4977_v60, %s8776_s24  ;;  %6173 = vperm.xlu0 %8683, %v10746_v18   ;;  %v5832_v60 = vrot.slane %v5817_v50, %v8980_v5  ;;  %v4683_v50 = vrot.slane %v4559_v25, %v8986_v7 }
 0x639   : > { %v4698_v57 = vrot.slane %v4683_v50, %v8986_v7 }
 0x63b   : > { %5043 = vrot.lane.b32.xlu1 %v5036_v42, %s8775_s23  ;;  %6214 = vrot.lane.b32.xlu0 %v6213_v63, %s8769_s10  ;;  %v4465_v42 = vrot.slane %v10814_v22, %v8986_v7  ;;  %v4469_v63 = vrot.slane %v10814_v22, %v12441_v62 }
 0x63c   : > { %8684 = vset.pattern.permute.xlu0 %v12483_v41 }
 0x63d   : > { %v4480_v10 = vrot.slane %v4465_v42, %v8986_v7 }
 0x63f   : > { %5096 = vrot.lane.b32.xlu1 %v5089_v23, %s8775_s23  ;;  %v4518_v23 = vrot.slane %v10814_v22, %v8992_v9  ;;  %v4592_v22 = vrot.slane %v4577_v11, %v8980_v5 }
 0x643   : > { %5149 = vrot.lane.b32.xlu1 %v5142_v12, %s8775_s23  ;;  %v4484_v12 = vrot.slane %v4469_v63, %v8986_v7 }
 0x645   : > { %v4492_v44 = vcombine.low %v4480_v10, %v4484_v12  ;;  %v4740_v10 = vrot.slane %v4559_v25, %v12443_v46 }
 0x647   : > { %5202 = vrot.lane.b32.xlu1 %v5195_v30, %s8775_s23  ;;  %v4533_v30 = vrot.slane %v4518_v23, %v8992_v9  ;;  %v4736_v23 = vrot.slane %v4559_v25, %v8992_v9 }
 0x64b   : > { %4387 = vrot.lane.b32.xlu1 %v4386_v21, %s8778_s28  ;;  %v4545_v21 = vcombine.low %v4533_v30, %v4537_v0  ;;  %v4751_v30 = vrot.slane %v4736_v23, %v8992_v9  ;;  %v12487_v23 = vld [vmem:[#allocation27_spill] sm:$0xff] }
 0x64f   : > { %5780 = vrot.lane.b32.xlu1 %v5773_v17, %s8770_s14  ;;  %v4634_v17 = vrot.slane %v4559_v25, %v12439_v33 }
 0x653   : > { %5839 = vrot.lane.b32.xlu1 %v5832_v60, %s8773_s15  ;;  %v4604_v60 = vcombine.low %v4592_v22, %v4596_v32 }
 0x657   : > { %5892 = vrot.lane.b32.xlu1 %v5885_v15, %s8773_s15  ;;  %v4649_v15 = vrot.slane %v4634_v17, %v8983_v6 }
 0x659   : > { %v4657_v63 = vcombine.low %v4645_v2, %v4649_v15 }
 0x65b   : > { %5945 = vrot.lane.b32.xlu1 %v5938_v27, %s8773_s15  ;;  %v12486_v27 = vld [vmem:[#allocation25_spill] sm:$0xff] }
 0x65c   : > { %v4777_v42 = vmul.f32 %v10809_v56, %v12486_v27 }
 0x65e   : > { %v4795_v12 = vrot.slane %v4777_v42, %v8980_v5  ;;  %v4799_v0 = vrot.slane %v4777_v42, %v12364_v1  ;;  %v4848_v25 = vrot.slane %v4777_v42, %v8983_v6  ;;  %v4901_v22 = vrot.slane %v4777_v42, %v8986_v7 }
 0x65f   : > { %5998 = vrot.lane.b32.xlu1 %v5991_v51, %s8773_s15  ;;  %v4702_v51 = vrot.slane %v4687_v54, %v8986_v7  ;;  %v4954_v15 = vrot.slane %v4777_v42, %v8992_v9 }
 0x660   : > { %v4810_v11 = vrot.slane %v4795_v12, %v8980_v5  ;;  %v4814_v53 = vrot.slane %v4799_v0, %v8980_v5  ;;  %v4863_v17 = vrot.slane %v4848_v25, %v8983_v6  ;;  %v4916_v2 = vrot.slane %v4901_v22, %v8986_v7  ;;  %v10986_v12 = vpop.permute.xlu0 %4562 }
 0x661   : > { %v4710_v37 = vcombine.low %v4698_v57, %v4702_v51  ;;  %v4958_v51 = vrot.slane %v4777_v42, %v12443_v46 }
 0x662   : > { %v4822_v32 = vcombine.low %v4810_v11, %v4814_v53 }
 0x663   : > { %4493 = vrot.lane.b32.xlu1 %v4492_v44, %s8778_s28  ;;  %v4755_v44 = vrot.slane %v4740_v10, %v8992_v9  ;;  %v4995_v10 = vmul.f32 %v10809_v56, %v12487_v23  ;;  %v4973_v0 = vrot.slane %v4958_v51, %v8992_v9 }
 0x665   : > { %v4763_v59 = vcombine.low %v4751_v30, %v4755_v44  ;;  %v5013_v11 = vrot.slane %v4995_v10, %v8980_v5  ;;  %v5066_v56 = vrot.slane %v4995_v10, %v8983_v6  ;;  %v5172_v51 = vrot.slane %v4995_v10, %v8992_v9 }
 0x667   : > { %4546 = vrot.lane.b32.xlu1 %v4545_v21, %s8778_s28  ;;  %v4852_v21 = vrot.slane %v4777_v42, %v12439_v33 }
 0x669   : > { %v4867_v50 = vrot.slane %v4852_v21, %v8983_v6  ;;  %v5028_v21 = vrot.slane %v5013_v11, %v8980_v5 }
 0x66b   : > { %4605 = vrot.lane.b32.xlu1 %v4604_v60, %s8777_s25  ;;  %v4905_v60 = vrot.slane %v4777_v42, %v12441_v62  ;;  %v4875_v57 = vcombine.low %v4863_v17, %v4867_v50  ;;  %v10996_v42 = vpop.permute.xlu0 %4617  ;;  %v5119_v17 = vrot.slane %v4995_v10, %v8986_v7 }
 0x66f   : > { %4658 = vrot.lane.b32.xlu1 %v4657_v63, %s8777_s25  ;;  %v4920_v63 = vrot.slane %v4905_v60, %v8986_v7 }
 0x671   : > { %v4928_v44 = vcombine.low %v4916_v2, %v4920_v63  ;;  %v5081_v2 = vrot.slane %v5066_v56, %v8983_v6  ;;  %v11011_v63 = vpop.permute.xlu0 %4670 }
 0x673   : > { %4711 = vrot.lane.b32.xlu1 %v4710_v37, %s8777_s25  ;;  %v4969_v37 = vrot.slane %v4954_v15, %v8992_v9 }
 0x675   : > { %v4981_v25 = vcombine.low %v4969_v37, %v4973_v0  ;;  %v5134_v0 = vrot.slane %v5119_v17, %v8986_v7  ;;  %v11021_v56 = vpop.permute.xlu0 %4723  ;;  %v5377_v17 = vrot.slane %v10845_v39, %v12364_v1 }
 0x677   : > { %4764 = vrot.lane.b32.xlu1 %v4763_v59, %s8777_s25  ;;  %v5017_v59 = vrot.slane %v4995_v10, %v12364_v1 }
 0x679   : > { %v5032_v22 = vrot.slane %v5017_v59, %v8980_v5  ;;  %v5176_v59 = vrot.slane %v4995_v10, %v12443_v46 }
 0x67b   : > { %4823 = vrot.lane.b32.xlu1 %v4822_v32, %s8776_s24  ;;  %v5070_v32 = vrot.slane %v4995_v10, %v12439_v33  ;;  %v5040_v60 = vcombine.low %v5028_v21, %v5032_v22 }
 0x67d   : > { %v10980_v54 = vpop.permute.xlu1 %4389  ;;  %v5085_v15 = vrot.slane %v5070_v32, %v8983_v6  ;;  %v5187_v32 = vrot.slane %v5172_v51, %v8992_v9 }
 0x67f   : > { %4876 = vrot.lane.b32.xlu1 %v4875_v57, %s8776_s24  ;;  %v5123_v57 = vrot.slane %v4995_v10, %v12441_v62  ;;  %v12488_v10 = vld [vmem:[#allocation21_spill] sm:$0xff] }
 0x681   : > { %v10990_v30 = vpop.permute.xlu1 %4442  ;;  %v5138_v11 = vrot.slane %v5123_v57, %v8986_v7 }
 0x683   : > { %4929 = vrot.lane.b32.xlu1 %v4928_v44, %s8776_s24  ;;  %v5093_v44 = vcombine.low %v5081_v2, %v5085_v15  ;;  %v5146_v22 = vcombine.low %v5134_v0, %v5138_v11  ;;  %v6008_v2 = vld [vmem:[#allocation2 + $0xc] sm:$0xf]  ;;  %v5392_v0 = vrot.slane %v5377_v17, %v8980_v5  ;;  %v11039_v11 = vpop.permute.xlu0 %4780 }
 0x684   : > { %v11033_v15 = vmul.f32 %v6008_v2, %v12488_v10 }
 0x685   : > { %v10999_v53 = vpop.permute.xlu1 %4495 }
 0x687   : > { %4982 = vrot.lane.b32.xlu1 %v4981_v25, %s8776_s24  ;;  %v5373_v25 = vrot.slane %v10845_v39, %v8980_v5  ;;  %v11047_v2 = vpop.permute.xlu0 %4835 }
 0x689   : > { %v11006_v50 = vpop.permute.xlu1 %4548  ;;  %v5388_v41 = vrot.slane %v5373_v25, %v8980_v5 }
 0x68b   : > { %5041 = vrot.lane.b32.xlu1 %v5040_v60, %s8775_s23  ;;  %v5191_v60 = vrot.slane %v5176_v59, %v8992_v9  ;;  %v5400_v59 = vcombine.low %v5388_v41, %v5392_v0  ;;  %v5483_v0 = vrot.slane %v10845_v39, %v12441_v62 }
 0x68d   : > { %v11015_v37 = vpop.permute.xlu1 %4607 }
 0x68f   : > { %5094 = vrot.lane.b32.xlu1 %v5093_v44, %s8775_s23  ;;  %v5199_v44 = vcombine.low %v5187_v32, %v5191_v60  ;;  %v6088_v32 = vrot.slane %v11033_v15, %v8983_v6  ;;  %v6141_v60 = vrot.slane %v11033_v15, %v8986_v7 }
 0x691   : > { %v11025_v21 = vpop.permute.xlu1 %4660  ;;  %v6103_v17 = vrot.slane %v6088_v32, %v8983_v6  ;;  %v5498_v32 = vrot.slane %v5483_v0, %v8986_v7  ;;  %v5551_v0 = vrot.slane %v5536_v31, %v8992_v9 }
 0x693   : > { %5147 = vrot.lane.b32.xlu1 %v5146_v22, %s8775_s23  ;;  %v6035_v22 = vrot.slane %v11033_v15, %v8980_v5 }
 0x695   : > { %v11035_v57 = vpop.permute.xlu1 %4713  ;;  %v6050_v25 = vrot.slane %v6035_v22, %v8980_v5  ;;  %v6156_v22 = vrot.slane %v6141_v60, %v8986_v7 }
 0x697   : > { %5200 = vrot.lane.b32.xlu1 %v5199_v44, %s8775_s23  ;;  %v5479_v44 = vrot.slane %v10845_v39, %v8986_v7 }
 0x699   : > { %v11042_v51 = vpop.permute.xlu1 %4766  ;;  %v5494_v8 = vrot.slane %v5479_v44, %v8986_v7  ;;  %v5547_v44 = vrot.slane %v5532_v26, %v8992_v9 }
 0x69b   : > { %5401 = vrot.lane.b32.xlu1 %v5400_v59, %s8774_s16  ;;  %v11064_v59 = vpop.permute.xlu0 %4888  ;;  %v5506_v49 = vcombine.low %v5494_v8, %v5498_v32  ;;  %v5559_v16 = vcombine.low %v5547_v44, %v5551_v0  ;;  %v12490_v0 = vld [vmem:[#allocation34_spill] sm:$0xff] }
 0x69d   : > { %v11049_v10 = vpop.permute.xlu1 %4825 }
 0x69f   : > { %6057 = vrot.lane.b32.xlu1 %v6050_v25, %s8769_s10  ;;  %v12489_v25 = vld [vmem:[#allocation31_spill] sm:$0xff] }
 0x6a0   : > { %v5573_v23 = vmul.f32 %v10806_v58, %v12489_v25 }
 0x6a1   : > { %v11057_v41 = vpop.permute.xlu1 %4878 }
 0x6a2   : > { %v5591_v60 = vrot.slane %v5573_v23, %v8980_v5  ;;  %v5595_v43 = vrot.slane %v5573_v23, %v12364_v1  ;;  %v5644_v4 = vrot.slane %v5573_v23, %v8983_v6  ;;  %v5648_v3 = vrot.slane %v5573_v23, %v12439_v33 }
 0x6a3   : > { %6110 = vrot.lane.b32.xlu1 %v6103_v17, %s8769_s10  ;;  %v11079_v17 = vpop.permute.xlu0 %4941  ;;  %v5701_v32 = vrot.slane %v5573_v23, %v12441_v62  ;;  %v5750_v44 = vrot.slane %v5573_v23, %v8992_v9  ;;  %v5754_v61 = vrot.slane %v5573_v23, %v12443_v46 }
 0x6a4   : > { %v5606_v25 = vrot.slane %v5591_v60, %v8980_v5  ;;  %v5610_v39 = vrot.slane %v5595_v43, %v8980_v5  ;;  %v5659_v31 = vrot.slane %v5644_v4, %v8983_v6  ;;  %v5697_v43 = vrot.slane %v5573_v23, %v8986_v7 }
 0x6a5   : > { %v11070_v27 = vpop.permute.xlu1 %4931  ;;  %v5769_v38 = vrot.slane %v5754_v61, %v8992_v9 }
 0x6a6   : > { %v5618_v26 = vcombine.low %v5606_v25, %v5610_v39  ;;  %v5712_v4 = vrot.slane %v5697_v43, %v8986_v7 }
 0x6a7   : > { %6163 = vrot.lane.b32.xlu1 %v6156_v22, %s8769_s10  ;;  %v11094_v34 = vpop.permute.xlu0 %4998 }
 0x6a9   : > { %v11083_v35 = vpop.permute.xlu1 %4984 }
 0x6ab   : > { %5507 = vrot.lane.b32.xlu1 %v5506_v49, %s8774_s16  ;;  %v5663_v49 = vrot.slane %v5648_v3, %v8983_v6  ;;  %v11104_v60 = vpop.permute.xlu0 %5053  ;;  %v5716_v3 = vrot.slane %v5701_v32, %v8986_v7 }
 0x6ad   : > { %v11090_v22 = vpop.permute.xlu1 %5043  ;;  %v5671_v39 = vcombine.low %v5659_v31, %v5663_v49  ;;  %v5724_v40 = vcombine.low %v5712_v4, %v5716_v3 }
 0x6af   : > { %5560 = vrot.lane.b32.xlu1 %v5559_v16, %s8774_s16  ;;  %v5791_v16 = vmul.f32 %v10806_v58, %v12490_v0  ;;  %v11121_v31 = vpop.permute.xlu0 %5106 }
 0x6b1   : > { %v11097_v8 = vpop.permute.xlu1 %5096  ;;  %v5809_v0 = vrot.slane %v5791_v16, %v8980_v5  ;;  %v5813_v20 = vrot.slane %v5791_v16, %v12364_v1  ;;  %v5862_v49 = vrot.slane %v5791_v16, %v8983_v6  ;;  %v5915_v4 = vrot.slane %v5791_v16, %v8986_v7 }
 0x6b2   : > { %v5968_v13 = vrot.slane %v5791_v16, %v8992_v9 }
 0x6b3   : > { %5619 = vrot.lane.b32.xlu1 %v5618_v26, %s8770_s14  ;;  %v5765_v26 = vrot.slane %v5750_v44, %v8992_v9  ;;  %v5824_v32 = vrot.slane %v5809_v0, %v8980_v5  ;;  %v5828_v44 = vrot.slane %v5813_v20, %v8980_v5  ;;  %v11131_v61 = vpop.permute.xlu0 %5159  ;;  %v5877_v48 = vrot.slane %v5862_v49, %v8983_v6 }
 0x6b4   : > { %v5930_v20 = vrot.slane %v5915_v4, %v8986_v7  ;;  %v6027_v49 = vrot.slane %v10871_v19, %v8980_v5  ;;  %v5983_v4 = vrot.slane %v5968_v13, %v8992_v9  ;;  %v6084_v13 = vrot.slane %v10871_v19, %v12439_v33 }
 0x6b5   : > { %v11109_v25 = vpop.permute.xlu1 %5149  ;;  %v5777_v43 = vcombine.low %v5765_v26, %v5769_v38  ;;  %v5919_v38 = vrot.slane %v5791_v16, %v12441_v62 }
 0x6b7   : > { %5672 = vrot.lane.b32.xlu1 %v5671_v39, %s8770_s14  ;;  %v5866_v39 = vrot.slane %v5791_v16, %v12439_v33 }
 0x6b9   : > { %v11116_v14 = vpop.permute.xlu1 %5202  ;;  %v5881_v55 = vrot.slane %v5866_v39, %v8983_v6 }
 0x6bb   : > { %5725 = vrot.lane.b32.xlu1 %v5724_v40, %s8770_s14  ;;  %v5836_v40 = vcombine.low %v5824_v32, %v5828_v44  ;;  %v5889_v26 = vcombine.low %v5877_v48, %v5881_v55  ;;  %v11146_v32 = vpop.permute.xlu0 %5213  ;;  %v6031_v48 = vrot.slane %v10871_v19, %v12364_v1 }
 0x6bc   : > { %12493 = vst [vmem:[#allocation68_spill] sm:$0xff] %v11146_v32 }
 0x6bd   : > { %v11125_v23 = vpop.permute.xlu1 %4387 }
 0x6be   : > { %v4391_v47 = vrot.slane %v11125_v23, 4 }
 0x6bf   : > { %5778 = vrot.lane.b32.xlu1 %v5777_v43, %s8770_s14  ;;  %v5934_v43 = vrot.slane %v5919_v38, %v8986_v7 }
 0x6c1   : > { %v11134_v3 = vpop.permute.xlu1 %5780  ;;  %v5942_v39 = vcombine.low %v5930_v20, %v5934_v43  ;;  %v6046_v20 = vrot.slane %v6031_v48, %v8980_v5 }
 0x6c2   : > { %12491 = vst [vmem:[#allocation59_spill] sm:$0xff] %v11134_v3  ;;  %v5972_v3 = vrot.slane %v5791_v16, %v12443_v46  ;;  %v11158_v16 = vpop.permute.xlu0 %5249 }
 0x6c3   : > { %5837 = vrot.lane.b32.xlu1 %v5836_v40, %s8773_s15  ;;  %12495 = vst [vmem:[#allocation13_spill] sm:$0xff] %v11158_v16  ;;  %v6080_v40 = vrot.slane %v10871_v19, %v8983_v6  ;;  %v4551_v16 = vrot.slane %v11006_v50, 4 }
 0x6c4   : > { %v5987_v55 = vrot.slane %v5972_v3, %v8992_v9 }
 0x6c5   : > { %v11141_v0 = vpop.permute.xlu1 %5839  ;;  %v6095_v3 = vrot.slane %v6080_v40, %v8983_v6 }
 0x6c6   : > { %12492 = vst [vmem:[#allocation54_spill] sm:$0xff] %v11141_v0  ;;  %v6099_v0 = vrot.slane %v6084_v13, %v8983_v6 }
 0x6c7   : > { %5890 = vrot.lane.b32.xlu1 %v5889_v26, %s8773_s15  ;;  %v5995_v26 = vcombine.low %v5983_v4, %v5987_v55  ;;  %v11177_v4 = vpop.permute.xlu0 %5358 }
 0x6c8   : > { %12498 = vst [vmem:[#allocation58_spill] sm:$0xff] %v11177_v4  ;;  %v6107_v48 = vcombine.low %v6095_v3, %v6099_v0 }
 0x6c9   : > { %v11151_v44 = vpop.permute.xlu1 %5892 }
 0x6ca   : > { %12494 = vst [vmem:[#allocation49_spill] sm:$0xff] %v11151_v44  ;;  %v6042_v44 = vrot.slane %v6027_v49, %v8980_v5  ;;  %v6137_v49 = vrot.slane %v10871_v19, %v12441_v62 }
 0x6cb   : > { %5943 = vrot.lane.b32.xlu1 %v5942_v39, %s8773_s15 }
 0x6cc   : > { %v6054_v39 = vcombine.low %v6042_v44, %v6046_v20  ;;  %v11185_v44 = vpop.permute.xlu0 %5403 }
 0x6cd   : > { %v11162_v38 = vpop.permute.xlu1 %5945  ;;  %12499 = vst [vmem:[#allocation56_spill] sm:$0xff] %v11185_v44  ;;  %v4392_v44 = vrot.slane %v10980_v54, 4  ;;  %v4353_v54 = vrot.slane %v10776_v29, %v9656_v24 }
 0x6ce   : > { %12496 = vst [vmem:[#allocation45_spill] sm:$0xff] %v11162_v38  ;;  %v6133_v38 = vrot.slane %v10871_v19, %v8986_v7  ;;  %v6194_v19 = vrot.slane %v11033_v15, %v8992_v9 }
 0x6cf   : > { %5996 = vrot.lane.b32.xlu1 %v5995_v26, %s8773_s15  ;;  %v6152_v26 = vrot.slane %v6137_v49, %v8986_v7  ;;  %v11205_v49 = vld [vmem:[%s12193_s2] sm:$0xf] }
 0x6d0   : > { %v6148_v40 = vrot.slane %v6133_v38, %v8986_v7  ;;  %v6209_v0 = vrot.slane %v6194_v19, %v8992_v9  ;;  %12502 = vst [vmem:[#allocation55_spill] sm:$0xff] %v11205_v49 }
 0x6d1   : > { %v11170_v43 = vpop.permute.xlu1 %5998 }
 0x6d2   : > { %12497 = vst [vmem:[#allocation64_spill] sm:$0xff] %v11170_v43  ;;  %v6160_v13 = vcombine.low %v6148_v40, %v6152_v26 }
 0x6d3   : > { %6055 = vrot.lane.b32.xlu1 %v6054_v39, %s8769_s10  ;;  %v11192_v39 = vpop.permute.xlu0 %5519 }
 0x6d4   : > { %12500 = vst [vmem:[#allocation52_spill] sm:$0xff] %v11192_v39  ;;  %v8889_v39 = vmov 111  }
 0x6d5   : > { %v11180_v55 = vpop.permute.xlu1 %4493 }
 0x6d7   : > { %6108 = vrot.lane.b32.xlu1 %v6107_v48, %s8769_s10  ;;  %v11200_v3 = vpop.permute.xlu0 %5576  ;;  %v8886_v48 = vmov 108  }
 0x6d8   : > { %12501 = vst [vmem:[#allocation65_spill] sm:$0xff] %v11200_v3 }
 0x6d9   : > { %v11187_v20 = vpop.permute.xlu1 %4546 }
 0x6db   : > { %6161 = vrot.lane.b32.xlu1 %v6160_v13, %s8769_s10  ;;  %v11210_v40 = vpop.permute.xlu0 %5631  ;;  %v8887_v13 = vmov 109  }
 0x6dc   : > { %12503 = vst [vmem:[#allocation63_spill] sm:$0xff] %v11210_v40 }
 0x6dd   : > { %v11194_v43 = vpop.permute.xlu1 %4605 }
 0x6df   : > { %6216 = vrot.lane.b32.xlu1 %v6209_v0, %s8769_s10  ;;  %v11218_v0 = vpop.permute.xlu0 %5684 }
 0x6e0   : > { %12504 = vst [vmem:[#allocation71_spill] sm:$0xff] %v11218_v0  ;;  %v4445_v0 = vrot.slane %v10990_v30, 4  ;;  %v4609_v30 = vrot.slane %v11194_v43, 4 }
 0x6e1   : > { %v11198_v38 = vpop.permute.xlu1 %4658 }
 0x6e2   : > { %v4662_v50 = vrot.slane %v11198_v38, 4 }
 0x6e3   : > { %6279 = vperm.xlu1 %8685, %v11205_v49   ;;  %v8888_v49 = vmov 110  }
 0x6e5   : > { %v11208_v15 = vpop.permute.xlu1 %4711 }
 0x6e7   : > { %8686 = vset.pattern.permute.xlu1 %v8886_v48  ;;  %v11223_v48 = vpop.permute.xlu0 %5737 }
 0x6e8   : > { %6301 = vperm.xlu1 %8686, %v10746_v18   ;;  %12505 = vst [vmem:[#allocation53_spill] sm:$0xff] %v11223_v48  ;;  %v4498_v48 = vrot.slane %v10999_v53, 4  ;;  %v4610_v53 = vrot.slane %v11015_v37, 4  ;;  %v4715_v37 = vrot.slane %v11208_v15, 4 }
 0x6e9   : > { %v11213_v26 = vpop.permute.xlu1 %4764 }
 0x6eb   : > { %v4441_v4 = vpop.permute.xlu0 %4440 }
 0x6ec   : > { %8687 = vset.pattern.permute.xlu1 %v8887_v13  ;;  %v4444_v36 = vrot.slane %v4441_v4, 4 }
 0x6ed   : > { %v11215_v19 = vpop.permute.xlu1 %4823  ;;  %6356 = vperm.xlu1 %8687, %v10746_v18  }
 0x6ee   : > { %v4446_v9 = vsel %vm350_vm8, %v4444_v36, %v4445_v0  ;;  %v4461_v0 = vrot.slane %v10781_v28, %v9656_v24  ;;  %v4716_v28 = vrot.slane %v11035_v57, 4  ;;  %v4626_v57 = vrot.slane %v10996_v42, %v9656_v24 }
 0x6f1   : > { %v11220_v3 = vpop.permute.xlu1 %4876  ;;  %8688 = vset.pattern.permute.xlu1 %v8888_v49  ;;  %v4497_v49 = vrot.slane %v11180_v55, 4 }
 0x6f2   : > { %6409 = vperm.xlu1 %8688, %v10746_v18  }
 0x6f3   : > { %v4499_v62 = vsel %vm350_vm8, %v4497_v49, %v4498_v48 }
 0x6f4   : > { %v4500_v29 = vsel %vm352_vm4, %v11180_v55, %v4499_v62  ;;  %v4769_v55 = vrot.slane %v11042_v51, 4 }
 0x6f5   : > { %v11225_v40 = vpop.permute.xlu1 %4929 }
 0x6f6   : > { %8689 = vset.pattern.permute.xlu1 %v8889_v39  ;;  %v4393_v39 = vsel %vm350_vm8, %v4391_v47, %v4392_v44  ;;  %v4447_v47 = vsel %vm352_vm4, %v4441_v4, %v4446_v9  ;;  %v4408_v44 = vrot.slane %v10779_v52, %v9656_v24  ;;  %v4611_v9 = vsel %vm350_vm8, %v4609_v30, %v4610_v53 }
 0x6f7   : > { %6462 = vperm.xlu1 %8689, %v10746_v18   ;;  %v4550_v18 = vrot.slane %v11187_v20, 4  ;;  %v4394_v7 = vsel %vm352_vm4, %v11125_v23, %v4393_v39  ;;  %v4663_v23 = vrot.slane %v11025_v21, 4  ;;  %v4502_v39 = vmul.f32 %v4500_v29, %v4461_v0 }
 0x6f8   : > { %v4396_v48 = vmul.f32 %v4394_v7, %v4353_v54  ;;  %v4449_v4 = vmul.f32 %v4447_v47, %v4408_v44  ;;  %v4768_v7 = vrot.slane %v11213_v26, 4  ;;  %v4571_v21 = vrot.slane %v10986_v12, %v9656_v24 }
 0x6f9   : > { %v11228_v13 = vpop.permute.xlu1 %4982  ;;  %v4552_v36 = vsel %vm350_vm8, %v4550_v18, %v4551_v16  ;;  %v4514_v16 = vrot.slane %v10767_v45, %v9656_v24  ;;  %v4664_v62 = vsel %vm350_vm8, %v4662_v50, %v4663_v23  ;;  %v4612_v45 = vsel %vm589_vm7, %v11194_v43, %v4611_v9 }
 0x6fa   : > { %v4553_v52 = vsel %vm352_vm4, %v11187_v20, %v4552_v36  ;;  %v4450_v18 = vadd.f32 %v4449_v4, %v4396_v48  ;;  %v4717_v20 = vsel %vm350_vm8, %v4715_v37, %v4716_v28  ;;  %v4827_v54 = vrot.slane %v11215_v19, 4  ;;  %v11305_v28 = vpop.permute.xlu0 %5794 }
 0x6fb   : > { %v4555_v30 = vmul.f32 %v4553_v52, %v4514_v16  ;;  %v4828_v47 = vrot.slane %v11049_v10, 4  ;;  %v4665_v53 = vsel %vm589_vm7, %v11198_v38, %v4664_v62  ;;  %v4614_v36 = vmul.f32 %v4612_v45, %v4571_v21 }
 0x6fc   : > { %v4503_v51 = vadd.f32 %v4502_v39, %v4450_v18  ;;  %v4770_v43 = vsel %vm350_vm8, %v4768_v7, %v4769_v55  ;;  %v4880_v50 = vrot.slane %v11220_v3, 4  ;;  %v4679_v44 = vrot.slane %v11011_v63, %v9656_v24 }
 0x6fd   : > { %v11234_v46 = vpop.permute.xlu1 %5041  ;;  %v4881_v0 = vrot.slane %v11057_v41, 4  ;;  %v4718_v42 = vsel %vm589_vm7, %v11208_v15, %v4717_v20  ;;  %v4667_v29 = vmul.f32 %v4665_v53, %v4626_v57  ;;  %v4829_v38 = vsel %vm350_vm8, %v4827_v54, %v4828_v47 }
 0x6fe   : > { %v4556_v10 = vadd.f32 %v4555_v30, %v4503_v51  ;;  %v4933_v23 = vrot.slane %v11225_v40, 4  ;;  %v4732_v48 = vrot.slane %v11021_v56, %v9656_v24  ;;  %v4934_v9 = vrot.slane %v11070_v27, 4  ;;  %v11330_v51 = vpop.permute.xlu0 %5849 }
 0x6ff   : > { %v4771_v37 = vsel %vm589_vm7, %v11213_v26, %v4770_v43  ;;  %v4720_v16 = vmul.f32 %v4718_v42, %v4679_v44  ;;  %v4882_v15 = vsel %vm350_vm8, %v4880_v50, %v4881_v0  ;;  %v4986_v4 = vrot.slane %v11228_v13, 4 }
 0x700   : > { %v4615_v41 = vadd.f32 %v4614_v36, %v4556_v10  ;;  %v4789_v52 = vrot.slane %v11039_v11, %v9656_v24  ;;  %v4987_v56 = vrot.slane %v11083_v35, 4  ;;  %v4830_v27 = vsel %vm826_vm6, %v11215_v19, %v4829_v38 }
 0x701   : > { %v11247_v32 = vpop.permute.xlu1 %5094  ;;  %v4773_v26 = vmul.f32 %v4771_v37, %v4732_v48  ;;  %v4935_v62 = vsel %vm350_vm8, %v4933_v23, %v4934_v9  ;;  %v5045_v7 = vrot.slane %v11234_v46, 4  ;;  %v4844_v21 = vrot.slane %v11047_v2, %v9656_v24 }
 0x702   : > { %v4668_v39 = vadd.f32 %v4667_v29, %v4615_v41  ;;  %v5046_v55 = vrot.slane %v11090_v22, 4  ;;  %v4883_v11 = vsel %vm826_vm6, %v11220_v3, %v4882_v15  ;;  %v4832_v18 = vmul.f32 %v4830_v27, %v4789_v52  ;;  %v11356_v37 = vpop.permute.xlu0 %5902 }
 0x703   : > { %v4988_v19 = vsel %vm350_vm8, %v4986_v4, %v4987_v56  ;;  %v5098_v30 = vrot.slane %v11247_v32, 4  ;;  %v4897_v20 = vrot.slane %v11064_v59, %v9656_v24  ;;  %v5099_v54 = vrot.slane %v11097_v8, 4 }
 0x704   : > { %v4721_v35 = vadd.f32 %v4720_v16, %v4668_v39  ;;  %v4936_v2 = vsel %vm826_vm6, %v11225_v40, %v4935_v62  ;;  %v4885_v57 = vmul.f32 %v4883_v11, %v4844_v21  ;;  %v5047_v3 = vsel %vm350_vm8, %v5045_v7, %v5046_v55 }
 0x705   : > { %v11266_v49 = vpop.permute.xlu1 %5147  ;;  %v4950_v53 = vrot.slane %v11079_v17, %v9656_v24  ;;  %v5152_v36 = vrot.slane %v11109_v25, 4  ;;  %v4989_v59 = vsel %vm826_vm6, %v11228_v13, %v4988_v19  ;;  %v4938_v40 = vmul.f32 %v4936_v2, %v4897_v20  ;;  %v8736_v19 = vld [vmem:[#allocation2 + $0x4] sm:$0xff] }
 0x706   : > { %v4774_v22 = vadd.f32 %v4773_v26, %v4721_v35  ;;  %v5151_v47 = vrot.slane %v11266_v49, 4  ;;  %v5100_v50 = vsel %vm350_vm8, %v5098_v30, %v5099_v54  ;;  %v5007_v0 = vrot.slane %v11094_v34, %v9656_v24  ;;  %v11376_v55 = vpop.permute.xlu0 %5955  ;;  %v12507_v30 = vld [vmem:[#allocation7_spill] sm:$0xff]  ;;  %v12508_v54 = vld [vmem:[#allocation10_spill] sm:$0xff] }
 0x707   : > { %v5048_v17 = vsel %vm1063_vm1, %v11234_v46, %v5047_v3  ;;  %v5205_v42 = vrot.slane %v11116_v14, 4  ;;  %v4991_v10 = vmul.f32 %v4989_v59, %v4950_v53  ;;  %v5062_v29 = vrot.slane %v11104_v60, %v9656_v24  ;;  %v12510_v53 = vld [vmem:[#allocation9_spill] sm:$0xff] }
 0x708   : > { %v4833_v43 = vadd.f32 %v4832_v18, %v4774_v22  ;;  %v5153_v13 = vsel %vm350_vm8, %v5151_v47, %v5152_v36  ;;  %v5101_v38 = vsel %vm1063_vm1, %v11247_v32, %v5100_v50  ;;  %v5227_v23 = vrot.slane %v10806_v58, %v8980_v5 }
 0x709   : > { %v11283_v12 = vpop.permute.xlu1 %5200  ;;  %v5050_v9 = vmul.f32 %v5048_v17, %v5007_v0  ;;  %v5231_v46 = vrot.slane %v10806_v58, %v12364_v1  ;;  %v5154_v60 = vsel %vm1063_vm1, %v11266_v49, %v5153_v13  ;;  %v5115_v32 = vrot.slane %v11121_v31, %v9656_v24 }
 0x70a   : > { %v5204_v44 = vrot.slane %v11283_v12, 4  ;;  %v4886_v25 = vadd.f32 %v4885_v57, %v4833_v43  ;;  %v5103_v16 = vmul.f32 %v5101_v38, %v5062_v29  ;;  %v5168_v15 = vrot.slane %v11131_v61, %v9656_v24  ;;  %v12506_v61 = vld [vmem:[#allocation68_spill] sm:$0xff]  ;;  %v12509_v57 = vld [vmem:[#allocation13_spill] sm:$0xff]  ;;  %v11390_v17 = vpop.permute.xlu0 %6012 }
 0x70b   : > { %v5262_v4 = vrot.slane %v10806_v58, %v8983_v6  ;;  %v5266_v52 = vrot.slane %v10806_v58, %v12439_v33  ;;  %v5156_v39 = vmul.f32 %v5154_v60, %v5115_v32  ;;  %v5237_v31 = vrot.slane %v5227_v23, %v8980_v5  ;;  %v12512_v23 = vld [vmem:[#allocation51_spill] sm:$0xff]  ;;  %v12513_v32 = vld [vmem:[#allocation56_spill] sm:$0xff] }
 0x70c   : > { %v4939_v34 = vadd.f32 %v4938_v40, %v4886_v25  ;;  %v5206_v14 = vsel %vm350_vm8, %v5204_v44, %v5205_v42  ;;  %v5241_v26 = vrot.slane %v5231_v46, %v8980_v5  ;;  %v5222_v21 = vrot.slane %v12506_v61, %v9656_v24  ;;  %v12511_v44 = vld [vmem:[#allocation11_spill] sm:$0xff]  ;;  %v12516_v61 = vld [vmem:[#allocation60_spill] sm:$0xff] }
 0x70d   : > { %v11299_v63 = vpop.permute.xlu1 %5401  ;;  %v5207_v56 = vsel %vm1063_vm1, %v11283_v12, %v5206_v14  ;;  %v5272_v58 = vrot.slane %v5262_v4, %v8983_v6  ;;  %v5276_v11 = vrot.slane %v5266_v52, %v8983_v6  ;;  %v5297_v20 = vrot.slane %v8736_v19, %v12507_v30  ;;  %v12514_v4 = vld [vmem:[#allocation67_spill] sm:$0xff] }
 0x70e   : > { %v4992_v41 = vadd.f32 %v4991_v10, %v4939_v34  ;;  %v5209_v7 = vmul.f32 %v5207_v56, %v5168_v15  ;;  %v5244_v18 = vcombine.low %v5237_v31, %v5241_v26  ;;  %v5301_v2 = vrot.slane %v8736_v19, %v12508_v54  ;;  %v5455_v14 = vpop.permute.xlu0 %5454 }
 0x70f   : > { %v5258_v3 = vrot.slane %v12509_v57, %v9656_v24  ;;  %v5279_v47 = vcombine.low %v5272_v58, %v5276_v11  ;;  %v5332_v36 = vrot.slane %v8736_v19, %v12510_v53  ;;  %v5307_v40 = vrot.slane %v5297_v20, %v12507_v30 }
 0x710   : > { %v5051_v49 = vadd.f32 %v5050_v9, %v4992_v41  ;;  %v5246_v43 = vmul.f32 %v5244_v18, %v5222_v21  ;;  %v5311_v50 = vrot.slane %v5301_v2, %v12507_v30  ;;  %v5336_v0 = vrot.slane %v8736_v19, %v12511_v44  ;;  %v12518_v19 = vld [vmem:[#allocation58_spill] sm:$0xff] }
 0x711   : > { %v11317_v45 = vpop.permute.xlu1 %6057  ;;  %v5281_v10 = vmul.f32 %v5279_v47, %v5258_v3  ;;  %v5342_v29 = vrot.slane %v5332_v36, %v12510_v53  ;;  %v5293_v34 = vrot.slane %v12512_v23, %v9656_v24  ;;  %v5405_v46 = vrot.slane %v11299_v63, 4 }
 0x712   : > { %v5104_v62 = vadd.f32 %v5103_v16, %v5051_v49  ;;  %v5314_v13 = vcombine.low %v5307_v40, %v5311_v50  ;;  %v5346_v38 = vrot.slane %v5336_v0, %v12510_v53  ;;  %v5406_v41 = vrot.slane %v12513_v32, 4 }
 0x713   : > { %v5328_v52 = vrot.slane %v12514_v4, %v9656_v24  ;;  %v5458_v56 = vrot.slane %v5455_v14, 4  ;;  %v5512_v21 = vrot.slane %v12516_v61, 4  ;;  %v5367_v20 = vrot.slane %v12518_v19, %v9656_v24  ;;  %v12524_v4 = vld [vmem:[#allocation52_spill] sm:$0xff]  ;;  %v12526_v61 = vld [vmem:[#allocation59_spill] sm:$0xff] }
 0x714   : > { %v5157_v35 = vadd.f32 %v5156_v39, %v5104_v62  ;;  %v5316_v16 = vmul.f32 %v5314_v13, %v5293_v34  ;;  %v5349_v15 = vcombine.low %v5342_v29, %v5346_v38  ;;  %v5407_v39 = vsel %vm350_vm8, %v5405_v46, %v5406_v41  ;;  %v12515_v62 = vld [vmem:[#allocation62_spill] sm:$0xff]  ;;  %v12521_v29 = vld [vmem:[#allocation8_spill] sm:$0xff]  ;;  %v12522_v34 = vld [vmem:[#allocation47_spill] sm:$0xff] }
 0x715   : > { %v11335_v8 = vpop.permute.xlu1 %6110  ;;  %v5408_v2 = vsel %vm1006_vm5, %v11299_v63, %v5407_v39  ;;  %v5475_v38 = vrot.slane %v12521_v29, %v9656_v24 }
 0x716   : > { %v5210_v22 = vadd.f32 %v5209_v7, %v5157_v35  ;;  %v5459_v7 = vrot.slane %v12515_v62, 4  ;;  %v5351_v58 = vmul.f32 %v5349_v15, %v5328_v52  ;;  %v12517_v35 = vld [vmem:[#allocation33_spill] sm:$0xff]  ;;  %v5410_v50 = vmul.f32 %v5408_v2, %v5367_v20  ;;  %v11436_v2 = vpop.permute.xlu0 %6067 }
 0x717   : > { %v5565_v18 = vrot.slane %v12517_v35, 4  ;;  %v5528_v52 = vrot.slane %v12524_v4, %v9656_v24  ;;  %v12525_v62 = vld [vmem:[#allocation65_spill] sm:$0xff] }
 0x718   : > { %v5247_v42 = vadd.f32 %v5246_v43, %v5210_v22  ;;  %v5460_v22 = vsel %vm350_vm8, %v5458_v56, %v5459_v7  ;;  %v12519_v43 = vld [vmem:[#allocation66_spill] sm:$0xff]  ;;  %v5585_v7 = vrot.slane %v12525_v62, %v9656_v24 }
 0x719   : > { %v11351_v48 = vpop.permute.xlu1 %6163  ;;  %v5624_v40 = vrot.slane %v12519_v43, 4  ;;  %v5461_v63 = vsel %vm1006_vm5, %v5455_v14, %v5460_v22  ;;  %v12528_v22 = vld [vmem:[#allocation54_spill] sm:$0xff] }
 0x71a   : > { %v5282_v9 = vadd.f32 %v5281_v10, %v5247_v42  ;;  %v12520_v10 = vld [vmem:[#allocation61_spill] sm:$0xff] }
 0x71b   : > { %v5422_v13 = vrot.slane %v12520_v10, %v9656_v24  ;;  %v12530_v10 = vld [vmem:[#allocation49_spill] sm:$0xff] }
 0x71c   : > { %v5317_v49 = vadd.f32 %v5316_v16, %v5282_v9  ;;  %v5677_v9 = vrot.slane %v12522_v34, 4  ;;  %v12523_v16 = vld [vmem:[#allocation57_spill] sm:$0xff] }
 0x71d   : > { %v11370_v27 = vpop.permute.xlu1 %5507  ;;  %v5730_v15 = vrot.slane %v12523_v16, 4  ;;  %v5463_v39 = vmul.f32 %v5461_v63, %v5422_v13  ;;  %v5895_v13 = vrot.slane %v12530_v10, 4 }
 0x71e   : > { %v5511_v31 = vrot.slane %v11370_v27, 4  ;;  %v5352_v57 = vadd.f32 %v5351_v58, %v5317_v49 }
 0x720   : > { %v5513_v3 = vsel %vm350_vm8, %v5511_v31, %v5512_v21  ;;  %v5411_v46 = vadd.f32 %v5410_v50, %v5352_v57  ;;  %v5783_v21 = vrot.slane %v12526_v61, 4  ;;  %v5842_v57 = vrot.slane %v12528_v22, 4 }
 0x721   : > { %v11380_v12 = vpop.permute.xlu1 %5560  ;;  %v5514_v23 = vsel %vm1006_vm5, %v11370_v27, %v5513_v3 }
 0x722   : > { %v5564_v11 = vrot.slane %v11380_v12, 4  ;;  %v5516_v14 = vmul.f32 %v5514_v23, %v5475_v38 }
 0x724   : > { %v5566_v0 = vsel %vm350_vm8, %v5564_v11, %v5565_v18  ;;  %v5464_v11 = vadd.f32 %v5463_v39, %v5411_v46  ;;  %v12532_v46 = vld [vmem:[#allocation45_spill] sm:$0xff]  ;;  %v6121_v39 = vpop.permute.xlu0 %6120 }
 0x725   : > { %v5620_v59 = vpop.permute.xlu1 %5619  ;;  %v5567_v56 = vsel %vm1006_vm5, %v11380_v12, %v5566_v0  ;;  %v12527_v12 = vld [vmem:[#allocation63_spill] sm:$0xff] }
 0x726   : > { %v5623_v47 = vrot.slane %v5620_v59, 4  ;;  %v5569_v35 = vmul.f32 %v5567_v56, %v5528_v52  ;;  %v5640_v20 = vrot.slane %v12527_v12, %v9656_v24  ;;  %v5517_v43 = vadd.f32 %v5516_v14, %v5464_v11  ;;  %v12529_v0 = vld [vmem:[#allocation71_spill] sm:$0xff] }
 0x727   : > { %v5911_v12 = vrot.slane %v11356_v37, %v9656_v24  ;;  %v6021_v37 = vrot.slane %v11390_v17, %v9656_v24 }
 0x728   : > { %v5625_v32 = vsel %vm350_vm8, %v5623_v47, %v5624_v40  ;;  %v5570_v38 = vadd.f32 %v5569_v35, %v5517_v43  ;;  %v6113_v43 = vrot.slane %v11335_v8, 4  ;;  %v6166_v8 = vrot.slane %v11351_v48, 4 }
 0x729   : > { %v5673_v25 = vpop.permute.xlu1 %5672  ;;  %v5626_v58 = vsel %vm769_vm3, %v5620_v59, %v5625_v32  ;;  %v5948_v32 = vrot.slane %v12532_v46, 4 }
 0x72a   : > { %v5676_v42 = vrot.slane %v5673_v25, 4  ;;  %v5628_v40 = vmul.f32 %v5626_v58, %v5585_v7 }
 0x72c   : > { %v5678_v31 = vsel %vm350_vm8, %v5676_v42, %v5677_v9  ;;  %v5693_v42 = vrot.slane %v12529_v0, %v9656_v24 }
 0x72d   : > { %v5726_v60 = vpop.permute.xlu1 %5725  ;;  %v5679_v3 = vsel %vm769_vm3, %v5673_v25, %v5678_v31  ;;  %v12531_v25 = vld [vmem:[#allocation53_spill] sm:$0xff]  ;;  %v12533_v31 = vld [vmem:[#allocation64_spill] sm:$0xff] }
 0x72e   : > { %v5729_v41 = vrot.slane %v5726_v60, 4  ;;  %v5681_v63 = vmul.f32 %v5679_v3, %v5640_v20  ;;  %v5746_v9 = vrot.slane %v12531_v25, %v9656_v24  ;;  %v6129_v25 = vrot.slane %v6121_v39, %v9656_v24 }
 0x730   : > { %v5731_v18 = vsel %vm350_vm8, %v5729_v41, %v5730_v15  ;;  %v5629_v15 = vadd.f32 %v5628_v40, %v5570_v38 }
 0x731   : > { %v5779_v26 = vpop.permute.xlu1 %5778  ;;  %v5732_v29 = vsel %vm769_vm3, %v5726_v60, %v5731_v18  ;;  %v5803_v60 = vrot.slane %v11305_v28, %v9656_v24 }
 0x732   : > { %v5782_v27 = vrot.slane %v5779_v26, 4  ;;  %v5734_v4 = vmul.f32 %v5732_v29, %v5693_v42  ;;  %v5682_v62 = vadd.f32 %v5681_v63, %v5629_v15 }
 0x734   : > { %v5784_v50 = vsel %vm350_vm8, %v5782_v27, %v5783_v21  ;;  %v6001_v27 = vrot.slane %v12533_v31, 4  ;;  %v6060_v21 = vrot.slane %v11317_v45, 4  ;;  %v5735_v35 = vadd.f32 %v5734_v4, %v5682_v62 }
 0x735   : > { %v5838_v36 = vpop.permute.xlu1 %5837  ;;  %v5785_v41 = vsel %vm769_vm3, %v5779_v26, %v5784_v50  ;;  %v5858_v26 = vrot.slane %v11330_v51, %v9656_v24  ;;  %v5964_v45 = vrot.slane %v11376_v55, %v9656_v24  ;;  %v6174_v51 = vpop.permute.xlu0 %6173  ;;  %v6076_v55 = vrot.slane %v11436_v2, %v9656_v24 }
 0x736   : > { %v5841_v19 = vrot.slane %v5838_v36, 4  ;;  %v5787_v7 = vmul.f32 %v5785_v41, %v5746_v9 }
 0x738   : > { %v5843_v23 = vsel %vm350_vm8, %v5841_v19, %v5842_v57  ;;  %v5788_v20 = vadd.f32 %v5787_v7, %v5735_v35  ;;  %v8892_v35 = vmov 114  }
 0x739   : > { %v5891_v49 = vpop.permute.xlu1 %5890  ;;  %v5844_v14 = vsel %vm532_vm2, %v5838_v36, %v5843_v23 }
 0x73a   : > { %v5894_v59 = vrot.slane %v5891_v49, 4  ;;  %v5846_v18 = vmul.f32 %v5844_v14, %v5803_v60 }
 0x73c   : > { %v5896_v52 = vsel %vm350_vm8, %v5894_v59, %v5895_v13  ;;  %v5847_v40 = vadd.f32 %v5846_v18, %v5788_v20  ;;  %v8893_v18 = vmov 115   ;;  %v8898_v20 = vmov 120  }
 0x73d   : > { %v5944_v47 = vpop.permute.xlu1 %5943  ;;  %v5897_v58 = vsel %vm532_vm2, %v5891_v49, %v5896_v52  ;;  %v6182_v52 = vrot.slane %v6174_v51, %v9656_v24  ;;  %v8902_v51 = vmov 124  }
 0x73e   : > { %v5947_v34 = vrot.slane %v5944_v47, 4  ;;  %v5899_v22 = vmul.f32 %v5897_v58, %v5858_v26  ;;  %v12534_v26 = vld [vmem:[#allocation55_spill] sm:$0xff]  ;;  %v11489_v58 = vld [vmem:[%s12192_s1] sm:$0xff] }
 0x740   : > { %v5949_v61 = vsel %vm350_vm8, %v5947_v34, %v5948_v32  ;;  %v5900_v0 = vadd.f32 %v5899_v22, %v5847_v40  ;;  %v6215_v34 = vpop.permute.xlu0 %6214  ;;  %v8899_v22 = vmov 121  }
 0x741   : > { %v5997_v16 = vpop.permute.xlu1 %5996  ;;  %v5950_v36 = vsel %vm532_vm2, %v5944_v47, %v5949_v61 }
 0x742   : > { %v6000_v56 = vrot.slane %v5997_v16, 4  ;;  %v5952_v50 = vmul.f32 %v5950_v36, %v5911_v12  ;;  %v8896_v36 = vmov 118   ;;  %v8897_v12 = vmov 119  }
 0x744   : > { %v6002_v28 = vsel %vm350_vm8, %v6000_v56, %v6001_v27  ;;  %v5953_v38 = vadd.f32 %v5952_v50, %v5900_v0 }
 0x745   : > { %v6056_v11 = vpop.permute.xlu1 %6055  ;;  %v6003_v49 = vsel %vm532_vm2, %v5997_v16, %v6002_v28  ;;  %v6218_v16 = vrot.slane %v6215_v34, 4  ;;  %v8894_v28 = vmov 116  }
 0x746   : > { %v6059_v19 = vrot.slane %v6056_v11, 4  ;;  %v6005_v42 = vmul.f32 %v6003_v49, %v5964_v45  ;;  %v8901_v45 = vmov 123  }
 0x748   : > { %v6061_v57 = vsel %vm350_vm8, %v6059_v19, %v6060_v21  ;;  %v6006_v9 = vadd.f32 %v6005_v42, %v5953_v38  ;;  %v8890_v21 = vmov 112   ;;  %v8895_v19 = vmov 117  }
 0x749   : > { %v6109_v3 = vpop.permute.xlu1 %6108  ;;  %v6062_v47 = vsel %vm293_vm0, %v6056_v11, %v6061_v57  ;;  %v8891_v11 = vmov 113   ;;  %v8900_v57 = vmov 122   ;;  %v8903_v42 = vmov 125  }
 0x74a   : > { %v6112_v59 = vrot.slane %v6109_v3, 4  ;;  %v6064_v63 = vmul.f32 %v6062_v47, %v6021_v37 }
 0x74c   : > { %v6114_v10 = vsel %vm350_vm8, %v6112_v59, %v6113_v43  ;;  %v6065_v2 = vadd.f32 %v6064_v63, %v6006_v9 }
 0x74d   : > { %v6115_v13 = vsel %vm293_vm0, %v6109_v3, %v6114_v10  ;;  %v6162_v29 = vpop.permute.xlu1 %6161 }
 0x74e   : > { %v6165_v23 = vrot.slane %v6162_v29, 4  ;;  %v6117_v17 = vmul.f32 %v6115_v13, %v6076_v55  ;;  %v8904_v13 = vmov 126  }
 0x74f   : > { %8704 = vset.pattern.permute.xlu1 %v8904_v13 }
 0x750   : > { %v6167_v46 = vsel %vm350_vm8, %v6165_v23, %v6166_v8  ;;  %v6118_v48 = vadd.f32 %v6117_v17, %v6065_v2  ;;  %v6292_v2 = vstv %s8408_s8 }
 0x751   : > { %v6168_v32 = vsel %vm293_vm0, %v6162_v29, %v6167_v46  ;;  %v6217_v41 = vpop.permute.xlu1 %6216 }
 0x752   : > { %v6170_v15 = vmul.f32 %v6168_v32, %v6129_v25  ;;  %v6219_v4 = vrot.slane %v6217_v41, 4 }
 0x754   : > { %v6220_v56 = vsel %vm350_vm8, %v6218_v16, %v6219_v4  ;;  %v6171_v14 = vadd.f32 %v6170_v15, %v6118_v48 }
 0x755   : > { %v6221_v60 = vsel %vm293_vm0, %v6215_v34, %v6220_v56 }
 0x756   : > { %v6223_v39 = vmul.f32 %v6221_v60, %v6182_v52  ;;  %v12535_v60 = vld [vmem:[#allocation12_spill] sm:$0xff] }
 0x758   : > { %v6224_v31 = vadd.f32 %v6223_v39, %v6171_v14  ;;  %v12536_v39 = vld [vmem:[#allocation14_spill] sm:$0xff] }
 0x75a   : > { %v6226_v27 = vcombine.high %v6224_v31, %v6224_v31  ;;  %v6228_v62 = vsel %vm350_vm8, %v6224_v31, 0.0 }
 0x75c   : > { %v6229_v7 = vsel %vm350_vm8, %v6226_v27, 0.0 }
 0x75d   : > { %v6230_v61 = vadd.f32 %v6229_v7, %v6228_v62 }
 0x75e   : > { %v6280_v10 = vpop.permute.xlu1 %6279 }
 0x75f   : > { %6231 = vadd.xlane.f32.xlu0 %v6230_v61  ;;  %v6287_v41 = vrot.slane %v6280_v10, %v9656_v24 }
 0x763   : > { %v11507_v55 = vpop.permute.xlu1 %6301 }
 0x768   : > { %v11509_v29 = vpop.permute.xlu1 %6356 }
 0x76d   : > { %v11511_v8 = vpop.permute.xlu1 %6409 }
 0x772   : > { %v11513_v38 = vpop.permute.xlu1 %6462 }
 0x775   : > { %6267 = vperm.xlu0 %8684, %v12534_v26   ;;  %v12537_v26 = vld [vmem:[#allocation17_spill] sm:$0xff] }
 0x779   : > { %8690 = vset.pattern.permute.xlu0 %v8890_v21 }
 0x77a   : > { %6519 = vperm.xlu0 %8690, %v11489_v58  }
 0x77e   : > { %8691 = vset.pattern.permute.xlu0 %v8891_v11 }
 0x77f   : > { %6574 = vperm.xlu0 %8691, %v11489_v58  }
 0x783   : > { %8692 = vset.pattern.permute.xlu0 %v8892_v35 }
 0x784   : > { %6627 = vperm.xlu0 %8692, %v11489_v58  }
 0x788   : > { %8693 = vset.pattern.permute.xlu0 %v8893_v18 }
 0x789   : > { %6680 = vperm.xlu0 %8693, %v11489_v58  }
 0x78d   : > { %8694 = vset.pattern.permute.xlu0 %v8894_v28 }
 0x78e   : > { %6737 = vperm.xlu0 %8694, %v11489_v58  }
 0x792   : > { %8695 = vset.pattern.permute.xlu0 %v8895_v19 }
 0x793   : > { %6792 = vperm.xlu0 %8695, %v11489_v58  }
 0x797   : > { %8696 = vset.pattern.permute.xlu0 %v8896_v36 }
 0x798   : > { %6845 = vperm.xlu0 %8696, %v11489_v58  }
 0x79c   : > { %8697 = vset.pattern.permute.xlu0 %v8897_v12 }
 0x79d   : > { %6898 = vperm.xlu0 %8697, %v11489_v58  }
 0x7a1   : > { %8698 = vset.pattern.permute.xlu0 %v8898_v20 }
 0x7a2   : > { %6955 = vperm.xlu0 %8698, %v11489_v58  }
 0x7a6   : > { %8699 = vset.pattern.permute.xlu0 %v8899_v22 }
 0x7a7   : > { %7010 = vperm.xlu0 %8699, %v11489_v58  }
 0x7ab   : > { %8700 = vset.pattern.permute.xlu0 %v8900_v57 }
 0x7ac   : > { %7063 = vperm.xlu0 %8700, %v11489_v58  }
 0x7b0   : > { %8701 = vset.pattern.permute.xlu0 %v8901_v45 }
 0x7b1   : > { %7116 = vperm.xlu0 %8701, %v11489_v58  }
 0x7b5   : > { %8702 = vset.pattern.permute.xlu0 %v8902_v51  ;;  %v12538_v51 = vld [vmem:[#allocation15_spill] sm:$0xff] }
 0x7b6   : > { %7170 = vperm.xlu0 %8702, %v11489_v58  }
 0x7ba   : > { %8703 = vset.pattern.permute.xlu0 %v8903_v42 }
 0x7e8   : > { %v6232_v49 = vpop.xlane.xlu0 %6231 }
 0x7e9   : > { %v6233_v3 = vmul.f32 0.00390625, %v6232_v49 }
 0x7eb   : > { %v6241_v43 = vrot.slane %v6233_v3, %v9656_v24 }
 0x7ed   : > { %v6243_v40 = vsub.f32 %v6224_v31, %v6241_v43 }
 0x7ef   : > { %v6244_v50 = vmul.f32 %v6243_v40, %v6243_v40 }
 0x7f0   : > { %v6268_v9 = vpop.permute.xlu0 %6267 }
 0x7f1   : > { %v6246_v59 = vcombine.high %v6244_v50, %v6244_v50  ;;  %v6248_v47 = vsel %vm350_vm8, %v6244_v50, 0.0  ;;  %v6275_v17 = vrot.slane %v6268_v9, %v9656_v24 }
 0x7f3   : > { %v6249_v37 = vsel %vm350_vm8, %v6246_v59, 0.0 }
 0x7f4   : > { %v6250_v0 = vadd.f32 %v6249_v37, %v6248_v47 }
 0x7f6   : > { %6251 = vadd.xlane.f32.xlu1 %v6250_v0 }
 0x87f   : > { %v6252_v63 = vpop.xlane.xlu1 %6251 }
 0x880   : > { %v6253_v23 = vmul.f32 0.00390625, %v6252_v63 }
 0x882   : > { %v6254_v34 = vadd.f32 1e-05, %v6253_v23 }
 0x884   : > { %8718 = vrsqrt.f32 %v6254_v34 }
 0x891   : > { %v8719_v25 = vpop.eup %8718 }
 0x892   : > { %v6263_v46 = vrot.slane %v8719_v25, %v9656_v24 }
 0x894   : > { %v6265_v32 = vmul.f32 %v6263_v46, %v6243_v40 }
 0x896   : > { %v6277_v16 = vmul.f32 %v6275_v17, %v6265_v32  ;;  %v12539_v17 = vld [vmem:[#allocation31_spill] sm:$0xff]  ;;  %v12540_v32 = vmov 6  }
 0x898   : > { %v6289_v15 = vadd.f32 %v6287_v41, %v6277_v16 }
 0x89a   : > { %vm6291_vm11 = vcmp.ge.f32.partialorder %v6289_v15, 0.0  ;;  %v6293_v4 = vmul.f32 %v6292_v2, %v6289_v15 }
 0x89c   : > { %v11518_v52 = vsel %vm6291_vm11, %v6289_v15, %v6293_v4 }
 0x89d   : > { %6295 = vst [vmem:[#allocation2 + $0x4] sm:$0xff] %v11518_v52  ;;  %v7312_v21 = vmul.f32 %v11518_v52, %v12537_v26  ;;  %v7512_v46 = vmul.f32 %v11518_v52, %v12539_v17 }
 0x89f   : > { %v7326_v12 = vrot.slane %v7312_v21, %v8980_v5  ;;  %v7330_v20 = vrot.slane %v7312_v21, %v12364_v1  ;;  %v7375_v3 = vrot.slane %v7312_v21, %v8983_v6  ;;  %v7379_v43 = vrot.slane %v7312_v21, %v12439_v33 }
 0x8a0   : > { %v7424_v0 = vrot.slane %v7312_v21, %v12507_v30  ;;  %v7428_v42 = vrot.slane %v7312_v21, %v12508_v54  ;;  %v7473_v9 = vrot.slane %v7312_v21, %v12510_v53  ;;  %v7477_v15 = vrot.slane %v7312_v21, %v12511_v44 }
 0x8a1   : > { %v7341_v59 = vrot.slane %v7326_v12, %v8980_v5  ;;  %v7345_v47 = vrot.slane %v7330_v20, %v8980_v5  ;;  %v7390_v37 = vrot.slane %v7375_v3, %v8983_v6  ;;  %v7394_v23 = vrot.slane %v7379_v43, %v8983_v6 }
 0x8a2   : > { %v7439_v34 = vrot.slane %v7424_v0, %v12507_v30  ;;  %v7443_v25 = vrot.slane %v7428_v42, %v12507_v30  ;;  %v7673_v0 = vrot.slane %v7512_v46, %v12510_v53  ;;  %v7677_v42 = vrot.slane %v7512_v46, %v12511_v44 }
 0x8a3   : > { %v7353_v13 = vcombine.low %v7341_v59, %v7345_v47  ;;  %v7402_v16 = vcombine.low %v7390_v37, %v7394_v23 }
 0x8a4   : > { %v6297_v48 = vld [vmem:[#allocation2 + $0x8] sm:$0xf]  ;;  %v11521_v56 = vld [vmem:[#allocation2] sm:$0xff] }
 0x8a5   : > { %v6299_v14 = vmul.f32 %v6297_v48, %v12535_v60  ;;  %v11526_v31 = vmul.f32 %v11521_v56, %v12536_v39  ;;  %v6515_v36 = vld [vmem:[#allocation2 + $0x8] sm:$0xf]  ;;  %v7451_v48 = vcombine.low %v7439_v34, %v7443_v25  ;;  %v7488_v60 = vrot.slane %v7473_v9, %v12510_v53 }
 0x8a6   : > { %v6517_v49 = vmul.f32 %v6515_v36, %v12538_v51  ;;  %v6733_v4 = vld [vmem:[#allocation2 + $0x8] sm:$0xf]  ;;  %v7530_v39 = vrot.slane %v7512_v46, %v12364_v1  ;;  %v7579_v36 = vrot.slane %v7512_v46, %v12439_v33 }
 0x8a7   : > { %v6377_v27 = vrot.slane %v6299_v14, %v8983_v6  ;;  %v6324_v62 = vrot.slane %v6299_v14, %v8980_v5  ;;  %v6422_v7 = vrot.slane %v11526_v31, %v12507_v30  ;;  %v6426_v61 = vrot.slane %v11526_v31, %v12508_v54 }
 0x8a8   : > { %v6430_v18 = vrot.slane %v6299_v14, %v12507_v30  ;;  %v6483_v45 = vrot.slane %v6299_v14, %v12510_v53  ;;  %v6542_v50 = vrot.slane %v6517_v49, %v8980_v5  ;;  %v6595_v63 = vrot.slane %v6517_v49, %v8983_v6 }
 0x8a9   : > { %v6392_v11 = vrot.slane %v6377_v27, %v8983_v6  ;;  %v6339_v35 = vrot.slane %v6324_v62, %v8980_v5  ;;  %v6437_v28 = vrot.slane %v6422_v7, %v12507_v30  ;;  %v6441_v19 = vrot.slane %v6426_v61, %v12507_v30  ;;  %v12541_v61 = vld [vmem:[#allocation20_spill] sm:$0xff] }
 0x8aa   : > { %v6445_v22 = vrot.slane %v6430_v18, %v12507_v30  ;;  %v6498_v40 = vrot.slane %v6483_v45, %v12510_v53  ;;  %v6557_v10 = vrot.slane %v6542_v50, %v8980_v5  ;;  %v6610_v41 = vrot.slane %v6595_v63, %v8983_v6  ;;  %v12542_v50 = vld [vmem:[#allocation34_spill] sm:$0xff]  ;;  %v12543_v63 = vld [vmem:[#allocation23_spill] sm:$0xff] }
 0x8ab   : > { %6399 = vrot.lane.b32.xlu0 %v6392_v11, %s8778_s28  ;;  %6346 = vrot.lane.b32.xlu1 %v6339_v35, %s8778_s28  ;;  %v6449_v57 = vcombine.low %v6437_v28, %v6441_v19  ;;  %v6648_v2 = vrot.slane %v6517_v49, %v12507_v30  ;;  %v7526_v14 = vrot.slane %v7512_v46, %v8980_v5 }
 0x8ac   : > { %v6701_v62 = vrot.slane %v6517_v49, %v12510_v53  ;;  %v7492_v7 = vrot.slane %v7477_v15, %v12510_v53  ;;  %v6735_v26 = vmul.f32 %v6733_v4, %v12541_v61  ;;  %v7545_v11 = vrot.slane %v7530_v39, %v8980_v5 }
 0x8ad   : > { %v6663_v27 = vrot.slane %v6648_v2, %v12507_v30  ;;  %v7541_v21 = vrot.slane %v7526_v14, %v8980_v5  ;;  %v7575_v35 = vrot.slane %v7512_v46, %v8983_v6  ;;  %v7594_v51 = vrot.slane %v7579_v36, %v8983_v6 }
 0x8ae   : > { %v6716_v18 = vrot.slane %v6701_v62, %v12510_v53  ;;  %v7500_v28 = vcombine.low %v7488_v60, %v7492_v7  ;;  %v6760_v19 = vrot.slane %v6735_v26, %v8980_v5  ;;  %v6813_v20 = vrot.slane %v6735_v26, %v8983_v6 }
 0x8af   : > { %6452 = vrot.lane.b32.xlu1 %v6445_v22, %s8778_s28  ;;  %6450 = vrot.lane.b32.xlu0 %v6449_v57, %s8778_s28  ;;  %v7553_v12 = vcombine.low %v7541_v21, %v7545_v11  ;;  %v7624_v22 = vrot.slane %v7512_v46, %v12507_v30  ;;  %v7590_v45 = vrot.slane %v7575_v35, %v8983_v6  ;;  %v12544_v21 = vld [vmem:[#allocation26_spill] sm:$0xff] }
 0x8b0   : > { %v6775_v57 = vrot.slane %v6760_v19, %v8980_v5  ;;  %v7628_v49 = vrot.slane %v7512_v46, %v12508_v54  ;;  %v6828_v3 = vrot.slane %v6813_v20, %v8983_v6  ;;  %v6866_v43 = vrot.slane %v6735_v26, %v12507_v30 }
 0x8b1   : > { %v7712_v59 = vmul.f32 %v11518_v52, %v12542_v50  ;;  %v7602_v47 = vcombine.low %v7590_v45, %v7594_v51  ;;  %v7692_v46 = vrot.slane %v7677_v42, %v12510_v53  ;;  %v7912_v11 = vmul.f32 %v11518_v52, %v12544_v21 }
 0x8b2   : > { %v7643_v37 = vrot.slane %v7628_v49, %v12507_v30  ;;  %v6881_v9 = vrot.slane %v6866_v43, %v12507_v30  ;;  %v6320_v50 = vrot.slane %v11526_v31, %v12364_v1 }
 0x8b3   : > { %6505 = vrot.lane.b32.xlu1 %v6498_v40, %s8778_s28  ;;  %7206 = vperm.xlu0 %8703, %v11489_v58   ;;  %v7639_v40 = vrot.slane %v7624_v22, %v12507_v30  ;;  %v7726_v34 = vrot.slane %v7712_v59, %v8980_v5  ;;  %v7730_v25 = vrot.slane %v7712_v59, %v12364_v1 }
 0x8b4   : > { %v7779_v60 = vrot.slane %v7712_v59, %v12439_v33  ;;  %v7824_v61 = vrot.slane %v7712_v59, %v12507_v30  ;;  %v7930_v49 = vrot.slane %v7912_v11, %v12364_v1  ;;  %v7975_v42 = vrot.slane %v7912_v11, %v8983_v6 }
 0x8b5   : > { %v7651_v17 = vcombine.low %v7639_v40, %v7643_v37  ;;  %v7745_v2 = vrot.slane %v7730_v25, %v8980_v5  ;;  %v6316_v40 = vrot.slane %v11526_v31, %v8980_v5 }
 0x8b6   : > { %v7794_v7 = vrot.slane %v7779_v60, %v8983_v6 }
 0x8b7   : > { %6564 = vrot.lane.b32.xlu1 %v6557_v10, %s8777_s25  ;;  %7354 = vrot.lane.b32.xlu0 %v7353_v13, %s8774_s16  ;;  %v6951_v10 = vld [vmem:[#allocation2 + $0x8] sm:$0xf]  ;;  %v6919_v13 = vrot.slane %v6735_v26, %v12510_v53  ;;  %v7828_v26 = vrot.slane %v7712_v59, %v12508_v54 }
 0x8b8   : > { %8706 = vset.pattern.permute.xlu0 %v12540_v32  ;;  %v6953_v23 = vmul.f32 %v6951_v10, %v12543_v63  ;;  %v7688_v32 = vrot.slane %v7673_v0, %v12510_v53  ;;  %v7945_v0 = vrot.slane %v7930_v49, %v8980_v5  ;;  %v7979_v10 = vrot.slane %v7912_v11, %v12439_v33 }
 0x8b9   : > { %v6934_v15 = vrot.slane %v6919_v13, %v12510_v53  ;;  %v7843_v20 = vrot.slane %v7828_v26, %v12507_v30  ;;  %v6331_v13 = vrot.slane %v6316_v40, %v8980_v5  ;;  %v6335_v63 = vrot.slane %v6320_v50, %v8980_v5  ;;  %v12545_v26 = vld [vmem:[#allocation16_spill] sm:$0xff] }
 0x8ba   : > { %v7700_v4 = vcombine.low %v7688_v32, %v7692_v46  ;;  %v7084_v36 = vrot.slane %v6953_v23, %v12507_v30  ;;  %v7137_v22 = vrot.slane %v6953_v23, %v12510_v53  ;;  %v8024_v32 = vrot.slane %v7912_v11, %v12507_v30 }
 0x8bb   : > { %6617 = vrot.lane.b32.xlu1 %v6610_v41, %s8777_s25  ;;  %7403 = vrot.lane.b32.xlu0 %v7402_v16, %s8774_s16  ;;  %v6978_v41 = vrot.slane %v6953_v23, %v8980_v5  ;;  %v7741_v16 = vrot.slane %v7726_v34, %v8980_v5  ;;  %v6373_v34 = vrot.slane %v11526_v31, %v12439_v33 }
 0x8bc   : > { %v6343_v46 = vcombine.low %v6331_v13, %v6335_v63  ;;  %v6475_v40 = vrot.slane %v11526_v31, %v12510_v53  ;;  %v6479_v50 = vrot.slane %v11526_v31, %v12511_v44 }
 0x8bd   : > { %v6993_v14 = vrot.slane %v6978_v41, %v8980_v5  ;;  %v7753_v39 = vcombine.low %v7741_v16, %v7745_v2  ;;  %v6388_v16 = vrot.slane %v6373_v34, %v8983_v6  ;;  %v8028_v2 = vrot.slane %v7912_v11, %v12508_v54 }
 0x8bf   : > { %6670 = vrot.lane.b32.xlu1 %v6663_v27, %s8777_s25  ;;  %7452 = vrot.lane.b32.xlu0 %v7451_v48, %s8774_s16  ;;  %v7775_v48 = vrot.slane %v7712_v59, %v8983_v6  ;;  %v7031_v27 = vrot.slane %v6953_v23, %v8983_v6  ;;  %v6369_v23 = vrot.slane %v11526_v31, %v8983_v6 }
 0x8c0   : > { %v8043_v60 = vrot.slane %v8028_v2, %v12507_v30  ;;  %v12549_v2 = vld [vmem:[#allocation25_spill] sm:$0xff] }
 0x8c1   : > { %v7790_v62 = vrot.slane %v7775_v48, %v8983_v6  ;;  %v7046_v35 = vrot.slane %v7031_v27, %v8983_v6  ;;  %v6384_v41 = vrot.slane %v6369_v23, %v8983_v6 }
 0x8c3   : > { %6723 = vrot.lane.b32.xlu1 %v6716_v18, %s8777_s25  ;;  %7501 = vrot.lane.b32.xlu0 %v7500_v28, %s8774_s16  ;;  %v7873_v18 = vrot.slane %v7712_v59, %v12510_v53  ;;  %v7877_v28 = vrot.slane %v7712_v59, %v12511_v44  ;;  %v7802_v19 = vcombine.low %v7790_v62, %v7794_v7 }
 0x8c4   : > { %v7152_v59 = vrot.slane %v7137_v22, %v12510_v53  ;;  %v6396_v48 = vcombine.low %v6384_v41, %v6388_v16  ;;  %v12547_v22 = vld [vmem:[#allocation30_spill] sm:$0xff] }
 0x8c5   : > { %v7888_v45 = vrot.slane %v7873_v18, %v12510_v53  ;;  %v7892_v51 = vrot.slane %v7877_v28, %v12510_v53 }
 0x8c7   : > { %6782 = vrot.lane.b32.xlu1 %v6775_v57, %s8776_s24  ;;  %7554 = vrot.lane.b32.xlu0 %v7553_v12, %s8770_s14  ;;  %v7839_v12 = vrot.slane %v7824_v61, %v12507_v30  ;;  %v7926_v57 = vrot.slane %v7912_v11, %v8980_v5  ;;  %v7900_v37 = vcombine.low %v7888_v45, %v7892_v51  ;;  %v8738_v61 = vld [vmem:[#allocation2 + $0xc] sm:$0xf] }
 0x8c8   : > { %v7313_v21 = vmul.f32 %v8738_v61, %v12545_v26 }
 0x8c9   : > { %v7851_v43 = vcombine.low %v7839_v12, %v7843_v20 }
 0x8ca   : > { %v7334_v18 = vrot.slane %v7313_v21, %v8980_v5  ;;  %v7432_v20 = vrot.slane %v7313_v21, %v12507_v30 }
 0x8cb   : > { %6835 = vrot.lane.b32.xlu1 %v6828_v3, %s8776_s24  ;;  %7603 = vrot.lane.b32.xlu0 %v7602_v47, %s8770_s14  ;;  %v7099_v3 = vrot.slane %v7084_v36, %v12507_v30  ;;  %v7941_v47 = vrot.slane %v7926_v57, %v8980_v5  ;;  %v12546_v36 = vmov 7   ;;  %v11702_v57 = vmul.f32 %v8738_v61, %v12547_v22 }
 0x8cc   : > { %v7349_v28 = vrot.slane %v7334_v18, %v8980_v5  ;;  %v7447_v45 = vrot.slane %v7432_v20, %v12507_v30 }
 0x8cd   : > { %v7953_v25 = vcombine.low %v7941_v47, %v7945_v0  ;;  %v7534_v49 = vrot.slane %v11702_v57, %v8980_v5  ;;  %v6490_v0 = vrot.slane %v6475_v40, %v12510_v53 }
 0x8cf   : > { %6888 = vrot.lane.b32.xlu1 %v6881_v9, %s8776_s24  ;;  %7652 = vrot.lane.b32.xlu0 %v7651_v17, %s8770_s14  ;;  %v7990_v9 = vrot.slane %v7975_v42, %v8983_v6  ;;  %v7994_v17 = vrot.slane %v7979_v10, %v8983_v6  ;;  %v6494_v42 = vrot.slane %v6479_v50, %v12510_v53  ;;  %v12550_v50 = vld [vmem:[#allocation27_spill] sm:$0xff] }
 0x8d1   : > { %v6502_v31 = vcombine.low %v6490_v0, %v6494_v42 }
 0x8d3   : > { %6941 = vrot.lane.b32.xlu1 %v6934_v15, %s8776_s24  ;;  %7701 = vrot.lane.b32.xlu0 %v7700_v4, %s8770_s14  ;;  %v8002_v15 = vcombine.low %v7990_v9, %v7994_v17  ;;  %v8039_v4 = vrot.slane %v8024_v32, %v12507_v30 }
 0x8d5   : > { %v8051_v27 = vcombine.low %v8039_v4, %v8043_v60 }
 0x8d7   : > { %7000 = vrot.lane.b32.xlu1 %v6993_v14, %s8775_s23  ;;  %7754 = vrot.lane.b32.xlu0 %v7753_v39, %s8773_s15  ;;  %v8073_v14 = vrot.slane %v7912_v11, %v12510_v53  ;;  %v8077_v39 = vrot.slane %v7912_v11, %v12511_v44  ;;  %v8905_v11 = vmov 127  }
 0x8d9   : > { %v8088_v62 = vrot.slane %v8073_v14, %v12510_v53  ;;  %v8092_v7 = vrot.slane %v8077_v39, %v12510_v53 }
 0x8db   : > { %7053 = vrot.lane.b32.xlu1 %v7046_v35, %s8775_s23  ;;  %7803 = vrot.lane.b32.xlu0 %v7802_v19, %s8773_s15  ;;  %v8100_v35 = vcombine.low %v8088_v62, %v8092_v7  ;;  %v7383_v19 = vrot.slane %v7313_v21, %v8983_v6 }
 0x8dd   : > { %v7398_v12 = vrot.slane %v7383_v19, %v8983_v6 }
 0x8df   : > { %7106 = vrot.lane.b32.xlu1 %v7099_v3, %s8775_s23  ;;  %7852 = vrot.lane.b32.xlu0 %v7851_v43, %s8773_s15  ;;  %v7583_v3 = vrot.slane %v11702_v57, %v8983_v6  ;;  %v7549_v43 = vrot.slane %v7534_v49, %v8980_v5 }
 0x8e3   : > { %7159 = vrot.lane.b32.xlu1 %v7152_v59, %s8775_s23  ;;  %7901 = vrot.lane.b32.xlu0 %v7900_v37, %s8773_s15  ;;  %v12548_v59 = vld [vmem:[#allocation24_spill] sm:$0xff]  ;;  %v7598_v37 = vrot.slane %v7583_v3, %v8983_v6 }
 0x8e4   : > { %v6516_v47 = vmul.f32 %v11521_v56, %v12548_v59  ;;  %v6952_v59 = vmul.f32 %v11521_v56, %v12550_v50 }
 0x8e6   : > { %v6534_v10 = vrot.slane %v6516_v47, %v8980_v5  ;;  %v6538_v13 = vrot.slane %v6516_v47, %v12364_v1  ;;  %v6587_v63 = vrot.slane %v6516_v47, %v8983_v6  ;;  %v6640_v9 = vrot.slane %v6516_v47, %v12507_v30 }
 0x8e7   : > { %7954 = vrot.lane.b32.xlu0 %v7953_v25, %s8769_s10  ;;  %6344 = vrot.lane.b32.xlu1 %v6343_v46, %s8778_s28  ;;  %v6591_v25 = vrot.slane %v6516_v47, %v12439_v33  ;;  %v6644_v41 = vrot.slane %v6516_v47, %v12508_v54  ;;  %v6693_v60 = vrot.slane %v6516_v47, %v12510_v53 }
 0x8e8   : > { %v6549_v23 = vrot.slane %v6534_v10, %v8980_v5  ;;  %v6553_v34 = vrot.slane %v6538_v13, %v8980_v5  ;;  %v6602_v32 = vrot.slane %v6587_v63, %v8983_v6  ;;  %v6655_v16 = vrot.slane %v6640_v9, %v12507_v30  ;;  %v11778_v63 = vpop.permute.xlu0 %6519 }
 0x8e9   : > { %v6606_v46 = vrot.slane %v6591_v25, %v8983_v6  ;;  %v6697_v14 = vrot.slane %v6516_v47, %v12511_v44  ;;  %v6708_v62 = vrot.slane %v6693_v60, %v12510_v53  ;;  %v6970_v10 = vrot.slane %v6952_v59, %v8980_v5 }
 0x8ea   : > { %v6561_v17 = vcombine.low %v6549_v23, %v6553_v34  ;;  %v6974_v13 = vrot.slane %v6952_v59, %v12364_v1  ;;  %v7027_v9 = vrot.slane %v6952_v59, %v12439_v33 }
 0x8eb   : > { %8003 = vrot.lane.b32.xlu0 %v8002_v15, %s8769_s10  ;;  %6397 = vrot.lane.b32.xlu1 %v6396_v48, %s8778_s28  ;;  %v6734_v15 = vmul.f32 %v11521_v56, %v12549_v2  ;;  %v6614_v4 = vcombine.low %v6602_v32, %v6606_v46  ;;  %v6659_v48 = vrot.slane %v6644_v41, %v12507_v30 }
 0x8ec   : > { %v6712_v7 = vrot.slane %v6697_v14, %v12510_v53  ;;  %v7023_v56 = vrot.slane %v6952_v59, %v8983_v6  ;;  %v6985_v34 = vrot.slane %v6970_v10, %v8980_v5  ;;  %v6989_v25 = vrot.slane %v6974_v13, %v8980_v5 }
 0x8ed   : > { %v6752_v39 = vrot.slane %v6734_v15, %v8980_v5  ;;  %v6756_v61 = vrot.slane %v6734_v15, %v12364_v1  ;;  %v6915_v40 = vrot.slane %v6734_v15, %v12511_v44  ;;  %v7076_v46 = vrot.slane %v6952_v59, %v12507_v30 }
 0x8ee   : > { %v6997_v41 = vcombine.low %v6985_v34, %v6989_v25  ;;  %v7042_v2 = vrot.slane %v7027_v9, %v8983_v6  ;;  %v12552_v9 = vld [vmem:[#allocation22_spill] sm:$0xff] }
 0x8ef   : > { %8052 = vrot.lane.b32.xlu0 %v8051_v27, %s8769_s10  ;;  %7241 = vperm.xlu1 %8704, %v11489_v58   ;;  %v6667_v27 = vcombine.low %v6655_v16, %v6659_v48  ;;  %v6767_v18 = vrot.slane %v6752_v39, %v8980_v5  ;;  %v6930_v42 = vrot.slane %v6915_v40, %v12510_v53 }
 0x8f0   : > { %v7038_v16 = vrot.slane %v7023_v56, %v8983_v6  ;;  %v7129_v48 = vrot.slane %v6952_v59, %v12510_v53  ;;  %v7091_v14 = vrot.slane %v7076_v46, %v12507_v30  ;;  %v7934_v46 = vrot.slane %v12552_v9, %v8980_v5 }
 0x8f2   : > { %v7050_v60 = vcombine.low %v7038_v16, %v7042_v2  ;;  %v7949_v16 = vrot.slane %v7934_v46, %v8980_v5  ;;  %v7983_v2 = vrot.slane %v12552_v9, %v8983_v6 }
 0x8f3   : > { %8101 = vrot.lane.b32.xlu0 %v8100_v35, %s8769_s10  ;;  %8705 = vset.pattern.permute.xlu1 %v8905_v11  ;;  %v6720_v35 = vcombine.low %v6708_v62, %v6712_v7  ;;  %v6771_v11 = vrot.slane %v6756_v61, %v8980_v5 }
 0x8f4   : > { %7276 = vperm.xlu1 %8705, %v11489_v58   ;;  %v7481_v58 = vrot.slane %v7313_v21, %v12510_v53  ;;  %v6805_v21 = vrot.slane %v6734_v15, %v8983_v6 }
 0x8f5   : > { %v6779_v20 = vcombine.low %v6767_v18, %v6771_v11 }
 0x8f6   : > { %v7496_v51 = vrot.slane %v7481_v58, %v12510_v53  ;;  %v6820_v22 = vrot.slane %v6805_v21, %v8983_v6  ;;  %v7144_v21 = vrot.slane %v7129_v48, %v12510_v53  ;;  %v7998_v48 = vrot.slane %v7983_v2, %v8983_v6 }
 0x8f8   : > { %7356 = vrot.lane.b32.xlu1 %v7349_v28, %s8774_s16  ;;  %v6809_v28 = vrot.slane %v6734_v15, %v12439_v33 }
 0x8f9   : > { %8707 = vset.pattern.permute.xlu1 %v12546_v36  ;;  %v6858_v36 = vrot.slane %v6734_v15, %v12507_v30 }
 0x8fc   : > { %7405 = vrot.lane.b32.xlu1 %v7398_v12, %s8774_s16  ;;  %v6862_v12 = vrot.slane %v6734_v15, %v12508_v54 }
 0x8fe   : > { %v6877_v49 = vrot.slane %v6862_v12, %v12507_v30 }
 0x900   : > { %7454 = vrot.lane.b32.xlu1 %v7447_v45, %s8774_s16  ;;  %v6824_v45 = vrot.slane %v6809_v28, %v8983_v6 }
 0x902   : > { %v6832_v3 = vcombine.low %v6820_v22, %v6824_v45  ;;  %v7681_v22 = vrot.slane %v11702_v57, %v12510_v53 }
 0x904   : > { %7503 = vrot.lane.b32.xlu1 %v7496_v51, %s8774_s16  ;;  %v6873_v51 = vrot.slane %v6858_v36, %v12507_v30  ;;  %v7632_v36 = vrot.slane %v11702_v57, %v12507_v30 }
 0x908   : > { %7556 = vrot.lane.b32.xlu1 %v7549_v43, %s8770_s14  ;;  %v6911_v43 = vrot.slane %v6734_v15, %v12510_v53  ;;  %v7080_v15 = vrot.slane %v6952_v59, %v12508_v54 }
 0x90a   : > { %v6926_v0 = vrot.slane %v6911_v43, %v12510_v53  ;;  %v7095_v39 = vrot.slane %v7080_v15, %v12507_v30 }
 0x90c   : > { %7605 = vrot.lane.b32.xlu1 %v7598_v37, %s8770_s14  ;;  %v6885_v37 = vcombine.low %v6873_v51, %v6877_v49  ;;  %v6938_v23 = vcombine.low %v6926_v0, %v6930_v42  ;;  %v7103_v61 = vcombine.low %v7091_v14, %v7095_v39  ;;  %v7696_v49 = vrot.slane %v7681_v22, %v12510_v53 }
 0x910   : > { %6503 = vrot.lane.b32.xlu1 %v6502_v31, %s8778_s28  ;;  %s265_s28 = scalar_lea.vmem %s12197_s6, %s8412_s9 }
 0x914   : > { %6562 = vrot.lane.b32.xlu1 %v6561_v17, %s8777_s25  ;;  %v11788_v17 = vpop.permute.xlu0 %6574 }
 0x918   : > { %6615 = vrot.lane.b32.xlu1 %v6614_v4, %s8777_s25  ;;  %v11803_v62 = vpop.permute.xlu0 %6627 }
 0x91c   : > { %6668 = vrot.lane.b32.xlu1 %v6667_v27, %s8777_s25  ;;  %v7133_v27 = vrot.slane %v6952_v59, %v12511_v44  ;;  %v11811_v18 = vpop.permute.xlu0 %6680 }
 0x91d   : > { %v11749_v26 = vpop.permute.xlu1 %6346 }
 0x920   : > { %6721 = vrot.lane.b32.xlu1 %v6720_v35, %s8777_s25  ;;  %v7148_v35 = vrot.slane %v7133_v27, %v12510_v53  ;;  %v11823_v45 = vpop.permute.xlu0 %6737 }
 0x921   : > { %v11756_v19 = vpop.permute.xlu1 %6452 }
 0x922   : > { %v7156_v28 = vcombine.low %v7144_v21, %v7148_v35  ;;  %v7254_v21 = vrot.slane %v11518_v52, %v12507_v30  ;;  %v7258_v35 = vrot.slane %v11518_v52, %v12508_v54 }
 0x924   : > { %6780 = vrot.lane.b32.xlu1 %v6779_v20, %s8776_s24  ;;  %v7647_v20 = vrot.slane %v7632_v36, %v12507_v30  ;;  %v11832_v40 = vpop.permute.xlu0 %6792  ;;  %v7264_v22 = vrot.slane %v7254_v21, %v12507_v30 }
 0x925   : > { %v11763_v58 = vpop.permute.xlu1 %6505 }
 0x928   : > { %6833 = vrot.lane.b32.xlu1 %v6832_v3, %s8776_s24  ;;  %v12551_v3 = vld [vmem:[#allocation19_spill] sm:$0xff]  ;;  %v11845_v10 = vpop.permute.xlu0 %6845 }
 0x929   : > { %v11772_v47 = vpop.permute.xlu1 %6564  ;;  %v7734_v43 = vrot.slane %v12551_v3, %v8980_v5  ;;  %v7783_v57 = vrot.slane %v12551_v3, %v8983_v6  ;;  %v7832_v42 = vrot.slane %v12551_v3, %v12507_v30  ;;  %v7881_v56 = vrot.slane %v12551_v3, %v12510_v53 }
 0x92a   : > { %v7289_v3 = vrot.slane %v11518_v52, %v12510_v53 }
 0x92b   : > { %v7749_v59 = vrot.slane %v7734_v43, %v8980_v5  ;;  %v7798_v0 = vrot.slane %v7783_v57, %v8983_v6  ;;  %v7847_v13 = vrot.slane %v7832_v42, %v12507_v30  ;;  %v7896_v25 = vrot.slane %v7881_v56, %v12510_v53  ;;  %v11898_v56 = vld [vmem:[%s12193_s2] sm:$0xf] }
 0x92c   : > { %6886 = vrot.lane.b32.xlu1 %v6885_v37, %s8776_s24  ;;  %v11854_v34 = vpop.permute.xlu0 %6898  ;;  %v7293_v43 = vrot.slane %v11518_v52, %v12511_v44  ;;  %v7299_v42 = vrot.slane %v7289_v3, %v12510_v53  ;;  %12553 = vst [vmem:[#allocation72_spill] sm:$0xff] %v11898_v56 }
 0x92d   : > { %v11781_v31 = vpop.permute.xlu1 %6617 }
 0x930   : > { %6939 = vrot.lane.b32.xlu1 %v6938_v23, %s8776_s24  ;;  %v11865_v15 = vpop.permute.xlu0 %6955 }
 0x931   : > { %v11790_v32 = vpop.permute.xlu1 %6670 }
 0x934   : > { %6998 = vrot.lane.b32.xlu1 %v6997_v41, %s8775_s23  ;;  %v11872_v39 = vpop.permute.xlu0 %7010 }
 0x935   : > { %v11797_v4 = vpop.permute.xlu1 %6723 }
 0x938   : > { %7051 = vrot.lane.b32.xlu1 %v7050_v60, %s8775_s23  ;;  %v8032_v60 = vrot.slane %v12552_v9, %v12507_v30 }
 0x939   : > { %v11806_v7 = vpop.permute.xlu1 %6782 }
 0x93a   : > { %v8047_v27 = vrot.slane %v8032_v60, %v12507_v30  ;;  %v11910_v60 = vld [vmem:[%s12194_s3] sm:$0xf] }
 0x93b   : > { %12556 = vst [vmem:[#allocation70_spill] sm:$0xff] %v11910_v60 }
 0x93c   : > { %7104 = vrot.lane.b32.xlu1 %v7103_v61, %s8775_s23  ;;  %v8081_v61 = vrot.slane %v12552_v9, %v12510_v53 }
 0x93d   : > { %v11813_v11 = vpop.permute.xlu1 %6835 }
 0x93e   : > { %v8096_v36 = vrot.slane %v8081_v61, %v12510_v53 }
 0x940   : > { %7157 = vrot.lane.b32.xlu1 %v7156_v28, %s8775_s23  ;;  %s8409_s23 = sld [smem:[#allocation3 + $0x3]] }
 0x941   : > { %v11818_v12 = vpop.permute.xlu1 %6888 }
 0x944   : > { %7654 = vrot.lane.b32.xlu1 %v7647_v20, %s8770_s14  ;;  %v11883_v20 = vpop.permute.xlu0 %7063 }
 0x945   : > { %v11826_v51 = vpop.permute.xlu1 %6941 }
 0x948   : > { %7703 = vrot.lane.b32.xlu1 %v7696_v49, %s8770_s14  ;;  %v7268_v49 = vrot.slane %v7258_v35, %v12507_v30  ;;  %v12558_v35 = vmov 1  }
 0x949   : > { %v11834_v50 = vpop.permute.xlu1 %7000 }
 0x94a   : > { %v7271_v57 = vcombine.low %v7264_v22, %v7268_v49 }
 0x94c   : > { %7756 = vrot.lane.b32.xlu1 %v7749_v59, %s8773_s15 }
 0x94d   : > { %v11840_v37 = vpop.permute.xlu1 %7053 }
 0x950   : > { %7805 = vrot.lane.b32.xlu1 %v7798_v0, %s8773_s15 }
 0x951   : > { %v11851_v23 = vpop.permute.xlu1 %7106 }
 0x954   : > { %7854 = vrot.lane.b32.xlu1 %v7847_v13, %s8773_s15  ;;  %v7303_v13 = vrot.slane %v7293_v43, %v12510_v53 }
 0x955   : > { %v11860_v41 = vpop.permute.xlu1 %7159 }
 0x958   : > { %7903 = vrot.lane.b32.xlu1 %v7896_v25, %s8773_s15  ;;  %v11901_v25 = vpop.permute.xlu0 %7116 }
 0x959   : > { %v6345_v14 = vpop.permute.xlu1 %6344 }
 0x95c   : > { %7956 = vrot.lane.b32.xlu1 %v7949_v16, %s8769_s10  ;;  %v7306_v16 = vcombine.low %v7299_v42, %v7303_v13  ;;  %v11915_v61 = vpop.permute.xlu0 %7170 }
 0x95d   : > { %v6398_v28 = vpop.permute.xlu1 %6397 }
 0x960   : > { %8005 = vrot.lane.b32.xlu1 %v7998_v48, %s8769_s10  ;;  %v12555_v48 = vmov 0  }
 0x964   : > { %8054 = vrot.lane.b32.xlu1 %v8047_v27, %s8769_s10 }
 0x968   : > { %8103 = vrot.lane.b32.xlu1 %v8096_v36, %s8769_s10  ;;  %v6400_v36 = vpop.permute.xlu0 %6399 }
 0x96a   : > { %v7242_v59 = vpop.permute.xlu1 %7241 }
 0x96b   : > { %v7250_v0 = vrot.slane %v7242_v59, %v9656_v24 }
 0x96c   : > { %8166 = vperm.xlu1 %8707, %v11898_v56   ;;  %v6451_v3 = vpop.permute.xlu0 %6450 }
 0x96d   : > { %v11903_v9 = vmul.f32 %v7271_v57, %v7250_v0  ;;  %v6401_v0 = vrot.slane %v6398_v28, 4  ;;  %v6454_v44 = vrot.slane %v6451_v3, 4 }
 0x96f   : > { %12554 = vst [vmem:[#allocation69_spill] sm:$0xff] %v11903_v9  ;;  %v7277_v46 = vpop.permute.xlu1 %7276 }
 0x970   : > { %v7285_v2 = vrot.slane %v7277_v46, %v9656_v24  ;;  %8708 = vset.pattern.permute.xlu1 %v12555_v48  ;;  %v11926_v59 = vpop.permute.xlu0 %7206  ;;  %v6402_v46 = vrot.slane %v6400_v36, 4  ;;  %v6508_v36 = vrot.slane %v11763_v58, 4 }
 0x971   : > { %8184 = vperm.xlu1 %8708, %v11910_v60  }
 0x972   : > { %v11912_v27 = vmul.f32 %v7306_v16, %v7285_v2  ;;  %v6348_v16 = vrot.slane %v6345_v14, 4  ;;  %v6349_v2 = vrot.slane %v11749_v26, 4  ;;  %v6403_v48 = vsel %vm350_vm8, %v6401_v0, %v6402_v46 }
 0x973   : > { %v11917_v21 = vpop.permute.xlu1 %7356  ;;  %v6404_v56 = vsel %vm352_vm4, %v6398_v28, %v6403_v48  ;;  %v6310_v26 = vrot.slane %v11507_v55, %v9656_v24 }
 0x974   : > { %12557 = vst [vmem:[#allocation18_spill] sm:$0xff] %v11912_v27  ;;  %v11930_v42 = vpop.permute.xlu0 %7354  ;;  %v6350_v54 = vsel %vm350_vm8, %v6348_v16, %v6349_v2  ;;  %v6365_v27 = vrot.slane %v11509_v29, %v9656_v24  ;;  %v6567_v16 = vrot.slane %v11772_v47, 4  ;;  %v6418_v29 = vrot.slane %v11511_v8, %v9656_v24 }
 0x975   : > { %8709 = vset.pattern.permute.xlu1 %v12558_v35  ;;  %v6455_v35 = vrot.slane %v11756_v19, 4  ;;  %v6351_v19 = vsel %vm352_vm4, %v6345_v14, %v6350_v54  ;;  %v6471_v47 = vrot.slane %v11513_v38, %v9656_v24  ;;  %v6620_v14 = vrot.slane %v11781_v31, 4 }
 0x976   : > { %v6406_v2 = vmul.f32 %v6404_v56, %v6365_v27  ;;  %v6353_v28 = vmul.f32 %v6351_v19, %v6310_v26  ;;  %v6673_v38 = vrot.slane %v11790_v32, 4 }
 0x977   : > { %v11920_v22 = vpop.permute.xlu1 %7405  ;;  %v6456_v0 = vsel %vm350_vm8, %v6454_v44, %v6455_v35 }
 0x978   : > { %v11938_v60 = vpop.permute.xlu0 %7403  ;;  %v6457_v58 = vsel %vm352_vm4, %v6451_v3, %v6456_v0 }
 0x979   : > { %v6459_v8 = vmul.f32 %v6457_v58, %v6418_v29 }
 0x97b   : > { %v11922_v49 = vpop.permute.xlu1 %7454 }
 0x97c   : > { %v11954_v55 = vpop.permute.xlu0 %7452 }
 0x97f   : > { %v11924_v43 = vpop.permute.xlu1 %7503 }
 0x980   : > { %v11968_v19 = vpop.permute.xlu0 %7501 }
 0x983   : > { %v11928_v57 = vpop.permute.xlu1 %7556 }
 0x987   : > { %v11932_v13 = vpop.permute.xlu1 %7605 }
 0x988   : > { %12559 = vst [vmem:[#allocation21_spill] sm:$0xff] %v11932_v13 }
 0x98b   : > { %v6504_v53 = vpop.permute.xlu1 %6503 }
 0x98c   : > { %v6507_v30 = vrot.slane %v6504_v53, 4 }
 0x98e   : > { %v6509_v13 = vsel %vm350_vm8, %v6507_v30, %v6508_v36  ;;  %v6407_v30 = vadd.f32 %v6406_v2, %v6353_v28 }
 0x98f   : > { %v6563_v46 = vpop.permute.xlu1 %6562  ;;  %v6510_v44 = vsel %vm352_vm4, %v6504_v53, %v6509_v13  ;;  %v6583_v53 = vrot.slane %v11788_v17, %v9656_v24 }
 0x990   : > { %v6566_v9 = vrot.slane %v6563_v46, 4  ;;  %v6512_v35 = vmul.f32 %v6510_v44, %v6471_v47  ;;  %v6460_v31 = vadd.f32 %v6459_v8, %v6407_v30  ;;  %v6689_v44 = vrot.slane %v11811_v18, %v9656_v24 }
 0x992   : > { %v6568_v48 = vsel %vm350_vm8, %v6566_v9, %v6567_v16  ;;  %v6528_v9 = vrot.slane %v11778_v63, %v9656_v24  ;;  %v6636_v63 = vrot.slane %v11803_v62, %v9656_v24 }
 0x993   : > { %v6616_v54 = vpop.permute.xlu1 %6615  ;;  %v6569_v27 = vsel %vm589_vm7, %v6563_v46, %v6568_v48  ;;  %v6513_v46 = vadd.f32 %v6512_v35, %v6460_v31  ;;  %v6726_v48 = vrot.slane %v11797_v4, 4  ;;  %v6746_v4 = vrot.slane %v11823_v45, %v9656_v24 }
 0x994   : > { %v6619_v56 = vrot.slane %v6616_v54, 4  ;;  %v6571_v26 = vmul.f32 %v6569_v27, %v6528_v9 }
 0x996   : > { %v6621_v3 = vsel %vm350_vm8, %v6619_v56, %v6620_v14  ;;  %v6572_v29 = vadd.f32 %v6571_v26, %v6513_v46  ;;  %v11978_v14 = vpop.permute.xlu0 %7554  ;;  %v6785_v56 = vrot.slane %v11806_v7, 4  ;;  %v6801_v7 = vrot.slane %v11832_v40, %v9656_v24 }
 0x997   : > { %v6622_v13 = vsel %vm589_vm7, %v6616_v54, %v6621_v3  ;;  %v6669_v36 = vpop.permute.xlu1 %6668  ;;  %v6891_v46 = vrot.slane %v11818_v12, 4  ;;  %v6907_v12 = vrot.slane %v11854_v34, %v9656_v24 }
 0x998   : > { %v6672_v0 = vrot.slane %v6669_v36, 4  ;;  %v6624_v16 = vmul.f32 %v6622_v13, %v6583_v53  ;;  %v6838_v13 = vrot.slane %v11813_v11, 4  ;;  %v6854_v11 = vrot.slane %v11845_v10, %v9656_v24 }
 0x99a   : > { %v6674_v2 = vsel %vm350_vm8, %v6672_v0, %v6673_v38  ;;  %v6625_v54 = vadd.f32 %v6624_v16, %v6572_v29  ;;  %v11987_v31 = vpop.permute.xlu0 %7603 }
 0x99b   : > { %v6675_v28 = vsel %vm589_vm7, %v6669_v36, %v6674_v2  ;;  %v6722_v17 = vpop.permute.xlu1 %6721 }
 0x99c   : > { %v6677_v58 = vmul.f32 %v6675_v28, %v6636_v63  ;;  %v6725_v32 = vrot.slane %v6722_v17, 4 }
 0x99e   : > { %v6727_v47 = vsel %vm350_vm8, %v6725_v32, %v6726_v48  ;;  %v6678_v27 = vadd.f32 %v6677_v58, %v6625_v54  ;;  %v11997_v48 = vpop.permute.xlu0 %7652  ;;  %v6944_v58 = vrot.slane %v11826_v51, 4  ;;  %v6964_v51 = vrot.slane %v11865_v15, %v9656_v24 }
 0x99f   : > { %v6728_v62 = vsel %vm589_vm7, %v6722_v17, %v6727_v47  ;;  %v6781_v30 = vpop.permute.xlu1 %6780 }
 0x9a0   : > { %v6730_v9 = vmul.f32 %v6728_v62, %v6689_v44  ;;  %v6784_v8 = vrot.slane %v6781_v30, 4 }
 0x9a2   : > { %v6731_v35 = vadd.f32 %v6730_v9, %v6678_v27  ;;  %v6786_v3 = vsel %vm350_vm8, %v6784_v8, %v6785_v56  ;;  %v12006_v9 = vpop.permute.xlu0 %7701 }
 0x9a3   : > { %v6787_v18 = vsel %vm826_vm6, %v6781_v30, %v6786_v3  ;;  %v6834_v53 = vpop.permute.xlu1 %6833  ;;  %v7003_v30 = vrot.slane %v11834_v50, 4  ;;  %v7056_v3 = vrot.slane %v11840_v37, 4  ;;  %v7019_v50 = vrot.slane %v11872_v39, %v9656_v24 }
 0x9a4   : > { %v6789_v36 = vmul.f32 %v6787_v18, %v6746_v4  ;;  %v6837_v38 = vrot.slane %v6834_v53, 4  ;;  %v7109_v37 = vrot.slane %v11851_v23, 4  ;;  %v7072_v39 = vrot.slane %v11883_v20, %v9656_v24 }
 0x9a6   : > { %v6790_v26 = vadd.f32 %v6789_v36, %v6731_v35  ;;  %v6839_v0 = vsel %vm350_vm8, %v6837_v38, %v6838_v13  ;;  %v7184_v13 = vrot.slane %v11518_v52, %v8980_v5  ;;  %v7188_v36 = vrot.slane %v11518_v52, %v12364_v1 }
 0x9a7   : > { %v6840_v45 = vsel %vm826_vm6, %v6834_v53, %v6839_v0  ;;  %v6887_v63 = vpop.permute.xlu1 %6886 }
 0x9a8   : > { %v6842_v16 = vmul.f32 %v6840_v45, %v6801_v7  ;;  %v6890_v2 = vrot.slane %v6887_v63, 4  ;;  %v12020_v7 = vpop.permute.xlu0 %7754 }
 0x9aa   : > { %v6843_v28 = vadd.f32 %v6842_v16, %v6790_v26  ;;  %v6892_v17 = vsel %vm350_vm8, %v6890_v2, %v6891_v46  ;;  %v7219_v46 = vrot.slane %v11518_v52, %v8983_v6  ;;  %v7223_v16 = vrot.slane %v11518_v52, %v12439_v33 }
 0x9ab   : > { %v6893_v40 = vsel %vm826_vm6, %v6887_v63, %v6892_v17  ;;  %v6940_v29 = vpop.permute.xlu1 %6939  ;;  %v7194_v2 = vrot.slane %v7184_v13, %v8980_v5 }
 0x9ac   : > { %v6895_v32 = vmul.f32 %v6893_v40, %v6854_v11  ;;  %v6943_v44 = vrot.slane %v6940_v29, 4  ;;  %v7198_v11 = vrot.slane %v7188_v36, %v8980_v5  ;;  %v7229_v52 = vrot.slane %v7219_v46, %v8983_v6 }
 0x9ae   : > { %v6896_v54 = vadd.f32 %v6895_v32, %v6843_v28  ;;  %v6945_v47 = vsel %vm350_vm8, %v6943_v44, %v6944_v58  ;;  %v8906_v32 = vmov 1985246804  }
 0x9af   : > { %v6946_v10 = vsel %vm826_vm6, %v6940_v29, %v6945_v47  ;;  %v6999_v62 = vpop.permute.xlu1 %6998  ;;  %v7162_v29 = vrot.slane %v11860_v41, 4  ;;  %v7315_v44 = vunpack.c.l.s4 %v8906_v32  ;;  %v12039_v47 = vpop.permute.xlu0 %7803  ;;  %v12564_v32 = vld [vmem:[#allocation21_spill] sm:$0xff] }
 0x9b0   : > { %v6948_v56 = vmul.f32 %v6946_v10, %v6907_v12  ;;  %v7002_v27 = vrot.slane %v6999_v62, 4  ;;  %v7125_v12 = vrot.slane %v11901_v25, %v9656_v24  ;;  %v7201_v10 = vcombine.low %v7194_v2, %v7198_v11 }
 0x9b1   : > { %v7359_v25 = vrot.slane %v11917_v21, 4  ;;  %v7559_v11 = vrot.slane %v11928_v57, 4  ;;  %v12566_v57 = vld [vmem:[#allocation29_spill] sm:$0xff] }
 0x9b2   : > { %v6949_v8 = vadd.f32 %v6948_v56, %v6896_v54  ;;  %v7004_v4 = vsel %vm350_vm8, %v7002_v27, %v7003_v30  ;;  %v7233_v54 = vrot.slane %v7223_v16, %v8983_v6  ;;  %v7215_v56 = vrot.slane %v11926_v59, %v9656_v24 }
 0x9b3   : > { %v7005_v34 = vsel %vm1063_vm1, %v6999_v62, %v7004_v4  ;;  %v7052_v35 = vpop.permute.xlu1 %7051  ;;  %v7179_v62 = vrot.slane %v11915_v61, %v9656_v24  ;;  %v7316_v4 = vunpack.c.0.s8 %v7315_v44  ;;  %v7407_v59 = vrot.slane %v11938_v60, 4 }
 0x9b4   : > { %v7007_v18 = vmul.f32 %v7005_v34, %v6964_v51  ;;  %v7055_v53 = vrot.slane %v7052_v35, 4  ;;  %v7236_v34 = vcombine.low %v7229_v52, %v7233_v54  ;;  %v7608_v44 = vrot.slane %v12564_v32, 4 }
 0x9b6   : > { %v7008_v15 = vadd.f32 %v7007_v18, %v6949_v8  ;;  %v7057_v38 = vsel %vm350_vm8, %v7055_v53, %v7056_v3  ;;  %v7358_v3 = vrot.slane %v11930_v42, 4  ;;  %v7408_v18 = vrot.slane %v11920_v22, 4 }
 0x9b7   : > { %v7058_v26 = vsel %vm1063_vm1, %v7052_v35, %v7057_v38  ;;  %v7105_v0 = vpop.permute.xlu1 %7104  ;;  %v7203_v35 = vmul.f32 %v7201_v10, %v7179_v62  ;;  %v7238_v53 = vmul.f32 %v7236_v34, %v7215_v56  ;;  %v12560_v38 = vld [vmem:[#allocation6_spill] sm:$0xff]  ;;  %v7506_v22 = vrot.slane %v11924_v43, 4 }
 0x9b8   : > { %v7060_v45 = vmul.f32 %v7058_v26, %v7019_v50  ;;  %v7108_v63 = vrot.slane %v7105_v0, 4  ;;  %v12050_v50 = vpop.permute.xlu0 %7852  ;;  %v7360_v36 = vsel %vm350_vm8, %v7358_v3, %v7359_v25  ;;  %v12056_v26 = vsub.s32 %v7316_v4, %v12560_v38  ;;  %v12567_v25 = vld [vmem:[#allocation35_spill] sm:$0xff] }
 0x9b9   : > { %v7361_v46 = vsel %vm1006_vm5, %v11930_v42, %v7360_v36  ;;  %v7558_v43 = vrot.slane %v11978_v14, 4  ;;  %v7607_v10 = vrot.slane %v11987_v31, 4  ;;  %v7656_v4 = vrot.slane %v11997_v48, 4 }
 0x9ba   : > { %v7061_v28 = vadd.f32 %v7060_v45, %v7008_v15  ;;  %v7110_v17 = vsel %vm350_vm8, %v7108_v63, %v7109_v37  ;;  %v7457_v15 = vrot.slane %v11922_v49, 4  ;;  %v7409_v37 = vsel %vm350_vm8, %v7407_v59, %v7408_v18  ;;  %v12561_v63 = vld [vmem:[#allocation32_spill] sm:$0xff] }
 0x9bb   : > { %v7111_v23 = vsel %vm1063_vm1, %v7105_v0, %v7110_v17  ;;  %v7158_v40 = vpop.permute.xlu1 %7157  ;;  %v7456_v0 = vrot.slane %v11954_v55, 4  ;;  %v7505_v49 = vrot.slane %v11968_v19, 4  ;;  %v7420_v54 = vrot.slane %v12566_v57, %v12056_v26  ;;  %v12572_v57 = vld [vmem:[#allocation40_spill] sm:$0xff] }
 0x9bc   : > { %v7113_v58 = vmul.f32 %v7111_v23, %v7072_v39  ;;  %v7161_v20 = vrot.slane %v7158_v40, 4  ;;  %v7320_v39 = vrot.slane %v12561_v63, %v12056_v26  ;;  %v12563_v23 = vld [vmem:[#allocation28_spill] sm:$0xff]  ;;  %v7560_v56 = vsel %vm350_vm8, %v7558_v43, %v7559_v11 }
 0x9bd   : > { %v7458_v2 = vsel %vm350_vm8, %v7456_v0, %v7457_v15  ;;  %v7609_v3 = vsel %vm350_vm8, %v7607_v10, %v7608_v44  ;;  %v7705_v59 = vrot.slane %v12006_v9, 4  ;;  %v7807_v11 = vrot.slane %v12039_v47, 4 }
 0x9be   : > { %v7114_v30 = vadd.f32 %v7113_v58, %v7061_v28  ;;  %v7163_v41 = vsel %vm350_vm8, %v7161_v20, %v7162_v29  ;;  %v12562_v28 = vld [vmem:[#allocation69_spill] sm:$0xff]  ;;  %v12072_v29 = vpop.permute.xlu0 %7901  ;;  %v7410_v58 = vsel %vm1006_vm5, %v11938_v60, %v7409_v37  ;;  %v7363_v42 = vmul.f32 %v7361_v46, %v7320_v39 }
 0x9bf   : > { %v7164_v27 = vsel %vm1063_vm1, %v7158_v40, %v7163_v41  ;;  %v7655_v51 = vpop.permute.xlu1 %7654  ;;  %v7371_v40 = vrot.slane %v12563_v23, %v12056_v26  ;;  %v7507_v20 = vsel %vm350_vm8, %v7505_v49, %v7506_v22  ;;  %v7459_v62 = vsel %vm1006_vm5, %v11954_v55, %v7458_v2  ;;  %v12568_v55 = vld [vmem:[#allocation36_spill] sm:$0xff]  ;;  %v12569_v37 = vld [vmem:[#allocation37_spill] sm:$0xff] }
 0x9c0   : > { %v7166_v8 = vmul.f32 %v7164_v27, %v7125_v12  ;;  %v12565_v12 = vld [vmem:[#allocation18_spill] sm:$0xff]  ;;  %v7657_v27 = vrot.slane %v7655_v51, 4  ;;  %v7508_v34 = vsel %vm1006_vm5, %v11968_v19, %v7507_v20  ;;  %v7561_v51 = vsel %vm769_vm3, %v11978_v14, %v7560_v56 }
 0x9c1   : > { %v7412_v41 = vmul.f32 %v7410_v58, %v7371_v40  ;;  %v7571_v22 = vrot.slane %v12569_v37, %v12056_v26  ;;  %v12570_v14 = vld [vmem:[#allocation38_spill] sm:$0xff]  ;;  %v7905_v10 = vrot.slane %v12072_v29, 4 }
 0x9c2   : > { %v7167_v61 = vadd.f32 %v7166_v8, %v7114_v30  ;;  %v7469_v8 = vrot.slane %v12567_v25, %v12056_v26  ;;  %v7955_v36 = vpop.permute.xlu0 %7954  ;;  %v7658_v0 = vsel %vm350_vm8, %v7656_v4, %v7657_v27  ;;  %v7620_v2 = vrot.slane %v12570_v14, %v12056_v26 }
 0x9c3   : > { %v7704_v13 = vpop.permute.xlu1 %7703  ;;  %v7958_v4 = vrot.slane %v7955_v36, 4 }
 0x9c4   : > { %v7204_v21 = vadd.f32 %v7203_v35, %v7167_v61  ;;  %v7461_v35 = vmul.f32 %v7459_v62, %v7420_v54  ;;  %v7706_v61 = vrot.slane %v7704_v13, 4  ;;  %v7758_v13 = vrot.slane %v12020_v7, 4 }
 0x9c5   : > { %v7720_v54 = vrot.slane %v12572_v57, %v12056_v26 }
 0x9c6   : > { %v7239_v45 = vadd.f32 %v7238_v53, %v7204_v21  ;;  %v7520_v53 = vrot.slane %v12568_v55, %v12056_v26  ;;  %v7510_v21 = vmul.f32 %v7508_v34, %v7469_v8  ;;  %v7707_v46 = vsel %vm350_vm8, %v7705_v59, %v7706_v61  ;;  %v8004_v20 = vpop.permute.xlu0 %8003 }
 0x9c7   : > { %v7757_v16 = vpop.permute.xlu1 %7756  ;;  %v7708_v32 = vsel %vm769_vm3, %v12006_v9, %v7707_v46  ;;  %v12573_v9 = vld [vmem:[#allocation41_spill] sm:$0xff]  ;;  %v8007_v61 = vrot.slane %v8004_v20, 4 }
 0x9c8   : > { %v7274_v17 = vadd.f32 %v12562_v28, %v7239_v45  ;;  %v7759_v19 = vrot.slane %v7757_v16, 4  ;;  %v7610_v45 = vsel %vm769_vm3, %v11987_v31, %v7609_v3  ;;  %v7563_v63 = vmul.f32 %v7561_v51, %v7520_v53  ;;  %v12571_v31 = vld [vmem:[#allocation39_spill] sm:$0xff] }
 0x9c9   : > { %v7659_v16 = vsel %vm769_vm3, %v11997_v48, %v7658_v0  ;;  %v7669_v58 = vrot.slane %v12571_v31, %v12056_v26  ;;  %v7771_v25 = vrot.slane %v12573_v9, %v12056_v26  ;;  %v12575_v0 = vld [vmem:[#allocation43_spill] sm:$0xff] }
 0x9ca   : > { %v7309_v52 = vadd.f32 %v12565_v12, %v7274_v17  ;;  %v7612_v17 = vmul.f32 %v7610_v45, %v7571_v22  ;;  %v7760_v40 = vsel %vm350_vm8, %v7758_v13, %v7759_v19  ;;  %v7661_v12 = vmul.f32 %v7659_v16, %v7620_v2  ;;  %v8053_v55 = vpop.permute.xlu0 %8052  ;;  %v12576_v45 = vld [vmem:[#allocation44_spill] sm:$0xff]  ;;  %v12577_v16 = vld [vmem:[#allocation46_spill] sm:$0xff] }
 0x9cb   : > { %v7806_v30 = vpop.permute.xlu1 %7805  ;;  %v7761_v62 = vsel %vm532_vm2, %v12020_v7, %v7760_v40  ;;  %v7710_v56 = vmul.f32 %v7708_v32, %v7669_v58  ;;  %v7869_v19 = vrot.slane %v12575_v0, %v12056_v26  ;;  %v8056_v46 = vrot.slane %v8053_v55, 4 }
 0x9cc   : > { %v7364_v60 = vadd.f32 %v7363_v42, %v7309_v52  ;;  %v7808_v49 = vrot.slane %v7806_v30, 4  ;;  %v7856_v42 = vrot.slane %v12050_v50, 4 }
 0x9ce   : > { %v7413_v18 = vadd.f32 %v7412_v41, %v7364_v60  ;;  %v7809_v52 = vsel %vm350_vm8, %v7807_v11, %v7808_v49  ;;  %v8102_v11 = vpop.permute.xlu0 %8101 }
 0x9cf   : > { %v7855_v15 = vpop.permute.xlu1 %7854  ;;  %v7810_v8 = vsel %vm532_vm2, %v12039_v47, %v7809_v52  ;;  %v12579_v52 = vld [vmem:[#allocation50_spill] sm:$0xff] }
 0x9d0   : > { %v7462_v38 = vadd.f32 %v7461_v35, %v7413_v18  ;;  %v7857_v43 = vrot.slane %v7855_v15, 4  ;;  %v7763_v35 = vmul.f32 %v7761_v62, %v7720_v54  ;;  %v12574_v18 = vld [vmem:[#allocation42_spill] sm:$0xff]  ;;  %v7812_v15 = vmul.f32 %v7810_v8, %v7771_v25  ;;  %v12580_v25 = vld [vmem:[#allocation72_spill] sm:$0xff] }
 0x9d1   : > { %v7820_v7 = vrot.slane %v12574_v18, %v12056_v26  ;;  %v12581_v8 = vmov 4  }
 0x9d2   : > { %v7511_v39 = vadd.f32 %v7510_v21, %v7462_v38  ;;  %v7858_v60 = vsel %vm350_vm8, %v7856_v42, %v7857_v43  ;;  %v12578_v43 = vld [vmem:[#allocation48_spill] sm:$0xff]  ;;  %v8105_v42 = vrot.slane %v8102_v11, 4 }
 0x9d3   : > { %v7904_v28 = vpop.permute.xlu1 %7903  ;;  %v7859_v53 = vsel %vm532_vm2, %v12050_v50, %v7858_v60  ;;  %v8020_v31 = vrot.slane %v12578_v43, %v12056_v26  ;;  %v12586_v43 = vld [vmem:[#allocation10_spill] sm:$0xff] }
 0x9d4   : > { %v7564_v23 = vadd.f32 %v7563_v63, %v7511_v39  ;;  %v7906_v48 = vrot.slane %v7904_v28, 4  ;;  %v7861_v22 = vmul.f32 %v7859_v53, %v7820_v7  ;;  %v7920_v63 = vrot.slane %v12576_v45, %v12056_v26  ;;  %v12582_v53 = vld [vmem:[#allocation70_spill] sm:$0xff] }
 0x9d5   : > { %v7971_v28 = vrot.slane %v12577_v16, %v12056_v26 }
 0x9d6   : > { %v7613_v44 = vadd.f32 %v7612_v17, %v7564_v23  ;;  %v7907_v3 = vsel %vm350_vm8, %v7905_v10, %v7906_v48 }
 0x9d7   : > { %v7957_v30 = vpop.permute.xlu1 %7956  ;;  %v7908_v47 = vsel %vm532_vm2, %v12072_v29, %v7907_v3 }
 0x9d8   : > { %v7662_v41 = vadd.f32 %v7661_v12, %v7613_v44  ;;  %v7959_v27 = vrot.slane %v7957_v30, 4  ;;  %v7910_v14 = vmul.f32 %v7908_v47, %v7869_v19 }
 0x9da   : > { %v7711_v34 = vadd.f32 %v7710_v56, %v7662_v41  ;;  %v7960_v21 = vsel %vm350_vm8, %v7958_v4, %v7959_v27 }
 0x9db   : > { %v8006_v59 = vpop.permute.xlu1 %8005  ;;  %v7961_v50 = vsel %vm293_vm0, %v7955_v36, %v7960_v21 }
 0x9dc   : > { %v7764_v51 = vadd.f32 %v7763_v35, %v7711_v34  ;;  %v8008_v38 = vrot.slane %v8006_v59, 4  ;;  %v7963_v23 = vmul.f32 %v7961_v50, %v7920_v63  ;;  %v12583_v59 = vmov 2  }
 0x9de   : > { %v7813_v37 = vadd.f32 %v7812_v15, %v7764_v51  ;;  %v8009_v13 = vsel %vm350_vm8, %v8007_v61, %v8008_v38  ;;  %v12584_v51 = vmov 3  }
 0x9df   : > { %v8055_v39 = vpop.permute.xlu1 %8054  ;;  %v8010_v29 = vsel %vm293_vm0, %v8004_v20, %v8009_v13  ;;  %v8069_v20 = vrot.slane %v12579_v52, %v12056_v26 }
 0x9e0   : > { %v7862_v49 = vadd.f32 %v7861_v22, %v7813_v37  ;;  %v8057_v2 = vrot.slane %v8055_v39, 4  ;;  %v8012_v44 = vmul.f32 %v8010_v29, %v7971_v28 }
 0x9e2   : > { %v7911_v17 = vadd.f32 %v7910_v14, %v7862_v49  ;;  %v8058_v40 = vsel %vm350_vm8, %v8056_v46, %v8057_v2  ;;  %v8179_v46 = vstv %s8409_s23 }
 0x9e3   : > { %v8059_v36 = vsel %vm293_vm0, %v8053_v55, %v8058_v40  ;;  %v8104_v58 = vpop.permute.xlu1 %8103 }
 0x9e4   : > { %v7964_v32 = vadd.f32 %v7963_v23, %v7911_v17  ;;  %v8106_v12 = vrot.slane %v8104_v58, 4  ;;  %v8061_v57 = vmul.f32 %v8059_v36, %v8020_v31  ;;  %v12585_v23 = vld [vmem:[#allocation7_spill] sm:$0xff]  ;;  %v12587_v31 = vld [vmem:[#allocation9_spill] sm:$0xff] }
 0x9e5   : > { %v12588_v58 = vld [vmem:[#allocation11_spill] sm:$0xff] }
 0x9e6   : > { %v8013_v48 = vadd.f32 %v8012_v44, %v7964_v32  ;;  %v8107_v54 = vsel %vm350_vm8, %v8105_v42, %v8106_v12 }
 0x9e7   : > { %v8108_v10 = vsel %vm293_vm0, %v8102_v11, %v8107_v54  ;;  %v8167_v15 = vpop.permute.xlu1 %8166 }
 0x9e8   : > { %v8062_v62 = vadd.f32 %v8061_v57, %v8013_v48  ;;  %v8110_v30 = vmul.f32 %v8108_v10, %v8069_v20  ;;  %v8174_v63 = vrot.slane %v8167_v15, %v9656_v24 }
 0x9ea   : > { %v8111_v41 = vadd.f32 %v8110_v30, %v8062_v62 }
 0x9ec   : > { %v8113_v56 = vcombine.high %v8111_v41, %v8111_v41  ;;  %v8115_v60 = vsel %vm350_vm8, %v8111_v41, 0.0  ;;  %v8185_v21 = vpop.permute.xlu1 %8184 }
 0x9ee   : > { %v8116_v27 = vsel %vm350_vm8, %v8113_v56, 0.0 }
 0x9ef   : > { %v8117_v9 = vadd.f32 %v8116_v27, %v8115_v60 }
 0x9f1   : > { %8118 = vadd.xlane.f32.xlu0 %v8117_v9 }
 0xa07   : > { %8154 = vperm.xlu0 %8706, %v12580_v25  }
 0xa0b   : > { %8713 = vset.pattern.permute.xlu0 %v12581_v8 }
 0xa7a   : > { %v8119_v26 = vpop.xlane.xlu0 %8118 }
 0xa7b   : > { %v8120_v4 = vmul.f32 0.00390625, %v8119_v26 }
 0xa7d   : > { %v8128_v34 = vrot.slane %v8120_v4, %v9656_v24 }
 0xa7f   : > { %v8130_v35 = vsub.f32 %v8111_v41, %v8128_v34 }
 0xa81   : > { %v8131_v3 = vmul.f32 %v8130_v35, %v8130_v35 }
 0xa82   : > { %v8155_v19 = vpop.permute.xlu0 %8154 }
 0xa83   : > { %v8133_v18 = vcombine.high %v8131_v3, %v8131_v3  ;;  %v8135_v7 = vsel %vm350_vm8, %v8131_v3, 0.0  ;;  %v8162_v13 = vrot.slane %v8155_v19, %v9656_v24 }
 0xa85   : > { %v8136_v61 = vsel %vm350_vm8, %v8133_v18, 0.0 }
 0xa86   : > { %v8137_v55 = vadd.f32 %v8136_v61, %v8135_v7 }
 0xa88   : > { %8138 = vadd.xlane.f32.xlu1 %v8137_v55 }
 0xa99   : > { %8211 = vperm.xlu1 %8709, %v12582_v53  }
 0xa9d   : > { %8710 = vset.pattern.permute.xlu1 %v12583_v59 }
 0xa9e   : > { %8237 = vperm.xlu1 %8710, %v12582_v53  }
 0xaa2   : > { %8711 = vset.pattern.permute.xlu1 %v12584_v51 }
 0xaa3   : > { %8263 = vperm.xlu1 %8711, %v12582_v53  }
 0xaa7   : > { %8712 = vset.pattern.permute.xlu1 %v12581_v8 }
 0xaa8   : > { %8289 = vperm.xlu1 %8712, %v12582_v53  }
 0xb11   : > { %v8139_v38 = vpop.xlane.xlu1 %8138 }
 0xb12   : > { %v8140_v47 = vmul.f32 0.00390625, %v8139_v38 }
 0xb14   : > { %v8141_v0 = vadd.f32 1e-05, %v8140_v47 }
 0xb15   : > { %v8212_v39 = vpop.permute.xlu1 %8211 }
 0xb16   : > { %8720 = vrsqrt.f32 %v8141_v0 }
 0xb19   : > { %v8238_v11 = vpop.permute.xlu1 %8237 }
 0xb1e   : > { %v8264_v30 = vpop.permute.xlu1 %8263 }
 0xb23   : > { %v8721_v37 = vpop.eup %8720  ;;  %v8290_v8 = vpop.permute.xlu1 %8289 }
 0xb24   : > { %v8150_v22 = vrot.slane %v8721_v37, %v9656_v24 }
 0xb26   : > { %v8152_v45 = vmul.f32 %v8150_v22, %v8130_v35 }
 0xb28   : > { %v8164_v50 = vmul.f32 %v8162_v13, %v8152_v45 }
 0xb2a   : > { %v8176_v49 = vadd.f32 %v8174_v63, %v8164_v50 }
 0xb2c   : > { %vm8178_vm12 = vcmp.ge.f32.partialorder %v8176_v49, 0.0  ;;  %v8180_v14 = vmul.f32 %v8179_v46, %v8176_v49 }
 0xb2e   : > { %v8181_v2 = vsel %vm8178_vm12, %v8176_v49, %v8180_v14 }
 0xb2f   : > { %v8191_v29 = vrot.slane %v8181_v2, %v8980_v5  ;;  %v8195_v16 = vrot.slane %v8181_v2, %v12364_v1  ;;  %v8217_v28 = vrot.slane %v8181_v2, %v8983_v6  ;;  %v8221_v17 = vrot.slane %v8181_v2, %v12439_v33 }
 0xb30   : > { %v8243_v40 = vrot.slane %v8181_v2, %v12585_v23  ;;  %v8247_v24 = vrot.slane %v8181_v2, %v12586_v43  ;;  %v8269_v36 = vrot.slane %v8181_v2, %v12587_v31  ;;  %v8273_v42 = vrot.slane %v8181_v2, %v12588_v58 }
 0xb31   : > { %v8201_v32 = vrot.slane %v8191_v29, %v8980_v5  ;;  %v8205_v44 = vrot.slane %v8195_v16, %v8980_v5  ;;  %v8227_v12 = vrot.slane %v8217_v28, %v8983_v6  ;;  %v8231_v1 = vrot.slane %v8221_v17, %v8983_v6 }
 0xb32   : > { %v8253_v52 = vrot.slane %v8243_v40, %v12585_v23  ;;  %v8257_v33 = vrot.slane %v8247_v24, %v12585_v23  ;;  %v8279_v20 = vrot.slane %v8269_v36, %v12587_v31  ;;  %v8283_v48 = vrot.slane %v8273_v42, %v12587_v31 }
 0xb33   : > { %v8206_v57 = vmul.f32 %v8201_v32, %v8185_v21  ;;  %v8207_v54 = vmul.f32 %v8205_v44, %v8185_v21  ;;  %v8232_v10 = vmul.f32 %v8227_v12, %v8212_v39  ;;  %v8233_v62 = vmul.f32 %v8231_v1, %v8212_v39 }
 0xb34   : > { %v8258_v5 = vmul.f32 %v8253_v52, %v8238_v11  ;;  %v8259_v60 = vmul.f32 %v8257_v33, %v8238_v11  ;;  %v8284_v6 = vmul.f32 %v8279_v20, %v8264_v30  ;;  %v8285_v25 = vmul.f32 %v8283_v48, %v8264_v30 }
 0xb35   : > { %v8234_v41 = vadd.f32 %v8232_v10, %v8206_v57  ;;  %v8235_v56 = vadd.f32 %v8233_v62, %v8207_v54 }
 0xb37   : > { %v8260_v27 = vadd.f32 %v8258_v5, %v8234_v41  ;;  %v8261_v9 = vadd.f32 %v8259_v60, %v8235_v56 }
 0xb39   : > { %v8286_v26 = vadd.f32 %v8284_v6, %v8260_v27  ;;  %v8287_v4 = vadd.f32 %v8285_v25, %v8261_v9 }
 0xb3b   : > { %v8292_v34 = vadd.f32 %v8290_v8, %v8286_v26  ;;  %v8293_v35 = vadd.f32 %v8290_v8, %v8287_v4 }
 0xb3d   : > { %v8296_v3 = vmin.f32 %v8292_v34, 20.0  ;;  %v8297_v18 = vmin.f32 %v8293_v35, 20.0  ;;  %vm8294_vm14 = vcmp.gt.f32.partialorder %v8292_v34, 20.0  ;;  %vm8295_vm0 = vcmp.gt.f32.partialorder %v8293_v35, 20.0 }
 0xb3f   : > { %v8298_v7 = vmul.f32 1.442695, %v8296_v3  ;;  %v8300_v61 = vmul.f32 1.442695, %v8297_v18 }
 0xb41   : > { %8722 = vpow2.f32 %v8298_v7 }
 0xb42   : > { %8724 = vpow2.f32 %v8300_v61 }
 0xb4e   : > { %v8723_v55 = vpop.eup %8722 }
 0xb4f   : > { %v8725_v53 = vpop.eup %8724  ;;  %v8302_v59 = vadd.f32 1.0, %v8723_v55  ;;  %v8305_v15 = vmul.f32 -0.5, %v8723_v55  ;;  %v8308_v47 = vand.u32 2147483647, %v8723_v55 }
 0xb50   : > { %v8311_v51 = vadd.f32 1.0, %v8725_v53  ;;  %v8314_v21 = vmul.f32 -0.5, %v8725_v53  ;;  %v8317_v19 = vand.u32 2147483647, %v8725_v53 }
 0xb51   : > { %8726 = vlog2.f32 %v8302_v59  ;;  %v8306_v38 = vadd.f32 1.0, %v8305_v15  ;;  %vm8309_vm13 = vcmp.lt.f32.partialorder %v8308_v47, 0.0004427343 }
 0xb52   : > { %8728 = vlog2.f32 %v8311_v51  ;;  %v8315_v0 = vadd.f32 1.0, %v8314_v21  ;;  %vm8318_vm15 = vcmp.lt.f32.partialorder %v8317_v19, 0.0004427343 }
 0xb53   : > { %v8307_v45 = vmul.f32 %v8723_v55, %v8306_v38 }
 0xb54   : > { %v8316_v50 = vmul.f32 %v8725_v53, %v8315_v0 }
 0xb5e   : > { %v8727_v37 = vpop.eup %8726 }
 0xb5f   : > { %v8729_v22 = vpop.eup %8728  ;;  %v8304_v13 = vmul.f32 0.6931472, %v8727_v37 }
 0xb60   : > { %v8313_v63 = vmul.f32 0.6931472, %v8729_v22 }
 0xb61   : > { %v8310_v39 = vsel %vm8309_vm13, %v8307_v45, %v8304_v13 }
 0xb62   : > { %v8319_v46 = vsel %vm8318_vm15, %v8316_v50, %v8313_v63  ;;  %v8320_v49 = vsel %vm8294_vm14, %v8292_v34, %v8310_v39 }
 0xb63   : > { %v8321_v14 = vsel %vm8295_vm0, %v8293_v35, %v8319_v46 }
 0xb64   : > { %v8324_v2 = vcombine.low %v8320_v49, %v8321_v14 }
 0xb66   : > { %8326 = vst [vmem:[%s265_s28] sm:$0xff] %v8324_v2 }
 0xb67 PF: > { %s17_s21 = sadd.s32 1, %s8765_s21  }
 0xb68   : > { %p14_p1 = scmp.ge.s32.totalorder %s17_s21, 4  }
 0xb6a   :  { %16 = sbr.rel (!%p14_p1) target bundleno = 1 (0x1), region = 79 }
 0xb6f   :  { %8348 = vsyncpa [#allocation4], 1 }
 0xb70   :  { %8350 = vsyncpa [#allocation4 + $0x1], 1 }

</bundles_post_ra>
